<compile_context>
chip_gen: v6e
topology: v6e:2x2x1
jax: 0.10.0
libtpu: 0.0.40
codegen_flags: <defaults>
</compile_context>

<pallas_src>
import functools

import numpy as np

import jax
import jax.numpy as jnp
from jax import lax
from jax.experimental import pallas as pl
from jax.experimental.pallas import tpu as pltpu


# Fixed LeNet geometry (fc1 = 16*6*6 implies a 32x32 single-channel input).
C1, C2 = 6, 16           # conv channel counts
KS = 5                   # conv kernel size
IMG = 32                 # input spatial size
PAD = IMG + 4            # zero-padded conv1 input spatial size (36)
O1, P1 = 32, 16          # conv1 / pool1 spatial size
O2, P2 = 12, 6           # conv2 / pool2 spatial size
LANES = 128

# Images per grid step.  8 keeps the pool-1 output exactly 128 lanes wide;
# raise to 16/32 on v5e/v6e (128 MiB VMEM, single core) for bigger steps.
NB = 8

XIN = NB * PAD           # conv1 activation lane width used (288)
XPAD_LANES = XIN + 8     # xpad scratch lane width (room for kw<=4 shifts)
A1_LANES = NB * P1 + 4   # pool1 output lanes (+4 so conv2 shifts stay in-bounds)
Y2_LANES = NB * P1       # conv2 output lane width (128)
A2_LANES = NB * P2       # pool2 output lanes (48)


# ---------------------------------------------------------------------------
# Fused kernel: one grid step = NB images end-to-end.
# ---------------------------------------------------------------------------
def _lenet_kernel(x_ref, m1_ref, b1_ref, ph1_ref, pw1_ref,
                  m2_ref, b2_ref, ph2_ref, pw2_ref,
                  w1_ref, bf1_ref, w2_ref, bf2_ref, w3_ref, bf3_ref,
                  o_ref, xpad_ref):
    f32 = jnp.float32

    # Stage 0: pack the NB raw images side-by-side (image-major lanes) into a
    # zeroed row buffer -> folds layout conversion and conv1 zero padding in.
    xpad_ref[...] = jnp.zeros_like(xpad_ref)
    for n in range(NB):
        xpad_ref[2:2 + IMG, n * PAD + 2:n * PAD + 2 + IMG] = x_ref[n]
    xpad = xpad_ref[...]                                   # (36, XPAD_LANES)

    # Conv1 (5x5, 1->6, pad 2): five banded MXU GEMMs, one per kernel column.
    # Rows of y1 = (channel, out_row); lanes = (image, out_col).
    y1 = jnp.dot(m1_ref[0], xpad[:, 0:XIN], preferred_element_type=f32)
    for kw in range(1, KS):
        y1 += jnp.dot(m1_ref[kw], xpad[:, kw:kw + XIN],
                      preferred_element_type=f32)
    r1 = jnp.maximum(y1 + b1_ref[...], 0.0)                # (192, 288)

    # Pool1 (2x2 avg) factored: height pool (left matmul) then width pool
    # (right matmul, also compacts lanes 36 -> 16 per image).
    a1 = jnp.dot(jnp.dot(ph1_ref[...], r1, preferred_element_type=f32),
                 pw1_ref[...], preferred_element_type=f32)  # (96, 132)

    # Conv2 (5x5, 6->16, valid): same banded-GEMM scheme over pooled rows.
    y2 = jnp.dot(m2_ref[0], a1[:, 0:Y2_LANES], preferred_element_type=f32)
    for kw in range(1, KS):
        y2 += jnp.dot(m2_ref[kw], a1[:, kw:kw + Y2_LANES],
                      preferred_element_type=f32)
    r2 = jnp.maximum(y2 + b2_ref[...], 0.0)                 # (192, 128)

    # Pool2 (2x2 avg); width matrix reorders lanes to (out_col-major,
    # image-minor) so fc1 becomes six contiguous-lane-sliced GEMMs.
    a2 = jnp.dot(jnp.dot(ph2_ref[...], r2, preferred_element_type=f32),
                 pw2_ref[...], preferred_element_type=f32)  # (128, 48)

    # FC head, kept in (feature, image) orientation.
    h = jnp.dot(w1_ref[0], a2[:, 0:NB], preferred_element_type=f32)
    for w in range(1, P2):
        h += jnp.dot(w1_ref[w], a2[:, w * NB:(w + 1) * NB],
                     preferred_element_type=f32)
    h = jnp.maximum(h + bf1_ref[...], 0.0)                  # fc1 + relu
    h = jnp.maximum(jnp.dot(w2_ref[...], h, preferred_element_type=f32)
                    + bf2_ref[...], 0.0)                    # fc2 + relu
    # fc3 flips to (image, class) via a transposed-LHS contraction so the
    # output store is lane-dense (NB, 128).
    logits = lax.dot_general(h, w3_ref[...], (((0,), (0,)), ((), ())),
                             preferred_element_type=f32)
    o_ref[...] = logits + bf3_ref[...]


# ---------------------------------------------------------------------------
# Pallas wrapper
# ---------------------------------------------------------------------------
@functools.partial(jax.jit, static_argnames=("num_classes",))
def lenet_forward(pp, x, num_classes=10):
    """x: (B, 1, 32, 32) NCHW float32 -> logits (B, num_classes)."""
    b = x.shape[0]
    assert x.shape[1:] == (1, IMG, IMG), x.shape
    xs = x.reshape(b, IMG, IMG).astype(jnp.float32)
    bpad = ((b + NB - 1) // NB) * NB
    if bpad != b:                              # pad batch to a multiple of NB
        xs = jnp.pad(xs, ((0, bpad - b), (0, 0), (0, 0)))

    cspec2 = lambda shape: pl.BlockSpec(shape, lambda i: (0, 0))
    cspec3 = lambda shape: pl.BlockSpec(shape, lambda i: (0, 0, 0))

    out = pl.pallas_call(
        _lenet_kernel,
        out_shape=jax.ShapeDtypeStruct((bpad, LANES), jnp.float32),
        grid=(bpad // NB,),
        in_specs=[
            pl.BlockSpec((NB, IMG, IMG), lambda i: (i, 0, 0)),   # images
            cspec3((KS, C1 * O1, PAD)),        # conv1 banded matrices
            cspec2((C1 * O1, 1)),              # conv1 bias column
            cspec2((C1 * P1, C1 * O1)),        # pool1 height matrix
            cspec2((XIN, A1_LANES)),           # pool1 width matrix
            cspec3((KS, C2 * O2, C1 * P1)),    # conv2 banded matrices
            cspec2((C2 * O2, 1)),              # conv2 bias column
            cspec2((LANES, C2 * O2)),          # pool2 height matrix
            cspec2((Y2_LANES, A2_LANES)),      # pool2 width matrix
            cspec3((P2, LANES, LANES)),        # fc1 per-column blocks
            cspec2((LANES, 1)),                # fc1 bias column
            cspec2((LANES, LANES)),            # fc2 weights
            cspec2((LANES, 1)),                # fc2 bias column
            cspec2((LANES, LANES)),            # fc3 weights (in, class)
            cspec2((1, LANES)),                # fc3 bias row
        ],
        out_specs=pl.BlockSpec((NB, LANES), lambda i: (i, 0)),
        scratch_shapes=[pltpu.VMEM((PAD, XPAD_LANES), jnp.float32)],
        compiler_params=pltpu.CompilerParams(
            dimension_semantics=("parallel",)),
    )(xs, pp["m1"], pp["b1"], pp["ph1"], pp["pw1"],
      pp["m2"], pp["b2"], pp["ph2"], pp["pw2"],
      pp["w1"], pp["bf1"], pp["w2"], pp["bf2"], pp["w3"], pp["bf3"])
    return out[:b, :num_classes]


# ---------------------------------------------------------------------------
# One-time parameter repacking (outside the jitted forward)
# ---------------------------------------------------------------------------
def prepare_params(params, num_classes=10):
    w1 = np.asarray(params["conv1_w"], np.float32)    # (6, 1, 5, 5)
    b1 = np.asarray(params["conv1_b"], np.float32)
    w2 = np.asarray(params["conv2_w"], np.float32)    # (16, 6, 5, 5)
    b2 = np.asarray(params["conv2_b"], np.float32)
    f1w = np.asarray(params["fc1_w"], np.float32)     # (120, 576)
    f1b = np.asarray(params["fc1_b"], np.float32)
    f2w = np.asarray(params["fc2_w"], np.float32)     # (84, 120)
    f2b = np.asarray(params["fc2_b"], np.float32)
    f3w = np.asarray(params["fc3_w"], np.float32)     # (nc, 84)
    f3b = np.asarray(params["fc3_b"], np.float32)
    nc = f3w.shape[0]
    assert nc == num_classes and nc <= LANES

    # conv1 banded matrices: row (c, ho) of m1[kw] carries w1[c, 0, :, kw] on
    # the diagonal band of padded input rows ho..ho+4.
    m1 = np.zeros((KS, C1 * O1, PAD), np.float32)
    for kw in range(KS):
        for c in range(C1):
            for ho in range(O1):
                for kh in range(KS):
                    m1[kw, c * O1 + ho, ho + kh] = w1[c, 0, kh, kw]
    b1c = np.repeat(b1, O1).reshape(C1 * O1, 1)

    # conv2 banded matrices over (input channel, pooled row).
    m2 = np.zeros((KS, C2 * O2, C1 * P1), np.float32)
    for kw in range(KS):
        for c2 in range(C2):
            for h2 in range(O2):
                for c1 in range(C1):
                    for kh in range(KS):
                        m2[kw, c2 * O2 + h2, c1 * P1 + h2 + kh] = w2[c2, c1, kh, kw]
    b2c = np.repeat(b2, O2).reshape(C2 * O2, 1)

    # Factored 2x2 average pools (height via left matmul, width via right).
    ph1 = np.zeros((C1 * P1, C1 * O1), np.float32)
    for c in range(C1):
        for i in range(P1):
            ph1[c * P1 + i, c * O1 + 2 * i] = 0.5
            ph1[c * P1 + i, c * O1 + 2 * i + 1] = 0.5
    pw1 = np.zeros((XIN, A1_LANES), np.float32)
    for n in range(NB):
        for j in range(P1):
            pw1[n * PAD + 2 * j, n * P1 + j] = 0.5
            pw1[n * PAD + 2 * j + 1, n * P1 + j] = 0.5

    ph2 = np.zeros((LANES, C2 * O2), np.float32)       # rows 96..127 stay zero
    for c in range(C2):
        for i in range(P2):
            ph2[c * P2 + i, c * O2 + 2 * i] = 0.5
            ph2[c * P2 + i, c * O2 + 2 * i + 1] = 0.5
    pw2 = np.zeros((Y2_LANES, A2_LANES), np.float32)   # lanes -> (col-major, image)
    for n in range(NB):
        for j in range(P2):
            pw2[n * P1 + 2 * j, j * NB + n] = 0.5
            pw2[n * P1 + 2 * j + 1, j * NB + n] = 0.5

    # fc1 split into P2=6 per-output-column blocks (torch flatten = c*36+h*6+w).
    w1b = np.zeros((P2, LANES, LANES), np.float32)
    for j in range(P2):
        for c in range(C2):
            for i in range(P2):
                w1b[j, :120, c * P2 + i] = f1w[:, c * P2 * P2 + i * P2 + j]
    bf1 = np.zeros((LANES, 1), np.float32); bf1[:120, 0] = f1b
    w2t = np.zeros((LANES, LANES), np.float32); w2t[:84, :120] = f2w
    bf2 = np.zeros((LANES, 1), np.float32); bf2[:84, 0] = f2b
    w3t = np.zeros((LANES, LANES), np.float32); w3t[:84, :nc] = f3w.T
    bf3 = np.zeros((1, LANES), np.float32); bf3[0, :nc] = f3b

    j = jnp.asarray
    return {"m1": j(m1), "b1": j(b1c), "ph1": j(ph1), "pw1": j(pw1),
            "m2": j(m2), "b2": j(b2c), "ph2": j(ph2), "pw2": j(pw2),
            "w1": j(w1b), "bf1": j(bf1), "w2": j(w2t), "bf2": j(bf2),
            "w3": j(w3t), "bf3": j(bf3)}


# ---------------------------------------------------------------------------
# Torch-layout parameter init and pure-JAX reference (for validation)
# ---------------------------------------------------------------------------
def init_params(key, num_classes=10):
    ks = jax.random.split(key, 10)
    s = 0.05
    return {
        "conv1_w": jax.random.normal(ks[0], (6, 1, 5, 5), jnp.float32) * s,
        "conv1_b": jax.random.normal(ks[1], (6,), jnp.float32) * s,
        "conv2_w": jax.random.normal(ks[2], (16, 6, 5, 5), jnp.float32) * s,
        "conv2_b": jax.random.normal(ks[3], (16,), jnp.float32) * s,
        "fc1_w": jax.random.normal(ks[4], (120, 16 * 6 * 6), jnp.float32) * s,
        "fc1_b": jax.random.normal(ks[5], (120,), jnp.float32) * s,
        "fc2_w": jax.random.normal(ks[6], (84, 120), jnp.float32) * s,
        "fc2_b": jax.random.normal(ks[7], (84,), jnp.float32) * s,
        "fc3_w": jax.random.normal(ks[8], (num_classes, 84), jnp.float32) * s,
        "fc3_b": jax.random.normal(ks[9], (num_classes,), jnp.float32) * s,
    }


def _reference_forward(params, x):
    hi = lax.Precision.HIGHEST
    y = lax.conv_general_dilated(x, params["conv1_w"], (1, 1), ((2, 2), (2, 2)),
                                 dimension_numbers=("NCHW", "OIHW", "NCHW"),
                                 precision=hi)
    y = jnp.maximum(y + params["conv1_b"][None, :, None, None], 0.0)
    y = y.reshape(y.shape[0], C1, P1, 2, P1, 2).mean(axis=(3, 5))
    y = lax.conv_general_dilated(y, params["conv2_w"], (1, 1), ((0, 0), (0, 0)),
                                 dimension_numbers=("NCHW", "OIHW", "NCHW"),
                                 precision=hi)
    y = jnp.maximum(y + params["conv2_b"][None, :, None, None], 0.0)
    y = y.reshape(y.shape[0], C2, P2, 2, P2, 2).mean(axis=(3, 5))
    y = y.reshape(y.shape[0], -1)
    y = jnp.maximum(jnp.dot(y, params["fc1_w"].T, precision=hi) + params["fc1_b"], 0.0)
    y = jnp.maximum(jnp.dot(y, params["fc2_w"].T, precision=hi) + params["fc2_b"], 0.0)
    return jnp.dot(y, params["fc3_w"].T, precision=hi) + params["fc3_b"]


if __name__ == "__main__":
    key = jax.random.PRNGKey(0)
    k_params, k_x = jax.random.split(key)
    params = init_params(k_params, num_classes=10)
    prepped = prepare_params(params, num_classes=10)
    # LeNet geometry (fc1 expects 16*6*6) implies 32x32 single-channel input.
    x = jax.random.normal(k_x, (12, 1, IMG, IMG), jnp.float32)

    out = lenet_forward(prepped, x)
    jax.block_until_ready(out)
    assert out.shape == (12, 10), out.shape

    ref = _reference_forward(params, x)
    np.testing.assert_allclose(np.asarray(out), np.asarray(ref),
                               rtol=2e-3, atol=2e-3)
    print("KERNEL_OK")
</pallas_src>

<mosaic_0001>
module attributes {stable_mosaic.version = 11 : i64} {
  func.func @_lenet_kernel(%arg0: i32, %arg1: memref<8x32x32xf32, #tpu.memory_space<vmem>>, %arg2: memref<5x192x36xf32, #tpu.memory_space<vmem>>, %arg3: memref<192x1xf32, #tpu.memory_space<vmem>>, %arg4: memref<96x192xf32, #tpu.memory_space<vmem>>, %arg5: memref<288x132xf32, #tpu.memory_space<vmem>>, %arg6: memref<5x192x96xf32, #tpu.memory_space<vmem>>, %arg7: memref<192x1xf32, #tpu.memory_space<vmem>>, %arg8: memref<128x192xf32, #tpu.memory_space<vmem>>, %arg9: memref<128x48xf32, #tpu.memory_space<vmem>>, %arg10: memref<6x128x128xf32, #tpu.memory_space<vmem>>, %arg11: memref<128x1xf32, #tpu.memory_space<vmem>>, %arg12: memref<128x128xf32, #tpu.memory_space<vmem>>, %arg13: memref<128x1xf32, #tpu.memory_space<vmem>>, %arg14: memref<128x128xf32, #tpu.memory_space<vmem>>, %arg15: memref<1x128xf32, #tpu.memory_space<vmem>>, %arg16: memref<8x128xf32, #tpu.memory_space<vmem>>, %arg17: memref<36x296xf32, #tpu.memory_space<vmem>>) attributes {dimension_semantics = [#tpu.dimension_semantics<parallel>], iteration_bounds = array<i64: 2>, scalar_prefetch = 0 : i64, scratch_operands = 1 : i64, tpu.core_type = #tpu.core_type<tc>, window_params = [{transform_indices = @transform_0, window_bounds = array<i64: 8, 32, 32>}, {pipeline_mode = #tpu.pipeline_mode<synchronous>, transform_indices = @transform_1, window_bounds = array<i64: 5, 192, 36>}, {pipeline_mode = #tpu.pipeline_mode<synchronous>, transform_indices = @transform_2, window_bounds = array<i64: 192, 1>}, {pipeline_mode = #tpu.pipeline_mode<synchronous>, transform_indices = @transform_3, window_bounds = array<i64: 96, 192>}, {pipeline_mode = #tpu.pipeline_mode<synchronous>, transform_indices = @transform_4, window_bounds = array<i64: 288, 132>}, {pipeline_mode = #tpu.pipeline_mode<synchronous>, transform_indices = @transform_5, window_bounds = array<i64: 5, 192, 96>}, {pipeline_mode = #tpu.pipeline_mode<synchronous>, transform_indices = @transform_6, window_bounds = array<i64: 192, 1>}, {pipeline_mode = #tpu.pipeline_mode<synchronous>, transform_indices = @transform_7, window_bounds = array<i64: 128, 192>}, {pipeline_mode = #tpu.pipeline_mode<synchronous>, transform_indices = @transform_8, window_bounds = array<i64: 128, 48>}, {pipeline_mode = #tpu.pipeline_mode<synchronous>, transform_indices = @transform_9, window_bounds = array<i64: 6, 128, 128>}, {pipeline_mode = #tpu.pipeline_mode<synchronous>, transform_indices = @transform_10, window_bounds = array<i64: 128, 1>}, {pipeline_mode = #tpu.pipeline_mode<synchronous>, transform_indices = @transform_11, window_bounds = array<i64: 128, 128>}, {pipeline_mode = #tpu.pipeline_mode<synchronous>, transform_indices = @transform_12, window_bounds = array<i64: 128, 1>}, {pipeline_mode = #tpu.pipeline_mode<synchronous>, transform_indices = @transform_13, window_bounds = array<i64: 128, 128>}, {pipeline_mode = #tpu.pipeline_mode<synchronous>, transform_indices = @transform_14, window_bounds = array<i64: 1, 128>}, {transform_indices = @transform_15, window_bounds = array<i64: 8, 128>}]} {
    %cst = arith.constant 0.000000e+00 : f32
    %0 = vector.broadcast %cst : f32 to vector<36x296xf32>
    %c0 = arith.constant 0 : index
    %c0_0 = arith.constant 0 : index
    %1 = vector.load %arg17[%c0, %c0_0] : memref<36x296xf32, #tpu.memory_space<vmem>>, vector<36x296xf32>
    tpu.vector_store %arg17[%c0, %c0_0], %0 {strides = array<i32>} : memref<36x296xf32, #tpu.memory_space<vmem>>, vector<36x296xf32>,
    %c0_1 = arith.constant 0 : index
    %c0_2 = arith.constant 0 : index
    %c0_3 = arith.constant 0 : index
    %2 = vector.load %arg1[%c0_1, %c0_2, %c0_3] : memref<8x32x32xf32, #tpu.memory_space<vmem>>, vector<1x32x32xf32>
    %3 = vector.shape_cast %2 : vector<1x32x32xf32> to vector<32x32xf32>
    %c2 = arith.constant 2 : index
    %c2_4 = arith.constant 2 : index
    %4 = vector.load %arg17[%c2, %c2_4] : memref<36x296xf32, #tpu.memory_space<vmem>>, vector<32x32xf32>
    tpu.vector_store %arg17[%c2, %c2_4], %3 {strides = array<i32>} : memref<36x296xf32, #tpu.memory_space<vmem>>, vector<32x32xf32>,
    %c1 = arith.constant 1 : index
    %c0_5 = arith.constant 0 : index
    %c0_6 = arith.constant 0 : index
    %5 = vector.load %arg1[%c1, %c0_5, %c0_6] : memref<8x32x32xf32, #tpu.memory_space<vmem>>, vector<1x32x32xf32>
    %6 = vector.shape_cast %5 : vector<1x32x32xf32> to vector<32x32xf32>
    %c2_7 = arith.constant 2 : index
    %c38 = arith.constant 38 : index
    %7 = vector.load %arg17[%c2_7, %c38] : memref<36x296xf32, #tpu.memory_space<vmem>>, vector<32x32xf32>
    tpu.vector_store %arg17[%c2_7, %c38], %6 {strides = array<i32>} : memref<36x296xf32, #tpu.memory_space<vmem>>, vector<32x32xf32>,
    %c2_8 = arith.constant 2 : index
    %c0_9 = arith.constant 0 : index
    %c0_10 = arith.constant 0 : index
    %8 = vector.load %arg1[%c2_8, %c0_9, %c0_10] : memref<8x32x32xf32, #tpu.memory_space<vmem>>, vector<1x32x32xf32>
    %9 = vector.shape_cast %8 : vector<1x32x32xf32> to vector<32x32xf32>
    %c2_11 = arith.constant 2 : index
    %c74 = arith.constant 74 : index
    %10 = vector.load %arg17[%c2_11, %c74] : memref<36x296xf32, #tpu.memory_space<vmem>>, vector<32x32xf32>
    tpu.vector_store %arg17[%c2_11, %c74], %9 {strides = array<i32>} : memref<36x296xf32, #tpu.memory_space<vmem>>, vector<32x32xf32>,
    %c3 = arith.constant 3 : index
    %c0_12 = arith.constant 0 : index
    %c0_13 = arith.constant 0 : index
    %11 = vector.load %arg1[%c3, %c0_12, %c0_13] : memref<8x32x32xf32, #tpu.memory_space<vmem>>, vector<1x32x32xf32>
    %12 = vector.shape_cast %11 : vector<1x32x32xf32> to vector<32x32xf32>
    %c2_14 = arith.constant 2 : index
    %c110 = arith.constant 110 : index
    %13 = vector.load %arg17[%c2_14, %c110] : memref<36x296xf32, #tpu.memory_space<vmem>>, vector<32x32xf32>
    tpu.vector_store %arg17[%c2_14, %c110], %12 {strides = array<i32>} : memref<36x296xf32, #tpu.memory_space<vmem>>, vector<32x32xf32>,
    %c4 = arith.constant 4 : index
    %c0_15 = arith.constant 0 : index
    %c0_16 = arith.constant 0 : index
    %14 = vector.load %arg1[%c4, %c0_15, %c0_16] : memref<8x32x32xf32, #tpu.memory_space<vmem>>, vector<1x32x32xf32>
    %15 = vector.shape_cast %14 : vector<1x32x32xf32> to vector<32x32xf32>
    %c2_17 = arith.constant 2 : index
    %c146 = arith.constant 146 : index
    %16 = vector.load %arg17[%c2_17, %c146] : memref<36x296xf32, #tpu.memory_space<vmem>>, vector<32x32xf32>
    tpu.vector_store %arg17[%c2_17, %c146], %15 {strides = array<i32>} : memref<36x296xf32, #tpu.memory_space<vmem>>, vector<32x32xf32>,
    %c5 = arith.constant 5 : index
    %c0_18 = arith.constant 0 : index
    %c0_19 = arith.constant 0 : index
    %17 = vector.load %arg1[%c5, %c0_18, %c0_19] : memref<8x32x32xf32, #tpu.memory_space<vmem>>, vector<1x32x32xf32>
    %18 = vector.shape_cast %17 : vector<1x32x32xf32> to vector<32x32xf32>
    %c2_20 = arith.constant 2 : index
    %c182 = arith.constant 182 : index
    %19 = vector.load %arg17[%c2_20, %c182] : memref<36x296xf32, #tpu.memory_space<vmem>>, vector<32x32xf32>
    tpu.vector_store %arg17[%c2_20, %c182], %18 {strides = array<i32>} : memref<36x296xf32, #tpu.memory_space<vmem>>, vector<32x32xf32>,
    %c6 = arith.constant 6 : index
    %c0_21 = arith.constant 0 : index
    %c0_22 = arith.constant 0 : index
    %20 = vector.load %arg1[%c6, %c0_21, %c0_22] : memref<8x32x32xf32, #tpu.memory_space<vmem>>, vector<1x32x32xf32>
    %21 = vector.shape_cast %20 : vector<1x32x32xf32> to vector<32x32xf32>
    %c2_23 = arith.constant 2 : index
    %c218 = arith.constant 218 : index
    %22 = vector.load %arg17[%c2_23, %c218] : memref<36x296xf32, #tpu.memory_space<vmem>>, vector<32x32xf32>
    tpu.vector_store %arg17[%c2_23, %c218], %21 {strides = array<i32>} : memref<36x296xf32, #tpu.memory_space<vmem>>, vector<32x32xf32>,
    %c7 = arith.constant 7 : index
    %c0_24 = arith.constant 0 : index
    %c0_25 = arith.constant 0 : index
    %23 = vector.load %arg1[%c7, %c0_24, %c0_25] : memref<8x32x32xf32, #tpu.memory_space<vmem>>, vector<1x32x32xf32>
    %24 = vector.shape_cast %23 : vector<1x32x32xf32> to vector<32x32xf32>
    %c2_26 = arith.constant 2 : index
    %c254 = arith.constant 254 : index
    %25 = vector.load %arg17[%c2_26, %c254] : memref<36x296xf32, #tpu.memory_space<vmem>>, vector<32x32xf32>
    tpu.vector_store %arg17[%c2_26, %c254], %24 {strides = array<i32>} : memref<36x296xf32, #tpu.memory_space<vmem>>, vector<32x32xf32>,
    %c0_27 = arith.constant 0 : index
    %c0_28 = arith.constant 0 : index
    %26 = vector.load %arg17[%c0_27, %c0_28] : memref<36x296xf32, #tpu.memory_space<vmem>>, vector<36x296xf32>
    %c0_29 = arith.constant 0 : index
    %c0_30 = arith.constant 0 : index
    %c0_31 = arith.constant 0 : index
    %27 = vector.load %arg2[%c0_29, %c0_30, %c0_31] : memref<5x192x36xf32, #tpu.memory_space<vmem>>, vector<1x192x36xf32>
    %28 = vector.shape_cast %27 : vector<1x192x36xf32> to vector<192x36xf32>
    %29 = vector.extract_strided_slice %26 {offsets = [0, 0], sizes = [36, 288], strides = [1, 1]} : vector<36x296xf32> to vector<36x288xf32>
    %cst_32 = arith.constant dense<0.000000e+00> : vector<192x288xf32>
    %30 = tpu.matmul %28, %29, %cst_32 {dimension_numbers = #tpu.dot_dimension_numbers<[1], [0], [0], [1], [0, 0, 1, 1], [], []>} : vector<192x36xf32>, vector<36x288xf32>, vector<192x288xf32> -> vector<192x288xf32>
    %c1_33 = arith.constant 1 : index
    %c0_34 = arith.constant 0 : index
    %c0_35 = arith.constant 0 : index
    %31 = vector.load %arg2[%c1_33, %c0_34, %c0_35] : memref<5x192x36xf32, #tpu.memory_space<vmem>>, vector<1x192x36xf32>
    %32 = vector.shape_cast %31 : vector<1x192x36xf32> to vector<192x36xf32>
    %33 = vector.extract_strided_slice %26 {offsets = [0, 1], sizes = [36, 288], strides = [1, 1]} : vector<36x296xf32> to vector<36x288xf32>
    %cst_36 = arith.constant dense<0.000000e+00> : vector<192x288xf32>
    %34 = tpu.matmul %32, %33, %cst_36 {dimension_numbers = #tpu.dot_dimension_numbers<[1], [0], [0], [1], [0, 0, 1, 1], [], []>} : vector<192x36xf32>, vector<36x288xf32>, vector<192x288xf32> -> vector<192x288xf32>
    %35 = arith.addf %30, %34 : vector<192x288xf32>
    %c2_37 = arith.constant 2 : index
    %c0_38 = arith.constant 0 : index
    %c0_39 = arith.constant 0 : index
    %36 = vector.load %arg2[%c2_37, %c0_38, %c0_39] : memref<5x192x36xf32, #tpu.memory_space<vmem>>, vector<1x192x36xf32>
    %37 = vector.shape_cast %36 : vector<1x192x36xf32> to vector<192x36xf32>
    %38 = vector.extract_strided_slice %26 {offsets = [0, 2], sizes = [36, 288], strides = [1, 1]} : vector<36x296xf32> to vector<36x288xf32>
    %cst_40 = arith.constant dense<0.000000e+00> : vector<192x288xf32>
    %39 = tpu.matmul %37, %38, %cst_40 {dimension_numbers = #tpu.dot_dimension_numbers<[1], [0], [0], [1], [0, 0, 1, 1], [], []>} : vector<192x36xf32>, vector<36x288xf32>, vector<192x288xf32> -> vector<192x288xf32>
    %40 = arith.addf %35, %39 : vector<192x288xf32>
    %c3_41 = arith.constant 3 : index
    %c0_42 = arith.constant 0 : index
    %c0_43 = arith.constant 0 : index
    %41 = vector.load %arg2[%c3_41, %c0_42, %c0_43] : memref<5x192x36xf32, #tpu.memory_space<vmem>>, vector<1x192x36xf32>
    %42 = vector.shape_cast %41 : vector<1x192x36xf32> to vector<192x36xf32>
    %43 = vector.extract_strided_slice %26 {offsets = [0, 3], sizes = [36, 288], strides = [1, 1]} : vector<36x296xf32> to vector<36x288xf32>
    %cst_44 = arith.constant dense<0.000000e+00> : vector<192x288xf32>
    %44 = tpu.matmul %42, %43, %cst_44 {dimension_numbers = #tpu.dot_dimension_numbers<[1], [0], [0], [1], [0, 0, 1, 1], [], []>} : vector<192x36xf32>, vector<36x288xf32>, vector<192x288xf32> -> vector<192x288xf32>
    %45 = arith.addf %40, %44 : vector<192x288xf32>
    %c4_45 = arith.constant 4 : index
    %c0_46 = arith.constant 0 : index
    %c0_47 = arith.constant 0 : index
    %46 = vector.load %arg2[%c4_45, %c0_46, %c0_47] : memref<5x192x36xf32, #tpu.memory_space<vmem>>, vector<1x192x36xf32>
    %47 = vector.shape_cast %46 : vector<1x192x36xf32> to vector<192x36xf32>
    %48 = vector.extract_strided_slice %26 {offsets = [0, 4], sizes = [36, 288], strides = [1, 1]} : vector<36x296xf32> to vector<36x288xf32>
    %cst_48 = arith.constant dense<0.000000e+00> : vector<192x288xf32>
    %49 = tpu.matmul %47, %48, %cst_48 {dimension_numbers = #tpu.dot_dimension_numbers<[1], [0], [0], [1], [0, 0, 1, 1], [], []>} : vector<192x36xf32>, vector<36x288xf32>, vector<192x288xf32> -> vector<192x288xf32>
    %50 = arith.addf %45, %49 : vector<192x288xf32>
    %c0_49 = arith.constant 0 : index
    %c0_50 = arith.constant 0 : index
    %51 = vector.load %arg3[%c0_49, %c0_50] : memref<192x1xf32, #tpu.memory_space<vmem>>, vector<192x1xf32>
    %52 = vector.broadcast %51 : vector<192x1xf32> to vector<192x288xf32>
    %53 = arith.addf %50, %52 : vector<192x288xf32>
    %cst_51 = arith.constant 0.000000e+00 : f32
    %54 = vector.broadcast %cst_51 : f32 to vector<192x288xf32>
    %55 = arith.maximumf %53, %54 : vector<192x288xf32>
    %c0_52 = arith.constant 0 : index
    %c0_53 = arith.constant 0 : index
    %56 = vector.load %arg4[%c0_52, %c0_53] : memref<96x192xf32, #tpu.memory_space<vmem>>, vector<96x192xf32>
    %cst_54 = arith.constant dense<0.000000e+00> : vector<96x288xf32>
    %57 = tpu.matmul %56, %55, %cst_54 {dimension_numbers = #tpu.dot_dimension_numbers<[1], [0], [0], [1], [0, 0, 1, 1], [], []>} : vector<96x192xf32>, vector<192x288xf32>, vector<96x288xf32> -> vector<96x288xf32>
    %c0_55 = arith.constant 0 : index
    %c0_56 = arith.constant 0 : index
    %58 = vector.load %arg5[%c0_55, %c0_56] : memref<288x132xf32, #tpu.memory_space<vmem>>, vector<288x132xf32>
    %cst_57 = arith.constant dense<0.000000e+00> : vector<96x132xf32>
    %59 = tpu.matmul %57, %58, %cst_57 {dimension_numbers = #tpu.dot_dimension_numbers<[1], [0], [0], [1], [0, 0, 1, 1], [], []>} : vector<96x288xf32>, vector<288x132xf32>, vector<96x132xf32> -> vector<96x132xf32>
    %c0_58 = arith.constant 0 : index
    %c0_59 = arith.constant 0 : index
    %c0_60 = arith.constant 0 : index
    %60 = vector.load %arg6[%c0_58, %c0_59, %c0_60] : memref<5x192x96xf32, #tpu.memory_space<vmem>>, vector<1x192x96xf32>
    %61 = vector.shape_cast %60 : vector<1x192x96xf32> to vector<192x96xf32>
    %62 = vector.extract_strided_slice %59 {offsets = [0, 0], sizes = [96, 128], strides = [1, 1]} : vector<96x132xf32> to vector<96x128xf32>
    %cst_61 = arith.constant dense<0.000000e+00> : vector<192x128xf32>
    %63 = tpu.matmul %61, %62, %cst_61 {dimension_numbers = #tpu.dot_dimension_numbers<[1], [0], [0], [1], [0, 0, 1, 1], [], []>} : vector<192x96xf32>, vector<96x128xf32>, vector<192x128xf32> -> vector<192x128xf32>
    %c1_62 = arith.constant 1 : index
    %c0_63 = arith.constant 0 : index
    %c0_64 = arith.constant 0 : index
    %64 = vector.load %arg6[%c1_62, %c0_63, %c0_64] : memref<5x192x96xf32, #tpu.memory_space<vmem>>, vector<1x192x96xf32>
    %65 = vector.shape_cast %64 : vector<1x192x96xf32> to vector<192x96xf32>
    %66 = vector.extract_strided_slice %59 {offsets = [0, 1], sizes = [96, 128], strides = [1, 1]} : vector<96x132xf32> to vector<96x128xf32>
    %cst_65 = arith.constant dense<0.000000e+00> : vector<192x128xf32>
    %67 = tpu.matmul %65, %66, %cst_65 {dimension_numbers = #tpu.dot_dimension_numbers<[1], [0], [0], [1], [0, 0, 1, 1], [], []>} : vector<192x96xf32>, vector<96x128xf32>, vector<192x128xf32> -> vector<192x128xf32>
    %68 = arith.addf %63, %67 : vector<192x128xf32>
    %c2_66 = arith.constant 2 : index
    %c0_67 = arith.constant 0 : index
    %c0_68 = arith.constant 0 : index
    %69 = vector.load %arg6[%c2_66, %c0_67, %c0_68] : memref<5x192x96xf32, #tpu.memory_space<vmem>>, vector<1x192x96xf32>
    %70 = vector.shape_cast %69 : vector<1x192x96xf32> to vector<192x96xf32>
    %71 = vector.extract_strided_slice %59 {offsets = [0, 2], sizes = [96, 128], strides = [1, 1]} : vector<96x132xf32> to vector<96x128xf32>
    %cst_69 = arith.constant dense<0.000000e+00> : vector<192x128xf32>
    %72 = tpu.matmul %70, %71, %cst_69 {dimension_numbers = #tpu.dot_dimension_numbers<[1], [0], [0], [1], [0, 0, 1, 1], [], []>} : vector<192x96xf32>, vector<96x128xf32>, vector<192x128xf32> -> vector<192x128xf32>
    %73 = arith.addf %68, %72 : vector<192x128xf32>
    %c3_70 = arith.constant 3 : index
    %c0_71 = arith.constant 0 : index
    %c0_72 = arith.constant 0 : index
    %74 = vector.load %arg6[%c3_70, %c0_71, %c0_72] : memref<5x192x96xf32, #tpu.memory_space<vmem>>, vector<1x192x96xf32>
    %75 = vector.shape_cast %74 : vector<1x192x96xf32> to vector<192x96xf32>
    %76 = vector.extract_strided_slice %59 {offsets = [0, 3], sizes = [96, 128], strides = [1, 1]} : vector<96x132xf32> to vector<96x128xf32>
    %cst_73 = arith.constant dense<0.000000e+00> : vector<192x128xf32>
    %77 = tpu.matmul %75, %76, %cst_73 {dimension_numbers = #tpu.dot_dimension_numbers<[1], [0], [0], [1], [0, 0, 1, 1], [], []>} : vector<192x96xf32>, vector<96x128xf32>, vector<192x128xf32> -> vector<192x128xf32>
    %78 = arith.addf %73, %77 : vector<192x128xf32>
    %c4_74 = arith.constant 4 : index
    %c0_75 = arith.constant 0 : index
    %c0_76 = arith.constant 0 : index
    %79 = vector.load %arg6[%c4_74, %c0_75, %c0_76] : memref<5x192x96xf32, #tpu.memory_space<vmem>>, vector<1x192x96xf32>
    %80 = vector.shape_cast %79 : vector<1x192x96xf32> to vector<192x96xf32>
    %81 = vector.extract_strided_slice %59 {offsets = [0, 4], sizes = [96, 128], strides = [1, 1]} : vector<96x132xf32> to vector<96x128xf32>
    %cst_77 = arith.constant dense<0.000000e+00> : vector<192x128xf32>
    %82 = tpu.matmul %80, %81, %cst_77 {dimension_numbers = #tpu.dot_dimension_numbers<[1], [0], [0], [1], [0, 0, 1, 1], [], []>} : vector<192x96xf32>, vector<96x128xf32>, vector<192x128xf32> -> vector<192x128xf32>
    %83 = arith.addf %78, %82 : vector<192x128xf32>
    %c0_78 = arith.constant 0 : index
    %c0_79 = arith.constant 0 : index
    %84 = vector.load %arg7[%c0_78, %c0_79] : memref<192x1xf32, #tpu.memory_space<vmem>>, vector<192x1xf32>
    %85 = vector.broadcast %84 : vector<192x1xf32> to vector<192x128xf32>
    %86 = arith.addf %83, %85 : vector<192x128xf32>
    %cst_80 = arith.constant 0.000000e+00 : f32
    %87 = vector.broadcast %cst_80 : f32 to vector<192x128xf32>
    %88 = arith.maximumf %86, %87 : vector<192x128xf32>
    %c0_81 = arith.constant 0 : index
    %c0_82 = arith.constant 0 : index
    %89 = vector.load %arg8[%c0_81, %c0_82] : memref<128x192xf32, #tpu.memory_space<vmem>>, vector<128x192xf32>
    %cst_83 = arith.constant dense<0.000000e+00> : vector<128x128xf32>
    %90 = tpu.matmul %89, %88, %cst_83 {dimension_numbers = #tpu.dot_dimension_numbers<[1], [0], [0], [1], [0, 0, 1, 1], [], []>} : vector<128x192xf32>, vector<192x128xf32>, vector<128x128xf32> -> vector<128x128xf32>
    %c0_84 = arith.constant 0 : index
    %c0_85 = arith.constant 0 : index
    %91 = vector.load %arg9[%c0_84, %c0_85] : memref<128x48xf32, #tpu.memory_space<vmem>>, vector<128x48xf32>
    %cst_86 = arith.constant dense<0.000000e+00> : vector<128x48xf32>
    %92 = tpu.matmul %90, %91, %cst_86 {dimension_numbers = #tpu.dot_dimension_numbers<[1], [0], [0], [1], [0, 0, 1, 1], [], []>} : vector<128x128xf32>, vector<128x48xf32>, vector<128x48xf32> -> vector<128x48xf32>
    %c0_87 = arith.constant 0 : index
    %c0_88 = arith.constant 0 : index
    %c0_89 = arith.constant 0 : index
    %93 = vector.load %arg10[%c0_87, %c0_88, %c0_89] : memref<6x128x128xf32, #tpu.memory_space<vmem>>, vector<1x128x128xf32>
    %94 = vector.shape_cast %93 : vector<1x128x128xf32> to vector<128x128xf32>
    %95 = vector.extract_strided_slice %92 {offsets = [0, 0], sizes = [128, 8], strides = [1, 1]} : vector<128x48xf32> to vector<128x8xf32>
    %cst_90 = arith.constant dense<0.000000e+00> : vector<128x8xf32>
    %96 = tpu.matmul %94, %95, %cst_90 {dimension_numbers = #tpu.dot_dimension_numbers<[1], [0], [0], [1], [0, 0, 1, 1], [], []>} : vector<128x128xf32>, vector<128x8xf32>, vector<128x8xf32> -> vector<128x8xf32>
    %c1_91 = arith.constant 1 : index
    %c0_92 = arith.constant 0 : index
    %c0_93 = arith.constant 0 : index
    %97 = vector.load %arg10[%c1_91, %c0_92, %c0_93] : memref<6x128x128xf32, #tpu.memory_space<vmem>>, vector<1x128x128xf32>
    %98 = vector.shape_cast %97 : vector<1x128x128xf32> to vector<128x128xf32>
    %99 = vector.extract_strided_slice %92 {offsets = [0, 8], sizes = [128, 8], strides = [1, 1]} : vector<128x48xf32> to vector<128x8xf32>
    %cst_94 = arith.constant dense<0.000000e+00> : vector<128x8xf32>
    %100 = tpu.matmul %98, %99, %cst_94 {dimension_numbers = #tpu.dot_dimension_numbers<[1], [0], [0], [1], [0, 0, 1, 1], [], []>} : vector<128x128xf32>, vector<128x8xf32>, vector<128x8xf32> -> vector<128x8xf32>
    %101 = arith.addf %96, %100 : vector<128x8xf32>
    %c2_95 = arith.constant 2 : index
    %c0_96 = arith.constant 0 : index
    %c0_97 = arith.constant 0 : index
    %102 = vector.load %arg10[%c2_95, %c0_96, %c0_97] : memref<6x128x128xf32, #tpu.memory_space<vmem>>, vector<1x128x128xf32>
    %103 = vector.shape_cast %102 : vector<1x128x128xf32> to vector<128x128xf32>
    %104 = vector.extract_strided_slice %92 {offsets = [0, 16], sizes = [128, 8], strides = [1, 1]} : vector<128x48xf32> to vector<128x8xf32>
    %cst_98 = arith.constant dense<0.000000e+00> : vector<128x8xf32>
    %105 = tpu.matmul %103, %104, %cst_98 {dimension_numbers = #tpu.dot_dimension_numbers<[1], [0], [0], [1], [0, 0, 1, 1], [], []>} : vector<128x128xf32>, vector<128x8xf32>, vector<128x8xf32> -> vector<128x8xf32>
    %106 = arith.addf %101, %105 : vector<128x8xf32>
    %c3_99 = arith.constant 3 : index
    %c0_100 = arith.constant 0 : index
    %c0_101 = arith.constant 0 : index
    %107 = vector.load %arg10[%c3_99, %c0_100, %c0_101] : memref<6x128x128xf32, #tpu.memory_space<vmem>>, vector<1x128x128xf32>
    %108 = vector.shape_cast %107 : vector<1x128x128xf32> to vector<128x128xf32>
    %109 = vector.extract_strided_slice %92 {offsets = [0, 24], sizes = [128, 8], strides = [1, 1]} : vector<128x48xf32> to vector<128x8xf32>
    %cst_102 = arith.constant dense<0.000000e+00> : vector<128x8xf32>
    %110 = tpu.matmul %108, %109, %cst_102 {dimension_numbers = #tpu.dot_dimension_numbers<[1], [0], [0], [1], [0, 0, 1, 1], [], []>} : vector<128x128xf32>, vector<128x8xf32>, vector<128x8xf32> -> vector<128x8xf32>
    %111 = arith.addf %106, %110 : vector<128x8xf32>
    %c4_103 = arith.constant 4 : index
    %c0_104 = arith.constant 0 : index
    %c0_105 = arith.constant 0 : index
    %112 = vector.load %arg10[%c4_103, %c0_104, %c0_105] : memref<6x128x128xf32, #tpu.memory_space<vmem>>, vector<1x128x128xf32>
    %113 = vector.shape_cast %112 : vector<1x128x128xf32> to vector<128x128xf32>
    %114 = vector.extract_strided_slice %92 {offsets = [0, 32], sizes = [128, 8], strides = [1, 1]} : vector<128x48xf32> to vector<128x8xf32>
    %cst_106 = arith.constant dense<0.000000e+00> : vector<128x8xf32>
    %115 = tpu.matmul %113, %114, %cst_106 {dimension_numbers = #tpu.dot_dimension_numbers<[1], [0], [0], [1], [0, 0, 1, 1], [], []>} : vector<128x128xf32>, vector<128x8xf32>, vector<128x8xf32> -> vector<128x8xf32>
    %116 = arith.addf %111, %115 : vector<128x8xf32>
    %c5_107 = arith.constant 5 : index
    %c0_108 = arith.constant 0 : index
    %c0_109 = arith.constant 0 : index
    %117 = vector.load %arg10[%c5_107, %c0_108, %c0_109] : memref<6x128x128xf32, #tpu.memory_space<vmem>>, vector<1x128x128xf32>
    %118 = vector.shape_cast %117 : vector<1x128x128xf32> to vector<128x128xf32>
    %119 = vector.extract_strided_slice %92 {offsets = [0, 40], sizes = [128, 8], strides = [1, 1]} : vector<128x48xf32> to vector<128x8xf32>
    %cst_110 = arith.constant dense<0.000000e+00> : vector<128x8xf32>
    %120 = tpu.matmul %118, %119, %cst_110 {dimension_numbers = #tpu.dot_dimension_numbers<[1], [0], [0], [1], [0, 0, 1, 1], [], []>} : vector<128x128xf32>, vector<128x8xf32>, vector<128x8xf32> -> vector<128x8xf32>
    %121 = arith.addf %116, %120 : vector<128x8xf32>
    %c0_111 = arith.constant 0 : index
    %c0_112 = arith.constant 0 : index
    %122 = vector.load %arg11[%c0_111, %c0_112] : memref<128x1xf32, #tpu.memory_space<vmem>>, vector<128x1xf32>
    %123 = vector.broadcast %122 : vector<128x1xf32> to vector<128x8xf32>
    %124 = arith.addf %121, %123 : vector<128x8xf32>
    %cst_113 = arith.constant 0.000000e+00 : f32
    %125 = vector.broadcast %cst_113 : f32 to vector<128x8xf32>
    %126 = arith.maximumf %124, %125 : vector<128x8xf32>
    %c0_114 = arith.constant 0 : index
    %c0_115 = arith.constant 0 : index
    %127 = vector.load %arg12[%c0_114, %c0_115] : memref<128x128xf32, #tpu.memory_space<vmem>>, vector<128x128xf32>
    %cst_116 = arith.constant dense<0.000000e+00> : vector<128x8xf32>
    %128 = tpu.matmul %127, %126, %cst_116 {dimension_numbers = #tpu.dot_dimension_numbers<[1], [0], [0], [1], [0, 0, 1, 1], [], []>} : vector<128x128xf32>, vector<128x8xf32>, vector<128x8xf32> -> vector<128x8xf32>
    %c0_117 = arith.constant 0 : index
    %c0_118 = arith.constant 0 : index
    %129 = vector.load %arg13[%c0_117, %c0_118] : memref<128x1xf32, #tpu.memory_space<vmem>>, vector<128x1xf32>
    %130 = vector.broadcast %129 : vector<128x1xf32> to vector<128x8xf32>
    %131 = arith.addf %128, %130 : vector<128x8xf32>
    %cst_119 = arith.constant 0.000000e+00 : f32
    %132 = vector.broadcast %cst_119 : f32 to vector<128x8xf32>
    %133 = arith.maximumf %131, %132 : vector<128x8xf32>
    %c0_120 = arith.constant 0 : index
    %c0_121 = arith.constant 0 : index
    %134 = vector.load %arg14[%c0_120, %c0_121] : memref<128x128xf32, #tpu.memory_space<vmem>>, vector<128x128xf32>
    %cst_122 = arith.constant dense<0.000000e+00> : vector<8x128xf32>
    %135 = tpu.matmul %133, %134, %cst_122 {dimension_numbers = #tpu.dot_dimension_numbers<[0], [0], [1], [1], [0, 1, 1, 1], [], []>} : vector<128x8xf32>, vector<128x128xf32>, vector<8x128xf32> -> vector<8x128xf32>
    %c0_123 = arith.constant 0 : index
    %c0_124 = arith.constant 0 : index
    %136 = vector.load %arg15[%c0_123, %c0_124] : memref<1x128xf32, #tpu.memory_space<vmem>>, vector<1x128xf32>
    %137 = vector.broadcast %136 : vector<1x128xf32> to vector<8x128xf32>
    %138 = arith.addf %135, %137 : vector<8x128xf32>
    %c0_125 = arith.constant 0 : index
    %c0_126 = arith.constant 0 : index
    %139 = vector.load %arg16[%c0_125, %c0_126] : memref<8x128xf32, #tpu.memory_space<vmem>>, vector<8x128xf32>
    tpu.vector_store %arg16[%c0_125, %c0_126], %138 {strides = array<i32>} : memref<8x128xf32, #tpu.memory_space<vmem>>, vector<8x128xf32>,
    return
  }
  func.func @transform_0(%arg0: i32) -> (i32, i32, i32) {
    %c0_i32 = arith.constant 0 : i32
    %c0_i32_0 = arith.constant 0 : i32
    %c0_i32_1 = arith.constant 0 : i32
    return %arg0, %c0_i32, %c0_i32_0 : i32, i32, i32
  }
  func.func @transform_1(%arg0: i32) -> (i32, i32, i32) {
    %c0_i32 = arith.constant 0 : i32
    %c0_i32_0 = arith.constant 0 : i32
    %c0_i32_1 = arith.constant 0 : i32
    %c0_i32_2 = arith.constant 0 : i32
    return %c0_i32, %c0_i32_0, %c0_i32_1 : i32, i32, i32
  }
  func.func @transform_2(%arg0: i32) -> (i32, i32) {
    %c0_i32 = arith.constant 0 : i32
    %c0_i32_0 = arith.constant 0 : i32
    %c0_i32_1 = arith.constant 0 : i32
    return %c0_i32, %c0_i32_0 : i32, i32
  }
  func.func @transform_3(%arg0: i32) -> (i32, i32) {
    %c0_i32 = arith.constant 0 : i32
    %c0_i32_0 = arith.constant 0 : i32
    %c0_i32_1 = arith.constant 0 : i32
    return %c0_i32, %c0_i32_0 : i32, i32
  }
  func.func @transform_4(%arg0: i32) -> (i32, i32) {
    %c0_i32 = arith.constant 0 : i32
    %c0_i32_0 = arith.constant 0 : i32
    %c0_i32_1 = arith.constant 0 : i32
    return %c0_i32, %c0_i32_0 : i32, i32
  }
  func.func @transform_5(%arg0: i32) -> (i32, i32, i32) {
    %c0_i32 = arith.constant 0 : i32
    %c0_i32_0 = arith.constant 0 : i32
    %c0_i32_1 = arith.constant 0 : i32
    %c0_i32_2 = arith.constant 0 : i32
    return %c0_i32, %c0_i32_0, %c0_i32_1 : i32, i32, i32
  }
  func.func @transform_6(%arg0: i32) -> (i32, i32) {
    %c0_i32 = arith.constant 0 : i32
    %c0_i32_0 = arith.constant 0 : i32
    %c0_i32_1 = arith.constant 0 : i32
    return %c0_i32, %c0_i32_0 : i32, i32
  }
  func.func @transform_7(%arg0: i32) -> (i32, i32) {
    %c0_i32 = arith.constant 0 : i32
    %c0_i32_0 = arith.constant 0 : i32
    %c0_i32_1 = arith.constant 0 : i32
    return %c0_i32, %c0_i32_0 : i32, i32
  }
  func.func @transform_8(%arg0: i32) -> (i32, i32) {
    %c0_i32 = arith.constant 0 : i32
    %c0_i32_0 = arith.constant 0 : i32
    %c0_i32_1 = arith.constant 0 : i32
    return %c0_i32, %c0_i32_0 : i32, i32
  }
  func.func @transform_9(%arg0: i32) -> (i32, i32, i32) {
    %c0_i32 = arith.constant 0 : i32
    %c0_i32_0 = arith.constant 0 : i32
    %c0_i32_1 = arith.constant 0 : i32
    %c0_i32_2 = arith.constant 0 : i32
    return %c0_i32, %c0_i32_0, %c0_i32_1 : i32, i32, i32
  }
  func.func @transform_10(%arg0: i32) -> (i32, i32) {
    %c0_i32 = arith.constant 0 : i32
    %c0_i32_0 = arith.constant 0 : i32
    %c0_i32_1 = arith.constant 0 : i32
    return %c0_i32, %c0_i32_0 : i32, i32
  }
  func.func @transform_11(%arg0: i32) -> (i32, i32) {
    %c0_i32 = arith.constant 0 : i32
    %c0_i32_0 = arith.constant 0 : i32
    %c0_i32_1 = arith.constant 0 : i32
    return %c0_i32, %c0_i32_0 : i32, i32
  }
  func.func @transform_12(%arg0: i32) -> (i32, i32) {
    %c0_i32 = arith.constant 0 : i32
    %c0_i32_0 = arith.constant 0 : i32
    %c0_i32_1 = arith.constant 0 : i32
    return %c0_i32, %c0_i32_0 : i32, i32
  }
  func.func @transform_13(%arg0: i32) -> (i32, i32) {
    %c0_i32 = arith.constant 0 : i32
    %c0_i32_0 = arith.constant 0 : i32
    %c0_i32_1 = arith.constant 0 : i32
    return %c0_i32, %c0_i32_0 : i32, i32
  }
  func.func @transform_14(%arg0: i32) -> (i32, i32) {
    %c0_i32 = arith.constant 0 : i32
    %c0_i32_0 = arith.constant 0 : i32
    %c0_i32_1 = arith.constant 0 : i32
    return %c0_i32, %c0_i32_0 : i32, i32
  }
  func.func @transform_15(%arg0: i32) -> (i32, i32) {
    %c0_i32 = arith.constant 0 : i32
    %c0_i32_0 = arith.constant 0 : i32
    return %arg0, %c0_i32 : i32, i32
  }
}

</mosaic_0001>

<bundles_post_ra>
// kernel: lenet_forward.1
= control target key start
LH: loop header
LB: loop body
LE: loop exit
PB: predicated region body
PF: predicated region fallthrough
CT: control target
= control target key end

     0   :  { %s17660_s0 = inlined_call_operand.vmem [shape: f32[16,32,32], index: 0, kind: input, shape index: {}]   ;;  %s17661_s1 = inlined_call_operand.vmem [shape: f32[5,192,36], index: 1, kind: input, shape index: {}]   ;;  %s17662_s2 = inlined_call_operand.vmem [shape: f32[192,1], index: 2, kind: input, shape index: {}]   ;;  %s17663_s3 = inlined_call_operand.vmem [shape: f32[96,192], index: 3, kind: input, shape index: {}]   ;;  %s17664_s4 = inlined_call_operand.vmem [shape: f32[288,132], index: 4, kind: input, shape index: {}]   ;;  %s17665_s5 = inlined_call_operand.vmem [shape: f32[5,192,96], index: 5, kind: input, shape index: {}]   ;;  %s17666_s6 = inlined_call_operand.vmem [shape: f32[192,1], index: 6, kind: input, shape index: {}]   ;;  %s17667_s7 = inlined_call_operand.vmem [shape: f32[128,192], index: 7, kind: input, shape index: {}]   ;;  %s17668_s8 = inlined_call_operand.vmem [shape: f32[128,48], index: 8, kind: input, shape index: {}]   ;;  %s17669_s9 = inlined_call_operand.vmem [shape: f32[6,128,128], index: 9, kind: input, shape index: {}]   ;;  %s17670_s10 = inlined_call_operand.vmem [shape: f32[128,1], index: 10, kind: input, shape index: {}]   ;;  %s17671_s11 = inlined_call_operand.vmem [shape: f32[128,128], index: 11, kind: input, shape index: {}]   ;;  %s17672_s12 = inlined_call_operand.vmem [shape: f32[128,1], index: 12, kind: input, shape index: {}]   ;;  %s17673_s13 = inlined_call_operand.vmem [shape: f32[128,128], index: 13, kind: input, shape index: {}]   ;;  %s17674_s14 = inlined_call_operand.vmem [shape: f32[1,128], index: 14, kind: input, shape index: {}]   ;;  %s17675_s15 = inlined_call_operand.hbm [shape: f32[16,128], index: 15, kind: output, shape index: {}]  }
   0x1   :  { %17724 = sst [smem:[#allocation153_spill]] %s17660_s0 }
   0x2   :  { %17725 = sst [smem:[#allocation154_spill]] %s17661_s1 }
   0x3   :  { %17726 = sst [smem:[#allocation155_spill]] %s17662_s2 }
   0x4   :  { %17727 = sst [smem:[#allocation156_spill]] %s17663_s3 }
   0x5   :  { %20 = vsyncpa [#allocation4], 0 }
   0x6   :  { %22 = vsyncpa [#allocation4 + $0x1], 0  ;;  %s11618_s18 = smov 0   ;;  %s11620_s19 = smov 0  }
   0x7   :  { %s11622_s20 = smov 0   ;;  %s11624_s21 = smov 0  }
   0x8 LB: > { %17728 = sst [smem:[#allocation6_spill]] %s11512_s20  ;;  %s11639_s22 = sadd.s32 4294967295, %s11516_s21   ;;  %s11516_s21 = sphi %s11624_s21, %s18205_s21   ;;  %s11512_s20 = sphi %s11622_s20, %s18202_s20   ;;  %s11508_s19 = sphi %s11620_s19, %s18204_s19   ;;  %s11504_s18 = sphi %s11618_s18, %s18203_s18  }
   0x9   : > { %s9044_s23 = sadd.s32 4294967294, %s11516_s21   ;;  %s11643_s24 = sadd.s32 1, %s11516_s21  }
   0xa   : > { %s355_s25 = sadd.s32 1, %s11512_s20  ;;  %s352_s26 = ssub.s32 %s11516_s21, %s11643_s24 }
   0xb   : > { %p365_p0 = scmp.ne.s32.totalorder %s11512_s20, %s11508_s19  ;;  %p353_p1 = scmp.eq.s32.totalorder %s352_s26, 0 }
   0xc   : > { %p366_p2 = scmp.eq.s32.totalorder %s11639_s22, 1  ;;  %p371_p3 = scmp.ne.s32.totalorder %s11508_s19, %s11504_s18 }
   0xd   : > { %p372_p4 = scmp.eq.s32.totalorder %s9044_s23, 1  ;;  %p9047_p7 = scmp.ge.s32.totalorder %s11516_s21, 1 }
   0xe   : > { %s11654_s27 = scalar_select %p353_p1, %s11512_s20, %s355_s25  }
   0xf   : > { %p11656_p5 = por %p366_p2, %p365_p0  ;;  %p11660_p6 = por %p372_p4, %p371_p3 }
  0x10   : > { %17729 = sst [smem:[#allocation7_spill]] %s11654_s27  ;;  %p442_p8 = scmp.lt.s32.totalorder %s11516_s21, 3 }
  0x12   : > { %p443_p9 = pnand %p9047_p7, %p442_p8 }
  0x14   : > { %446 = sbr.rel (%p443_p9) target bundleno = 3436 (0xd6c), region = 80 }
  0x19   : > { %s9049_s30 = sshll.u32 %s11639_s22, 3  ;;  %v17695_v0 = vmov 0.0   ;;  %s17732_s0 = sld [smem:[#allocation153_spill]]  ;;  %vm523_vm0 = vcmask 1041408   ;;  %vm513_vm1 = vcmask 322560   ;;  %vm500_vm2 = vcmask 326656  }
  0x1a   : > { %p492_p10 = scmp.lt.s32.totalorder %s9049_s30, 15  ;;  %512 = vst [vmem:[#allocation2 + $0x68] sm:$0xf] %v17695_v0  ;;  %498 = vst [vmem:[#allocation2] sm:$0xff] %v17695_v0  ;;  %1119 = vmatprep.mubr.f32.mxu0 %v17695_v0  ;;  %s17678_s26 = smov 110   ;;  %vm677_vm3 = vcmask 107520  }
  0x1b   : > { %499 = vst [vmem:[#allocation2 + $0x8] sm:$0xff] %v17695_v0  ;;  %502 = vst [vmem:[#allocation2 + $0x18] sm:$0xff] %v17695_v0  ;;  %s17676_s17 = smov 38   ;;  %s17686_s23 = smov 54   ;;  %vm552_vm4 = vcmask 271376   ;;  %vm716_vm5 = vcmask 402576  }
  0x1c   : > { %503 = vst [vmem:[#allocation2 + $0x20] sm:$0xff] %v17695_v0  ;;  %505 = vst [vmem:[#allocation2 + $0x30] sm:$0xff] %v17695_v0  ;;  %s18207_s30 = smov (!%p492_p10, %s9049_s30), 15  ;;  %s17739_s27 = smov 126   ;;  %vm591_vm6 = vcmask 566576   ;;  %vm755_vm7 = vcmask 697776  }
  0x1d   : > { %506 = vst [vmem:[#allocation2 + $0x38] sm:$0xff] %v17695_v0  ;;  %508 = vst [vmem:[#allocation2 + $0x48] sm:$0xff] %v17695_v0  ;;  %s9784_s16 = sshll.u32 %s18207_s30, 5  ;;  %s17682_s30 = smov 2   ;;  %vm669_vm8 = vcmask 113664   ;;  %vm712_vm9 = vcmask 408720  }
  0x1e   : > { %509 = vst [vmem:[#allocation2 + $0x50] sm:$0xff] %v17695_v0  ;;  %511 = vst [vmem:[#allocation2 + $0x60] sm:$0xf] %v17695_v0  ;;  %s17740_s20 = smov 90   ;;  %vm794_vm10 = vcmask 992976   ;;  %vm630_vm11 = vcmask 861776  }
  0x1f   : > { %s11681_s25 = scalar_lea.vmem %s17732_s0, %s9784_s16  ;;  %s17680_s16 = smov 18   ;;  %514 = vst.msk [vmem:[#allocation2 + $0x70] sm:$0xf] %vm513_vm1, %v17695_v0  ;;  %vm548_vm12 = vcmask 277520   ;;  %vm675_vm13 = vcmask 1042288   ;;  %vm751_vm14 = vcmask 703920  }
  0x20   : > { %v9063_v1 = vld [vmem:[%s11681_s25 + $0x78] sm:$0xff]  ;;  %v9062_v7 = vld [vmem:[%s11681_s25 + $0x70] sm:$0xff]  ;;  %v9061_v23 = vld [vmem:[%s11681_s25 + $0x68] sm:$0xff]  ;;  %510 = vst.msk [vmem:[#allocation2 + $0x58] sm:$0xff] %vm500_vm2, %v17695_v0  ;;  %s17738_s0 = smov 54   ;;  %vm587_vm15 = vcmask 572720  }
  0x21   : > { %v518_v2 = vld [vmem:[%s11681_s25 + $0x18] sm:$0xff]  ;;  %v646_v4 = vrot.slane %v9063_v1, 6  ;;  %v644_v11 = vrot.slane %v9062_v7, 6  ;;  %v9066_v12 = vld [vmem:[%s11681_s25 + $0x90] sm:$0xff]  ;;  %v642_v27 = vrot.slane %v9061_v23, 6  ;;  %v9065_v34 = vld [vmem:[%s11681_s25 + $0x88] sm:$0xff] }
  0x22   : > { %v9067_v3 = vld [vmem:[%s11681_s25 + $0x98] sm:$0xff]  ;;  %v529_v5 = vrot.slane %v518_v2, 6  ;;  %v691_v15 = vrot.slane %v9066_v12, 6  ;;  %v517_v17 = vld [vmem:[%s11681_s25 + $0x10] sm:$0xff]  ;;  %v689_v38 = vrot.slane %v9065_v34, 6  ;;  %v516_v40 = vld [vmem:[%s11681_s25 + $0x8] sm:$0xff] }
  0x23   : > { %v9055_v6 = vld [vmem:[%s11681_s25 + $0x38] sm:$0xff]  ;;  %656 = vrot.lane.b32.xlu0 %v646_v4, %s17678_s26  ;;  %v693_v8 = vrot.slane %v9067_v3, 6  ;;  %v647_v14 = vsel %vm523_vm0, %v644_v11, %v646_v4  ;;  %v527_v21 = vrot.slane %v517_v17, 6  ;;  %v9070_v22 = vld [vmem:[%s11681_s25 + $0xb0] sm:$0xff]  ;;  %v645_v30 = vsel %vm523_vm0, %v642_v27, %v644_v11  ;;  %v9069_v45 = vld [vmem:[%s11681_s25 + $0xa8] sm:$0xff]  ;;  %501 = vst.msk [vmem:[#allocation2 + $0x10] sm:$0xff] %vm500_vm2, %v17695_v0 }
  0x24   : > { %539 = vrot.lane.b32.xlu1 %v529_v5, %s17682_s30  ;;  %v568_v9 = vrot.slane %v9055_v6, 6  ;;  %v9071_v10 = vld [vmem:[%s11681_s25 + $0xb8] sm:$0xff]  ;;  %v730_v26 = vrot.slane %v9070_v22, 6  ;;  %v9054_v28 = vld [vmem:[%s11681_s25 + $0x30] sm:$0xff]  ;;  %v692_v42 = vsel %vm523_vm0, %v689_v38, %v691_v15  ;;  %v525_v44 = vrot.slane %v516_v40, 6  ;;  %v9060_v46 = vld [vmem:[%s11681_s25 + $0x60] sm:$0xff] }
  0x25   : > { %v732_v13 = vrot.slane %v9071_v10, 6  ;;  %v9075_v16 = vld [vmem:[%s11681_s25 + $0xd8] sm:$0xff]  ;;  %v694_v19 = vsel %vm523_vm0, %v691_v15, %v693_v8  ;;  %v530_v25 = vsel %vm523_vm0, %v527_v21, %v529_v5  ;;  %v566_v31 = vrot.slane %v9054_v28, 6  ;;  %v9074_v33 = vld [vmem:[%s11681_s25 + $0xd0] sm:$0xff]  ;;  %504 = vst.msk [vmem:[#allocation2 + $0x28] sm:$0xff] %vm500_vm2, %v17695_v0  ;;  %507 = vst.msk [vmem:[#allocation2 + $0x40] sm:$0xff] %vm500_vm2, %v17695_v0 }
  0x26   : > { %v771_v18 = vrot.slane %v9075_v16, 6  ;;  %v9059_v20 = vld [vmem:[%s11681_s25 + $0x58] sm:$0xff]  ;;  %v769_v37 = vrot.slane %v9074_v33, 6  ;;  %v9058_v39 = vld [vmem:[%s11681_s25 + $0x50] sm:$0xff]  ;;  %v528_v48 = vsel %vm523_vm0, %v525_v44, %v527_v21  ;;  %v728_v49 = vrot.slane %v9069_v45, 6  ;;  %v9053_v51 = vld [vmem:[%s11681_s25 + $0x28] sm:$0xff] }
  0x27   : > { %703 = vrot.lane.b32.xlu0 %v693_v8, %s17680_s16  ;;  %v607_v24 = vrot.slane %v9059_v20, 6  ;;  %v733_v29 = vsel %vm523_vm0, %v730_v26, %v732_v13  ;;  %v9079_v32 = vld [vmem:[%s11681_s25 + $0xf8] sm:$0xff]  ;;  %v569_v36 = vsel %vm523_vm0, %v566_v31, %v568_v9  ;;  %v605_v43 = vrot.slane %v9058_v39, 6  ;;  %v9078_v52 = vld [vmem:[%s11681_s25 + $0xf0] sm:$0xff]  ;;  %v9073_v57 = vld [vmem:[%s11681_s25 + $0xc8] sm:$0xff]  ;;  %s17741_s1 = sld [smem:[#allocation154_spill]] }
  0x28   : > { %578 = vrot.lane.b32.xlu1 %v568_v9, %s17676_s17  ;;  %s17688_s17 = smov 90   ;;  %v810_v35 = vrot.slane %v9079_v32, 6  ;;  %v772_v41 = vsel %vm523_vm0, %v769_v37, %v771_v18  ;;  %v641_v50 = vrot.slane %v9060_v46, 6  ;;  %v731_v53 = vsel %vm523_vm0, %v728_v49, %v730_v26  ;;  %v9064_v58 = vld [vmem:[%s11681_s25 + $0x80] sm:$0xff]  ;;  %v9057_v63 = vld [vmem:[%s11681_s25 + $0x48] sm:$0xff]  ;;  %s17745_s2 = sld [smem:[#allocation155_spill]] }
  0x29   : > { %v608_v47 = vsel %vm523_vm0, %v605_v43, %v607_v24  ;;  %v564_v55 = vrot.slane %v9053_v51, 6  ;;  %v808_v56 = vrot.slane %v9078_v52, 6  ;;  %v767_v61 = vrot.slane %v9073_v57, 6  ;;  %v515_v1 = vld [vmem:[%s11681_s25] sm:$0xff]  ;;  %v9077_v11 = vld [vmem:[%s11681_s25 + $0xe8] sm:$0xff]  ;;  %s17897_s3 = sld [smem:[#allocation156_spill]] }
  0x2a   : > { %v643_v54 = vsel %vm523_vm0, %v641_v50, %v642_v27  ;;  %v688_v62 = vrot.slane %v9064_v58, 6  ;;  %v603_v4 = vrot.slane %v9057_v63, 6  ;;  %v524_v5 = vrot.slane %v515_v1, 6  ;;  %v9068_v6 = vld [vmem:[%s11681_s25 + $0xa0] sm:$0xff] }
  0x2b   : > { %742 = vrot.lane.b32.xlu0 %v732_v13, %s17686_s23  ;;  %v567_v59 = vsel %vm523_vm0, %v564_v55, %v566_v31  ;;  %v811_v60 = vsel %vm523_vm0, %v808_v56, %v810_v35  ;;  %v770_v2 = vsel %vm523_vm0, %v767_v61, %v769_v37  ;;  %v727_v9 = vrot.slane %v9068_v6, 6  ;;  %v9052_v10 = vld [vmem:[%s11681_s25 + $0x20] sm:$0xff] }
  0x2c   : > { %654 = vrot.lane.b32.xlu1 %v647_v14, %s17678_s26  ;;  %s17684_s26 = smov 74   ;;  %v690_v3 = vsel %vm523_vm0, %v688_v62, %v689_v38  ;;  %v606_v7 = vsel %vm523_vm0, %v603_v4, %v605_v43  ;;  %v526_v8 = vsel %vm523_vm0, %v524_v5, %v525_v44  ;;  %v563_v13 = vrot.slane %v9052_v10, 6  ;;  %v9072_v15 = vld [vmem:[%s11681_s25 + $0xc0] sm:$0xff] }
  0x2d   : > { %v729_v12 = vsel %vm523_vm0, %v727_v9, %v728_v49  ;;  %v806_v14 = vrot.slane %v9077_v11, 6  ;;  %v9076_v22 = vld [vmem:[%s11681_s25 + $0xe0] sm:$0xff]  ;;  %vm841_vm1 = vcmask 238592   ;;  %vm790_vm2 = vcmask 999120  }
  0x2e   : > { %v565_v16 = vsel %vm523_vm0, %v563_v13, %v564_v55  ;;  %v11835_v6 = vld [vmem:[%s17741_s1 + $0xc0] sm:$0xff] }
  0x2f   : > { %701 = vrot.lane.b32.xlu0 %v694_v19, %s17680_s16  ;;  %s17733_s16 = smov 110   ;;  %v809_v17 = vsel %vm523_vm0, %v806_v14, %v808_v56  ;;  %v9056_v19 = vld [vmem:[%s11681_s25 + $0x40] sm:$0xff] }
  0x30   : > { %781 = vrot.lane.b32.xlu1 %v771_v18, %s17688_s17  ;;  %v766_v18 = vrot.slane %v9072_v15, 6  ;;  %v602_v21 = vrot.slane %v9056_v19, 6 }
  0x32   : > { %v768_v20 = vsel %vm523_vm0, %v766_v18, %v767_v61  ;;  %v604_v23 = vsel %vm523_vm0, %v602_v21, %v603_v4 }
  0x33   : > { %537 = vrot.lane.b32.xlu0 %v530_v25, %s17682_s30  ;;  %s17734_s30 = smov 38  }
  0x34   : > { %617 = vrot.lane.b32.xlu1 %v607_v24, %s17684_s26  ;;  %s17690_s26 = smov 126   ;;  %v805_v24 = vrot.slane %v9076_v22, 6 }
  0x36   : > { %v807_v25 = vsel %vm523_vm0, %v805_v24, %v806_v14  ;;  %vm839_vm0 = vcmask 1042416  }
  0x37   : > { %652 = vrot.lane.b32.xlu0 %v645_v30, %s17733_s16 }
  0x38   : > { %740 = vrot.lane.b32.xlu1 %v733_v29, %s17686_s23  ;;  %s17735_s23 = smov 18  }
  0x3b   : > { %820 = vrot.lane.b32.xlu0 %v810_v35, %s17690_s26  ;;  %s17737_s26 = smov 2  }
  0x3c   : > { %576 = vrot.lane.b32.xlu1 %v569_v36, %s17734_s30 }
  0x3f   : > { %699 = vrot.lane.b32.xlu0 %v692_v42, %s17735_s23 }
  0x40   : > { %779 = vrot.lane.b32.xlu1 %v772_v41, %s17688_s17  ;;  %s17736_s17 = smov 74  }
  0x43   : > { %535 = vrot.lane.b32.xlu0 %v528_v48, %s17737_s26 }
  0x44   : > { %615 = vrot.lane.b32.xlu1 %v608_v47, %s17736_s17 }
  0x47   : > { %650 = vrot.lane.b32.xlu0 %v643_v54, %s17733_s16 }
  0x48   : > { %738 = vrot.lane.b32.xlu1 %v731_v53, %s17738_s0 }
  0x4b   : > { %818 = vrot.lane.b32.xlu0 %v811_v60, %s17739_s27 }
  0x4c   : > { %574 = vrot.lane.b32.xlu1 %v567_v59, %s17734_s30 }
  0x4f   : > { %697 = vrot.lane.b32.xlu0 %v690_v3, %s17735_s23 }
  0x50   : > { %777 = vrot.lane.b32.xlu1 %v770_v2, %s17740_s20 }
  0x53   : > { %533 = vrot.lane.b32.xlu0 %v526_v8, %s17737_s26 }
  0x54   : > { %613 = vrot.lane.b32.xlu1 %v606_v7, %s17736_s17 }
  0x57   : > { %648 = vrot.lane.b32.xlu0 %v641_v50, %s17733_s16 }
  0x58   : > { %736 = vrot.lane.b32.xlu1 %v729_v12, %s17738_s0 }
  0x5b   : > { %816 = vrot.lane.b32.xlu0 %v809_v17, %s17739_s27 }
  0x5c   : > { %572 = vrot.lane.b32.xlu1 %v565_v16, %s17734_s30 }
  0x5f   : > { %695 = vrot.lane.b32.xlu0 %v688_v62, %s17735_s23  ;;  %s18080_s23 = smov 125  }
  0x60   : > { %775 = vrot.lane.b32.xlu1 %v768_v20, %s17740_s20 }
  0x63   : > { %531 = vrot.lane.b32.xlu0 %v524_v5, %s17737_s26  ;;  %s17719_s26 = smov 125  }
  0x64   : > { %611 = vrot.lane.b32.xlu1 %v604_v23, %s17736_s17 }
  0x67   : > { %734 = vrot.lane.b32.xlu0 %v727_v9, %s17738_s0  ;;  %s17721_s0 = smov 127  }
  0x68   : > { %814 = vrot.lane.b32.xlu1 %v807_v25, %s17739_s27 }
  0x6b   : > { %570 = vrot.lane.b32.xlu0 %v563_v13, %s17734_s30  ;;  %s17693_s30 = smov 124  }
  0x6c   : > { %773 = vrot.lane.b32.xlu1 %v766_v18, %s17740_s20 }
  0x6f   : > { %609 = vrot.lane.b32.xlu0 %v602_v21, %s17736_s17  ;;  %s11535_s17 = smov 88  }
  0x70   : > { %812 = vrot.lane.b32.xlu1 %v805_v24, %s17739_s27 }
  0x95   : > { %v657_v26 = vpop.permute.xlu0 %656 }
  0x96   : > { %v540_v27 = vpop.permute.xlu1 %539  ;;  %678 = vst.msk [vmem:[#allocation2 + $0x68] sm:$0x3] %vm677_vm3, %v657_v26  ;;  %vm626_vm3 = vcmask 867920  }
  0x97   : > { %553 = vst.msk [vmem:[#allocation2 + $0x60] sm:$0x3] %vm552_vm4, %v540_v27  ;;  %vm667_vm4 = vcmask 1048432  }
  0x99   : > { %v704_v28 = vpop.permute.xlu0 %703 }
  0x9a   : > { %v579_v29 = vpop.permute.xlu1 %578  ;;  %717 = vst.msk [vmem:[#allocation2 + $0x68] sm:$0x3] %vm716_vm5, %v704_v28  ;;  %vm831_vm5 = vcmask 1048560  }
  0x9b   : > { %592 = vst.msk [vmem:[#allocation2 + $0x60] sm:$0x3] %vm591_vm6, %v579_v29  ;;  %vm833_vm6 = vcmask 244736  }
  0x9d   : > { %v743_v30 = vpop.permute.xlu0 %742 }
  0x9e   : > { %v655_v31 = vpop.permute.xlu1 %654  ;;  %756 = vst.msk [vmem:[#allocation2 + $0x68] sm:$0x3] %vm755_vm7, %v743_v30  ;;  %vm665_vm7 = vcmask 113666  }
  0x9f   : > { %674 = vst.msk [vmem:[#allocation2 + $0x50] sm:$0xff] %vm669_vm8, %v655_v31 }
  0xa1   : > { %v702_v32 = vpop.permute.xlu0 %701 }
  0xa2   : > { %v782_v33 = vpop.permute.xlu1 %781  ;;  %715 = vst.msk [vmem:[#allocation2 + $0x50] sm:$0xff] %vm712_vm9, %v702_v32  ;;  %v11978_v32 = vld [vmem:[%s17741_s1 + $0xc8] sm:$0xff] }
  0xa3   : > { %795 = vst.msk [vmem:[#allocation2 + $0x68] sm:$0x3] %vm794_vm10, %v782_v33  ;;  %vm749_vm10 = vcmask 703922  }
  0xa5   : > { %v538_v35 = vpop.permute.xlu0 %537 }
  0xa6   : > { %v618_v34 = vpop.permute.xlu1 %617  ;;  %551 = vst.msk [vmem:[#allocation2 + $0x48] sm:$0xff] %vm548_vm12, %v538_v35 }
  0xa7   : > { %631 = vst.msk [vmem:[#allocation2 + $0x60] sm:$0x3] %vm630_vm11, %v618_v34  ;;  %vm585_vm11 = vcmask 572722   ;;  %v11986_v34 = vld [vmem:[%s17741_s1 + $0xd0] sm:$0xff] }
  0xa8   : > { %676 = vst.msk [vmem:[#allocation2 + $0x60] sm:$0x3] %vm675_vm13, %v657_v26  ;;  %vm975_vm13 = vcmask 293888  }
  0xa9   : > { %v653_v37 = vpop.permute.xlu0 %652  ;;  %10393 = vmatprep.mubr.msk.f32.mxu1 %vm975_vm13, %v11835_v6 }
  0xaa   : > { %v741_v36 = vpop.permute.xlu1 %740  ;;  %672 = vst.msk [vmem:[#allocation2 + $0x38] sm:$0xff] %vm669_vm8, %v653_v37 }
  0xab   : > { %754 = vst.msk [vmem:[#allocation2 + $0x50] sm:$0xff] %vm751_vm14, %v741_v36 }
  0xad   : > { %v821_v39 = vpop.permute.xlu0 %820 }
  0xae   : > { %v577_v38 = vpop.permute.xlu1 %576  ;;  %840 = vst.msk [vmem:[#allocation2 + $0x68] sm:$0x3] %vm839_vm0, %v821_v39  ;;  %vm829_vm0 = vcmask 244738  }
  0xaf   : > { %590 = vst.msk [vmem:[#allocation2 + $0x48] sm:$0xff] %vm587_vm15, %v577_v38  ;;  %v11849_v11 = vld [vmem:[#allocation2 + $0x60] sm:$0xf] }
  0xb0   : > { %842 = vst.msk [vmem:[#allocation2 + $0x70] sm:$0x3] %vm841_vm1, %v821_v39  ;;  %vm663_vm1 = vcmask 1048434  }
  0xb1   : > { %v700_v41 = vpop.permute.xlu0 %699 }
  0xb2   : > { %v780_v40 = vpop.permute.xlu1 %779  ;;  %714 = vst.msk [vmem:[#allocation2 + $0x38] sm:$0xff] %vm712_vm9, %v700_v41  ;;  %v12012_v41 = vld [vmem:[%s17741_s1 + $0xe0] sm:$0xff] }
  0xb3   : > { %793 = vst.msk [vmem:[#allocation2 + $0x50] sm:$0xff] %vm790_vm2, %v780_v40 }
  0xb5   : > { %v536_v43 = vpop.permute.xlu0 %535  ;;  %v11857_v13 = vld [vmem:[#allocation2 + $0x68] sm:$0xf] }
  0xb6   : > { %v616_v42 = vpop.permute.xlu1 %615  ;;  %550 = vst.msk [vmem:[#allocation2 + $0x30] sm:$0xff] %vm548_vm12, %v536_v43 }
  0xb7   : > { %v11792_v44 = vld [vmem:[#allocation2 + $0x70] sm:$0xf]  ;;  %629 = vst.msk [vmem:[#allocation2 + $0x48] sm:$0xff] %vm626_vm3, %v616_v42  ;;  %v12018_v42 = vld [vmem:[%s17741_s1 + $0xe8] sm:$0xff] }
  0xb8   : > { %950 = vrot.lane.b32.xlu1 %v11792_v44, %s17721_s0  ;;  %673 = vst.msk [vmem:[#allocation2 + $0x48] sm:$0xff] %vm667_vm4, %v655_v31 }
  0xb9   : > { %v651_v46 = vpop.permute.xlu0 %650 }
  0xba   : > { %v739_v45 = vpop.permute.xlu1 %738  ;;  %670 = vst.msk [vmem:[#allocation2 + $0x20] sm:$0xff] %vm669_vm8, %v651_v46  ;;  %vm710_vm8 = vcmask 408722  }
  0xbb   : > { %753 = vst.msk [vmem:[#allocation2 + $0x38] sm:$0xff] %vm751_vm14, %v739_v45 }
  0xbd   : > { %v819_v48 = vpop.permute.xlu0 %818 }
  0xbe   : > { %v575_v47 = vpop.permute.xlu1 %574  ;;  %837 = vst.msk [vmem:[#allocation2 + $0x50] sm:$0xff] %vm831_vm5, %v819_v48 }
  0xbf   : > { %589 = vst.msk [vmem:[#allocation2 + $0x30] sm:$0xff] %vm587_vm15, %v575_v47  ;;  %v11824_v2 = vld [vmem:[#allocation2 + $0x48] sm:$0xff] }
  0xc0   : > { %838 = vst.msk [vmem:[#allocation2 + $0x58] sm:$0xff] %vm833_vm6, %v819_v48 }
  0xc1   : > { %v698_v50 = vpop.permute.xlu0 %697 }
  0xc2   : > { %v778_v49 = vpop.permute.xlu1 %777  ;;  %713 = vst.msk [vmem:[#allocation2 + $0x20] sm:$0xff] %vm712_vm9, %v698_v50  ;;  %vm546_vm9 = vcmask 277522   ;;  %v12040_v50 = vld [vmem:[%s17741_s1 + $0xf8] sm:$0xff] }
  0xc3   : > { %792 = vst.msk [vmem:[#allocation2 + $0x38] sm:$0xff] %vm790_vm2, %v778_v49  ;;  %v12034_v49 = vld [vmem:[%s17741_s1 + $0xf0] sm:$0xff] }
  0xc5   : > { %v534_v52 = vpop.permute.xlu0 %533  ;;  %v11845_v10 = vld [vmem:[#allocation2 + $0x50] sm:$0xff] }
  0xc6   : > { %v614_v51 = vpop.permute.xlu1 %613  ;;  %549 = vst.msk [vmem:[#allocation2 + $0x18] sm:$0xff] %vm548_vm12, %v534_v52  ;;  %vm788_vm12 = vcmask 999122  }
  0xc7   : > { %v11806_v53 = vld [vmem:[#allocation2 + $0x58] sm:$0xff]  ;;  %628 = vst.msk [vmem:[#allocation2 + $0x30] sm:$0xff] %vm626_vm3, %v614_v51  ;;  %v12046_v51 = vld [vmem:[%s17741_s1 + $0x100] sm:$0xff] }
  0xc8   : > { %944 = vrot.lane.b32.xlu0 %v11806_v53, %s17721_s0  ;;  %671 = vst.msk [vmem:[#allocation2 + $0x30] sm:$0xff] %vm667_vm4, %v653_v37  ;;  %v12000_v37 = vld [vmem:[%s17741_s1 + $0xd8] sm:$0xff] }
  0xc9   : > { %v649_v55 = vpop.permute.xlu0 %648 }
  0xca   : > { %v737_v54 = vpop.permute.xlu1 %736  ;;  %666 = vst.msk [vmem:[#allocation2 + $0x8] sm:$0xfc] %vm665_vm7, %v649_v55  ;;  %vm4099_vm7 = vcmask 523264  }
  0xcb   : > { %752 = vst.msk [vmem:[#allocation2 + $0x20] sm:$0xff] %vm751_vm14, %v737_v54  ;;  %vm624_vm14 = vcmask 867922  }
  0xcd   : > { %v817_v57 = vpop.permute.xlu0 %816 }
  0xce   : > { %v573_v56 = vpop.permute.xlu1 %572  ;;  %835 = vst.msk [vmem:[#allocation2 + $0x38] sm:$0xff] %vm831_vm5, %v817_v57 }
  0xcf   : > { %588 = vst.msk [vmem:[#allocation2 + $0x18] sm:$0xff] %vm587_vm15, %v573_v56  ;;  %vm827_vm15 = vcmask 1048562   ;;  %v11865_v15 = vld [vmem:[#allocation2 + $0x30] sm:$0xff] }
  0xd0   : > { %836 = vst.msk [vmem:[#allocation2 + $0x40] sm:$0xff] %vm833_vm6, %v817_v57 }
  0xd1   : > { %v696_v59 = vpop.permute.xlu0 %695 }
  0xd2   : > { %v776_v58 = vpop.permute.xlu1 %775  ;;  %711 = vst.msk [vmem:[#allocation2 + $0x8] sm:$0xfc] %vm710_vm8, %v696_v59  ;;  %v12094_v59 = vld [vmem:[%s17741_s1 + $0x120] sm:$0xff]  ;;  %vm4470_vm8 = vcmask 261120  }
  0xd3   : > { %791 = vst.msk [vmem:[#allocation2 + $0x20] sm:$0xff] %vm790_vm2, %v776_v58  ;;  %vm1048_vm2 = vcmask 1043456   ;;  %v12074_v58 = vld [vmem:[%s17741_s1 + $0x110] sm:$0xff] }
  0xd5   : > { %v532_v61 = vpop.permute.xlu0 %531  ;;  %v11871_v16 = vld [vmem:[#allocation2 + $0x38] sm:$0xff] }
  0xd6   : > { %v612_v60 = vpop.permute.xlu1 %611  ;;  %547 = vst.msk [vmem:[#allocation2] sm:$0xfc] %vm546_vm9, %v532_v61  ;;  %v12111_v61 = vld [vmem:[%s17741_s1 + $0x128] sm:$0xff]  ;;  %vm4926_vm9 = vcmask 785408  }
  0xd7   : > { %v11818_v62 = vld [vmem:[#allocation2 + $0x40] sm:$0xff]  ;;  %627 = vst.msk [vmem:[#allocation2 + $0x18] sm:$0xff] %vm626_vm3, %v612_v60  ;;  %vm952_vm3 = vcmask 1039360  }
  0xd8   : > { %938 = vrot.lane.b32.xlu1 %v11818_v62, %s17721_s0  ;;  %668 = vst.msk [vmem:[#allocation2 + $0x18] sm:$0xff] %vm667_vm4, %v651_v46  ;;  %vm1976_vm4 = vcmask 1031168  }
  0xd9   : > { %v735_v1 = vpop.permute.xlu0 %734 }
  0xda   : > { %v815_v63 = vpop.permute.xlu1 %814  ;;  %750 = vst.msk [vmem:[#allocation2 + $0x8] sm:$0xfc] %vm749_vm10, %v735_v1  ;;  %vm11536_vm10 = vmmov 0  }
  0xdb   : > { %832 = vst.msk [vmem:[#allocation2 + $0x20] sm:$0xff] %vm831_vm5, %v815_v63  ;;  %vm2598_vm5 = vcmask 1022976  }
  0xdc   : > { %834 = vst.msk [vmem:[#allocation2 + $0x28] sm:$0xff] %vm833_vm6, %v815_v63  ;;  %940 = vrot.lane.b32.xlu1 %v11824_v2, %s17721_s0  ;;  %vm3220_vm6 = vcmask 1014784  }
  0xdd   : > { %v571_v3 = vpop.permute.xlu0 %570 }
  0xde   : > { %v774_v4 = vpop.permute.xlu1 %773  ;;  %586 = vst.msk [vmem:[#allocation2] sm:$0xfc] %vm585_vm11, %v571_v3 }
  0xdf   : > { %789 = vst.msk [vmem:[#allocation2 + $0x8] sm:$0xfc] %vm788_vm12, %v774_v4  ;;  %v11830_v5 = vld [vmem:[#allocation2 + $0x18] sm:$0xff]  ;;  %v12144_v4 = vld [vmem:[%s17741_s1 + $0x140] sm:$0xff] }
  0xe0   : > { %928 = vrot.lane.b32.xlu1 %v11830_v5, %s17721_s0 }
  0xe1   : > { %v610_v7 = vpop.permute.xlu0 %609 }
  0xe2   : > { %v813_v8 = vpop.permute.xlu1 %812  ;;  %625 = vst.msk [vmem:[#allocation2] sm:$0xfc] %vm624_vm14, %v610_v7  ;;  %v11853_v12 = vld [vmem:[#allocation2 + $0x20] sm:$0xff]  ;;  %v12163_v7 = vld [vmem:[%s17741_s1 + $0x150] sm:$0xff] }
  0xe3   : > { %v11841_v9 = vld [vmem:[#allocation2 + $0x28] sm:$0xff]  ;;  %828 = vst.msk [vmem:[#allocation2 + $0x8] sm:$0xfc] %vm827_vm15, %v813_v8 }
  0xe4   : > { %830 = vst.msk [vmem:[#allocation2 + $0x10] sm:$0xfc] %vm829_vm0, %v813_v8  ;;  %932 = vrot.lane.b32.xlu0 %v11841_v9, %s17721_s0  ;;  %942 = vrot.lane.b32.xlu1 %v11845_v10, %s17721_s0 }
  0xe5   : > { %664 = vst.msk [vmem:[#allocation2] sm:$0xfc] %vm663_vm1, %v649_v55  ;;  %v12058_v55 = vld [vmem:[%s17741_s1 + $0x108] sm:$0xff] }
  0xe8   : > { %946 = vrot.lane.b32.xlu0 %v11849_v11, %s17721_s0  ;;  %930 = vrot.lane.b32.xlu1 %v11853_v12, %s17721_s0 }
  0xea   : > { %v11877_v17 = vld [vmem:[#allocation2 + $0x8] sm:$0xff] }
  0xeb   : > { %v11859_v14 = vld [vmem:[#allocation2 + $0x10] sm:$0xff] }
  0xec   : > { %948 = vrot.lane.b32.xlu0 %v11857_v13, %s17721_s0  ;;  %926 = vrot.lane.b32.xlu1 %v11859_v14, %s17721_s0  ;;  %v11883_v18 = vld [vmem:[#allocation2] sm:$0xff] }
  0xf0   : > { %934 = vrot.lane.b32.xlu0 %v11865_v15, %s17721_s0  ;;  %1972 = vrot.lane.b32.xlu1 %v11857_v13, %s17739_s27 }
  0xf4   : > { %936 = vrot.lane.b32.xlu0 %v11871_v16, %s17721_s0  ;;  %1970 = vrot.lane.b32.xlu1 %v11849_v11, %s17739_s27 }
  0xf8   : > { %924 = vrot.lane.b32.xlu0 %v11877_v17, %s17721_s0  ;;  %1968 = vrot.lane.b32.xlu1 %v11806_v53, %s17739_s27 }
  0xfc   : > { %922 = vrot.lane.b32.xlu0 %v11883_v18, %s17721_s0  ;;  %1958 = vrot.lane.b32.xlu1 %v11865_v15, %s17739_s27  ;;  %s11532_s0 = smov 112  }
 0x100   : > { %1974 = vrot.lane.b32.xlu0 %v11792_v44, %s17739_s27  ;;  %1956 = vrot.lane.b32.xlu1 %v11841_v9, %s17739_s27 }
 0x104   : > { %1964 = vrot.lane.b32.xlu0 %v11824_v2, %s17739_s27  ;;  %1960 = vrot.lane.b32.xlu1 %v11871_v16, %s17739_s27 }
 0x108   : > { %1962 = vrot.lane.b32.xlu0 %v11818_v62, %s17739_s27  ;;  %1948 = vrot.lane.b32.xlu1 %v11877_v17, %s17739_s27 }
 0x10c   : > { %1952 = vrot.lane.b32.xlu0 %v11830_v5, %s17739_s27  ;;  %1946 = vrot.lane.b32.xlu1 %v11883_v18, %s17739_s27 }
 0x110   : > { %1966 = vrot.lane.b32.xlu0 %v11845_v10, %s17739_s27  ;;  %2596 = vrot.lane.b32.xlu1 %v11792_v44, %s17719_s26 }
 0x114   : > { %1954 = vrot.lane.b32.xlu0 %v11853_v12, %s17739_s27  ;;  %2588 = vrot.lane.b32.xlu1 %v11845_v10, %s17719_s26 }
 0x118   : > { %1950 = vrot.lane.b32.xlu0 %v11859_v14, %s17739_s27  ;;  %2586 = vrot.lane.b32.xlu1 %v11824_v2, %s17719_s26 }
 0x11c   : > { %2594 = vrot.lane.b32.xlu0 %v11857_v13, %s17719_s26  ;;  %2584 = vrot.lane.b32.xlu1 %v11818_v62, %s17719_s26 }
 0x120   : > { %2592 = vrot.lane.b32.xlu0 %v11849_v11, %s17719_s26  ;;  %2576 = vrot.lane.b32.xlu1 %v11853_v12, %s17719_s26 }
 0x124   : > { %2590 = vrot.lane.b32.xlu0 %v11806_v53, %s17719_s26  ;;  %2574 = vrot.lane.b32.xlu1 %v11830_v5, %s17719_s26 }
 0x128   : > { %2582 = vrot.lane.b32.xlu0 %v11871_v16, %s17719_s26  ;;  %2572 = vrot.lane.b32.xlu1 %v11859_v14, %s17719_s26 }
 0x12a   : > { %v951_v19 = vpop.permute.xlu1 %950 }
 0x12b   : > { %10383 = vmatprep.subr.msk.mxu1 %vm1048_vm2, %v951_v19 }
 0x12c   : > { %2580 = vrot.lane.b32.xlu0 %v11865_v15, %s17719_s26  ;;  %10384 = vmatpush3.msk.msra.mxu1 %vm1048_vm2, %v951_v19 }
 0x12d   : > { %3216 = vrot.lane.b32.xlu1 %v11857_v13, %s17693_s30 }
 0x130   : > { %2578 = vrot.lane.b32.xlu0 %v11841_v9, %s17719_s26 }
 0x131   : > { %3214 = vrot.lane.b32.xlu1 %v11849_v11, %s17693_s30 }
 0x134   : > { %2570 = vrot.lane.b32.xlu0 %v11877_v17, %s17719_s26 }
 0x135   : > { %3212 = vrot.lane.b32.xlu1 %v11806_v53, %s17693_s30 }
 0x138   : > { %2568 = vrot.lane.b32.xlu0 %v11883_v18, %s17719_s26  ;;  %s11533_s26 = smov 104  }
 0x139   : > { %3204 = vrot.lane.b32.xlu1 %v11871_v16, %s17693_s30 }
 0x13a   : > { %v945_v20 = vpop.permute.xlu0 %944 }
 0x13b   : > { %10385 = vmatprep.subr.mxu1 %v945_v20 }
 0x13c   : > { %3218 = vrot.lane.b32.xlu0 %v11792_v44, %s17693_s30  ;;  %10386 = vmatpush3.msra.mxu1 %v945_v20 }
 0x13d   : > { %3202 = vrot.lane.b32.xlu1 %v11865_v15, %s17693_s30 }
 0x140   : > { %3210 = vrot.lane.b32.xlu0 %v11845_v10, %s17693_s30 }
 0x141   : > { %3200 = vrot.lane.b32.xlu1 %v11841_v9, %s17693_s30 }
 0x144   : > { %3208 = vrot.lane.b32.xlu0 %v11824_v2, %s17693_s30 }
 0x145   : > { %3192 = vrot.lane.b32.xlu1 %v11877_v17, %s17693_s30 }
 0x148   : > { %3206 = vrot.lane.b32.xlu0 %v11818_v62, %s17693_s30 }
 0x149   : > { %3190 = vrot.lane.b32.xlu1 %v11883_v18, %s17693_s30 }
 0x14a   : > { %v939_v21 = vpop.permute.xlu1 %938 }
 0x14b   : > { %10387 = vmatprep.subr.mxu1 %v939_v21 }
 0x14c   : > { %3198 = vrot.lane.b32.xlu0 %v11853_v12, %s17693_s30  ;;  %10388 = vmatpush3.msra.mxu1 %v939_v21 }
 0x14e   : > { %v941_v22 = vpop.permute.xlu1 %940 }
 0x150   : > { %3196 = vrot.lane.b32.xlu0 %v11830_v5, %s17693_s30 }
 0x152   : > { %v929_v23 = vpop.permute.xlu1 %928 }
 0x154   : > { %3194 = vrot.lane.b32.xlu0 %v11859_v14, %s17693_s30  ;;  %s18081_s30 = smov 124  }
 0x156   : > { %v933_v24 = vpop.permute.xlu0 %932  ;;  %v943_v25 = vpop.permute.xlu1 %942 }
 0x157   : > { %10389 = vmatprep.subr.mxu1 %v933_v24  ;;  %v960_v33 = vsel %vm952_vm3, %v943_v25, %v945_v20  ;;  %v959_v36 = vsel %vm952_vm3, %v941_v22, %v943_v25  ;;  %v12245_v20 = vld [vmem:[%s17741_s1 + $0x8] sm:$0xff]  ;;  %v12261_v22 = vld [vmem:[%s17741_s1 + $0x10] sm:$0xff] }
 0x158   : > { %10390 = vmatpush3.msra.mxu1 %v933_v24 }
 0x15a   : > { %v947_v26 = vpop.permute.xlu0 %946  ;;  %v931_v27 = vpop.permute.xlu1 %930 }
 0x15b   : > { %v956_v43 = vsel %vm952_vm3, %v931_v27, %v933_v24  ;;  %v955_v47 = vsel %vm952_vm3, %v929_v23, %v931_v27  ;;  %v12296_v27 = vld [vmem:[%s17741_s1 + $0x20] sm:$0xff] }
 0x15e   : > { %v949_v28 = vpop.permute.xlu0 %948  ;;  %v927_v29 = vpop.permute.xlu1 %926 }
 0x15f   : > { %v962_v30 = vsel %vm952_vm3, %v949_v28, %v951_v19  ;;  %v961_v31 = vsel %vm952_vm3, %v947_v26, %v949_v28  ;;  %10391 = vmatprep.subr.mxu1 %v927_v29  ;;  %v12283_v26 = vld [vmem:[%s17741_s1 + $0x18] sm:$0xff]  ;;  %v12307_v28 = vld [vmem:[%s17741_s1 + $0x28] sm:$0xff] }
 0x160   : > { %9104 = vmatprep.subr.msk.mxu0 %vm1048_vm2, %v962_v30  ;;  %10392 = vmatpush3.msra.mxu1 %v927_v29  ;;  %v12329_v30 = vld [vmem:[%s17741_s1 + $0x38] sm:$0xff] }
 0x161   : > { %9105 = vmatpush1.msk.msra.mxu0 %vm1048_vm2, %v961_v31  ;;  %10394 = vmatmul.mubr.msk.f32.vlgmr.msra.gmra.mxu1 %vm975_vm13, %v11978_v32  ;;  %v12340_v31 = vld [vmem:[%s17741_s1 + $0x40] sm:$0xff] }
 0x162   : > { %1079 = vmatprep.subr.mxu0 %v960_v33  ;;  %v935_v35 = vpop.permute.xlu0 %934  ;;  %9155 = vmatprep.subr.msk.mxu1 %vm1048_vm2, %v11857_v13  ;;  %v12025_v46 = vpop.permute.xlu1 %1972  ;;  %v12362_v33 = vld [vmem:[%s17741_s1 + $0x50] sm:$0xff] }
 0x163   : > { %1080 = vmatpush1.msra.mxu0 %v959_v36  ;;  %9156 = vmatpush1.msk.msra.mxu1 %vm1048_vm2, %v11849_v11  ;;  %v12395_v36 = vld [vmem:[%s17741_s1 + $0x68] sm:$0xff] }
 0x164   : > { %10396 = vmatprep.mubr.msk.f32.mxu1 %vm975_vm13, %v11986_v34  ;;  %1551 = vmatprep.subr.mxu1 %v11845_v10  ;;  %v12182_v10 = vld [vmem:[%s17741_s1 + $0x160] sm:$0xff] }
 0x165   : > { %1552 = vmatpush1.msra.mxu1 %v11824_v2  ;;  %v12135_v2 = vld [vmem:[%s17741_s1 + $0x138] sm:$0xff] }
 0x166   : > { %v937_v38 = vpop.permute.xlu0 %936  ;;  %10397 = vmatmul.mubr.msk.f32.gmra.mxu1 %vm975_vm13, %v12000_v37  ;;  %1553 = vmatprep.subr.mxu1 %v11871_v16  ;;  %v12060_v56 = vpop.permute.xlu1 %1970 }
 0x167   : > { %v958_v39 = vsel %vm952_vm3, %v937_v38, %v939_v21  ;;  %v957_v40 = vsel %vm952_vm3, %v935_v35, %v937_v38  ;;  %1554 = vmatpush1.msra.mxu1 %v11865_v15  ;;  %10399 = vmatprep.mubr.msk.f32.mxu1 %vm975_vm13, %v12012_v41  ;;  %v12215_v15 = vld [vmem:[%s17741_s1 + $0x178] sm:$0xff]  ;;  %v12384_v35 = vld [vmem:[%s17741_s1 + $0x60] sm:$0xff] }
 0x168   : > { %1081 = vmatprep.subr.mxu0 %v958_v39  ;;  %1555 = vmatprep.subr.mxu1 %v11853_v12  ;;  %v12196_v12 = vld [vmem:[%s17741_s1 + $0x168] sm:$0xff]  ;;  %v12417_v38 = vld [vmem:[%s17741_s1 + $0x78] sm:$0xff]  ;;  %v12429_v39 = vld [vmem:[%s17741_s1 + $0x80] sm:$0xff] }
 0x169   : > { %1082 = vmatpush1.msra.mxu0 %v957_v40  ;;  %1556 = vmatpush1.msra.mxu1 %v11830_v5  ;;  %v12156_v5 = vld [vmem:[%s17741_s1 + $0x148] sm:$0xff]  ;;  %v1985_v40 = vsel %vm1976_vm4, %v12060_v56, %v12025_v46  ;;  %v877_v56 = vld [vmem:[%s17741_s1 + $0x98] sm:$0xff] }
 0x16a   : > { %v925_v45 = vpop.permute.xlu0 %924  ;;  %1083 = vmatprep.subr.mxu0 %v956_v43  ;;  %10400 = vmatmul.mubr.msk.f32.gmra.mxu1 %vm975_vm13, %v12018_v42 }
 0x16b   : > { %v954_v48 = vsel %vm952_vm3, %v925_v45, %v927_v29  ;;  %1557 = vmatprep.subr.mxu1 %v11877_v17  ;;  %1084 = vmatpush1.msra.mxu0 %v955_v47  ;;  %v12318_v29 = vld [vmem:[%s17741_s1 + $0x30] sm:$0xff] }
 0x16c   : > { %1558 = vmatpush1.msra.mxu1 %v11883_v18  ;;  %1085 = vmatprep.subr.mxu0 %v954_v48  ;;  %v12230_v18 = vld [vmem:[%s17741_s1] sm:$0xff] }
 0x16d   : > { %10402 = vmatprep.mubr.msk.f32.mxu1 %vm975_vm13, %v12034_v49 }
 0x16e   : > { %v923_v52 = vpop.permute.xlu0 %922  ;;  %10403 = vmatmul.mubr.msk.f32.gmra.mxu1 %vm975_vm13, %v12040_v50 }
 0x16f   : > { %v953_v54 = vsel %vm952_vm3, %v923_v52, %v925_v45  ;;  %10405 = vmatprep.mubr.msk.f32.mxu1 %vm975_vm13, %v12046_v51  ;;  %v875_v45 = vld [vmem:[%s17741_s1 + $0x88] sm:$0xff] }
 0x170   : > { %1086 = vmatpush1.msra.mxu0 %v953_v54 }
 0x171   : > { %9106 = vmatmul.mubr.msk.f32.vlgmr.msra.gmra.mxu0 %vm975_vm13, %v11835_v6  ;;  %10429 = vmatprep.subr.msk.mxu0 %vm1048_vm2, %v11792_v44 }
 0x172   : > { %10430 = vmatpush3.msk.msra.mxu0 %vm1048_vm2, %v11792_v44  ;;  %v12068_v57 = vpop.permute.xlu0 %1974  ;;  %1125 = vmatprep.mubr.f32.mxu0 %v17695_v0  ;;  %v12085_v44 = vld [vmem:[%s17741_s1 + $0x118] sm:$0xff] }
 0x173   : > { %10406 = vmatmul.mubr.msk.f32.gmra.mxu1 %vm975_vm13, %v12058_v55  ;;  %10431 = vmatprep.subr.mxu0 %v11806_v53  ;;  %v1986_v1 = vsel %vm1976_vm4, %v12025_v46, %v12068_v57 }
 0x174   : > { %10475 = vmatprep.subr.msk.mxu1 %vm1048_vm2, %v12068_v57  ;;  %10432 = vmatpush3.msra.mxu0 %v11806_v53  ;;  %v12100_v53 = vpop.permute.xlu1 %1968 }
 0x175   : > { %9107 = vmatmul.mubr.msk.f32.gmra.mxu0 %vm975_vm13, %v11978_v32  ;;  %10408 = vmatprep.mubr.msk.f32.mxu1 %vm975_vm13, %v12074_v58  ;;  %v12351_v32 = vld [vmem:[%s17741_s1 + $0x48] sm:$0xff] }
 0x176   : > { %10433 = vmatprep.subr.mxu0 %v11818_v62  ;;  %v12097_v60 = vpop.permute.xlu0 %1964  ;;  %1131 = vmatprep.mubr.f32.mxu0 %v17695_v0 }
 0x177   : > { %10409 = vmatmul.mubr.msk.f32.gmra.mxu1 %vm975_vm13, %v12085_v44  ;;  %10434 = vmatpush3.msra.mxu0 %v11818_v62  ;;  %v12120_v62 = vld [vmem:[%s17741_s1 + $0x130] sm:$0xff] }
 0x178   : > { %10435 = vmatprep.subr.mxu0 %v11841_v9  ;;  %10411 = vmatprep.mubr.msk.f32.mxu1 %vm975_vm13, %v12094_v59  ;;  %v12137_v3 = vpop.permute.xlu1 %1958 }
 0x179   : > { %10436 = vmatpush3.msra.mxu0 %v11841_v9  ;;  %v12177_v9 = vld [vmem:[%s17741_s1 + $0x158] sm:$0xff] }
 0x17a   : > { %9108 = vmatmul.mubr.msk.f32.gmra.mxu0 %vm975_vm13, %v11986_v34  ;;  %10437 = vmatprep.subr.mxu0 %v11859_v14  ;;  %v12125_v63 = vpop.permute.xlu0 %1962  ;;  %v12373_v34 = vld [vmem:[%s17741_s1 + $0x58] sm:$0xff] }
 0x17b   : > { %10412 = vmatmul.mubr.msk.f32.gmra.mxu1 %vm975_vm13, %v12111_v61  ;;  %10438 = vmatpush3.msra.mxu0 %v11859_v14  ;;  %v12203_v14 = vld [vmem:[%s17741_s1 + $0x170] sm:$0xff] }
 0x17c   : > { %9230 = vmatprep.subr.msk.mxu0 %vm1048_vm2, %v1986_v1  ;;  %1137 = vmatprep.mubr.f32.mxu0 %v17695_v0  ;;  %v12167_v8 = vpop.permute.xlu1 %1956 }
 0x17d   : > { %10414 = vmatprep.mubr.msk.f32.mxu1 %vm975_vm13, %v12120_v62 }
 0x17e   : > { %9109 = vmatmul.mubr.msk.f32.gmra.mxu0 %vm975_vm13, %v12000_v37  ;;  %v12158_v6 = vpop.permute.xlu0 %1952  ;;  %v12406_v37 = vld [vmem:[%s17741_s1 + $0x70] sm:$0xff] }
 0x17f   : > { %10415 = vmatmul.mubr.msk.f32.gmra.mxu1 %vm975_vm13, %v12135_v2  ;;  %1143 = vmatprep.mubr.f32.mxu0 %v17695_v0 }
 0x180   : > { %10417 = vmatprep.mubr.msk.f32.mxu1 %vm975_vm13, %v12144_v4  ;;  %v12198_v13 = vpop.permute.xlu1 %1960 }
 0x181   : > { %v1982_v46 = vsel %vm1976_vm4, %v12198_v13, %v12125_v63  ;;  %v1981_v47 = vsel %vm1976_vm4, %v12137_v3, %v12198_v13  ;;  %v12573_v13 = vld [vmem:[%s17741_s1 + $0x1a0] sm:$0xff] }
 0x182   : > { %9110 = vmatmul.mubr.msk.f32.gmra.mxu0 %vm975_vm13, %v12012_v41  ;;  %v12186_v11 = vpop.permute.xlu0 %1966 }
 0x183   : > { %10418 = vmatmul.mubr.msk.f32.gmra.mxu1 %vm975_vm13, %v12156_v5  ;;  %1149 = vmatprep.mubr.f32.mxu0 %v17695_v0  ;;  %v1983_v43 = vsel %vm1976_vm4, %v12097_v60, %v12186_v11  ;;  %v879_v60 = vld [vmem:[%s17741_s1 + $0xa8] sm:$0xff] }
 0x184   : > { %10420 = vmatprep.mubr.msk.f32.mxu1 %vm975_vm13, %v12163_v7  ;;  %v12221_v17 = vpop.permute.xlu1 %1948 }
 0x186   : > { %9111 = vmatmul.mubr.msk.f32.gmra.mxu0 %vm975_vm13, %v12018_v42  ;;  %v12217_v16 = vpop.permute.xlu0 %1954  ;;  %v1984_v42 = vsel %vm1976_vm4, %v12186_v11, %v12100_v53 }
 0x187   : > { %10421 = vmatmul.mubr.msk.f32.gmra.mxu1 %vm975_vm13, %v12177_v9  ;;  %1155 = vmatprep.mubr.f32.mxu0 %v17695_v0  ;;  %v1980_v48 = vsel %vm1976_vm4, %v12217_v16, %v12167_v8 }
 0x188   : > { %10423 = vmatprep.mubr.msk.f32.mxu1 %vm975_vm13, %v12182_v10  ;;  %v12247_v21 = vpop.permute.xlu1 %1946 }
 0x189   : > { %v1977_v54 = vsel %vm1976_vm4, %v12247_v21, %v12221_v17 }
 0x18a   : > { %9112 = vmatmul.mubr.msk.f32.gmra.mxu0 %vm975_vm13, %v12034_v49  ;;  %v12234_v19 = vpop.permute.xlu0 %1950 }
 0x18b   : > { %10424 = vmatmul.mubr.msk.f32.gmra.mxu1 %vm975_vm13, %v12196_v12  ;;  %1161 = vmatprep.mubr.f32.mxu0 %v17695_v0  ;;  %v1978_v52 = vsel %vm1976_vm4, %v12221_v17, %v12234_v19 }
 0x18c   : > { %10426 = vmatprep.mubr.msk.f32.mxu1 %vm975_vm13, %v12203_v14  ;;  %v12270_v24 = vpop.permute.xlu1 %2596 }
 0x18e   : > { %9113 = vmatmul.mubr.msk.f32.gmra.mxu0 %vm975_vm13, %v12040_v50  ;;  %v12263_v23 = vpop.permute.xlu0 %2594  ;;  %v1979_v50 = vsel %vm1976_vm4, %v12158_v6, %v12217_v16  ;;  %v12584_v16 = vld [vmem:[%s17741_s1 + $0x1a8] sm:$0xff] }
 0x18f   : > { %10427 = vmatmul.mubr.msk.f32.gmra.mxu1 %vm975_vm13, %v12215_v15  ;;  %1167 = vmatprep.mubr.f32.mxu0 %v17695_v0  ;;  %v2608_v25 = vsel %vm2598_vm5, %v12263_v23, %v12270_v24 }
 0x190   : > { %1591 = vmatprep.mubr.f32.mxu1 %v17695_v0 }
 0x192   : > { %9114 = vmatmul.mubr.msk.f32.gmra.mxu0 %vm975_vm13, %v12046_v51  ;;  %v12434_v41 = vpop.permute.xlu0 %2592  ;;  %v876_v51 = vld [vmem:[%s17741_s1 + $0x90] sm:$0xff] }
 0x193   : > { %9157 = vmatmul.mubr.msk.f32.vlgmr.msra.gmra.mxu1 %vm975_vm13, %v12230_v18  ;;  %1173 = vmatprep.mubr.f32.mxu0 %v17695_v0  ;;  %v2607_v6 = vsel %vm2598_vm5, %v12434_v41, %v12263_v23  ;;  %v12605_v23 = vld [vmem:[%s17741_s1 + $0x1b8] sm:$0xff]  ;;  %v12733_v41 = vld [vmem:[%s17741_s1 + $0x220] sm:$0xff] }
 0x194   : > { %10476 = vmatpush3.msk.msra.mxu1 %vm1048_vm2, %v12068_v57  ;;  %1597 = vmatprep.mubr.f32.mxu1 %v17695_v0 }
 0x195   : > { %10477 = vmatprep.subr.mxu1 %v12100_v53 }
 0x196   : > { %10478 = vmatpush3.msra.mxu1 %v12100_v53  ;;  %9115 = vmatmul.mubr.msk.f32.gmra.mxu0 %vm975_vm13, %v12058_v55  ;;  %v12465_v49 = vpop.permute.xlu0 %2590  ;;  %v2589_v55 = vpop.permute.xlu1 %2588 }
 0x197   : > { %10479 = vmatprep.subr.mxu1 %v12125_v63  ;;  %9158 = vmatmul.mubr.msk.f32.gmra.mxu1 %vm975_vm13, %v12245_v20 }
 0x198   : > { %10480 = vmatpush3.msra.mxu1 %v12125_v63  ;;  %1179 = vmatprep.mubr.f32.mxu0 %v17695_v0  ;;  %v881_v63 = vld [vmem:[%s17741_s1 + $0xb8] sm:$0xff] }
 0x199   : > { %10481 = vmatprep.subr.mxu1 %v12167_v8  ;;  %1603 = vmatprep.mubr.f32.mxu1 %v17695_v0 }
 0x19a   : > { %10482 = vmatpush3.msra.mxu1 %v12167_v8  ;;  %9116 = vmatmul.mubr.msk.f32.gmra.mxu0 %vm975_vm13, %v12074_v58  ;;  %v2583_v57 = vpop.permute.xlu0 %2582  ;;  %v878_v58 = vld [vmem:[%s17741_s1 + $0xa0] sm:$0xff]  ;;  %v2606_v8 = vsel %vm2598_vm5, %v2589_v55, %v12465_v49 }
 0x19b   : > { %10483 = vmatprep.subr.mxu1 %v12234_v19  ;;  %9159 = vmatmul.mubr.msk.f32.gmra.mxu1 %vm975_vm13, %v12261_v22 }
 0x19c   : > { %10484 = vmatpush3.msra.mxu1 %v12234_v19  ;;  %1185 = vmatprep.mubr.f32.mxu0 %v17695_v0 }
 0x19d   : > { %9305 = vmatprep.subr.msk.mxu1 %vm1048_vm2, %v2608_v25  ;;  %1609 = vmatprep.mubr.f32.mxu1 %v17695_v0  ;;  %v12614_v25 = vld [vmem:[%s17741_s1 + $0x1c0] sm:$0xff] }
 0x19e   : > { %9117 = vmatmul.mubr.msk.f32.gmra.mxu0 %vm975_vm13, %v12085_v44  ;;  %v2587_v44 = vpop.permute.xlu1 %2586 }
 0x19f   : > { %9160 = vmatmul.mubr.msk.f32.gmra.mxu1 %vm975_vm13, %v12283_v26  ;;  %1191 = vmatprep.mubr.f32.mxu0 %v17695_v0 }
 0x1a0   : > { %1615 = vmatprep.mubr.f32.mxu1 %v17695_v0 }
 0x1a2   : > { %9118 = vmatmul.mubr.msk.f32.gmra.mxu0 %vm975_vm13, %v12094_v59  ;;  %v2581_v59 = vpop.permute.xlu0 %2580  ;;  %v12513_v53 = vpop.permute.xlu1 %2584 }
 0x1a3   : > { %9161 = vmatmul.mubr.msk.f32.gmra.mxu1 %vm975_vm13, %v12296_v27  ;;  %1197 = vmatprep.mubr.f32.mxu0 %v17695_v0 }
 0x1a4   : > { %1621 = vmatprep.mubr.f32.mxu1 %v17695_v0 }
 0x1a6   : > { %9119 = vmatmul.mubr.msk.f32.gmra.mxu0 %vm975_vm13, %v12111_v61  ;;  %v880_v61 = vld [vmem:[%s17741_s1 + $0xb0] sm:$0xff]  ;;  %v2577_v1 = vpop.permute.xlu1 %2576 }
 0x1a7   : > { %9162 = vmatmul.mubr.msk.f32.gmra.mxu1 %vm975_vm13, %v12307_v28  ;;  %1203 = vmatprep.mubr.f32.mxu0 %v17695_v0 }
 0x1a8   : > { %1627 = vmatprep.mubr.f32.mxu1 %v17695_v0 }
 0x1aa   : > { %9120 = vmatmul.mubr.msk.f32.gmra.mxu0 %vm975_vm13, %v12120_v62  ;;  %v12522_v62 = vpop.permute.xlu0 %2578 }
 0x1ab   : > { %9163 = vmatmul.mubr.msk.f32.gmra.mxu1 %vm975_vm13, %v12318_v29  ;;  %1209 = vmatprep.mubr.f32.mxu0 %v17695_v0 }
 0x1ac   : > { %1633 = vmatprep.mubr.f32.mxu1 %v17695_v0 }
 0x1ae   : > { %9121 = vmatmul.mubr.msk.f32.gmra.mxu0 %vm975_vm13, %v12135_v2  ;;  %v9206_v2 = vld [vmem:[%s17741_s1 + $0x180] sm:$0xff]  ;;  %v2571_v3 = vpop.permute.xlu0 %2570 }
 0x1af   : > { %9164 = vmatmul.mubr.msk.f32.gmra.mxu1 %vm975_vm13, %v12329_v30  ;;  %1215 = vmatprep.mubr.f32.mxu0 %v17695_v0 }
 0x1b0   : > { %1639 = vmatprep.mubr.f32.mxu1 %v17695_v0 }
 0x1b2   : > { %9122 = vmatmul.mubr.msk.f32.gmra.mxu0 %vm975_vm13, %v12144_v4  ;;  %v9207_v4 = vld [vmem:[%s17741_s1 + $0x188] sm:$0xff]  ;;  %v2569_v11 = vpop.permute.xlu0 %2568 }
 0x1b3   : > { %9165 = vmatmul.mubr.msk.f32.gmra.mxu1 %vm975_vm13, %v12340_v31  ;;  %1221 = vmatprep.mubr.f32.mxu0 %v17695_v0  ;;  %v2599_v21 = vsel %vm2598_vm5, %v2569_v11, %v2571_v3  ;;  %v3799_v11 = vld [vmem:[%s17745_s2 + $0x60] sm:$0xff] }
 0x1b4   : > { %1645 = vmatprep.mubr.f32.mxu1 %v17695_v0 }
 0x1b6   : > { %9123 = vmatmul.mubr.msk.f32.gmra.mxu0 %vm975_vm13, %v12156_v5  ;;  %v12548_v5 = vld [vmem:[%s17741_s1 + $0x190] sm:$0xff] }
 0x1b7   : > { %9166 = vmatmul.mubr.msk.f32.gmra.mxu1 %vm975_vm13, %v12351_v32  ;;  %1227 = vmatprep.mubr.f32.mxu0 %v17695_v0 }
 0x1b8   : > { %1651 = vmatprep.mubr.f32.mxu1 %v17695_v0 }
 0x1ba   : > { %9124 = vmatmul.mubr.msk.f32.gmra.mxu0 %vm975_vm13, %v12163_v7  ;;  %v2575_v7 = vpop.permute.xlu1 %2574 }
 0x1bb   : > { %9167 = vmatmul.mubr.msk.f32.gmra.mxu1 %vm975_vm13, %v12362_v33  ;;  %1233 = vmatprep.mubr.f32.mxu0 %v17695_v0  ;;  %v2601_v17 = vsel %vm2598_vm5, %v2575_v7, %v2577_v1  ;;  %v3800_v7 = vld [vmem:[%s17745_s2 + $0x68] sm:$0xff] }
 0x1bc   : > { %1657 = vmatprep.mubr.f32.mxu1 %v17695_v0 }
 0x1be   : > { %9125 = vmatmul.mubr.msk.f32.gmra.mxu0 %vm975_vm13, %v12177_v9  ;;  %v12564_v9 = vld [vmem:[%s17741_s1 + $0x198] sm:$0xff] }
 0x1bf   : > { %9168 = vmatmul.mubr.msk.f32.gmra.mxu1 %vm975_vm13, %v12373_v34  ;;  %1239 = vmatprep.mubr.f32.mxu0 %v17695_v0 }
 0x1c0   : > { %1663 = vmatprep.mubr.f32.mxu1 %v17695_v0 }
 0x1c2   : > { %9126 = vmatmul.mubr.msk.f32.gmra.mxu0 %vm975_vm13, %v12182_v10  ;;  %v2605_v10 = vsel %vm2598_vm5, %v2587_v44, %v2589_v55  ;;  %v12820_v44 = vld [vmem:[%s17741_s1 + $0x250] sm:$0xff] }
 0x1c3   : > { %9169 = vmatmul.mubr.msk.f32.gmra.mxu1 %vm975_vm13, %v12384_v35  ;;  %1245 = vmatprep.mubr.f32.mxu0 %v17695_v0 }
 0x1c4   : > { %1669 = vmatprep.mubr.f32.mxu1 %v17695_v0 }
 0x1c6   : > { %9127 = vmatmul.mubr.msk.f32.gmra.mxu0 %vm975_vm13, %v12196_v12  ;;  %v2604_v12 = vsel %vm2598_vm5, %v2583_v57, %v12513_v53 }
 0x1c7   : > { %9170 = vmatmul.mubr.msk.f32.gmra.mxu1 %vm975_vm13, %v12395_v36  ;;  %1251 = vmatprep.mubr.f32.mxu0 %v17695_v0 }
 0x1c8   : > { %1675 = vmatprep.mubr.f32.mxu1 %v17695_v0 }
 0x1ca   : > { %9128 = vmatmul.mubr.msk.f32.gmra.mxu0 %vm975_vm13, %v12203_v14  ;;  %v2603_v14 = vsel %vm2598_vm5, %v2581_v59, %v2583_v57 }
 0x1cb   : > { %9171 = vmatmul.mubr.msk.f32.gmra.mxu1 %vm975_vm13, %v12406_v37  ;;  %1257 = vmatprep.mubr.f32.mxu0 %v17695_v0 }
 0x1cc   : > { %1681 = vmatprep.mubr.f32.mxu1 %v17695_v0 }
 0x1ce   : > { %9129 = vmatmul.mubr.msk.f32.gmra.mxu0 %vm975_vm13, %v12215_v15  ;;  %v2602_v15 = vsel %vm2598_vm5, %v2577_v1, %v12522_v62  ;;  %v3801_v1 = vld [vmem:[%s17745_s2 + $0x70] sm:$0xff] }
 0x1cf   : > { %9172 = vmatmul.mubr.msk.f32.gmra.mxu1 %vm975_vm13, %v12417_v38  ;;  %10439 = vmatprep.mubr.msk.f32.mxu0 %vm975_vm13, %v12230_v18  ;;  %v2573_v18 = vpop.permute.xlu1 %2572 }
 0x1d0   : > { %1687 = vmatprep.mubr.f32.mxu1 %v17695_v0  ;;  %v2600_v19 = vsel %vm2598_vm5, %v2571_v3, %v2573_v18  ;;  %v12860_v3 = vld [vmem:[%s17741_s1 + $0x260] sm:$0xff] }
 0x1d2   : > { %10440 = vmatmul.mubr.msk.f32.vlgmr.msra.gmra.mxu0 %vm975_vm13, %v12245_v20  ;;  %v12594_v20 = vld [vmem:[%s17741_s1 + $0x1b0] sm:$0xff] }
 0x1d3   : > { %9231 = vmatpush1.msk.msra.mxu0 %vm1048_vm2, %v1985_v40  ;;  %9173 = vmatmul.mubr.msk.f32.gmra.mxu1 %vm975_vm13, %v12429_v39  ;;  %v12728_v40 = vld [vmem:[%s17741_s1 + $0x218] sm:$0xff] }
 0x1d4   : > { %2101 = vmatprep.subr.mxu0 %v1984_v42  ;;  %10442 = vmatprep.mubr.msk.f32.mxu0 %vm975_vm13, %v12261_v22  ;;  %v12599_v22 = vpop.permute.xlu0 %3218 }
 0x1d5   : > { %2102 = vmatpush1.msra.mxu0 %v1983_v43  ;;  %1693 = vmatprep.mubr.f32.mxu1 %v17695_v0 }
 0x1d6   : > { %2103 = vmatprep.subr.mxu0 %v1982_v46  ;;  %10443 = vmatmul.mubr.msk.f32.gmra.mxu0 %vm975_vm13, %v12283_v26  ;;  %v12625_v26 = vld [vmem:[%s17741_s1 + $0x1c8] sm:$0xff]  ;;  %v12754_v46 = vld [vmem:[%s17741_s1 + $0x230] sm:$0xff] }
 0x1d7   : > { %2104 = vmatpush1.msra.mxu0 %v1981_v47  ;;  %9174 = vmatmul.mubr.msk.f32.gmra.mxu1 %vm975_vm13, %v875_v45 }
 0x1d8   : > { %2105 = vmatprep.subr.mxu0 %v1980_v48  ;;  %10445 = vmatprep.mubr.msk.f32.mxu0 %vm975_vm13, %v12296_v27  ;;  %v12631_v27 = vld [vmem:[%s17741_s1 + $0x1d0] sm:$0xff]  ;;  %v12768_v48 = vld [vmem:[%s17741_s1 + $0x238] sm:$0xff] }
 0x1d9   : > { %2106 = vmatpush1.msra.mxu0 %v1979_v50  ;;  %1699 = vmatprep.mubr.f32.mxu1 %v17695_v0  ;;  %v12781_v50 = vld [vmem:[%s17741_s1 + $0x240] sm:$0xff] }
 0x1da   : > { %2107 = vmatprep.subr.mxu0 %v1978_v52  ;;  %10446 = vmatmul.mubr.msk.f32.gmra.mxu0 %vm975_vm13, %v12307_v28  ;;  %v12642_v28 = vld [vmem:[%s17741_s1 + $0x1d8] sm:$0xff] }
 0x1db   : > { %2108 = vmatpush1.msra.mxu0 %v1977_v54  ;;  %9175 = vmatmul.mubr.msk.f32.gmra.mxu1 %vm975_vm13, %v876_v51 }
 0x1dc   : > { %10521 = vmatprep.subr.msk.mxu0 %vm1048_vm2, %v12270_v24  ;;  %10448 = vmatprep.mubr.msk.f32.mxu0 %vm975_vm13, %v12318_v29  ;;  %v12662_v29 = vld [vmem:[%s17741_s1 + $0x1e8] sm:$0xff] }
 0x1dd   : > { %1705 = vmatprep.mubr.f32.mxu1 %v17695_v0 }
 0x1de   : > { %10449 = vmatmul.mubr.msk.f32.gmra.mxu0 %vm975_vm13, %v12329_v30  ;;  %v12667_v30 = vpop.permute.xlu1 %3216 }
 0x1df   : > { %9176 = vmatmul.mubr.msk.f32.gmra.mxu1 %vm975_vm13, %v877_v56  ;;  %10451 = vmatprep.mubr.msk.f32.mxu0 %vm975_vm13, %v12340_v31  ;;  %v12674_v31 = vld [vmem:[%s17741_s1 + $0x1f0] sm:$0xff] }
 0x1e0   : > { %1711 = vmatprep.mubr.f32.mxu1 %v17695_v0 }
 0x1e2   : > { %10452 = vmatmul.mubr.msk.f32.gmra.mxu0 %vm975_vm13, %v12351_v32  ;;  %v3230_v32 = vsel %vm3220_vm6, %v12667_v30, %v12599_v22 }
 0x1e3   : > { %9177 = vmatmul.mubr.msk.f32.gmra.mxu1 %vm975_vm13, %v878_v58  ;;  %10454 = vmatprep.mubr.msk.f32.mxu0 %vm975_vm13, %v12362_v33  ;;  %v12681_v33 = vpop.permute.xlu0 %3210 }
 0x1e4   : > { %1717 = vmatprep.mubr.f32.mxu1 %v17695_v0 }
 0x1e6   : > { %10455 = vmatmul.mubr.msk.f32.gmra.mxu0 %vm975_vm13, %v12373_v34  ;;  %v12688_v34 = vld [vmem:[%s17741_s1 + $0x1f8] sm:$0xff] }
 0x1e7   : > { %9178 = vmatmul.mubr.msk.f32.gmra.mxu1 %vm975_vm13, %v879_v60  ;;  %10457 = vmatprep.mubr.msk.f32.mxu0 %vm975_vm13, %v12384_v35  ;;  %v12695_v35 = vld [vmem:[%s17741_s1 + $0x200] sm:$0xff] }
 0x1e8   : > { %1723 = vmatprep.mubr.f32.mxu1 %v17695_v0 }
 0x1ea   : > { %10458 = vmatmul.mubr.msk.f32.gmra.mxu0 %vm975_vm13, %v12395_v36  ;;  %v12702_v36 = vpop.permute.xlu1 %3214 }
 0x1eb   : > { %9179 = vmatmul.mubr.msk.f32.gmra.mxu1 %vm975_vm13, %v880_v61  ;;  %10460 = vmatprep.mubr.msk.f32.mxu0 %vm975_vm13, %v12406_v37  ;;  %v12709_v37 = vld [vmem:[%s17741_s1 + $0x208] sm:$0xff] }
 0x1ec   : > { %1729 = vmatprep.mubr.f32.mxu1 %v17695_v0 }
 0x1ee   : > { %10461 = vmatmul.mubr.msk.f32.gmra.mxu0 %vm975_vm13, %v12417_v38  ;;  %v12714_v38 = vld [vmem:[%s17741_s1 + $0x210] sm:$0xff]  ;;  %v12735_v42 = vpop.permute.xlu1 %3212 }
 0x1ef   : > { %9180 = vmatmul.mubr.msk.f32.gmra.mxu1 %vm975_vm13, %v881_v63  ;;  %10463 = vmatprep.mubr.msk.f32.mxu0 %vm975_vm13, %v12429_v39  ;;  %v12716_v39 = vpop.permute.xlu0 %3208 }
 0x1f0   : > { %10485 = vmatprep.mubr.msk.f32.mxu1 %vm975_vm13, %v9206_v2 }
 0x1f2   : > { %10464 = vmatmul.mubr.msk.f32.gmra.mxu0 %vm975_vm13, %v875_v45  ;;  %v12749_v45 = vld [vmem:[%s17741_s1 + $0x228] sm:$0xff]  ;;  %v12761_v47 = vpop.permute.xlu1 %3204 }
 0x1f3   : > { %10486 = vmatmul.mubr.msk.f32.vlgmr.msra.gmra.mxu1 %vm975_vm13, %v9207_v4  ;;  %10466 = vmatprep.mubr.msk.f32.mxu0 %vm975_vm13, %v876_v51  ;;  %v12742_v43 = vpop.permute.xlu0 %3206 }
 0x1f4   : > { %9306 = vmatpush1.msk.msra.mxu1 %vm1048_vm2, %v2607_v6  ;;  %10488 = vmatprep.mubr.msk.f32.mxu1 %vm975_vm13, %v12548_v5 }
 0x1f5   : > { %2723 = vmatprep.subr.mxu1 %v2606_v8 }
 0x1f6   : > { %2724 = vmatpush1.msra.mxu1 %v2605_v10  ;;  %10467 = vmatmul.mubr.msk.f32.gmra.mxu0 %vm975_vm13, %v877_v56  ;;  %v12783_v51 = vpop.permute.xlu1 %3202  ;;  %v12802_v56 = vld [vmem:[%s17741_s1 + $0x248] sm:$0xff] }
 0x1f7   : > { %2725 = vmatprep.subr.mxu1 %v2604_v12  ;;  %10489 = vmatmul.mubr.msk.f32.gmra.mxu1 %vm975_vm13, %v12564_v9  ;;  %v12885_v10 = vld [vmem:[%s17741_s1 + $0x268] sm:$0xff] }
 0x1f8   : > { %2726 = vmatpush1.msra.mxu1 %v2603_v14  ;;  %10469 = vmatprep.mubr.msk.f32.mxu0 %vm975_vm13, %v878_v58  ;;  %v3798_v14 = vld [vmem:[%s17745_s2 + $0x58] sm:$0xff] }
 0x1f9   : > { %2727 = vmatprep.subr.mxu1 %v2602_v15  ;;  %10491 = vmatprep.mubr.msk.f32.mxu1 %vm975_vm13, %v12573_v13 }
 0x1fa   : > { %2728 = vmatpush1.msra.mxu1 %v2601_v17  ;;  %10470 = vmatmul.mubr.msk.f32.gmra.mxu0 %vm975_vm13, %v879_v60  ;;  %v12813_v58 = vpop.permute.xlu1 %3200  ;;  %v12910_v17 = vld [vmem:[%s17741_s1 + $0x270] sm:$0xff] }
 0x1fb   : > { %2729 = vmatprep.subr.mxu1 %v2600_v19  ;;  %10492 = vmatmul.mubr.msk.f32.gmra.mxu1 %vm975_vm13, %v12584_v16 }
 0x1fc   : > { %2730 = vmatpush1.msra.mxu1 %v2599_v21  ;;  %10472 = vmatprep.mubr.msk.f32.mxu0 %vm975_vm13, %v880_v61  ;;  %v12841_v61 = vld [vmem:[%s17741_s1 + $0x258] sm:$0xff]  ;;  %v3796_v21 = vld [vmem:[%s17745_s2 + $0x48] sm:$0xff] }
 0x1fd   : > { %10567 = vmatprep.subr.msk.mxu1 %vm1048_vm2, %v12599_v22  ;;  %10494 = vmatprep.mubr.msk.f32.mxu1 %vm975_vm13, %v12594_v20 }
 0x1fe   : > { %10473 = vmatmul.mubr.msk.f32.gmra.mxu0 %vm975_vm13, %v881_v63  ;;  %v11530_v63 = vmov 0  }
 0x1ff   : > { %10495 = vmatmul.mubr.msk.f32.gmra.mxu1 %vm975_vm13, %v12605_v23  ;;  %2141 = vmatprep.mubr.f32.mxu0 %v17695_v0 }
 0x200   : > { %10497 = vmatprep.mubr.msk.f32.mxu1 %vm975_vm13, %v12614_v25  ;;  %11455 = vset.pattern.permute.xlu1 %v11530_v63 }
 0x201   : > { %3883 = vperm.xlu1 %11455, %v3801_v1   ;;  %11454 = vset.pattern.permute.xlu0 %v11530_v63 }
 0x202   : > { %9232 = vmatmul.mubr.msk.f32.vlgmr.msra.gmra.mxu0 %vm975_vm13, %v9206_v2 }
 0x203   : > { %10522 = vmatpush3.msk.msra.mxu0 %vm1048_vm2, %v12270_v24  ;;  %10498 = vmatmul.mubr.msk.f32.gmra.mxu1 %vm975_vm13, %v12625_v26  ;;  %v12652_v24 = vld [vmem:[%s17741_s1 + $0x1e0] sm:$0xff] }
 0x204   : > { %10523 = vmatprep.subr.mxu0 %v12465_v49  ;;  %2147 = vmatprep.mubr.f32.mxu0 %v17695_v0 }
 0x205   : > { %10524 = vmatpush3.msra.mxu0 %v12465_v49  ;;  %10500 = vmatprep.mubr.msk.f32.mxu1 %vm975_vm13, %v12631_v27  ;;  %v12770_v49 = vpop.permute.xlu0 %3198 }
 0x206   : > { %10525 = vmatprep.subr.mxu0 %v12513_v53  ;;  %9233 = vmatmul.mubr.msk.f32.gmra.mxu0 %vm975_vm13, %v9207_v4  ;;  %v3802_v4 = vld [vmem:[%s17745_s2 + $0x78] sm:$0xff] }
 0x207   : > { %10526 = vmatpush3.msra.mxu0 %v12513_v53  ;;  %10501 = vmatmul.mubr.msk.f32.gmra.mxu1 %vm975_vm13, %v12642_v28 }
 0x208   : > { %10527 = vmatprep.subr.mxu0 %v12522_v62  ;;  %2153 = vmatprep.mubr.f32.mxu0 %v17695_v0 }
 0x209   : > { %10528 = vmatpush3.msra.mxu0 %v12522_v62  ;;  %10503 = vmatprep.mubr.msk.f32.mxu1 %vm975_vm13, %v12652_v24  ;;  %v12792_v54 = vpop.permute.xlu0 %3196 }
 0x20a   : > { %10529 = vmatprep.subr.mxu0 %v2573_v18  ;;  %9234 = vmatmul.mubr.msk.f32.gmra.mxu0 %vm975_vm13, %v12548_v5 }
 0x20b   : > { %10530 = vmatpush3.msra.mxu0 %v2573_v18  ;;  %10504 = vmatmul.mubr.msk.f32.gmra.mxu1 %vm975_vm13, %v12662_v29  ;;  %v3797_v18 = vld [vmem:[%s17745_s2 + $0x50] sm:$0xff] }
 0x20c   : > { %9380 = vmatprep.subr.msk.mxu0 %vm1048_vm2, %v3230_v32  ;;  %2159 = vmatprep.mubr.f32.mxu0 %v17695_v0  ;;  %v12960_v32 = vld [vmem:[%s17741_s1 + $0x280] sm:$0xff] }
 0x20d   : > { %10506 = vmatprep.mubr.msk.f32.mxu1 %vm975_vm13, %v12674_v31  ;;  %v12826_v60 = vpop.permute.xlu0 %3194  ;;  %3888 = vperm.xlu0 %11454, %v3802_v4   ;;  %v3792_v4 = vld [vmem:[%s17745_s2 + $0x28] sm:$0xff] }
 0x20e   : > { %9235 = vmatmul.mubr.msk.f32.gmra.mxu0 %vm975_vm13, %v12564_v9  ;;  %3878 = vperm.xlu1 %11455, %v3800_v7  }
 0x20f   : > { %10507 = vmatmul.mubr.msk.f32.gmra.mxu1 %vm975_vm13, %v12688_v34  ;;  %2165 = vmatprep.mubr.f32.mxu0 %v17695_v0 }
 0x210   : > { %10509 = vmatprep.mubr.msk.f32.mxu1 %vm975_vm13, %v12695_v35 }
 0x211   : > { %3873 = vperm.xlu0 %11454, %v3799_v11  }
 0x212   : > { %9236 = vmatmul.mubr.msk.f32.gmra.mxu0 %vm975_vm13, %v12573_v13  ;;  %3868 = vperm.xlu1 %11455, %v3798_v14   ;;  %v3791_v14 = vld [vmem:[%s17745_s2 + $0x20] sm:$0xff] }
 0x213   : > { %10510 = vmatmul.mubr.msk.f32.gmra.mxu1 %vm975_vm13, %v12709_v37  ;;  %2171 = vmatprep.mubr.f32.mxu0 %v17695_v0 }
 0x214   : > { %10512 = vmatprep.mubr.msk.f32.mxu1 %vm975_vm13, %v12714_v38 }
 0x215   : > { %3863 = vperm.xlu0 %11454, %v3797_v18  }
 0x216   : > { %9237 = vmatmul.mubr.msk.f32.gmra.mxu0 %vm975_vm13, %v12584_v16  ;;  %3858 = vperm.xlu1 %11455, %v3796_v21  }
 0x217   : > { %10513 = vmatmul.mubr.msk.f32.gmra.mxu1 %vm975_vm13, %v12728_v40  ;;  %2177 = vmatprep.mubr.f32.mxu0 %v17695_v0 }
 0x218   : > { %10515 = vmatprep.mubr.msk.f32.mxu1 %vm975_vm13, %v12733_v41 }
 0x21a   : > { %9238 = vmatmul.mubr.msk.f32.gmra.mxu0 %vm975_vm13, %v12594_v20 }
 0x21b   : > { %10516 = vmatmul.mubr.msk.f32.gmra.mxu1 %vm975_vm13, %v12749_v45  ;;  %2183 = vmatprep.mubr.f32.mxu0 %v17695_v0 }
 0x21c   : > { %10518 = vmatprep.mubr.msk.f32.mxu1 %vm975_vm13, %v12754_v46 }
 0x21e   : > { %9239 = vmatmul.mubr.msk.f32.gmra.mxu0 %vm975_vm13, %v12605_v23 }
 0x21f   : > { %10519 = vmatmul.mubr.msk.f32.gmra.mxu1 %vm975_vm13, %v12768_v48  ;;  %2189 = vmatprep.mubr.f32.mxu0 %v17695_v0 }
 0x220   : > { %2763 = vmatprep.mubr.f32.mxu1 %v17695_v0 }
 0x221   : > { %v12787_v52 = vpop.f32.mrf.mxu1 }
 0x222   : > { %9240 = vmatmul.mubr.msk.f32.gmra.mxu0 %vm975_vm13, %v12614_v25  ;;  %v12935_v25 = vld [vmem:[%s17741_s1 + $0x278] sm:$0xff] }
 0x223   : > { %9307 = vmatmul.mubr.msk.f32.vlgmr.msra.gmra.mxu1 %vm975_vm13, %v12781_v50  ;;  %2195 = vmatprep.mubr.f32.mxu0 %v17695_v0  ;;  %v12796_v55 = vpop.f32.mrf.mxu1 }
 0x224   : > { %10568 = vmatpush3.msk.msra.mxu1 %vm1048_vm2, %v12599_v22  ;;  %17742 = vst [vmem:[#allocation8_spill] sm:$0xff] %v12796_v55  ;;  %2769 = vmatprep.mubr.f32.mxu1 %v17695_v0 }
 0x225   : > { %10569 = vmatprep.subr.mxu1 %v12735_v42 }
 0x226   : > { %10570 = vmatpush3.msra.mxu1 %v12735_v42  ;;  %9241 = vmatmul.mubr.msk.f32.gmra.mxu0 %vm975_vm13, %v12625_v26  ;;  %v12809_v57 = vpop.f32.mrf.mxu1  ;;  %v3795_v26 = vld [vmem:[%s17745_s2 + $0x40] sm:$0xff] }
 0x227   : > { %10571 = vmatprep.subr.mxu1 %v12742_v43  ;;  %9308 = vmatmul.mubr.msk.f32.gmra.mxu1 %vm975_vm13, %v12802_v56 }
 0x228   : > { %10572 = vmatpush3.msra.mxu1 %v12742_v43  ;;  %2201 = vmatprep.mubr.f32.mxu0 %v17695_v0  ;;  %v12823_v59 = vpop.f32.mrf.mxu1 }
 0x229   : > { %10573 = vmatprep.subr.mxu1 %v12813_v58  ;;  %17743 = vst [vmem:[#allocation9_spill] sm:$0xff] %v12823_v59  ;;  %2775 = vmatprep.mubr.f32.mxu1 %v17695_v0 }
 0x22a   : > { %10574 = vmatpush3.msra.mxu1 %v12813_v58  ;;  %9242 = vmatmul.mubr.msk.f32.gmra.mxu0 %vm975_vm13, %v12631_v27  ;;  %v12832_v53 = vpop.f32.mrf.mxu1 }
 0x22b   : > { %10575 = vmatprep.subr.mxu1 %v12826_v60  ;;  %9309 = vmatmul.mubr.msk.f32.gmra.mxu1 %vm975_vm13, %v12820_v44 }
 0x22c   : > { %10576 = vmatpush3.msra.mxu1 %v12826_v60  ;;  %2207 = vmatprep.mubr.f32.mxu0 %v17695_v0  ;;  %v12843_v62 = vpop.f32.mrf.mxu1 }
 0x22d   : > { %17744 = vst [vmem:[#allocation10_spill] sm:$0xff] %v12843_v62  ;;  %2781 = vmatprep.mubr.f32.mxu1 %v17695_v0  ;;  %3853 = vperm.xlu0 %11454, %v3795_v26   ;;  %v3790_v26 = vld [vmem:[%s17745_s2 + $0x18] sm:$0xff] }
 0x22e   : > { %9243 = vmatmul.mubr.msk.f32.gmra.mxu0 %vm975_vm13, %v12642_v28  ;;  %v12851_v2 = vpop.f32.mrf.mxu1 }
 0x22f   : > { %9310 = vmatmul.mubr.msk.f32.gmra.mxu1 %vm975_vm13, %v12841_v61  ;;  %2213 = vmatprep.mubr.f32.mxu0 %v17695_v0 }
 0x230   : > { %2787 = vmatprep.mubr.f32.mxu1 %v17695_v0  ;;  %v12865_v5 = vpop.f32.mrf.mxu1 }
 0x231   : > { %17746 = vst [vmem:[#allocation11_spill] sm:$0xff] %v12865_v5  ;;  %v12867_v6 = vpop.f32.mrf.mxu0 }
 0x232   : > { %9244 = vmatmul.mubr.msk.f32.gmra.mxu0 %vm975_vm13, %v12652_v24  ;;  %v3794_v24 = vld [vmem:[%s17745_s2 + $0x38] sm:$0xff] }
 0x233   : > { %v12874_v8 = vpop.f32.mrf.mxu1  ;;  %9311 = vmatmul.mubr.msk.f32.gmra.mxu1 %vm975_vm13, %v12860_v3  ;;  %v12878_v9 = vpop.f32.mrf.mxu0  ;;  %2219 = vmatprep.mubr.f32.mxu0 %v17695_v0 }
 0x234   : > { %2793 = vmatprep.mubr.f32.mxu1 %v17695_v0  ;;  %3848 = vperm.xlu1 %11455, %v3794_v24  }
 0x235   : > { %v12890_v12 = vpop.f32.mrf.mxu1  ;;  %v12892_v13 = vpop.f32.mrf.mxu0 }
 0x236   : > { %17747 = vst [vmem:[#allocation12_spill] sm:$0xff] %v12890_v12  ;;  %9245 = vmatmul.mubr.msk.f32.gmra.mxu0 %vm975_vm13, %v12662_v29 }
 0x237   : > { %v12899_v15 = vpop.f32.mrf.mxu1  ;;  %9312 = vmatmul.mubr.msk.f32.gmra.mxu1 %vm975_vm13, %v12885_v10  ;;  %v12903_v16 = vpop.f32.mrf.mxu0  ;;  %2225 = vmatprep.mubr.f32.mxu0 %v17695_v0 }
 0x238   : > { %2799 = vmatprep.mubr.f32.mxu1 %v17695_v0  ;;  %3838 = vperm.xlu1 %11455, %v3792_v4   ;;  %v3789_v4 = vld [vmem:[%s17745_s2 + $0x10] sm:$0xff] }
 0x239   : > { %v12915_v19 = vpop.f32.mrf.mxu1 }
 0x23a   : > { %17748 = vst [vmem:[#allocation13_spill] sm:$0xff] %v12915_v19  ;;  %v12917_v20 = vpop.f32.mrf.mxu0  ;;  %9246 = vmatmul.mubr.msk.f32.gmra.mxu0 %vm975_vm13, %v12674_v31 }
 0x23b   : > { %v12924_v22 = vpop.f32.mrf.mxu1  ;;  %9313 = vmatmul.mubr.msk.f32.gmra.mxu1 %vm975_vm13, %v12910_v17  ;;  %2231 = vmatprep.mubr.f32.mxu0 %v17695_v0 }
 0x23c   : > { %17749 = vst [vmem:[#allocation14_spill] sm:$0xff] %v12924_v22  ;;  %v12929_v23 = vpop.f32.mrf.mxu0  ;;  %2805 = vmatprep.mubr.f32.mxu1 %v17695_v0  ;;  %3828 = vperm.xlu1 %11455, %v3790_v26   ;;  %v17758_v26 = vmov 0.0  }
 0x23d   : > { %v12940_v27 = vpop.f32.mrf.mxu1 }
 0x23e   : > { %17750 = vst [vmem:[#allocation15_spill] sm:$0xff] %v12940_v27  ;;  %v12942_v28 = vpop.f32.mrf.mxu0  ;;  %9247 = vmatmul.mubr.msk.f32.gmra.mxu0 %vm975_vm13, %v12688_v34  ;;  %v3793_v34 = vld [vmem:[%s17745_s2 + $0x30] sm:$0xff] }
 0x23f   : > { %v12949_v29 = vpop.f32.mrf.mxu1  ;;  %9314 = vmatmul.mubr.msk.f32.gmra.mxu1 %vm975_vm13, %v12935_v25  ;;  %2237 = vmatprep.mubr.f32.mxu0 %v17695_v0 }
 0x240   : > { %17751 = vst [vmem:[#allocation16_spill] sm:$0xff] %v12949_v29  ;;  %v12954_v31 = vpop.f32.mrf.mxu0  ;;  %2811 = vmatprep.mubr.f32.mxu1 %v17695_v0  ;;  %3843 = vperm.xlu0 %11454, %v3793_v34  }
 0x241   : > { %v12965_v63 = vpop.f32.mrf.mxu1 }
 0x242   : > { %17752 = vst [vmem:[#allocation17_spill] sm:$0xff] %v12965_v63  ;;  %v12967_v1 = vpop.f32.mrf.mxu0  ;;  %9248 = vmatmul.mubr.msk.f32.gmra.mxu0 %vm975_vm13, %v12695_v35  ;;  %v12985_v35 = vld [vmem:[%s17741_s1 + $0x288] sm:$0xff] }
 0x243   : > { %v12974_v7 = vpop.f32.mrf.mxu1  ;;  %9315 = vmatmul.mubr.msk.f32.gmra.mxu1 %vm975_vm13, %v12960_v32  ;;  %2243 = vmatprep.mubr.f32.mxu0 %v17695_v0 }
 0x244   : > { %17753 = vst [vmem:[#allocation18_spill] sm:$0xff] %v12974_v7  ;;  %v12979_v11 = vpop.f32.mrf.mxu0  ;;  %2817 = vmatprep.mubr.f32.mxu1 %v17695_v0  ;;  %3833 = vperm.xlu0 %11454, %v3791_v14  }
 0x245   : > { %v12990_v18 = vpop.f32.mrf.mxu1 }
 0x246   : > { %17754 = vst [vmem:[#allocation19_spill] sm:$0xff] %v12990_v18  ;;  %v12992_v21 = vpop.f32.mrf.mxu0  ;;  %9249 = vmatmul.mubr.msk.f32.gmra.mxu0 %vm975_vm13, %v12709_v37  ;;  %v13010_v37 = vld [vmem:[%s17741_s1 + $0x290] sm:$0xff] }
 0x247   : > { %v12999_v24 = vpop.f32.mrf.mxu1  ;;  %9316 = vmatmul.mubr.msk.f32.gmra.mxu1 %vm975_vm13, %v12985_v35  ;;  %2249 = vmatprep.mubr.f32.mxu0 %v17695_v0 }
 0x248   : > { %17755 = vst [vmem:[#allocation20_spill] sm:$0xff] %v12999_v24  ;;  %v13004_v34 = vpop.f32.mrf.mxu0  ;;  %2823 = vmatprep.mubr.f32.mxu1 %v17695_v0  ;;  %3823 = vperm.xlu0 %11454, %v3789_v4   ;;  %v3788_v0 = vld [vmem:[%s17745_s2 + $0x8] sm:$0xff]  ;;  %v3787_v4 = vld [vmem:[%s17745_s2] sm:$0xff] }
 0x249   : > { %v13015_v14 = vpop.f32.mrf.mxu1  ;;  %3818 = vperm.xlu1 %11455, %v3788_v0  }
 0x24a   : > { %17756 = vst [vmem:[#allocation21_spill] sm:$0xff] %v13015_v14  ;;  %v13017_v18 = vpop.f32.mrf.mxu0  ;;  %9250 = vmatmul.mubr.msk.f32.gmra.mxu0 %vm975_vm13, %v12714_v38  ;;  %v13035_v38 = vld [vmem:[%s17741_s1 + $0x298] sm:$0xff] }
 0x24b   : > { %v13024_v55 = vpop.f32.mrf.mxu1  ;;  %9317 = vmatmul.mubr.msk.f32.gmra.mxu1 %vm975_vm13, %v13010_v37  ;;  %2255 = vmatprep.mubr.f32.mxu0 %v17758_v26 }
 0x24c   : > { %17757 = vst [vmem:[#allocation22_spill] sm:$0xff] %v13024_v55  ;;  %v13029_v59 = vpop.f32.mrf.mxu0  ;;  %2829 = vmatprep.mubr.f32.mxu1 %v17758_v26  ;;  %3813 = vperm.xlu0 %11454, %v3787_v4  }
 0x24d   : > { %v13040_v14 = vpop.f32.mrf.mxu1 }
 0x24e   : > { %17759 = vst [vmem:[#allocation23_spill] sm:$0xff] %v13040_v14  ;;  %v13042_v62 = vpop.f32.mrf.mxu0  ;;  %9251 = vmatmul.mubr.msk.f32.gmra.mxu0 %vm975_vm13, %v12728_v40  ;;  %v13057_v14 = vld [vmem:[%s17741_s1 + $0x2a0] sm:$0xff] }
 0x24f   : > { %v13046_v5 = vpop.f32.mrf.mxu1  ;;  %9318 = vmatmul.mubr.msk.f32.gmra.mxu1 %vm975_vm13, %v13035_v38  ;;  %2261 = vmatprep.mubr.f32.mxu0 %v17758_v26 }
 0x250   : > { %17760 = vst [vmem:[#allocation24_spill] sm:$0xff] %v13046_v5  ;;  %v13051_v0 = vpop.f32.mrf.mxu0  ;;  %2835 = vmatprep.mubr.f32.mxu1 %v17758_v26 }
 0x251   : > { %v13059_v12 = vpop.f32.mrf.mxu1 }
 0x252   : > { %17761 = vst [vmem:[#allocation25_spill] sm:$0xff] %v13059_v12  ;;  %v13061_v40 = vpop.f32.mrf.mxu0  ;;  %9252 = vmatmul.mubr.msk.f32.gmra.mxu0 %vm975_vm13, %v12733_v41  ;;  %v13077_v12 = vld [vmem:[%s17741_s1 + $0x2a8] sm:$0xff] }
 0x253   : > { %v1593_v4 = vpop.f32.mrf.mxu1  ;;  %9319 = vmatmul.mubr.msk.f32.gmra.mxu1 %vm975_vm13, %v13057_v14  ;;  %2267 = vmatprep.mubr.f32.mxu0 %v17758_v26 }
 0x254   : > { %v13069_v19 = vadd.f32 %v1593_v4, %v12867_v6  ;;  %v13071_v63 = vpop.f32.mrf.mxu0  ;;  %2841 = vmatprep.mubr.f32.mxu1 %v17758_v26 }
 0x255   : > { %v1595_v27 = vpop.f32.mrf.mxu1 }
 0x256   : > { %v13080_v41 = vadd.f32 %v1595_v27, %v12878_v9  ;;  %v13082_v5 = vpop.f32.mrf.mxu0  ;;  %9253 = vmatmul.mubr.msk.f32.gmra.mxu0 %vm975_vm13, %v12749_v45  ;;  %v13098_v9 = vld [vmem:[%s17741_s1 + $0x2b0] sm:$0xff] }
 0x257   : > { %v1599_v6 = vpop.f32.mrf.mxu1  ;;  %9320 = vmatmul.mubr.msk.f32.gmra.mxu1 %vm975_vm13, %v13077_v12  ;;  %2273 = vmatprep.mubr.f32.mxu0 %v17758_v26 }
 0x258   : > { %v13090_v4 = vadd.f32 %v1599_v6, %v12892_v13  ;;  %v13092_v55 = vpop.f32.mrf.mxu0  ;;  %2847 = vmatprep.mubr.f32.mxu1 %v17758_v26 }
 0x259   : > { %v1601_v27 = vpop.f32.mrf.mxu1 }
 0x25a   : > { %v13101_v45 = vadd.f32 %v1601_v27, %v12903_v16  ;;  %v13103_v24 = vpop.f32.mrf.mxu0  ;;  %9254 = vmatmul.mubr.msk.f32.gmra.mxu0 %vm975_vm13, %v12754_v46  ;;  %v13119_v16 = vld [vmem:[%s17741_s1 + $0x2b8] sm:$0xff] }
 0x25b   : > { %v1605_v13 = vpop.f32.mrf.mxu1  ;;  %9321 = vmatmul.mubr.msk.f32.gmra.mxu1 %vm975_vm13, %v13098_v9  ;;  %2279 = vmatprep.mubr.f32.mxu0 %v17758_v26 }
 0x25c   : > { %v13111_v6 = vadd.f32 %v1605_v13, %v12917_v20  ;;  %v13113_v7 = vpop.f32.mrf.mxu0  ;;  %2853 = vmatprep.mubr.f32.mxu1 %v17758_v26  ;;  %v3810_v20 = vld [vmem:[%s17745_s2 + $0xb8] sm:$0xff] }
 0x25d   : > { %v1607_v27 = vpop.f32.mrf.mxu1  ;;  %3928 = vperm.xlu1 %11455, %v3810_v20  }
 0x25e   : > { %17762 = vst [vmem:[#allocation26_spill] sm:$0xff] %v13111_v6  ;;  %v13122_v46 = vadd.f32 %v1607_v27, %v12929_v23  ;;  %v13124_v29 = vpop.f32.mrf.mxu0  ;;  %9255 = vmatmul.mubr.msk.f32.gmra.mxu0 %vm975_vm13, %v12768_v48  ;;  %v13144_v48 = vld [vmem:[%s17741_s1 + $0x2c0] sm:$0xff]  ;;  %v3809_v27 = vld [vmem:[%s17745_s2 + $0xb0] sm:$0xff] }
 0x25f   : > { %v1611_v13 = vpop.f32.mrf.mxu1  ;;  %9322 = vmatmul.mubr.msk.f32.gmra.mxu1 %vm975_vm13, %v13119_v16  ;;  %10531 = vmatprep.mubr.msk.f32.mxu0 %vm975_vm13, %v12781_v50  ;;  %v3229_v50 = vsel %vm3220_vm6, %v12702_v36, %v12667_v30  ;;  %v3227_v30 = vsel %vm3220_vm6, %v12716_v39, %v12681_v33  ;;  %v3225_v39 = vsel %vm3220_vm6, %v12783_v51, %v12761_v47 }
 0x260   : > { %17763 = vst [vmem:[#allocation27_spill] sm:$0xff] %v13122_v46  ;;  %v13136_v6 = vadd.f32 %v1611_v13, %v12942_v28  ;;  %v13138_v23 = vpop.f32.mrf.mxu0  ;;  %2859 = vmatprep.mubr.f32.mxu1 %v17758_v26  ;;  %v3193_v46 = vpop.permute.xlu1 %3192  ;;  %3923 = vperm.xlu0 %11454, %v3809_v27   ;;  %v3228_v27 = vsel %vm3220_vm6, %v12681_v33, %v12735_v42 }
 0x261   : > { %v1613_v22 = vpop.f32.mrf.mxu1  ;;  %v3226_v33 = vsel %vm3220_vm6, %v12761_v47, %v12742_v43  ;;  %v3224_v43 = vsel %vm3220_vm6, %v12770_v49, %v12813_v58  ;;  %v3223_v47 = vsel %vm3220_vm6, %v12792_v54, %v12770_v49 }
 0x262   : > { %v13153_v28 = vadd.f32 %v1613_v22, %v12954_v31  ;;  %v13155_v13 = vpop.f32.mrf.mxu0  ;;  %10532 = vmatmul.mubr.msk.f32.vlgmr.msra.gmra.mxu0 %vm975_vm13, %v12802_v56  ;;  %v13178_v56 = vld [vmem:[%s17741_s1 + $0x2c8] sm:$0xff] }
 0x263   : > { %9381 = vmatpush1.msk.msra.mxu0 %vm1048_vm2, %v3229_v50  ;;  %v1617_v20 = vpop.f32.mrf.mxu1  ;;  %9323 = vmatmul.mubr.msk.f32.gmra.mxu1 %vm975_vm13, %v13144_v48 }
 0x264   : > { %v13169_v36 = vadd.f32 %v1617_v20, %v12967_v1  ;;  %3345 = vmatprep.subr.mxu0 %v3228_v27  ;;  %v13171_v22 = vpop.f32.mrf.mxu0  ;;  %10534 = vmatprep.mubr.msk.f32.mxu0 %vm975_vm13, %v12820_v44  ;;  %v3191_v1 = vpop.permute.xlu1 %3190  ;;  %v3222_v20 = vsel %vm3220_vm6, %v3193_v46, %v12826_v60  ;;  %v3807_v60 = vld [vmem:[%s17745_s2 + $0xa0] sm:$0xff] }
 0x265   : > { %3346 = vmatpush1.msra.mxu0 %v3227_v30  ;;  %v1619_v42 = vpop.f32.mrf.mxu1  ;;  %2865 = vmatprep.mubr.f32.mxu1 %v17758_v26  ;;  %v3221_v49 = vsel %vm3220_vm6, %v3191_v1, %v3193_v46  ;;  %v13273_v1 = vld [vmem:[%s17741_s1 + $0x2e0] sm:$0xff] }
 0x266   : > { %v13188_v31 = vadd.f32 %v1619_v42, %v12979_v11  ;;  %3347 = vmatprep.subr.mxu0 %v3226_v33  ;;  %v13190_v44 = vpop.f32.mrf.mxu0  ;;  %10535 = vmatmul.mubr.msk.f32.gmra.mxu0 %vm975_vm13, %v12841_v61  ;;  %v13212_v61 = vld [vmem:[%s17741_s1 + $0x2d0] sm:$0xff] }
 0x267   : > { %3348 = vmatpush1.msra.mxu0 %v3225_v39  ;;  %v1623_v50 = vpop.f32.mrf.mxu1  ;;  %9324 = vmatmul.mubr.msk.f32.gmra.mxu1 %vm975_vm13, %v13178_v56  ;;  %v3805_v33 = vld [vmem:[%s17745_s2 + $0x90] sm:$0xff] }
 0x268   : > { %17764 = vst [vmem:[#allocation28_spill] sm:$0xff] %v13188_v31  ;;  %v13203_v51 = vadd.f32 %v1623_v50, %v12992_v21  ;;  %3349 = vmatprep.subr.mxu0 %v3224_v43  ;;  %v13205_v11 = vpop.f32.mrf.mxu0  ;;  %10537 = vmatprep.mubr.msk.f32.mxu0 %vm975_vm13, %v12860_v3  ;;  %v3808_v3 = vld [vmem:[%s17745_s2 + $0xa8] sm:$0xff]  ;;  %v13536_v31 = vld [vmem:[%s17741_s1 + $0x370] sm:$0xff] }
 0x269   : > { %3350 = vmatpush1.msra.mxu0 %v3223_v47  ;;  %v1625_v58 = vpop.f32.mrf.mxu1  ;;  %2871 = vmatprep.mubr.f32.mxu1 %v17758_v26 }
 0x26a   : > { %v13219_v54 = vadd.f32 %v1625_v58, %v13004_v34  ;;  %3351 = vmatprep.subr.mxu0 %v3222_v20  ;;  %v13221_v21 = vpop.f32.mrf.mxu0  ;;  %10538 = vmatmul.mubr.msk.f32.gmra.mxu0 %vm975_vm13, %v12885_v10  ;;  %v13244_v10 = vld [vmem:[%s17741_s1 + $0x2d8] sm:$0xff] }
 0x26b   : > { %3352 = vmatpush1.msra.mxu0 %v3221_v49  ;;  %v1629_v27 = vpop.f32.mrf.mxu1  ;;  %9325 = vmatmul.mubr.msk.f32.gmra.mxu1 %vm975_vm13, %v13212_v61 }
 0x26c   : > { %17765 = vst [vmem:[#allocation29_spill] sm:$0xff] %v13219_v54  ;;  %v13234_v34 = vadd.f32 %v1629_v27, %v13017_v18  ;;  %v13236_v46 = vpop.f32.mrf.mxu0  ;;  %10540 = vmatprep.mubr.msk.f32.mxu0 %vm975_vm13, %v12910_v17  ;;  %2877 = vmatprep.mubr.f32.mxu1 %v17758_v26  ;;  %v3806_v17 = vld [vmem:[%s17745_s2 + $0x98] sm:$0xff] }
 0x26d   : > { %v1631_v30 = vpop.f32.mrf.mxu1  ;;  %3918 = vperm.xlu1 %11455, %v3808_v3   ;;  %3913 = vperm.xlu0 %11454, %v3807_v60  }
 0x26e   : > { %v13247_v42 = vadd.f32 %v1631_v30, %v13029_v59  ;;  %v13249_v18 = vpop.f32.mrf.mxu0  ;;  %10541 = vmatmul.mubr.msk.f32.gmra.mxu0 %vm975_vm13, %v12935_v25  ;;  %4273 = vmatprep.subr.mxu0 %v17758_v26 }
 0x26f   : > { %v1635_v39 = vpop.f32.mrf.mxu1  ;;  %9326 = vmatmul.mubr.msk.f32.gmra.mxu1 %vm975_vm13, %v13244_v10  ;;  %10543 = vmatprep.mubr.msk.f32.mxu0 %vm975_vm13, %v12960_v32  ;;  %v3803_v32 = vld [vmem:[%s17745_s2 + $0x80] sm:$0xff] }
 0x270   : > { %17766 = vst [vmem:[#allocation30_spill] sm:$0xff] %v13247_v42  ;;  %v13265_v59 = vadd.f32 %v1635_v39, %v13042_v62  ;;  %v13267_v25 = vpop.f32.mrf.mxu0  ;;  %2883 = vmatprep.mubr.f32.mxu1 %v17758_v26  ;;  %v3804_v62 = vld [vmem:[%s17745_s2 + $0x88] sm:$0xff]  ;;  %v13555_v42 = vld [vmem:[%s17741_s1 + $0x378] sm:$0xff] }
 0x271   : > { %v1637_v50 = vpop.f32.mrf.mxu1  ;;  %3908 = vperm.xlu1 %11455, %v3806_v17   ;;  %3903 = vperm.xlu0 %11454, %v3805_v33  }
 0x272   : > { %v13276_v43 = vadd.f32 %v1637_v50, %v13051_v0  ;;  %v13278_v47 = vpop.f32.mrf.mxu0  ;;  %10544 = vmatmul.mubr.msk.f32.gmra.mxu0 %vm975_vm13, %v12985_v35  ;;  %v13301_v35 = vld [vmem:[%s17741_s1 + $0x2e8] sm:$0xff] }
 0x273   : > { %v1641_v58 = vpop.f32.mrf.mxu1  ;;  %9327 = vmatmul.mubr.msk.f32.gmra.mxu1 %vm975_vm13, %v13273_v1  ;;  %10546 = vmatprep.mubr.msk.f32.mxu0 %vm975_vm13, %v13010_v37 }
 0x274   : > { %17767 = vst [vmem:[#allocation31_spill] sm:$0xff] %v13276_v43  ;;  %v13293_v0 = vadd.f32 %v1641_v58, %v13061_v40  ;;  %v13295_v20 = vpop.f32.mrf.mxu0  ;;  %2889 = vmatprep.mubr.f32.mxu1 %v17758_v26  ;;  %v13372_v58 = vld [vmem:[%s17741_s1 + $0x310] sm:$0xff]  ;;  %v13562_v43 = vld [vmem:[%s17741_s1 + $0x380] sm:$0xff] }
 0x275   : > { %17768 = vst [vmem:[#allocation32_spill] sm:$0xff] %v13295_v20  ;;  %v1643_v49 = vpop.f32.mrf.mxu1  ;;  %3898 = vperm.xlu1 %11455, %v3804_v62   ;;  %3893 = vperm.xlu0 %11454, %v3803_v32   ;;  %v13529_v20 = vld [vmem:[%s17741_s1 + $0x368] sm:$0xff] }
 0x276   : > { %v13304_v3 = vadd.f32 %v1643_v49, %v13071_v63  ;;  %v13306_v60 = vpop.f32.mrf.mxu0  ;;  %10547 = vmatmul.mubr.msk.f32.gmra.mxu0 %vm975_vm13, %v13035_v38  ;;  %v9303_v63 = vld [vmem:[%s17741_s1 + $0x2f0] sm:$0xff] }
 0x277   : > { %v1647_v37 = vpop.f32.mrf.mxu1  ;;  %9328 = vmatmul.mubr.msk.f32.gmra.mxu1 %vm975_vm13, %v13301_v35  ;;  %10549 = vmatprep.mubr.msk.f32.mxu0 %vm975_vm13, %v13057_v14 }
 0x278   : > { %17769 = vst [vmem:[#allocation33_spill] sm:$0xff] %v13304_v3  ;;  %v13315_v40 = vadd.f32 %v1647_v37, %v13082_v5  ;;  %v13317_v27 = vpop.f32.mrf.mxu0  ;;  %2895 = vmatprep.mubr.f32.mxu1 %v17758_v26 }
 0x279   : > { %17770 = vst [vmem:[#allocation34_spill] sm:$0xff] %v13317_v27  ;;  %v1649_v30 = vpop.f32.mrf.mxu1 }
 0x27a   : > { %v13324_v38 = vadd.f32 %v1649_v30, %v13092_v55  ;;  %v13326_v17 = vpop.f32.mrf.mxu0  ;;  %10550 = vmatmul.mubr.msk.f32.gmra.mxu0 %vm975_vm13, %v13077_v12  ;;  %v9304_v55 = vld [vmem:[%s17741_s1 + $0x2f8] sm:$0xff]  ;;  %v13345_v12 = vld [vmem:[%s17741_s1 + $0x300] sm:$0xff] }
 0x27b   : > { %v1653_v14 = vpop.f32.mrf.mxu1  ;;  %9329 = vmatmul.mubr.msk.f32.gmra.mxu1 %vm975_vm13, %v9303_v63  ;;  %10552 = vmatprep.mubr.msk.f32.mxu0 %vm975_vm13, %v13098_v9 }
 0x27c   : > { %17771 = vst [vmem:[#allocation35_spill] sm:$0xff] %v13324_v38  ;;  %v13334_v5 = vadd.f32 %v1653_v14, %v13103_v24  ;;  %v13336_v33 = vpop.f32.mrf.mxu0  ;;  %2901 = vmatprep.mubr.f32.mxu1 %v17758_v26  ;;  %v13400_v14 = vld [vmem:[%s17741_s1 + $0x320] sm:$0xff]  ;;  %v13581_v38 = vld [vmem:[%s17741_s1 + $0x388] sm:$0xff] }
 0x27d   : > { %17772 = vst [vmem:[#allocation36_spill] sm:$0xff] %v13336_v33  ;;  %v1655_v39 = vpop.f32.mrf.mxu1 }
 0x27e   : > { %v13348_v50 = vadd.f32 %v1655_v39, %v13113_v7  ;;  %v13350_v9 = vpop.f32.mrf.mxu0  ;;  %10553 = vmatmul.mubr.msk.f32.gmra.mxu0 %vm975_vm13, %v13119_v16  ;;  %v13367_v7 = vld [vmem:[%s17741_s1 + $0x308] sm:$0xff] }
 0x27f   : > { %v1659_v24 = vpop.f32.mrf.mxu1  ;;  %9330 = vmatmul.mubr.msk.f32.gmra.mxu1 %vm975_vm13, %v9304_v55  ;;  %10555 = vmatprep.mubr.msk.f32.mxu0 %vm975_vm13, %v13144_v48 }
 0x280   : > { %17773 = vst [vmem:[#allocation37_spill] sm:$0xff] %v13348_v50  ;;  %v13358_v62 = vadd.f32 %v1659_v24, %v13124_v29  ;;  %v13360_v32 = vpop.f32.mrf.mxu0  ;;  %10577 = vmatprep.mubr.msk.f32.mxu1 %vm975_vm13, %v13345_v12  ;;  %v13588_v50 = vld [vmem:[%s17741_s1 + $0x390] sm:$0xff] }
 0x281   : > { %17774 = vst [vmem:[#allocation38_spill] sm:$0xff] %v13360_v32  ;;  %v1661_v16 = vpop.f32.mrf.mxu1 }
 0x282   : > { %v13375_v48 = vadd.f32 %v1661_v16, %v13138_v23  ;;  %v13377_v29 = vpop.f32.mrf.mxu0  ;;  %10556 = vmatmul.mubr.msk.f32.gmra.mxu0 %vm975_vm13, %v13178_v56  ;;  %v13395_v23 = vld [vmem:[%s17741_s1 + $0x318] sm:$0xff] }
 0x283   : > { %v1665_v49 = vpop.f32.mrf.mxu1  ;;  %10578 = vmatmul.mubr.msk.f32.vlgmr.msra.gmra.mxu1 %vm975_vm13, %v13367_v7  ;;  %10558 = vmatprep.mubr.msk.f32.mxu0 %vm975_vm13, %v13212_v61 }
 0x284   : > { %17775 = vst [vmem:[#allocation39_spill] sm:$0xff] %v13375_v48  ;;  %v13386_v37 = vadd.f32 %v1665_v49, %v13155_v13  ;;  %v13388_v30 = vpop.f32.mrf.mxu0  ;;  %10580 = vmatprep.mubr.msk.f32.mxu1 %vm975_vm13, %v13372_v58  ;;  %v13428_v49 = vld [vmem:[%s17741_s1 + $0x330] sm:$0xff] }
 0x285   : > { %17776 = vst [vmem:[#allocation40_spill] sm:$0xff] %v13388_v30  ;;  %v1667_v56 = vpop.f32.mrf.mxu1 }
 0x286   : > { %v13403_v61 = vadd.f32 %v1667_v56, %v13171_v22  ;;  %v13405_v13 = vpop.f32.mrf.mxu0  ;;  %10559 = vmatmul.mubr.msk.f32.gmra.mxu0 %vm975_vm13, %v13244_v10  ;;  %v13423_v22 = vld [vmem:[%s17741_s1 + $0x328] sm:$0xff] }
 0x287   : > { %v1671_v39 = vpop.f32.mrf.mxu1  ;;  %10581 = vmatmul.mubr.msk.f32.gmra.mxu1 %vm975_vm13, %v13395_v23  ;;  %10561 = vmatprep.mubr.msk.f32.mxu0 %vm975_vm13, %v13273_v1 }
 0x288   : > { %17777 = vst [vmem:[#allocation41_spill] sm:$0xff] %v13403_v61  ;;  %v13414_v24 = vadd.f32 %v1671_v39, %v13190_v44  ;;  %v13416_v16 = vpop.f32.mrf.mxu0  ;;  %10583 = vmatprep.mubr.msk.f32.mxu1 %vm975_vm13, %v13400_v14  ;;  %v13607_v61 = vld [vmem:[%s17741_s1 + $0x398] sm:$0xff] }
 0x289   : > { %17778 = vst [vmem:[#allocation42_spill] sm:$0xff] %v13416_v16  ;;  %v1673_v10 = vpop.f32.mrf.mxu1 }
 0x28a   : > { %v13431_v1 = vadd.f32 %v1673_v10, %v13205_v11  ;;  %v13433_v44 = vpop.f32.mrf.mxu0  ;;  %10562 = vmatmul.mubr.msk.f32.gmra.mxu0 %vm975_vm13, %v13301_v35  ;;  %v13450_v11 = vld [vmem:[%s17741_s1 + $0x338] sm:$0xff]  ;;  %v13455_v10 = vld [vmem:[%s17741_s1 + $0x340] sm:$0xff] }
 0x28b   : > { %v1677_v56 = vpop.f32.mrf.mxu1  ;;  %10584 = vmatmul.mubr.msk.f32.gmra.mxu1 %vm975_vm13, %v13423_v22  ;;  %10564 = vmatprep.mubr.msk.f32.mxu0 %vm975_vm13, %v9303_v63 }
 0x28c   : > { %17779 = vst [vmem:[#allocation43_spill] sm:$0xff] %v13431_v1  ;;  %v13441_v39 = vadd.f32 %v1677_v56, %v13221_v21  ;;  %v13443_v16 = vpop.f32.mrf.mxu0  ;;  %10586 = vmatprep.mubr.msk.f32.mxu1 %vm975_vm13, %v13428_v49 }
 0x28d   : > { %17780 = vst [vmem:[#allocation44_spill] sm:$0xff] %v13443_v16  ;;  %v1679_v35 = vpop.f32.mrf.mxu1 }
 0x28e   : > { %v13458_v63 = vadd.f32 %v1679_v35, %v13236_v46  ;;  %v13460_v21 = vpop.f32.mrf.mxu0  ;;  %10565 = vmatmul.mubr.msk.f32.gmra.mxu0 %vm975_vm13, %v9304_v55  ;;  %v13476_v46 = vld [vmem:[%s17741_s1 + $0x348] sm:$0xff]  ;;  %v13481_v35 = vld [vmem:[%s17741_s1 + $0x350] sm:$0xff] }
 0x28f   : > { %v1683_v56 = vpop.f32.mrf.mxu1  ;;  %10587 = vmatmul.mubr.msk.f32.gmra.mxu1 %vm975_vm13, %v13450_v11  ;;  %3385 = vmatprep.mubr.f32.mxu0 %v17758_v26 }
 0x290   : > { %17781 = vst [vmem:[#allocation45_spill] sm:$0xff] %v13458_v63  ;;  %v13467_v16 = vadd.f32 %v1683_v56, %v13249_v18  ;;  %v13469_v30 = vpop.f32.mrf.mxu0  ;;  %10589 = vmatprep.mubr.msk.f32.mxu1 %vm975_vm13, %v13455_v10  ;;  %v13633_v63 = vld [vmem:[%s17741_s1 + $0x3a8] sm:$0xff] }
 0x291   : > { %17782 = vst [vmem:[#allocation46_spill] sm:$0xff] %v13469_v30  ;;  %v1685_v55 = vpop.f32.mrf.mxu1 }
 0x292   : > { %v13484_v32 = vadd.f32 %v1685_v55, %v13267_v25  ;;  %v13486_v18 = vpop.f32.mrf.mxu0  ;;  %9382 = vmatmul.mubr.msk.f32.vlgmr.msra.gmra.mxu0 %vm975_vm13, %v13345_v12  ;;  %v13503_v25 = vld [vmem:[%s17741_s1 + $0x358] sm:$0xff]  ;;  %v13510_v55 = vld [vmem:[%s17741_s1 + $0x360] sm:$0xff] }
 0x293   : > { %v1689_v56 = vpop.f32.mrf.mxu1  ;;  %10590 = vmatmul.mubr.msk.f32.gmra.mxu1 %vm975_vm13, %v13476_v46  ;;  %3391 = vmatprep.mubr.f32.mxu0 %v17758_v26 }
 0x294   : > { %17783 = vst [vmem:[#allocation47_spill] sm:$0xff] %v13484_v32  ;;  %v13494_v30 = vadd.f32 %v1689_v56, %v13278_v47  ;;  %v13496_v33 = vpop.f32.mrf.mxu0  ;;  %10592 = vmatprep.mubr.msk.f32.mxu1 %vm975_vm13, %v13481_v35  ;;  %v13614_v32 = vld [vmem:[%s17741_s1 + $0x3a0] sm:$0xff] }
 0x295   : > { %17784 = vst [vmem:[#allocation48_spill] sm:$0xff] %v13496_v33  ;;  %v13505_v12 = vpop.f32.mrf.mxu1  ;;  %v13640_v33 = vld [vmem:[%s17741_s1 + $0x3b0] sm:$0xff] }
 0x296   : > { %17785 = vst [vmem:[#allocation49_spill] sm:$0xff] %v13505_v12  ;;  %v13512_v27 = vpop.f32.mrf.mxu0  ;;  %9383 = vmatmul.mubr.msk.f32.gmra.mxu0 %vm975_vm13, %v13367_v7 }
 0x297   : > { %v1695_v47 = vpop.f32.mrf.mxu1  ;;  %10593 = vmatmul.mubr.msk.f32.gmra.mxu1 %vm975_vm13, %v13503_v25  ;;  %3397 = vmatprep.mubr.f32.mxu0 %v17758_v26 }
 0x298   : > { %v13520_v56 = vadd.f32 %v1695_v47, %v13306_v60  ;;  %v13522_v12 = vpop.f32.mrf.mxu0  ;;  %10595 = vmatprep.mubr.msk.f32.mxu1 %vm975_vm13, %v13510_v55 }
 0x299   : > { %17786 = vst [vmem:[#allocation50_spill] sm:$0xff] %v13522_v12  ;;  %v13531_v7 = vpop.f32.mrf.mxu1 }
 0x29a   : > { %17787 = vst [vmem:[#allocation51_spill] sm:$0xff] %v13531_v7  ;;  %v13538_v54 = vpop.f32.mrf.mxu0  ;;  %9384 = vmatmul.mubr.msk.f32.gmra.mxu0 %vm975_vm13, %v13372_v58 }
 0x29b   : > { %v1701_v60 = vpop.f32.mrf.mxu1  ;;  %10596 = vmatmul.mubr.msk.f32.gmra.mxu1 %vm975_vm13, %v13529_v20  ;;  %3403 = vmatprep.mubr.f32.mxu0 %v17758_v26 }
 0x29c   : > { %v13546_v47 = vadd.f32 %v1701_v60, %v13326_v17  ;;  %v13548_v7 = vpop.f32.mrf.mxu0  ;;  %10598 = vmatprep.mubr.msk.f32.mxu1 %vm975_vm13, %v13536_v31 }
 0x29d   : > { %17788 = vst [vmem:[#allocation52_spill] sm:$0xff] %v13548_v7  ;;  %v13557_v58 = vpop.f32.mrf.mxu1  ;;  %v13659_v7 = vld [vmem:[%s17741_s1 + $0x3b8] sm:$0xff]  ;;  %s18079_s1 = smov 127  }
 0x29e   : > { %17789 = vst [vmem:[#allocation53_spill] sm:$0xff] %v13557_v58  ;;  %v13564_v3 = vpop.f32.mrf.mxu0  ;;  %9385 = vmatmul.mubr.msk.f32.gmra.mxu0 %vm975_vm13, %v13395_v23 }
 0x29f   : > { %v1707_v17 = vpop.f32.mrf.mxu1  ;;  %10599 = vmatmul.mubr.msk.f32.gmra.mxu1 %vm975_vm13, %v13555_v42  ;;  %3409 = vmatprep.mubr.f32.mxu0 %v17758_v26 }
 0x2a0   : > { %v13572_v60 = vadd.f32 %v1707_v17, %v13350_v9  ;;  %v13574_v58 = vpop.f32.mrf.mxu0  ;;  %10601 = vmatprep.mubr.msk.f32.mxu1 %vm975_vm13, %v13562_v43 }
 0x2a1   : > { %17790 = vst [vmem:[#allocation54_spill] sm:$0xff] %v13574_v58  ;;  %v13583_v23 = vpop.f32.mrf.mxu1 }
 0x2a2   : > { %17791 = vst [vmem:[#allocation55_spill] sm:$0xff] %v13583_v23  ;;  %v13590_v48 = vpop.f32.mrf.mxu0  ;;  %9386 = vmatmul.mubr.msk.f32.gmra.mxu0 %vm975_vm13, %v13400_v14 }
 0x2a3   : > { %v1713_v9 = vpop.f32.mrf.mxu1  ;;  %10602 = vmatmul.mubr.msk.f32.gmra.mxu1 %vm975_vm13, %v13581_v38  ;;  %3415 = vmatprep.mubr.f32.mxu0 %v17758_v26 }
 0x2a4   : > { %v13598_v17 = vadd.f32 %v1713_v9, %v13377_v29  ;;  %v13600_v23 = vpop.f32.mrf.mxu0  ;;  %10604 = vmatprep.mubr.msk.f32.mxu1 %vm975_vm13, %v13588_v50 }
 0x2a5   : > { %17792 = vst [vmem:[#allocation56_spill] sm:$0xff] %v13600_v23  ;;  %v13609_v14 = vpop.f32.mrf.mxu1 }
 0x2a6   : > { %17793 = vst [vmem:[#allocation57_spill] sm:$0xff] %v13609_v14  ;;  %v13616_v1 = vpop.f32.mrf.mxu0  ;;  %9387 = vmatmul.mubr.msk.f32.gmra.mxu0 %vm975_vm13, %v13423_v22 }
 0x2a7   : > { %v1719_v29 = vpop.f32.mrf.mxu1  ;;  %10605 = vmatmul.mubr.msk.f32.gmra.mxu1 %vm975_vm13, %v13607_v61  ;;  %3421 = vmatprep.mubr.f32.mxu0 %v17758_v26 }
 0x2a8   : > { %v13624_v9 = vadd.f32 %v1719_v29, %v13405_v13  ;;  %v13626_v14 = vpop.f32.mrf.mxu0  ;;  %10607 = vmatprep.mubr.msk.f32.mxu1 %vm975_vm13, %v13614_v32 }
 0x2a9   : > { %17795 = vst [vmem:[#allocation59_spill] sm:$0xff] %v13626_v14  ;;  %v13635_v22 = vpop.f32.mrf.mxu1 }
 0x2aa   : > { %17794 = vst [vmem:[#allocation58_spill] sm:$0xff] %v13624_v9  ;;  %17796 = vst [vmem:[#allocation60_spill] sm:$0xff] %v13635_v22  ;;  %v13642_v12 = vpop.f32.mrf.mxu0  ;;  %9388 = vmatmul.mubr.msk.f32.gmra.mxu0 %vm975_vm13, %v13428_v49 }
 0x2ab   : > { %v1725_v13 = vpop.f32.mrf.mxu1  ;;  %10608 = vmatmul.mubr.msk.f32.gmra.mxu1 %vm975_vm13, %v13633_v63  ;;  %3427 = vmatprep.mubr.f32.mxu0 %v17758_v26 }
 0x2ac   : > { %v13650_v29 = vadd.f32 %v1725_v13, %v13433_v44  ;;  %v13652_v22 = vpop.f32.mrf.mxu0  ;;  %10610 = vmatprep.mubr.msk.f32.mxu1 %vm975_vm13, %v13640_v33 }
 0x2ad   : > { %17798 = vst [vmem:[#allocation62_spill] sm:$0xff] %v13652_v22  ;;  %v13661_v49 = vpop.f32.mrf.mxu1 }
 0x2ae   : > { %17797 = vst [vmem:[#allocation61_spill] sm:$0xff] %v13650_v29  ;;  %17799 = vst [vmem:[#allocation63_spill] sm:$0xff] %v13661_v49  ;;  %v13663_v58 = vpop.f32.mrf.mxu0  ;;  %9389 = vmatmul.mubr.msk.f32.gmra.mxu0 %vm975_vm13, %v13450_v11  ;;  %v1808_v49 = vadd.f32 %v13486_v18, %v12787_v52 }
 0x2af   : > { %v1731_v23 = vpop.f32.mrf.mxu1  ;;  %10611 = vmatmul.mubr.msk.f32.gmra.mxu1 %vm975_vm13, %v13659_v7  ;;  %3433 = vmatprep.mubr.f32.mxu0 %v17758_v26 }
 0x2b0   : > { %v13671_v44 = vadd.f32 %v1731_v23, %v13460_v21  ;;  %v13673_v13 = vpop.f32.mrf.mxu0  ;;  %v1818_v23 = vadd.f32 %v13512_v27, %v12809_v57 }
 0x2b1   : > { %v13675_v14 = vpop.f32.mrf.mxu1 }
 0x2b2   : > { %17800 = vst [vmem:[#allocation64_spill] sm:$0xff] %v13675_v14  ;;  %v13679_v22 = vpop.f32.mrf.mxu0  ;;  %9390 = vmatmul.mubr.msk.f32.gmra.mxu0 %vm975_vm13, %v13455_v10 }
 0x2b3   : > { %v10487_v11 = vpop.f32.mrf.mxu1  ;;  %3439 = vmatprep.mubr.f32.mxu0 %v17758_v26 }
 0x2b4   : > { %v13684_v29 = vadd.f32 %v10487_v11, %v1808_v49  ;;  %v13686_v9 = vpop.f32.mrf.mxu0  ;;  %v1828_v11 = vadd.f32 %v13538_v54, %v12832_v53 }
 0x2b5   : > { %17801 = vst [vmem:[#allocation65_spill] sm:$0xff] %v13686_v9  ;;  %v13688_v21 = vpop.f32.mrf.mxu1 }
 0x2b6   : > { %17802 = vst [vmem:[#allocation66_spill] sm:$0xff] %v13688_v21  ;;  %v13692_v14 = vpop.f32.mrf.mxu0  ;;  %9391 = vmatmul.mubr.msk.f32.gmra.mxu0 %vm975_vm13, %v13476_v46 }
 0x2b7   : > { %v10490_v52 = vpop.f32.mrf.mxu1  ;;  %3445 = vmatprep.mubr.f32.mxu0 %v17758_v26 }
 0x2b8   : > { %v13697_v10 = vadd.f32 %v10490_v52, %v1818_v23  ;;  %v13699_v18 = vpop.f32.mrf.mxu0  ;;  %v1838_v52 = vadd.f32 %v13564_v3, %v12851_v2 }
 0x2b9   : > { %17803 = vst [vmem:[#allocation67_spill] sm:$0xff] %v13699_v18  ;;  %v13701_v49 = vpop.f32.mrf.mxu1 }
 0x2ba   : > { %v13705_v9 = vpop.f32.mrf.mxu0  ;;  %9392 = vmatmul.mubr.msk.f32.gmra.mxu0 %vm975_vm13, %v13481_v35 }
 0x2bb   : > { %v10493_v57 = vpop.f32.mrf.mxu1  ;;  %3451 = vmatprep.mubr.f32.mxu0 %v17758_v26 }
 0x2bc   : > { %v13710_v27 = vadd.f32 %v10493_v57, %v1828_v11  ;;  %v13712_v46 = vpop.f32.mrf.mxu0  ;;  %v1848_v57 = vadd.f32 %v13590_v48, %v12874_v8  ;;  %v1858_v8 = vadd.f32 %v13616_v1, %v12899_v15 }
 0x2bd   : > { %17804 = vst [vmem:[#allocation68_spill] sm:$0xff] %v13712_v46  ;;  %v13714_v23 = vpop.f32.mrf.mxu1 }
 0x2be   : > { %v13718_v18 = vpop.f32.mrf.mxu0  ;;  %9393 = vmatmul.mubr.msk.f32.gmra.mxu0 %vm975_vm13, %v13503_v25 }
 0x2bf   : > { %v10496_v53 = vpop.f32.mrf.mxu1  ;;  %3457 = vmatprep.mubr.f32.mxu0 %v17758_v26 }
 0x2c0   : > { %v13723_v54 = vadd.f32 %v10496_v53, %v1838_v52  ;;  %v13725_v35 = vpop.f32.mrf.mxu0 }
 0x2c1   : > { %17805 = vst [vmem:[#allocation69_spill] sm:$0xff] %v13725_v35  ;;  %v13727_v11 = vpop.f32.mrf.mxu1 }
 0x2c2   : > { %v2143_v46 = vpop.f32.mrf.mxu0  ;;  %9394 = vmatmul.mubr.msk.f32.gmra.mxu0 %vm975_vm13, %v13510_v55 }
 0x2c3   : > { %v13734_v2 = vadd.f32 %v2143_v46, %v13069_v19  ;;  %v10499_v3 = vpop.f32.mrf.mxu1  ;;  %3463 = vmatprep.mubr.f32.mxu0 %v17758_v26 }
 0x2c4   : > { %v13737_v25 = vadd.f32 %v10499_v3, %v1848_v57  ;;  %v2145_v52 = vpop.f32.mrf.mxu0 }
 0x2c5   : > { %v13740_v53 = vadd.f32 %v2145_v52, %v13080_v41  ;;  %v13742_v35 = vpop.f32.mrf.mxu1  ;;  %v17808_v52 = vld [vmem:[#allocation14_spill] sm:$0xff] }
 0x2c6   : > { %v2149_v48 = vpop.f32.mrf.mxu0  ;;  %9395 = vmatmul.mubr.msk.f32.gmra.mxu0 %vm975_vm13, %v13529_v20  ;;  %v1868_v15 = vadd.f32 %v13642_v12, %v17808_v52 }
 0x2c7   : > { %17806 = vst [vmem:[#allocation70_spill] sm:$0xff] %v13740_v53  ;;  %v13749_v19 = vadd.f32 %v2149_v48, %v13090_v4  ;;  %v10502_v55 = vpop.f32.mrf.mxu1  ;;  %3469 = vmatprep.mubr.f32.mxu0 %v17758_v26  ;;  %v17809_v4 = vld [vmem:[#allocation26_spill] sm:$0xff] }
 0x2c8   : > { %v13752_v46 = vadd.f32 %v10502_v55, %v1858_v8  ;;  %v2151_v57 = vpop.f32.mrf.mxu0 }
 0x2c9   : > { %v13755_v41 = vadd.f32 %v2151_v57, %v13101_v45  ;;  %v13757_v3 = vpop.f32.mrf.mxu1  ;;  %v17810_v45 = vld [vmem:[#allocation27_spill] sm:$0xff] }
 0x2ca   : > { %v2155_v1 = vpop.f32.mrf.mxu0  ;;  %9396 = vmatmul.mubr.msk.f32.gmra.mxu0 %vm975_vm13, %v13536_v31 }
 0x2cb   : > { %17807 = vst [vmem:[#allocation71_spill] sm:$0xff] %v13755_v41  ;;  %v13764_v20 = vadd.f32 %v2155_v1, %v17809_v4  ;;  %v10505_v48 = vpop.f32.mrf.mxu1  ;;  %3475 = vmatprep.mubr.f32.mxu0 %v17758_v26  ;;  %v17812_v41 = vld [vmem:[#allocation16_spill] sm:$0xff] }
 0x2cc   : > { %v13767_v8 = vadd.f32 %v10505_v48, %v1868_v15  ;;  %v2157_v55 = vpop.f32.mrf.mxu0  ;;  %v1878_v12 = vadd.f32 %v13663_v58, %v17812_v41 }
 0x2cd   : > { %v13770_v57 = vadd.f32 %v2157_v55, %v17810_v45  ;;  %v13772_v53 = vpop.f32.mrf.mxu1  ;;  %v17814_v45 = vld [vmem:[#allocation18_spill] sm:$0xff] }
 0x2ce   : > { %v2161_v52 = vpop.f32.mrf.mxu0  ;;  %9397 = vmatmul.mubr.msk.f32.gmra.mxu0 %vm975_vm13, %v13555_v42  ;;  %v1888_v58 = vadd.f32 %v13679_v22, %v17814_v45 }
 0x2cf   : > { %17811 = vst [vmem:[#allocation14_spill] sm:$0xff] %v13770_v57  ;;  %v13779_v31 = vadd.f32 %v2161_v52, %v13136_v6  ;;  %v10508_v1 = vpop.f32.mrf.mxu1  ;;  %3481 = vmatprep.mubr.f32.mxu0 %v17758_v26 }
 0x2d0   : > { %v13782_v15 = vadd.f32 %v10508_v1, %v1878_v12  ;;  %v2163_v4 = vpop.f32.mrf.mxu0  ;;  %v17817_v1 = vld [vmem:[#allocation20_spill] sm:$0xff] }
 0x2d1   : > { %v13785_v48 = vadd.f32 %v2163_v4, %v13153_v28  ;;  %v13787_v55 = vpop.f32.mrf.mxu1  ;;  %v1898_v4 = vadd.f32 %v13692_v14, %v17817_v1 }
 0x2d2   : > { %v2167_v41 = vpop.f32.mrf.mxu0  ;;  %9398 = vmatmul.mubr.msk.f32.gmra.mxu0 %vm975_vm13, %v13562_v43 }
 0x2d3   : > { %17813 = vst [vmem:[#allocation26_spill] sm:$0xff] %v13785_v48  ;;  %v13794_v6 = vadd.f32 %v2167_v41, %v13169_v36  ;;  %v10511_v42 = vpop.f32.mrf.mxu1  ;;  %3487 = vmatprep.mubr.f32.mxu0 %v17758_v26 }
 0x2d4   : > { %v13797_v12 = vadd.f32 %v10511_v42, %v1888_v58  ;;  %v13799_v52 = vpop.f32.mrf.mxu0  ;;  %v17821_v42 = vld [vmem:[#allocation22_spill] sm:$0xff] }
 0x2d5   : > { %17815 = vst [vmem:[#allocation27_spill] sm:$0xff] %v13799_v52  ;;  %v13801_v28 = vpop.f32.mrf.mxu1  ;;  %v1908_v57 = vadd.f32 %v13705_v9, %v17821_v42 }
 0x2d6   : > { %17816 = vst [vmem:[#allocation16_spill] sm:$0xff] %v13801_v28  ;;  %v2173_v22 = vpop.f32.mrf.mxu0  ;;  %9399 = vmatmul.mubr.msk.f32.gmra.mxu0 %vm975_vm13, %v13581_v38 }
 0x2d7   : > { %v13808_v43 = vadd.f32 %v2173_v22, %v13203_v51  ;;  %v10514_v36 = vpop.f32.mrf.mxu1  ;;  %3493 = vmatprep.mubr.f32.mxu0 %v17758_v26 }
 0x2d8   : > { %v13811_v45 = vadd.f32 %v10514_v36, %v1898_v4  ;;  %v13813_v58 = vpop.f32.mrf.mxu0  ;;  %v17825_v36 = vld [vmem:[#allocation24_spill] sm:$0xff] }
 0x2d9   : > { %17819 = vst [vmem:[#allocation20_spill] sm:$0xff] %v13813_v58  ;;  %v13815_v41 = vpop.f32.mrf.mxu1  ;;  %v1918_v48 = vadd.f32 %v13718_v18, %v17825_v36 }
 0x2da   : > { %17818 = vst [vmem:[#allocation18_spill] sm:$0xff] %v13811_v45  ;;  %17820 = vst [vmem:[#allocation72_spill] sm:$0xff] %v13815_v41  ;;  %v2179_v14 = vpop.f32.mrf.mxu0  ;;  %9400 = vmatmul.mubr.msk.f32.gmra.mxu0 %vm975_vm13, %v13588_v50 }
 0x2db   : > { %v2489_v38 = vadd.f32 %v2179_v14, %v13234_v34  ;;  %v10517_v51 = vpop.f32.mrf.mxu1  ;;  %3499 = vmatprep.mubr.f32.mxu0 %v17758_v26 }
 0x2dc   : > { %v13823_v1 = vadd.f32 %v10517_v51, %v1908_v57  ;;  %v13825_v4 = vpop.f32.mrf.mxu0 }
 0x2dd   : > { %17823 = vst [vmem:[#allocation73_spill] sm:$0xff] %v13825_v4  ;;  %v13827_v22 = vpop.f32.mrf.mxu1 }
 0x2de   : > { %17822 = vst [vmem:[#allocation22_spill] sm:$0xff] %v13823_v1  ;;  %17824 = vst [vmem:[#allocation74_spill] sm:$0xff] %v13827_v22  ;;  %v2185_v52 = vpop.f32.mrf.mxu0  ;;  %9401 = vmatmul.mubr.msk.f32.gmra.mxu0 %vm975_vm13, %v13607_v61 }
 0x2df   : > { %v2492_v50 = vadd.f32 %v2185_v52, %v13265_v59  ;;  %v10520_v9 = vpop.f32.mrf.mxu1  ;;  %3505 = vmatprep.mubr.f32.mxu0 %v17758_v26 }
 0x2e0   : > { %v13835_v34 = vadd.f32 %v10520_v9, %v1918_v48  ;;  %v13837_v57 = vpop.f32.mrf.mxu0 }
 0x2e1   : > { %17827 = vst [vmem:[#allocation75_spill] sm:$0xff] %v13837_v57  ;;  %v13839_v42 = vpop.f32.mrf.mxu1 }
 0x2e2   : > { %17826 = vst [vmem:[#allocation24_spill] sm:$0xff] %v13835_v34  ;;  %17828 = vst [vmem:[#allocation76_spill] sm:$0xff] %v13839_v42  ;;  %v2191_v14 = vpop.f32.mrf.mxu0  ;;  %9402 = vmatmul.mubr.msk.f32.gmra.mxu0 %vm975_vm13, %v13614_v32 }
 0x2e3   : > { %v2495_v18 = vadd.f32 %v2191_v14, %v13293_v0  ;;  %v2765_v51 = vpop.f32.mrf.mxu1  ;;  %3511 = vmatprep.mubr.f32.mxu0 %v17758_v26 }
 0x2e4   : > { %v13846_v59 = vadd.f32 %v2765_v51, %v13734_v2  ;;  %v13848_v61 = vpop.f32.mrf.mxu0 }
 0x2e5   : > { %17829 = vst [vmem:[#allocation77_spill] sm:$0xff] %v13848_v61  ;;  %v13850_v48 = vpop.f32.mrf.mxu1 }
 0x2e6   : > { %17830 = vst [vmem:[#allocation78_spill] sm:$0xff] %v13850_v48  ;;  %v2197_v52 = vpop.f32.mrf.mxu0  ;;  %9403 = vmatmul.mubr.msk.f32.gmra.mxu0 %vm975_vm13, %v13633_v63 }
 0x2e7   : > { %v2498_v36 = vadd.f32 %v2197_v52, %v13315_v40  ;;  %v2771_v9 = vpop.f32.mrf.mxu1  ;;  %3517 = vmatprep.mubr.f32.mxu0 %v17758_v26 }
 0x2e8   : > { %v13857_v0 = vadd.f32 %v2771_v9, %v13749_v19  ;;  %v13859_v32 = vpop.f32.mrf.mxu0 }
 0x2e9   : > { %17831 = vst [vmem:[#allocation79_spill] sm:$0xff] %v13859_v32  ;;  %v13861_v2 = vpop.f32.mrf.mxu1 }
 0x2ea   : > { %17832 = vst [vmem:[#allocation80_spill] sm:$0xff] %v13861_v2  ;;  %v2203_v14 = vpop.f32.mrf.mxu0  ;;  %9404 = vmatmul.mubr.msk.f32.gmra.mxu0 %vm975_vm13, %v13640_v33 }
 0x2eb   : > { %v2501_v51 = vadd.f32 %v2203_v14, %v13334_v5  ;;  %v2777_v48 = vpop.f32.mrf.mxu1  ;;  %3523 = vmatprep.mubr.f32.mxu0 %v17758_v26 }
 0x2ec   : > { %v13868_v40 = vadd.f32 %v2777_v48, %v13764_v20  ;;  %v13870_v63 = vpop.f32.mrf.mxu0 }
 0x2ed   : > { %17833 = vst [vmem:[#allocation81_spill] sm:$0xff] %v13870_v63  ;;  %v13872_v19 = vpop.f32.mrf.mxu1 }
 0x2ee   : > { %17834 = vst [vmem:[#allocation82_spill] sm:$0xff] %v13872_v19  ;;  %v2209_v52 = vpop.f32.mrf.mxu0  ;;  %9405 = vmatmul.mubr.msk.f32.gmra.mxu0 %vm975_vm13, %v13659_v7 }
 0x2ef   : > { %v2504_v9 = vadd.f32 %v2209_v52, %v13358_v62  ;;  %v2783_v2 = vpop.f32.mrf.mxu1 }
 0x2f0   : > { %v13878_v33 = vadd.f32 %v2783_v2, %v13779_v31  ;;  %v13880_v5 = vpop.f32.mrf.mxu0 }
 0x2f1   : > { %17835 = vst [vmem:[#allocation83_spill] sm:$0xff] %v13880_v5  ;;  %v13882_v14 = vpop.f32.mrf.mxu1 }
 0x2f2   : > { %17836 = vst [vmem:[#allocation84_spill] sm:$0xff] %v13882_v14  ;;  %v2215_v20 = vpop.f32.mrf.mxu0 }
 0x2f3   : > { %v2507_v48 = vadd.f32 %v2215_v20, %v13386_v37  ;;  %v2789_v58 = vpop.f32.mrf.mxu1 }
 0x2f4   : > { %v13886_v19 = vadd.f32 %v2789_v58, %v13794_v6  ;;  %v13888_v4 = vpop.f32.mrf.mxu0 }
 0x2f5   : > { %17837 = vst [vmem:[#allocation85_spill] sm:$0xff] %v13888_v4  ;;  %v13890_v7 = vpop.f32.mrf.mxu1 }
 0x2f6   : > { %17838 = vst [vmem:[#allocation86_spill] sm:$0xff] %v13890_v7  ;;  %v2221_v62 = vpop.f32.mrf.mxu0 }
 0x2f7   : > { %v2510_v52 = vadd.f32 %v2221_v62, %v13414_v24  ;;  %v2795_v31 = vpop.f32.mrf.mxu1 }
 0x2f8   : > { %v13894_v2 = vadd.f32 %v2795_v31, %v13808_v43  ;;  %v13896_v57 = vpop.f32.mrf.mxu0 }
 0x2f9   : > { %17840 = vst [vmem:[#allocation88_spill] sm:$0xff] %v13896_v57  ;;  %v13898_v14 = vpop.f32.mrf.mxu1 }
 0x2fa   : > { %17839 = vst [vmem:[#allocation87_spill] sm:$0xff] %v13894_v2  ;;  %17841 = vst [vmem:[#allocation89_spill] sm:$0xff] %v13898_v14  ;;  %v2227_v37 = vpop.f32.mrf.mxu0 }
 0x2fb   : > { %v2513_v20 = vadd.f32 %v2227_v37, %v13441_v39  ;;  %v2801_v6 = vpop.f32.mrf.mxu1 }
 0x2fc   : > { %v13901_v58 = vadd.f32 %v2801_v6, %v2489_v38  ;;  %v13903_v61 = vpop.f32.mrf.mxu0 }
 0x2fd   : > { %17843 = vst [vmem:[#allocation91_spill] sm:$0xff] %v13903_v61  ;;  %v13905_v7 = vpop.f32.mrf.mxu1 }
 0x2fe   : > { %17842 = vst [vmem:[#allocation90_spill] sm:$0xff] %v13901_v58  ;;  %17844 = vst [vmem:[#allocation92_spill] sm:$0xff] %v13905_v7  ;;  %v2233_v32 = vpop.f32.mrf.mxu0 }
 0x2ff   : > { %v2516_v24 = vadd.f32 %v2233_v32, %v13467_v16  ;;  %v2807_v62 = vpop.f32.mrf.mxu1 }
 0x300   : > { %v13908_v43 = vadd.f32 %v2807_v62, %v2492_v50  ;;  %v13910_v31 = vpop.f32.mrf.mxu0 }
 0x301   : > { %17846 = vst [vmem:[#allocation94_spill] sm:$0xff] %v13910_v31  ;;  %v13912_v2 = vpop.f32.mrf.mxu1 }
 0x302   : > { %17845 = vst [vmem:[#allocation93_spill] sm:$0xff] %v13908_v43  ;;  %17847 = vst [vmem:[#allocation95_spill] sm:$0xff] %v13912_v2  ;;  %v2239_v14 = vpop.f32.mrf.mxu0 }
 0x303   : > { %v2519_v39 = vadd.f32 %v2239_v14, %v13494_v30  ;;  %v2813_v37 = vpop.f32.mrf.mxu1 }
 0x304   : > { %v13915_v38 = vadd.f32 %v2813_v37, %v2495_v18  ;;  %v13917_v6 = vpop.f32.mrf.mxu0 }
 0x305   : > { %17849 = vst [vmem:[#allocation97_spill] sm:$0xff] %v13917_v6  ;;  %v13919_v58 = vpop.f32.mrf.mxu1 }
 0x306   : > { %17848 = vst [vmem:[#allocation96_spill] sm:$0xff] %v13915_v38  ;;  %17850 = vst [vmem:[#allocation98_spill] sm:$0xff] %v13919_v58  ;;  %v2245_v7 = vpop.f32.mrf.mxu0 }
 0x307   : > { %v2522_v16 = vadd.f32 %v2245_v7, %v13520_v56  ;;  %v2819_v32 = vpop.f32.mrf.mxu1 }
 0x308   : > { %v13922_v50 = vadd.f32 %v2819_v32, %v2498_v36  ;;  %v13924_v62 = vpop.f32.mrf.mxu0 }
 0x309   : > { %17852 = vst [vmem:[#allocation100_spill] sm:$0xff] %v13924_v62  ;;  %v13926_v43 = vpop.f32.mrf.mxu1 }
 0x30a   : > { %17851 = vst [vmem:[#allocation99_spill] sm:$0xff] %v13922_v50  ;;  %17853 = vst [vmem:[#allocation101_spill] sm:$0xff] %v13926_v43  ;;  %v2251_v2 = vpop.f32.mrf.mxu0 }
 0x30b   : > { %v2525_v30 = vadd.f32 %v2251_v2, %v13546_v47  ;;  %v2825_v14 = vpop.f32.mrf.mxu1 }
 0x30c   : > { %v13929_v18 = vadd.f32 %v2825_v14, %v2501_v51  ;;  %v13931_v37 = vpop.f32.mrf.mxu0 }
 0x30d   : > { %17855 = vst [vmem:[#allocation103_spill] sm:$0xff] %v13931_v37  ;;  %v13933_v6 = vpop.f32.mrf.mxu1 }
 0x30e   : > { %17854 = vst [vmem:[#allocation102_spill] sm:$0xff] %v13929_v18  ;;  %17856 = vst [vmem:[#allocation104_spill] sm:$0xff] %v13933_v6  ;;  %v2257_v38 = vpop.f32.mrf.mxu0  ;;  %v17863_v18 = vld [vmem:[#allocation58_spill] sm:$0xff] }
 0x30f   : > { %v2528_v56 = vadd.f32 %v2257_v38, %v13572_v60  ;;  %v2831_v7 = vpop.f32.mrf.mxu1 }
 0x310   : > { %v13936_v36 = vadd.f32 %v2831_v7, %v2504_v9  ;;  %v13938_v32 = vpop.f32.mrf.mxu0 }
 0x311   : > { %17858 = vst [vmem:[#allocation106_spill] sm:$0xff] %v13938_v32  ;;  %v13940_v62 = vpop.f32.mrf.mxu1 }
 0x312   : > { %17857 = vst [vmem:[#allocation105_spill] sm:$0xff] %v13936_v36  ;;  %17859 = vst [vmem:[#allocation107_spill] sm:$0xff] %v13940_v62  ;;  %v2263_v50 = vpop.f32.mrf.mxu0  ;;  %v17867_v36 = vld [vmem:[#allocation61_spill] sm:$0xff] }
 0x313   : > { %v2531_v47 = vadd.f32 %v2263_v50, %v13598_v17  ;;  %v2837_v2 = vpop.f32.mrf.mxu1 }
 0x314   : > { %v13943_v51 = vadd.f32 %v2837_v2, %v2507_v48  ;;  %v13945_v14 = vpop.f32.mrf.mxu0 }
 0x315   : > { %17861 = vst [vmem:[#allocation109_spill] sm:$0xff] %v13945_v14  ;;  %v13947_v37 = vpop.f32.mrf.mxu1 }
 0x316   : > { %17860 = vst [vmem:[#allocation108_spill] sm:$0xff] %v13943_v51  ;;  %17862 = vst [vmem:[#allocation110_spill] sm:$0xff] %v13947_v37  ;;  %v2269_v58 = vpop.f32.mrf.mxu0 }
 0x317   : > { %v2534_v60 = vadd.f32 %v2269_v58, %v17863_v18  ;;  %v2843_v38 = vpop.f32.mrf.mxu1 }
 0x318   : > { %v13950_v9 = vadd.f32 %v2843_v38, %v2510_v52  ;;  %v13952_v7 = vpop.f32.mrf.mxu0 }
 0x319   : > { %17865 = vst [vmem:[#allocation111_spill] sm:$0xff] %v13952_v7  ;;  %v13954_v32 = vpop.f32.mrf.mxu1 }
 0x31a   : > { %17864 = vst [vmem:[#allocation58_spill] sm:$0xff] %v13950_v9  ;;  %17866 = vst [vmem:[#allocation112_spill] sm:$0xff] %v13954_v32  ;;  %v2275_v43 = vpop.f32.mrf.mxu0 }
 0x31b   : > { %v2537_v17 = vadd.f32 %v2275_v43, %v17867_v36  ;;  %v2849_v50 = vpop.f32.mrf.mxu1 }
 0x31c   : > { %v13957_v48 = vadd.f32 %v2849_v50, %v2513_v20  ;;  %v13959_v2 = vpop.f32.mrf.mxu0 }
 0x31d   : > { %17869 = vst [vmem:[#allocation113_spill] sm:$0xff] %v13959_v2  ;;  %v13961_v14 = vpop.f32.mrf.mxu1 }
 0x31e   : > { %17868 = vst [vmem:[#allocation61_spill] sm:$0xff] %v13957_v48  ;;  %17870 = vst [vmem:[#allocation114_spill] sm:$0xff] %v13961_v14  ;;  %v2281_v6 = vpop.f32.mrf.mxu0 }
 0x31f   : > { %v2540_v58 = vadd.f32 %v2281_v6, %v13671_v44  ;;  %v2855_v18 = vpop.f32.mrf.mxu1 }
 0x320   : > { %v13964_v52 = vadd.f32 %v2855_v18, %v2516_v24  ;;  %v13966_v38 = vpop.f32.mrf.mxu0 }
 0x321   : > { %17872 = vst [vmem:[#allocation116_spill] sm:$0xff] %v13966_v38  ;;  %v13968_v7 = vpop.f32.mrf.mxu1 }
 0x322   : > { %17871 = vst [vmem:[#allocation115_spill] sm:$0xff] %v13964_v52  ;;  %17873 = vst [vmem:[#allocation117_spill] sm:$0xff] %v13968_v7  ;;  %v10533_v51 = vpop.f32.mrf.mxu0 }
 0x323   : > { %v13971_v43 = vadd.f32 %v10533_v51, %v13684_v29  ;;  %v2861_v20 = vpop.f32.mrf.mxu1 }
 0x324   : > { %v13973_v36 = vadd.f32 %v2861_v20, %v2519_v39  ;;  %v13975_v50 = vpop.f32.mrf.mxu0 }
 0x325   : > { %17874 = vst [vmem:[#allocation118_spill] sm:$0xff] %v13971_v43  ;;  %17876 = vst [vmem:[#allocation120_spill] sm:$0xff] %v13975_v50  ;;  %v13977_v2 = vpop.f32.mrf.mxu1  ;;  %v17915_v50 = vld [vmem:[#allocation59_spill] sm:$0xff] }
 0x326   : > { %17875 = vst [vmem:[#allocation119_spill] sm:$0xff] %v13973_v36  ;;  %17877 = vst [vmem:[#allocation121_spill] sm:$0xff] %v13977_v2  ;;  %v10536_v62 = vpop.f32.mrf.mxu0 }
 0x327   : > { %v13980_v44 = vadd.f32 %v10536_v62, %v13697_v10  ;;  %v2867_v24 = vpop.f32.mrf.mxu1 }
 0x328   : > { %v13982_v6 = vadd.f32 %v2867_v24, %v2522_v16  ;;  %v13984_v18 = vpop.f32.mrf.mxu0 }
 0x329   : > { %v13986_v38 = vpop.f32.mrf.mxu1 }
 0x32a   : > { %17878 = vst [vmem:[#allocation122_spill] sm:$0xff] %v13982_v6  ;;  %17879 = vst [vmem:[#allocation123_spill] sm:$0xff] %v13986_v38  ;;  %v10539_v29 = vpop.f32.mrf.mxu0 }
 0x32b   : > { %v13989_v51 = vadd.f32 %v10539_v29, %v13710_v27  ;;  %v2873_v39 = vpop.f32.mrf.mxu1 }
 0x32c   : > { %v13991_v20 = vadd.f32 %v2873_v39, %v2525_v30  ;;  %v13993_v36 = vpop.f32.mrf.mxu0 }
 0x32d   : > { %v13995_v2 = vpop.f32.mrf.mxu1 }
 0x32e   : > { %17880 = vst [vmem:[#allocation124_spill] sm:$0xff] %v13991_v20  ;;  %17881 = vst [vmem:[#allocation125_spill] sm:$0xff] %v13995_v2  ;;  %v13997_v10 = vpop.f32.mrf.mxu0 }
 0x32f   : > { %v2879_v62 = vpop.f32.mrf.mxu1 }
 0x330   : > { %v13999_v16 = vadd.f32 %v2879_v62, %v2528_v56  ;;  %v14001_v24 = vpop.f32.mrf.mxu0 }
 0x331   : > { %v14003_v6 = vpop.f32.mrf.mxu1 }
 0x332   : > { %17882 = vst [vmem:[#allocation126_spill] sm:$0xff] %v13999_v16  ;;  %17883 = vst [vmem:[#allocation127_spill] sm:$0xff] %v14003_v6  ;;  %v14005_v38 = vpop.f32.mrf.mxu0 }
 0x333   : > { %v2885_v27 = vpop.f32.mrf.mxu1 }
 0x334   : > { %v14007_v29 = vadd.f32 %v2885_v27, %v2531_v47  ;;  %v14009_v30 = vpop.f32.mrf.mxu0 }
 0x335   : > { %v14011_v39 = vpop.f32.mrf.mxu1 }
 0x336   : > { %17884 = vst [vmem:[#allocation128_spill] sm:$0xff] %v14007_v29  ;;  %17885 = vst [vmem:[#allocation129_spill] sm:$0xff] %v14011_v39  ;;  %v14013_v20 = vpop.f32.mrf.mxu0 }
 0x337   : > { %v2891_v2 = vpop.f32.mrf.mxu1 }
 0x338   : > { %v14015_v9 = vadd.f32 %v2891_v2, %v2534_v60  ;;  %v14017_v56 = vpop.f32.mrf.mxu0 }
 0x339   : > { %v14019_v62 = vpop.f32.mrf.mxu1 }
 0x33a   : > { %17886 = vst [vmem:[#allocation130_spill] sm:$0xff] %v14015_v9  ;;  %17887 = vst [vmem:[#allocation131_spill] sm:$0xff] %v14019_v62  ;;  %v10551_v16 = vpop.f32.mrf.mxu0 }
 0x33b   : > { %v2897_v6 = vpop.f32.mrf.mxu1  ;;  %v3134_v43 = vadd.f32 %v10551_v16, %v13767_v8  ;;  %v17916_v16 = vld [vmem:[#allocation12_spill] sm:$0xff] }
 0x33c   : > { %v14021_v63 = vadd.f32 %v2897_v6, %v2537_v17  ;;  %v3034_v37 = vpop.f32.mrf.mxu0 }
 0x33d   : > { %v14023_v47 = vpop.f32.mrf.mxu1 }
 0x33e   : > { %17888 = vst [vmem:[#allocation132_spill] sm:$0xff] %v14021_v63  ;;  %17889 = vst [vmem:[#allocation133_spill] sm:$0xff] %v14023_v47  ;;  %v10554_v27 = vpop.f32.mrf.mxu0 }
 0x33f   : > { %v2903_v29 = vpop.f32.mrf.mxu1 }
 0x340   : > { %v14025_v5 = vadd.f32 %v2903_v29, %v2540_v58  ;;  %v3044_v39 = vpop.f32.mrf.mxu0  ;;  %v4076_v58 = vld [vmem:[%s17897_s3 + $0x8] sm:$0xff] }
 0x341   : > { %v14027_v48 = vpop.f32.mrf.mxu1  ;;  %9431 = vmatprep.mubr.msk.f32.mxu1 %vm4099_vm7, %v4076_v58  ;;  %9443 = vmatprep.mubr.msk.f32.mxu0 %vm4099_vm7, %v4076_v58 }
 0x342   : > { %17890 = vst [vmem:[#allocation134_spill] sm:$0xff] %v14025_v5  ;;  %17891 = vst [vmem:[#allocation135_spill] sm:$0xff] %v14027_v48  ;;  %v10557_v60 = vpop.f32.mrf.mxu0  ;;  %v14055_v48 = vpop.permute.xlu0 %3888 }
 0x343   : > { %v14030_v2 = vadd.f32 %v10557_v60, %v13797_v12  ;;  %v14032_v9 = vpop.f32.mrf.mxu1  ;;  %v14049_v60 = vpop.permute.xlu1 %3883 }
 0x344   : > { %17893 = vst [vmem:[#allocation137_spill] sm:$0xff] %v14032_v9  ;;  %v14034_v62 = vpop.f32.mrf.mxu0 }
 0x345   : > { %17892 = vst [vmem:[#allocation136_spill] sm:$0xff] %v14030_v2  ;;  %17894 = vst [vmem:[#allocation138_spill] sm:$0xff] %v14034_v62  ;;  %v14036_v17 = vpop.f32.mrf.mxu1 }
 0x346   : > { %17895 = vst [vmem:[#allocation139_spill] sm:$0xff] %v14036_v17  ;;  %v14038_v6 = vpop.f32.mrf.mxu0  ;;  %v14071_v31 = vpop.permute.xlu0 %3873  ;;  %v17912_v17 = vld [vmem:[#allocation17_spill] sm:$0xff] }
 0x347   : > { %17896 = vst [vmem:[#allocation140_spill] sm:$0xff] %v14038_v6  ;;  %v14043_v29 = vpop.f32.mrf.mxu1  ;;  %v14065_v4 = vpop.permute.xlu1 %3878  ;;  %v1873_v42 = vadd.f32 %v13673_v13, %v17912_v17 }
 0x348   : > { %17898 = vst [vmem:[#allocation141_spill] sm:$0xff] %v14043_v29  ;;  %v14047_v12 = vpop.f32.mrf.mxu0 }
 0x349   : > { %17899 = vst [vmem:[#allocation142_spill] sm:$0xff] %v14047_v12  ;;  %v14051_v63 = vpop.f32.mrf.mxu1 }
 0x34a   : > { %17900 = vst [vmem:[#allocation143_spill] sm:$0xff] %v14051_v63  ;;  %v14053_v5 = vpop.f32.mrf.mxu0  ;;  %v14086_v41 = vpop.permute.xlu0 %3863 }
 0x34b   : > { %17901 = vst [vmem:[#allocation144_spill] sm:$0xff] %v14053_v5  ;;  %v14057_v47 = vpop.f32.mrf.mxu1  ;;  %v14082_v12 = vpop.permute.xlu1 %3868 }
 0x34c   : > { %v14059_v52 = vpop.f32.mrf.mxu0 }
 0x34d   : > { %17902 = vst [vmem:[#allocation145_spill] sm:$0xff] %v14059_v52  ;;  %v14061_v7 = vpop.f32.mrf.mxu1 }
 0x34e   : > { %v14063_v32 = vpop.f32.mrf.mxu0 }
 0x34f   : > { %17903 = vst [vmem:[#allocation146_spill] sm:$0xff] %v14063_v32  ;;  %v14067_v58 = vpop.f32.mrf.mxu1  ;;  %v17911_v32 = vld [vmem:[#allocation62_spill] sm:$0xff] }
 0x350   : > { %v14069_v14 = vpop.f32.mrf.mxu0 }
 0x351   : > { %17904 = vst [vmem:[#allocation147_spill] sm:$0xff] %v14069_v14  ;;  %v14073_v57 = vpop.f32.mrf.mxu1  ;;  %v17910_v14 = vld [vmem:[#allocation15_spill] sm:$0xff] }
 0x352   : > { %v3387_v61 = vpop.f32.mrf.mxu0  ;;  %v1863_v34 = vadd.f32 %v17911_v32, %v17910_v14 }
 0x353   : > { %v14076_v2 = vadd.f32 %v3387_v61, %v13846_v59  ;;  %v14078_v62 = vpop.f32.mrf.mxu1  ;;  %v14093_v61 = vpop.permute.xlu1 %3858 }
 0x354   : > { %v14080_v28 = vpop.f32.mrf.mxu0 }
 0x355   : > { %17905 = vst [vmem:[#allocation148_spill] sm:$0xff] %v14076_v2  ;;  %17906 = vst [vmem:[#allocation149_spill] sm:$0xff] %v14080_v28  ;;  %v14084_v6 = vpop.f32.mrf.mxu1 }
 0x356   : > { %v3393_v45 = vpop.f32.mrf.mxu0 }
 0x357   : > { %v14089_v52 = vadd.f32 %v3393_v45, %v13857_v0  ;;  %v10594_v5 = vpop.f32.mrf.mxu1  ;;  %v14104_v45 = vpop.permute.xlu0 %3853 }
 0x358   : > { %v14091_v1 = vpop.f32.mrf.mxu0 }
 0x359   : > { %17907 = vst [vmem:[#allocation150_spill] sm:$0xff] %v14089_v52  ;;  %17908 = vst [vmem:[#allocation151_spill] sm:$0xff] %v14091_v1  ;;  %v3646_v22 = vpop.f32.mrf.mxu1  ;;  %v2509_v52 = vadd.f32 %v13772_v53, %v1863_v34  ;;  %v2515_v1 = vadd.f32 %v13787_v55, %v1873_v42  ;;  %v14118_v55 = vpop.permute.xlu1 %3848 }
 0x35a   : > { %v3399_v59 = vpop.f32.mrf.mxu0 }
 0x35b   : > { %v14096_v2 = vadd.f32 %v3399_v59, %v13868_v40  ;;  %v10597_v28 = vpop.f32.mrf.mxu1  ;;  %v3140_v40 = vadd.f32 %v10554_v27, %v13782_v15  ;;  %v3131_v17 = vadd.f32 %v3034_v37, %v2509_v52  ;;  %v3128_v15 = vadd.f32 %v14013_v20, %v13752_v46  ;;  %v17917_v37 = vld [vmem:[#allocation56_spill] sm:$0xff]  ;;  %v14126_v52 = vpop.permute.xlu0 %3843 }
 0x35c   : > { %v14102_v9 = vpop.f32.mrf.mxu0  ;;  %v3756_v63 = vadd.f32 %v10597_v28, %v3134_v43 }
 0x35d   : > { %17909 = vst [vmem:[#allocation152_spill] sm:$0xff] %v14096_v2  ;;  %17913 = vst [vmem:[#allocation15_spill] sm:$0xff] %v14102_v9  ;;  %v3656_v0 = vpop.f32.mrf.mxu1  ;;  %v17914_v2 = vld [vmem:[#allocation13_spill] sm:$0xff]  ;;  %v3137_v9 = vadd.f32 %v3044_v39, %v2515_v1  ;;  %v1843_v1 = vadd.f32 %v17917_v37, %v17916_v16  ;;  %v3750_v39 = vadd.f32 %v10594_v5, %v3128_v15  ;;  %v17919_v5 = vld [vmem:[#allocation54_spill] sm:$0xff] }
 0x35e   : > { %v3405_v59 = vpop.f32.mrf.mxu0  ;;  %v1853_v32 = vadd.f32 %v17915_v50, %v17914_v2  ;;  %v3753_v34 = vadd.f32 %v3656_v0, %v3131_v17  ;;  %v3972_v46 = vadd.f32 %v14065_v4, %v3756_v63  ;;  %v17918_v63 = vld [vmem:[#allocation11_spill] sm:$0xff]  ;;  %v17921_v16 = vld [vmem:[#allocation52_spill] sm:$0xff] }
 0x35f   : > { %v14113_v14 = vadd.f32 %v3405_v59, %v13878_v33  ;;  %v10600_v13 = vpop.f32.mrf.mxu1  ;;  %v2497_v27 = vadd.f32 %v13742_v35, %v1843_v1  ;;  %v14158_v15 = vpop.permute.xlu0 %3833 }
 0x360   : > { %v3762_v21 = vadd.f32 %v10600_v13, %v3140_v40  ;;  %v14115_v29 = vpop.f32.mrf.mxu0  ;;  %v2503_v53 = vadd.f32 %v13757_v3, %v1853_v32  ;;  %v1833_v32 = vadd.f32 %v17919_v5, %v17918_v63  ;;  %v14147_v13 = vpop.permute.xlu1 %3838 }
 0x361   : > { %v3666_v8 = vpop.f32.mrf.mxu1  ;;  %v3119_v35 = vadd.f32 %v14009_v30, %v2497_v27 }
 0x362   : > { %v3978_v42 = vadd.f32 %v14055_v48, %v3762_v21  ;;  %v3759_v33 = vadd.f32 %v3666_v8, %v3137_v9  ;;  %v3411_v50 = vpop.f32.mrf.mxu0  ;;  %v3125_v28 = vadd.f32 %v14017_v56, %v2503_v53  ;;  %v3122_v56 = vadd.f32 %v14005_v38, %v13737_v25 }
 0x363   : > { %v14129_v3 = vadd.f32 %v3411_v50, %v13886_v19  ;;  %v14131_v43 = vpop.f32.mrf.mxu1  ;;  %v3969_v19 = vadd.f32 %v14071_v31, %v3753_v34  ;;  %v4044_v38 = vmax.f32 %v3972_v46, 0.0  ;;  %v2491_v8 = vadd.f32 %v13727_v11, %v1833_v32  ;;  %v17920_v50 = vld [vmem:[#allocation10_spill] sm:$0xff] }
 0x364   : > { %v4050_v20 = vmax.f32 %v3978_v42, 0.0  ;;  %v3975_v21 = vadd.f32 %v14049_v60, %v3759_v33  ;;  %v14135_v9 = vpop.f32.mrf.mxu0  ;;  %v3747_v0 = vadd.f32 %v3646_v22, %v3125_v28  ;;  %v3744_v25 = vadd.f32 %v14078_v62, %v3122_v56  ;;  %v17923_v56 = vld [vmem:[#allocation50_spill] sm:$0xff] }
 0x365   : > { %v14138_v2 = vpop.f32.mrf.mxu1  ;;  %v3966_v22 = vadd.f32 %v14082_v12, %v3750_v39  ;;  %v3116_v34 = vadd.f32 %v13997_v10, %v13723_v54  ;;  %v3741_v42 = vadd.f32 %v14084_v6, %v3119_v35  ;;  %v4041_v62 = vmax.f32 %v3969_v19, 0.0  ;;  %v14177_v39 = vpop.permute.xlu1 %3828 }
 0x366   : > { %v4047_v40 = vmax.f32 %v3975_v21, 0.0  ;;  %v14143_v59 = vpop.f32.mrf.mxu0  ;;  %4274 = vmatpush1.msra.mxu0 %v4050_v20  ;;  %v3963_v30 = vadd.f32 %v14086_v41, %v3747_v0  ;;  %v1823_v37 = vadd.f32 %v17921_v16, %v17920_v50  ;;  %v3113_v11 = vadd.f32 %v14001_v24, %v2491_v8  ;;  %v14187_v19 = vpop.permute.xlu0 %3823 }
 0x367   : > { %v14149_v17 = vpop.f32.mrf.mxu1  ;;  %4275 = vmatprep.subr.mxu0 %v17758_v26  ;;  %v3738_v28 = vadd.f32 %v14067_v58, %v3116_v34  ;;  %v3960_v54 = vadd.f32 %v14093_v61, %v3744_v25  ;;  %v4038_v10 = vmax.f32 %v3966_v22, 0.0  ;;  %v3957_v21 = vadd.f32 %v14104_v45, %v3741_v42  ;;  %v17922_v58 = vld [vmem:[#allocation9_spill] sm:$0xff]  ;;  %17924 = vst [vmem:[#allocation62_spill] sm:$0xff] %v14187_v19 }
 0x368   : > { %v14155_v53 = vpop.f32.mrf.mxu0  ;;  %4276 = vmatpush1.msra.mxu0 %v4047_v40  ;;  %v2485_v46 = vadd.f32 %v13714_v23, %v1823_v37  ;;  %v3735_v20 = vadd.f32 %v14073_v57, %v3113_v11  ;;  %v4035_v27 = vmax.f32 %v3963_v30, 0.0  ;;  %v1813_v0 = vadd.f32 %v17923_v56, %v17922_v58  ;;  %v17930_v11 = vld [vmem:[#allocation66_spill] sm:$0xff] }
 0x369   : > { %4277 = vmatprep.subr.mxu0 %v17758_v26  ;;  %v14169_v1 = vpop.f32.mrf.mxu1  ;;  %v3732_v23 = vadd.f32 %v14057_v47, %v13989_v51  ;;  %v3954_v57 = vadd.f32 %v14118_v55, %v3738_v28  ;;  %v4032_v5 = vmax.f32 %v3960_v54, 0.0  ;;  %v17926_v51 = vld [vmem:[#allocation48_spill] sm:$0xff]  ;;  %v14206_v34 = vpop.permute.xlu1 %3818  ;;  %v17931_v54 = vld [vmem:[#allocation143_spill] sm:$0xff] }
 0x36a   : > { %v14165_v33 = vpop.f32.mrf.mxu0  ;;  %4278 = vmatpush1.msra.mxu0 %v4044_v38  ;;  %v3107_v63 = vadd.f32 %v13993_v36, %v2485_v46  ;;  %v2479_v35 = vadd.f32 %v13701_v49, %v1813_v0  ;;  %v3951_v22 = vadd.f32 %v14126_v52, %v3735_v20  ;;  %v4029_v38 = vmax.f32 %v3957_v21, 0.0  ;;  %v17925_v36 = vld [vmem:[#allocation8_spill] sm:$0xff]  ;;  %17927 = vst [vmem:[#allocation17_spill] sm:$0xff] %v14206_v34  ;;  %v17928_v49 = vld [vmem:[#allocation141_spill] sm:$0xff]  ;;  %v14217_v37 = vpop.permute.xlu0 %3813 }
 0x36b   : > { %4279 = vmatprep.subr.mxu0 %v17758_v26  ;;  %v14189_v40 = vpop.f32.mrf.mxu1  ;;  %v1803_v47 = vadd.f32 %v17926_v51, %v17925_v36  ;;  %v4026_v50 = vmax.f32 %v3954_v57, 0.0  ;;  %17929 = vst [vmem:[#allocation13_spill] sm:$0xff] %v14217_v37  ;;  %v17933_v21 = vld [vmem:[#allocation69_spill] sm:$0xff]  ;;  %v17935_v0 = vld [vmem:[#allocation120_spill] sm:$0xff] }
 0x36c   : > { %v14175_v6 = vpop.f32.mrf.mxu0  ;;  %4280 = vmatpush1.msra.mxu0 %v4041_v62  ;;  %v3729_v25 = vadd.f32 %v14061_v7, %v3107_v63  ;;  %v3101_v30 = vadd.f32 %v13984_v18, %v2479_v35  ;;  %v3726_v7 = vadd.f32 %v17928_v49, %v13980_v44  ;;  %v3948_v62 = vadd.f32 %v14147_v13, %v3732_v23  ;;  %v17932_v44 = vld [vmem:[#allocation25_spill] sm:$0xff]  ;;  %v17936_v23 = vld [vmem:[#allocation118_spill] sm:$0xff] }
 0x36d   : > { %4281 = vmatprep.subr.mxu0 %v17758_v26  ;;  %v14208_v42 = vpop.f32.mrf.mxu1  ;;  %v2473_v28 = vadd.f32 %v17930_v11, %v1803_v47  ;;  %v4023_v18 = vmax.f32 %v3951_v22, 0.0  ;;  %v14227_v58 = vpop.permute.xlu1 %3928  ;;  %v17937_v57 = vld [vmem:[#allocation137_spill] sm:$0xff]  ;;  %v17940_v47 = vld [vmem:[#allocation139_spill] sm:$0xff]  ;;  %v17941_v11 = vld [vmem:[#allocation24_spill] sm:$0xff] }
 0x36e   : > { %v14183_v24 = vpop.f32.mrf.mxu0  ;;  %4282 = vmatpush1.msra.mxu0 %v4038_v10  ;;  %v3723_v10 = vadd.f32 %v17931_v54, %v3101_v30  ;;  %v3945_v46 = vadd.f32 %v14158_v15, %v3729_v25  ;;  %17934 = vst [vmem:[#allocation59_spill] sm:$0xff] %v14227_v58  ;;  %v3942_v35 = vadd.f32 %v14177_v39, %v3726_v7  ;;  %v4020_v25 = vmax.f32 %v3948_v62, 0.0  ;;  %v14237_v51 = vpop.permute.xlu0 %3923  ;;  %v17943_v7 = vld [vmem:[#allocation23_spill] sm:$0xff]  ;;  %v17944_v62 = vld [vmem:[#allocation68_spill] sm:$0xff] }
 0x36f   : > { %4283 = vmatprep.subr.mxu0 %v17758_v26  ;;  %v10612_v56 = vpop.f32.mrf.mxu1  ;;  %v3095_v63 = vadd.f32 %v17935_v0, %v2473_v28  ;;  %17939 = vst [vmem:[#allocation12_spill] sm:$0xff] %v14237_v51  ;;  %v17942_v28 = vld [vmem:[#allocation146_spill] sm:$0xff] }
 0x370   : > { %v14196_v32 = vpop.f32.mrf.mxu0  ;;  %4284 = vmatpush1.msra.mxu0 %v4035_v27  ;;  %v1913_v27 = vadd.f32 %v17933_v21, %v17932_v44  ;;  %v3939_v49 = vadd.f32 %v14187_v19, %v3723_v10  ;;  %v3164_v54 = vadd.f32 %v17942_v28, %v17941_v11  ;;  %v4014_v0 = vmax.f32 %v3942_v35, 0.0  ;;  %v17948_v28 = vld [vmem:[#allocation22_spill] sm:$0xff] }
 0x371   : > { %4285 = vmatprep.subr.mxu0 %v17758_v26  ;;  %v3717_v30 = vadd.f32 %v17940_v47, %v3095_v63  ;;  %v3706_v21 = vpop.f32.mrf.mxu1  ;;  %v14254_v47 = vpop.permute.xlu1 %3918 }
 0x372   : > { %v14202_v8 = vpop.f32.mrf.mxu0  ;;  %4286 = vmatpush1.msra.mxu0 %v4032_v5  ;;  %v3720_v5 = vadd.f32 %v17937_v57, %v17936_v23  ;;  %v17945_v23 = vld [vmem:[#allocation147_spill] sm:$0xff]  ;;  %v3786_v57 = vadd.f32 %v10612_v56, %v3164_v54  ;;  %17947 = vst [vmem:[#allocation56_spill] sm:$0xff] %v14254_v47  ;;  %v4011_v11 = vmax.f32 %v3939_v49, 0.0  ;;  %v17950_v56 = vld [vmem:[#allocation21_spill] sm:$0xff] }
 0x373   : > { %4287 = vmatprep.subr.mxu0 %v17758_v26 }
 0x374   : > { %v14215_v16 = vpop.f32.mrf.mxu0  ;;  %4288 = vmatpush1.msra.mxu0 %v4029_v38  ;;  %v17938_v38 = vld [vmem:[#allocation76_spill] sm:$0xff]  ;;  %v4002_v49 = vadd.f32 %v14227_v58, %v3786_v57  ;;  %v17958_v57 = vld [vmem:[#allocation65_spill] sm:$0xff] }
 0x375   : > { %4289 = vmatprep.subr.mxu0 %v17758_v26  ;;  %v2539_v36 = vadd.f32 %v17938_v38, %v1913_v27  ;;  %v3936_v27 = vadd.f32 %v14206_v34, %v3720_v5 }
 0x376   : > { %v14223_v20 = vpop.f32.mrf.mxu0  ;;  %4290 = vmatpush1.msra.mxu0 %v4026_v50  ;;  %v4017_v50 = vmax.f32 %v3945_v46, 0.0  ;;  %v17946_v46 = vld [vmem:[#allocation74_spill] sm:$0xff] }
 0x377   : > { %4291 = vmatprep.subr.mxu0 %v17758_v26  ;;  %v3161_v63 = vadd.f32 %v17945_v23, %v2539_v36  ;;  %v17951_v36 = vld [vmem:[#allocation67_spill] sm:$0xff]  ;;  %v17953_v23 = vld [vmem:[#allocation145_spill] sm:$0xff] }
 0x378   : > { %v14234_v22 = vpop.f32.mrf.mxu0  ;;  %4292 = vmatpush1.msra.mxu0 %v4023_v18  ;;  %v1903_v18 = vadd.f32 %v17944_v62, %v17943_v7  ;;  %v17949_v7 = vld [vmem:[#allocation144_spill] sm:$0xff]  ;;  %v1893_v54 = vadd.f32 %v17951_v36, %v17950_v56 }
 0x379   : > { %4293 = vmatprep.subr.mxu0 %v17758_v26  ;;  %v3158_v62 = vadd.f32 %v17949_v7, %v17948_v28  ;;  %v3783_v5 = vadd.f32 %v3706_v21, %v3161_v63  ;;  %v17954_v21 = vld [vmem:[#allocation72_spill] sm:$0xff] }
 0x37a   : > { %v14244_v44 = vpop.f32.mrf.mxu0  ;;  %4294 = vmatpush1.msra.mxu0 %v4020_v25  ;;  %v2533_v38 = vadd.f32 %v17946_v46, %v1903_v18  ;;  %v3933_v25 = vadd.f32 %v14217_v37, %v3717_v30  ;;  %v4008_v18 = vmax.f32 %v3936_v27, 0.0  ;;  %v2527_v63 = vadd.f32 %v17954_v21, %v1893_v54  ;;  %v17956_v28 = vld [vmem:[#allocation140_spill] sm:$0xff] }
 0x37b   : > { %4295 = vmatprep.subr.mxu0 %v17758_v26  ;;  %v3780_v30 = vadd.f32 %v14189_v40, %v3158_v62  ;;  %v3999_v27 = vadd.f32 %v14237_v51, %v3783_v5  ;;  %v17957_v40 = vld [vmem:[#allocation19_spill] sm:$0xff] }
 0x37c   : > { %v14251_v10 = vpop.f32.mrf.mxu0  ;;  %4296 = vmatpush1.msra.mxu0 %v4017_v50  ;;  %v14264_v50 = vpop.permute.xlu0 %3913  ;;  %v3155_v46 = vadd.f32 %v17953_v23, %v2533_v38  ;;  %v4005_v56 = vmax.f32 %v3933_v25, 0.0  ;;  %v1883_v62 = vadd.f32 %v17958_v57, %v17957_v40 }
 0x37d   : > { %4297 = vmatprep.subr.mxu0 %v17758_v26  ;;  %17952 = vst [vmem:[#allocation11_spill] sm:$0xff] %v14264_v50  ;;  %v14282_v23 = vpop.permute.xlu1 %3908  ;;  %v3996_v25 = vadd.f32 %v14254_v47, %v3780_v30  ;;  %v4071_v57 = vmax.f32 %v3999_v27, 0.0 }
 0x37e   : > { %v14260_v35 = vpop.f32.mrf.mxu0  ;;  %4298 = vmatpush1.msra.mxu0 %v4014_v0  ;;  %v17955_v0 = vld [vmem:[#allocation18_spill] sm:$0xff]  ;;  %v3777_v36 = vadd.f32 %v14208_v42, %v3155_v46  ;;  %17959 = vst [vmem:[#allocation54_spill] sm:$0xff] %v14282_v23 }
 0x37f   : > { %4299 = vmatprep.subr.mxu0 %v17758_v26  ;;  %v3152_v7 = vadd.f32 %v17956_v28, %v17955_v0  ;;  %v4074_v0 = vmax.f32 %v4002_v49, 0.0  ;;  %v17964_v49 = vld [vmem:[#allocation136_spill] sm:$0xff] }
 0x380   : > { %v14270_v37 = vpop.f32.mrf.mxu0  ;;  %4300 = vmatpush1.msra.mxu0 %v4011_v11  ;;  %v17960_v11 = vld [vmem:[#allocation142_spill] sm:$0xff]  ;;  %v14290_v5 = vpop.permute.xlu0 %3903  ;;  %v3993_v40 = vadd.f32 %v14264_v50, %v3777_v36 }
 0x381   : > { %4301 = vmatprep.subr.mxu0 %v17758_v26  ;;  %v3149_v54 = vadd.f32 %v17960_v11, %v2527_v63  ;;  %v3774_v21 = vadd.f32 %v14149_v17, %v3152_v7  ;;  %17961 = vst [vmem:[#allocation10_spill] sm:$0xff] %v14290_v5  ;;  %v17963_v17 = vld [vmem:[#allocation138_spill] sm:$0xff]  ;;  %v3768_v7 = vadd.f32 %v14131_v43, %v17964_v49  ;;  %v4068_v11 = vmax.f32 %v3996_v25, 0.0  ;;  %v17970_v49 = vld [vmem:[#allocation88_spill] sm:$0xff] }
 0x382   : > { %v14278_v38 = vpop.f32.mrf.mxu0  ;;  %4302 = vmatpush1.msra.mxu0 %v4008_v18  ;;  %v17962_v18 = vld [vmem:[#allocation16_spill] sm:$0xff]  ;;  %v4065_v27 = vmax.f32 %v3993_v40, 0.0 }
 0x383   : > { %4303 = vmatprep.subr.mxu0 %v17758_v26  ;;  %v2521_v46 = vadd.f32 %v17962_v18, %v1883_v62  ;;  %v3771_v28 = vadd.f32 %v14169_v1, %v3149_v54  ;;  %v14301_v62 = vpop.permute.xlu1 %3898  ;;  %v17967_v18 = vld [vmem:[#allocation91_spill] sm:$0xff] }
 0x384   : > { %v14288_v42 = vpop.f32.mrf.mxu0  ;;  %4304 = vmatpush1.msra.mxu0 %v4005_v56  ;;  %v3990_v56 = vadd.f32 %v14282_v23, %v3774_v21  ;;  %17965 = vst [vmem:[#allocation52_spill] sm:$0xff] %v14301_v62  ;;  %v14308_v43 = vpop.permute.xlu0 %3893  ;;  %v3984_v21 = vadd.f32 %v14301_v62, %v3768_v7  ;;  %v17977_v62 = vld [vmem:[#allocation117_spill] sm:$0xff] }
 0x385   : > { %4321 = vmatprep.subr.mxu0 %v17758_v26  ;;  %v3143_v30 = vadd.f32 %v17963_v17, %v2521_v46  ;;  %v3987_v36 = vadd.f32 %v14290_v5, %v3771_v28  ;;  %17968 = vst [vmem:[#allocation9_spill] sm:$0xff] %v14308_v43  ;;  %v17969_v17 = vld [vmem:[#allocation43_spill] sm:$0xff]  ;;  %v17972_v28 = vld [vmem:[#allocation94_spill] sm:$0xff] }
 0x386   : > { %v3465_v63 = vpop.f32.mrf.mxu0  ;;  %4322 = vmatpush2.msra.mxu0 %v4074_v0  ;;  %v17966_v0 = vld [vmem:[#allocation45_spill] sm:$0xff]  ;;  %v4062_v25 = vmax.f32 %v3990_v56, 0.0  ;;  %v17973_v5 = vld [vmem:[#allocation114_spill] sm:$0xff]  ;;  %v17976_v56 = vld [vmem:[#allocation112_spill] sm:$0xff] }
 0x387   : > { %4323 = vmatprep.subr.mxu0 %v17758_v26  ;;  %v3765_v1 = vadd.f32 %v14138_v2, %v3143_v30  ;;  %v2514_v46 = vadd.f32 %v17967_v18, %v17966_v0  ;;  %v2511_v2 = vadd.f32 %v17970_v49, %v17969_v17  ;;  %v17971_v30 = vld [vmem:[#allocation47_spill] sm:$0xff]  ;;  %v17974_v0 = vld [vmem:[#allocation41_spill] sm:$0xff]  ;;  %v4059_v51 = vmax.f32 %v3987_v36, 0.0  ;;  %v17982_v36 = vld [vmem:[#allocation110_spill] sm:$0xff] }
 0x388   : > { %v3467_v47 = vpop.f32.mrf.mxu0  ;;  %4324 = vmatpush2.msra.mxu0 %v4071_v57  ;;  %v2517_v40 = vadd.f32 %v17972_v28, %v17971_v30  ;;  %v17975_v18 = vld [vmem:[#allocation85_spill] sm:$0xff]  ;;  %v17978_v49 = vld [vmem:[#allocation115_spill] sm:$0xff] }
 0x389   : > { %4325 = vmatprep.subr.mxu0 %v17758_v26  ;;  %v2508_v23 = vadd.f32 %v17975_v18, %v17974_v0  ;;  %v3981_v50 = vadd.f32 %v14308_v43, %v3765_v1  ;;  %v17980_v0 = vld [vmem:[#allocation39_spill] sm:$0xff] }
 0x38a   : > { %v3471_v54 = vpop.f32.mrf.mxu0  ;;  %4326 = vmatpush2.msra.mxu0 %v4068_v11  ;;  %v3136_v11 = vadd.f32 %v17973_v5, %v2514_v46  ;;  %v3139_v58 = vadd.f32 %v17977_v62, %v2517_v40  ;;  %v4056_v5 = vmax.f32 %v3984_v21, 0.0  ;;  %v17979_v46 = vld [vmem:[#allocation61_spill] sm:$0xff]  ;;  %v17981_v18 = vld [vmem:[#allocation83_spill] sm:$0xff] }
 0x38b   : > { %4327 = vmatprep.subr.mxu0 %v17758_v26  ;;  %v3757_v30 = vadd.f32 %v3471_v54, %v17979_v46  ;;  %v2505_v1 = vadd.f32 %v17981_v18, %v17980_v0  ;;  %v3130_v43 = vadd.f32 %v17982_v36, %v2508_v23  ;;  %v17983_v62 = vld [vmem:[#allocation37_spill] sm:$0xff]  ;;  %v4053_v40 = vmax.f32 %v3981_v50, 0.0 }
 0x38c   : > { %v3473_v57 = vpop.f32.mrf.mxu0  ;;  %4328 = vmatpush2.msra.mxu0 %v4065_v27  ;;  %v3133_v27 = vadd.f32 %v17976_v56, %v2511_v2  ;;  %v14352_v56 = vld [vmem:[%s17897_s3 + $0x18] sm:$0xff] }
 0x38d   : > { %4329 = vmatprep.subr.mxu0 %v17758_v26  ;;  %v3758_v17 = vadd.f32 %v3473_v57, %v3136_v11  ;;  %v17984_v57 = vld [vmem:[#allocation81_spill] sm:$0xff]  ;;  %v17985_v11 = vld [vmem:[#allocation58_spill] sm:$0xff]  ;;  %v3752_v50 = vadd.f32 %v14288_v42, %v3130_v43  ;;  %v3973_v43 = vadd.f32 %v14049_v60, %v3757_v30 }
 0x38e   : > { %v3477_v7 = vpop.f32.mrf.mxu0  ;;  %4330 = vmatpush2.msra.mxu0 %v4062_v25  ;;  %v3755_v25 = vadd.f32 %v3467_v47, %v3133_v27  ;;  %v2502_v2 = vadd.f32 %v17984_v57, %v17983_v62  ;;  %v17986_v47 = vld [vmem:[#allocation107_spill] sm:$0xff]  ;;  %v4468_v27 = vld [vmem:[%s17664_s4 + $0x230] sm:$0xff] }
 0x38f   : > { %v3760_v34 = vadd.f32 %v3477_v7, %v17978_v49  ;;  %4331 = vmatprep.subr.mxu0 %v17758_v26  ;;  %v3754_v7 = vadd.f32 %v3465_v63, %v17985_v11  ;;  %v3127_v23 = vadd.f32 %v17986_v47, %v2505_v1  ;;  %v3974_v63 = vadd.f32 %v14049_v60, %v3758_v17  ;;  %v17987_v49 = vld [vmem:[#allocation35_spill] sm:$0xff]  ;;  %v17990_v17 = vld [vmem:[#allocation104_spill] sm:$0xff]  ;;  %v17992_v30 = vld [vmem:[#allocation77_spill] sm:$0xff] }
 0x390   : > { %v3479_v28 = vpop.f32.mrf.mxu0  ;;  %4332 = vmatpush2.msra.mxu0 %v4059_v51  ;;  %v14339_v51 = vld [vmem:[%s17897_s3] sm:$0xff]  ;;  %v3124_v0 = vadd.f32 %v17990_v17, %v2502_v2  ;;  %v3971_v1 = vadd.f32 %v14065_v4, %v3755_v25  ;;  %v17993_v57 = vld [vmem:[#allocation105_spill] sm:$0xff] }
 0x391   : > { %v3761_v19 = vadd.f32 %v3479_v28, %v3139_v58  ;;  %4333 = vmatprep.subr.mxu0 %v17758_v26  ;;  %v3976_v21 = vadd.f32 %v14055_v48, %v3760_v34  ;;  %v4469_v58 = vld [vmem:[%s17664_s4 + $0x238] sm:$0xff]  ;;  %v17989_v28 = vld [vmem:[#allocation108_spill] sm:$0xff]  ;;  %v3749_v18 = vadd.f32 %v14270_v37, %v3127_v23  ;;  %v4466_v60 = vld [vmem:[%s17664_s4 + $0x220] sm:$0xff]  ;;  %v3970_v2 = vadd.f32 %v14065_v4, %v3754_v7 }
 0x392   : > { %v14334_v54 = vpop.f32.mrf.mxu0  ;;  %4334 = vmatpush2.msra.mxu0 %v4056_v5  ;;  %v17988_v5 = vld [vmem:[#allocation79_spill] sm:$0xff]  ;;  %v3751_v42 = vadd.f32 %v14278_v38, %v17989_v28  ;;  %v17991_v38 = vld [vmem:[#allocation33_spill] sm:$0xff]  ;;  %v3746_v23 = vadd.f32 %v14251_v10, %v3124_v0  ;;  %v4046_v4 = vmax.f32 %v3974_v63, 0.0  ;;  %v14394_v7 = vld [vmem:[%s17897_s3 + $0x28] sm:$0xff]  ;;  %v4045_v28 = vmax.f32 %v3973_v43, 0.0 }
 0x393   : > { %v3977_v34 = vadd.f32 %v14055_v48, %v3761_v19  ;;  %4335 = vmatprep.subr.mxu0 %v17758_v26  ;;  %v2499_v46 = vadd.f32 %v17988_v5, %v17987_v49  ;;  %v4467_v19 = vld [vmem:[%s17664_s4 + $0x228] sm:$0xff]  ;;  %v2496_v62 = vadd.f32 %v17992_v30, %v17991_v38  ;;  %v4048_v11 = vmax.f32 %v3976_v21, 0.0  ;;  %v14384_v25 = vld [vmem:[%s17897_s3 + $0x10] sm:$0xff]  ;;  %v17995_v21 = vld [vmem:[#allocation31_spill] sm:$0xff] }
 0x394   : > { %v14362_v48 = vpop.f32.mrf.mxu0  ;;  %4336 = vmatpush2.msra.mxu0 %v4053_v40  ;;  %v3748_v40 = vadd.f32 %v14260_v35, %v17993_v57  ;;  %v3968_v35 = vadd.f32 %v14071_v31, %v3752_v50  ;;  %v17997_v5 = vld [vmem:[#allocation102_spill] sm:$0xff]  ;;  %v3965_v0 = vadd.f32 %v14082_v12, %v3749_v18  ;;  %v14423_v18 = vld [vmem:[%s17897_s3 + $0x20] sm:$0xff] }
 0x395   : > { %v4049_v36 = vmax.f32 %v3977_v34, 0.0  ;;  %4338 = vmatmul.mubr.f32.vlgmr.msra.gmra.mxu0 %v14339_v51  ;;  %4668 = vmatprep.subr.mxu0 %v4469_v58  ;;  %v17994_v58 = vld [vmem:[#allocation101_spill] sm:$0xff]  ;;  %v17996_v34 = vld [vmem:[#allocation75_spill] sm:$0xff]  ;;  %v4465_v50 = vld [vmem:[%s17664_s4 + $0x218] sm:$0xff] }
 0x396   : > { %v14379_v37 = vpop.f32.mrf.mxu0  ;;  %9444 = vmatprep.mubr.msk.f32.mxu0 %vm4099_vm7, %v14352_v56  ;;  %4669 = vmatpush1.msra.mxu0 %v4468_v27  ;;  %v3121_v47 = vadd.f32 %v17994_v58, %v2499_v46  ;;  %v2493_v49 = vadd.f32 %v17996_v34, %v17995_v21  ;;  %v3745_v27 = vadd.f32 %v14244_v44, %v17997_v5  ;;  %v17998_v63 = vld [vmem:[#allocation98_spill] sm:$0xff]  ;;  %v18004_v58 = vld [vmem:[#allocation20_spill] sm:$0xff] }
 0x397   : > { %4136 = vmatprep.subr.mxu1 %v4049_v36  ;;  %4670 = vmatprep.subr.mxu0 %v4467_v19  ;;  %v3967_v46 = vadd.f32 %v14071_v31, %v3751_v42  ;;  %v3118_v17 = vadd.f32 %v17998_v63, %v2496_v62  ;;  %v4043_v36 = vmax.f32 %v3971_v1, 0.0  ;;  %v4464_v31 = vld [vmem:[%s17664_s4 + $0x210] sm:$0xff]  ;;  %v17999_v44 = vld [vmem:[#allocation30_spill] sm:$0xff]  ;;  %v3964_v30 = vadd.f32 %v14082_v12, %v3748_v40  ;;  %v18002_v1 = vld [vmem:[#allocation95_spill] sm:$0xff] }
 0x398   : > { %v14401_v10 = vpop.f32.mrf.mxu0  ;;  %4137 = vmatpush1.msra.mxu1 %v4048_v11  ;;  %4671 = vmatpush1.msra.mxu0 %v4466_v60  ;;  %v3743_v19 = vadd.f32 %v14234_v22, %v3121_v47  ;;  %v18000_v42 = vld [vmem:[#allocation73_spill] sm:$0xff]  ;;  %v18001_v60 = vld [vmem:[#allocation99_spill] sm:$0xff]  ;;  %v4042_v62 = vmax.f32 %v3970_v2, 0.0  ;;  %v3115_v57 = vadd.f32 %v18002_v1, %v2493_v49  ;;  %v4040_v12 = vmax.f32 %v3968_v35, 0.0  ;;  %v14433_v40 = vld [vmem:[%s17897_s3 + $0x38] sm:$0xff] }
 0x399   : > { %4138 = vmatprep.subr.mxu1 %v4046_v4  ;;  %4343 = vmatmul.mubr.f32.gmra.mxu0 %v14384_v25  ;;  %v2490_v43 = vadd.f32 %v18000_v42, %v17999_v44  ;;  %v3742_v38 = vadd.f32 %v14223_v20, %v18001_v60  ;;  %v3740_v11 = vadd.f32 %v14215_v16, %v3118_v17  ;;  %v18003_v2 = vld [vmem:[#allocation29_spill] sm:$0xff]  ;;  %v18005_v4 = vld [vmem:[#allocation96_spill] sm:$0xff]  ;;  %v4039_v49 = vmax.f32 %v3967_v46, 0.0  ;;  %v18008_v17 = vld [vmem:[#allocation27_spill] sm:$0xff] }
 0x39a   : > { %v14418_v22 = vpop.f32.mrf.mxu0  ;;  %4139 = vmatpush1.msra.mxu1 %v4045_v28  ;;  %9445 = vmatprep.mubr.msk.f32.mxu0 %vm4099_vm7, %v14394_v7  ;;  %v3962_v20 = vadd.f32 %v14086_v41, %v3746_v23  ;;  %v2487_v47 = vadd.f32 %v18004_v58, %v18003_v2  ;;  %v3739_v21 = vadd.f32 %v14202_v8, %v18005_v4  ;;  %v18006_v23 = vld [vmem:[#allocation92_spill] sm:$0xff]  ;;  %v4036_v46 = vmax.f32 %v3964_v30, 0.0  ;;  %v18012_v1 = vld [vmem:[#allocation86_spill] sm:$0xff]  ;;  %v18014_v2 = vld [vmem:[#allocation49_spill] sm:$0xff] }
 0x39b   : > { %4140 = vmatprep.subr.mxu1 %v4043_v36  ;;  %4672 = vmatprep.subr.mxu0 %v4465_v50  ;;  %v3961_v34 = vadd.f32 %v14086_v41, %v3745_v27  ;;  %v3112_v35 = vadd.f32 %v18006_v23, %v2490_v43  ;;  %v3737_v5 = vadd.f32 %v14196_v32, %v3115_v57  ;;  %v4037_v50 = vmax.f32 %v3965_v0, 0.0  ;;  %v18007_v63 = vld [vmem:[#allocation28_spill] sm:$0xff]  ;;  %v18009_v36 = vld [vmem:[#allocation93_spill] sm:$0xff]  ;;  %v18011_v43 = vld [vmem:[#allocation90_spill] sm:$0xff] }
 0x39c   : > { %v14440_v16 = vpop.f32.mrf.mxu0  ;;  %4141 = vmatpush1.msra.mxu1 %v4042_v62  ;;  %4673 = vmatpush1.msra.mxu0 %v4464_v31  ;;  %v3959_v28 = vadd.f32 %v14093_v61, %v3743_v19  ;;  %v2484_v8 = vadd.f32 %v18008_v17, %v18007_v63  ;;  %v3736_v41 = vadd.f32 %v14183_v24, %v18009_v36  ;;  %v14456_v32 = vld [vmem:[%s17897_s3 + $0x30] sm:$0xff]  ;;  %v14466_v42 = vld [vmem:[%s17897_s3 + $0x48] sm:$0xff] }
 0x39d   : > { %4142 = vmatprep.subr.mxu1 %v4040_v12  ;;  %4348 = vmatmul.mubr.f32.gmra.mxu0 %v14423_v18  ;;  %v3958_v27 = vadd.f32 %v14093_v61, %v3742_v38  ;;  %v18010_v19 = vld [vmem:[#allocation89_spill] sm:$0xff]  ;;  %v3734_v44 = vadd.f32 %v14175_v6, %v3112_v35  ;;  %v3956_v24 = vadd.f32 %v14104_v45, %v3740_v11  ;;  %v4034_v61 = vmax.f32 %v3962_v20, 0.0  ;;  %v18013_v12 = vld [vmem:[#allocation32_spill] sm:$0xff] }
 0x39e   : > { %v14451_v31 = vpop.f32.mrf.mxu0  ;;  %4143 = vmatpush1.msra.mxu1 %v4039_v49  ;;  %9446 = vmatprep.mubr.msk.f32.mxu0 %vm4099_vm7, %v14433_v40  ;;  %v3109_v0 = vadd.f32 %v18010_v19, %v2487_v47  ;;  %v3733_v60 = vadd.f32 %v14165_v33, %v18011_v43  ;;  %v3955_v38 = vadd.f32 %v14104_v45, %v3739_v21  ;;  %v4033_v30 = vmax.f32 %v3961_v34, 0.0  ;;  %v18015_v33 = vld [vmem:[#allocation87_spill] sm:$0xff]  ;;  %v18016_v34 = vld [vmem:[#allocation26_spill] sm:$0xff]  ;;  %v18017_v49 = vld [vmem:[#allocation84_spill] sm:$0xff] }
 0x39f   : > { %4144 = vmatprep.subr.mxu1 %v4037_v50  ;;  %v3106_v6 = vadd.f32 %v18012_v1, %v2484_v8  ;;  %v3953_v11 = vadd.f32 %v14118_v55, %v3737_v5  ;;  %v4031_v20 = vmax.f32 %v3959_v28, 0.0  ;;  %v14479_v58 = vadd.f32 %v18014_v2, %v18013_v12  ;;  %v14500_v5 = vld [vmem:[%s17897_s3 + $0x58] sm:$0xff]  ;;  %v18019_v50 = vld [vmem:[#allocation51_spill] sm:$0xff]  ;;  %v18020_v17 = vld [vmem:[#allocation36_spill] sm:$0xff] }
 0x3a0   : > { %v14471_v62 = vpop.f32.mrf.mxu0  ;;  %4145 = vmatpush1.msra.mxu1 %v4036_v46  ;;  %v3731_v57 = vadd.f32 %v14155_v53, %v3109_v0  ;;  %v3730_v45 = vadd.f32 %v14143_v59, %v18015_v33  ;;  %v3952_v47 = vadd.f32 %v14118_v55, %v3736_v41  ;;  %v4030_v4 = vmax.f32 %v3958_v27, 0.0  ;;  %v14489_v53 = vld [vmem:[%s17897_s3 + $0x40] sm:$0xff]  ;;  %v18018_v28 = vld [vmem:[#allocation34_spill] sm:$0xff]  ;;  %v18021_v8 = vld [vmem:[#allocation53_spill] sm:$0xff] }
 0x3a1   : > { %4146 = vmatprep.subr.mxu1 %v4034_v61  ;;  %4353 = vmatmul.mubr.f32.gmra.mxu0 %v14456_v32  ;;  %v3103_v23 = vadd.f32 %v18017_v49, %v18016_v34  ;;  %v3728_v35 = vadd.f32 %v14135_v9, %v3106_v6  ;;  %v3950_v59 = vadd.f32 %v14126_v52, %v3734_v44  ;;  %v4028_v55 = vmax.f32 %v3956_v24, 0.0  ;;  %v18022_v46 = vld [vmem:[#allocation14_spill] sm:$0xff]  ;;  %v18030_v33 = vld [vmem:[#allocation15_spill] sm:$0xff] }
 0x3a2   : > { %v14484_v21 = vpop.f32.mrf.mxu0  ;;  %4147 = vmatpush1.msra.mxu1 %v4033_v30  ;;  %9447 = vmatprep.mubr.msk.f32.mxu0 %vm4099_vm7, %v14466_v42  ;;  %v14504_v63 = vadd.f32 %v18019_v50, %v18018_v28  ;;  %v1704_v36 = vadd.f32 %v18021_v8, %v18020_v17  ;;  %v3949_v41 = vadd.f32 %v14126_v52, %v3733_v60  ;;  %v4027_v27 = vmax.f32 %v3955_v38, 0.0  ;;  %v18023_v19 = vld [vmem:[#allocation82_spill] sm:$0xff]  ;;  %v18025_v30 = vld [vmem:[#allocation55_spill] sm:$0xff]  ;;  %v18026_v52 = vld [vmem:[#allocation40_spill] sm:$0xff] }
 0x3a3   : > { %4148 = vmatprep.subr.mxu1 %v4031_v20  ;;  %v3100_v0 = vadd.f32 %v18023_v19, %v18022_v46  ;;  %v3725_v44 = vadd.f32 %v14115_v29, %v3103_v23  ;;  %v3947_v24 = vadd.f32 %v14147_v13, %v3731_v57  ;;  %v4025_v61 = vmax.f32 %v3953_v11, 0.0  ;;  %v18024_v43 = vld [vmem:[#allocation38_spill] sm:$0xff]  ;;  %v18027_v60 = vld [vmem:[#allocation57_spill] sm:$0xff]  ;;  %v18028_v57 = vld [vmem:[#allocation71_spill] sm:$0xff] }
 0x3a4   : > { %v14509_v9 = vpop.f32.mrf.mxu0  ;;  %4149 = vmatpush1.msra.mxu1 %v4030_v4  ;;  %v14518_v1 = vadd.f32 %v18025_v30, %v18024_v43  ;;  %v1716_v38 = vadd.f32 %v18027_v60, %v18026_v52  ;;  %v3946_v6 = vadd.f32 %v14147_v13, %v3730_v45  ;;  %v4024_v20 = vmax.f32 %v3952_v47, 0.0  ;;  %v14528_v29 = vld [vmem:[%s17897_s3 + $0x50] sm:$0xff]  ;;  %v18029_v11 = vld [vmem:[#allocation80_spill] sm:$0xff]  ;;  %v18031_v45 = vld [vmem:[#allocation42_spill] sm:$0xff] }
 0x3a5   : > { %4150 = vmatprep.subr.mxu1 %v4028_v55  ;;  %4358 = vmatmul.mubr.f32.gmra.mxu0 %v14489_v53  ;;  %v3097_v2 = vadd.f32 %v18029_v11, %v18028_v57  ;;  %v3722_v4 = vadd.f32 %v18030_v33, %v3100_v0  ;;  %v3944_v34 = vadd.f32 %v14158_v15, %v3728_v35  ;;  %v4022_v13 = vmax.f32 %v3950_v59, 0.0  ;;  %v18032_v47 = vld [vmem:[#allocation60_spill] sm:$0xff]  ;;  %v18034_v55 = vld [vmem:[#allocation63_spill] sm:$0xff]  ;;  %v18036_v46 = vld [vmem:[#allocation78_spill] sm:$0xff] }
 0x3a6   : > { %v14523_v12 = vpop.f32.mrf.mxu0  ;;  %4151 = vmatpush1.msra.mxu1 %v4027_v27  ;;  %9448 = vmatprep.mubr.msk.f32.mxu0 %vm4099_vm7, %v14500_v5  ;;  %v1722_v49 = vadd.f32 %v18032_v47, %v18031_v45  ;;  %v18033_v23 = vld [vmem:[#allocation44_spill] sm:$0xff]  ;;  %v3943_v50 = vadd.f32 %v14158_v15, %v14129_v3  ;;  %v4021_v17 = vmax.f32 %v3949_v41, 0.0  ;;  %v18035_v27 = vld [vmem:[#allocation70_spill] sm:$0xff]  ;;  %v18037_v0 = vld [vmem:[#allocation151_spill] sm:$0xff]  ;;  %v3941_v35 = vadd.f32 %v14177_v39, %v3725_v44 }
 0x3a7   : > { %4152 = vmatprep.subr.mxu1 %v4025_v61  ;;  %v1728_v28 = vadd.f32 %v18034_v55, %v18033_v23  ;;  %v3094_v19 = vadd.f32 %v18036_v46, %v18035_v27  ;;  %v3719_v43 = vadd.f32 %v18037_v0, %v3097_v2  ;;  %v4019_v59 = vmax.f32 %v3947_v24, 0.0  ;;  %v14550_v61 = vld [vmem:[%s17897_s3 + $0x68] sm:$0xff]  ;;  %v18038_v3 = vld [vmem:[#allocation46_spill] sm:$0xff]  ;;  %v18040_v30 = vld [vmem:[#allocation103_spill] sm:$0xff] }
 0x3a8   : > { %v3515_v8 = vpop.f32.mrf.mxu0  ;;  %4153 = vmatpush1.msra.mxu1 %v4024_v20  ;;  %v18039_v15 = vld [vmem:[#allocation64_spill] sm:$0xff]  ;;  %v14555_v52 = vadd.f32 %v18040_v30, %v1704_v36  ;;  %v3940_v60 = vadd.f32 %v14177_v39, %v14113_v14  ;;  %v4018_v20 = vmax.f32 %v3946_v6, 0.0  ;;  %v18041_v24 = vld [vmem:[#allocation113_spill] sm:$0xff]  ;;  %v18043_v33 = vld [vmem:[#allocation62_spill] sm:$0xff]  ;;  %v4016_v45 = vmax.f32 %v3944_v34, 0.0 }
 0x3a9   : > { %4154 = vmatprep.subr.mxu1 %v4022_v13  ;;  %4363 = vmatmul.mubr.f32.gmra.mxu0 %v14528_v29  ;;  %v1734_v41 = vadd.f32 %v18039_v15, %v18038_v3  ;;  %v2538_v57 = vadd.f32 %v18041_v24, %v1728_v28  ;;  %v18042_v11 = vld [vmem:[#allocation149_spill] sm:$0xff]  ;;  %v3938_v13 = vadd.f32 %v18043_v33, %v3722_v4  ;;  %v18044_v47 = vld [vmem:[#allocation111_spill] sm:$0xff]  ;;  %v18045_v23 = vld [vmem:[#allocation116_spill] sm:$0xff]  ;;  %v4015_v39 = vmax.f32 %v3943_v50, 0.0 }
 0x3aa   : > { %v3519_v44 = vpop.f32.mrf.mxu0  ;;  %4155 = vmatpush1.msra.mxu1 %v4021_v17  ;;  %9449 = vmatprep.mubr.msk.f32.mxu0 %vm4099_vm7, %v14550_v61  ;;  %v3716_v2 = vadd.f32 %v18042_v11, %v3094_v19  ;;  %v2535_v36 = vadd.f32 %v18044_v47, %v1722_v49  ;;  %v18046_v27 = vld [vmem:[#allocation152_spill] sm:$0xff]  ;;  %v14571_v28 = vld [vmem:[%s17897_s3 + $0x60] sm:$0xff]  ;;  %v18047_v17 = vld [vmem:[#allocation109_spill] sm:$0xff]  ;;  %v4013_v49 = vmax.f32 %v3941_v35, 0.0 }
 0x3ab   : > { %4156 = vmatprep.subr.mxu1 %v4019_v59  ;;  %v2541_v55 = vadd.f32 %v18045_v23, %v1734_v41  ;;  %v3937_v14 = vadd.f32 %v18043_v33, %v18046_v27  ;;  %v2532_v46 = vadd.f32 %v18047_v17, %v1716_v38  ;;  %v18048_v4 = vld [vmem:[#allocation133_spill] sm:$0xff]  ;;  %v14579_v59 = vld [vmem:[%s17897_s3 + $0x78] sm:$0xff]  ;;  %v18050_v50 = vld [vmem:[#allocation131_spill] sm:$0xff] }
 0x3ac   : > { %v3521_v6 = vpop.f32.mrf.mxu0  ;;  %4157 = vmatpush1.msra.mxu1 %v4018_v20  ;;  %v3160_v19 = vadd.f32 %v18048_v4, %v2538_v57  ;;  %v18049_v34 = vld [vmem:[#allocation17_spill] sm:$0xff]  ;;  %v3157_v3 = vadd.f32 %v18050_v50, %v2535_v36  ;;  %v18051_v15 = vld [vmem:[#allocation135_spill] sm:$0xff]  ;;  %v18052_v30 = vld [vmem:[#allocation150_spill] sm:$0xff]  ;;  %v4012_v20 = vmax.f32 %v3940_v60, 0.0 }
 0x3ad   : > { %v3935_v0 = vadd.f32 %v18049_v34, %v3719_v43  ;;  %4158 = vmatprep.subr.mxu1 %v4016_v45  ;;  %4368 = vmatmul.mubr.f32.gmra.mxu0 %v14571_v28  ;;  %v3163_v41 = vadd.f32 %v18051_v15, %v2541_v55  ;;  %v3934_v38 = vadd.f32 %v18049_v34, %v18052_v30  ;;  %v18053_v43 = vld [vmem:[#allocation13_spill] sm:$0xff]  ;;  %v18054_v11 = vld [vmem:[#allocation134_spill] sm:$0xff]  ;;  %v4010_v45 = vmax.f32 %v3938_v13, 0.0  ;;  %v18056_v23 = vld [vmem:[#allocation148_spill] sm:$0xff] }
 0x3ae   : > { %v3525_v24 = vpop.f32.mrf.mxu0  ;;  %4159 = vmatpush1.msra.mxu1 %v4015_v39  ;;  %9450 = vmatprep.mubr.msk.f32.mxu0 %vm4099_vm7, %v14579_v59  ;;  %v3932_v35 = vadd.f32 %v18053_v43, %v3716_v2  ;;  %v3782_v57 = vadd.f32 %v3521_v6, %v3160_v19  ;;  %v18055_v47 = vld [vmem:[#allocation106_spill] sm:$0xff]  ;;  %v3931_v55 = vadd.f32 %v18053_v43, %v18056_v23  ;;  %v4009_v27 = vmax.f32 %v3937_v14, 0.0  ;;  %v18057_v60 = vld [vmem:[#allocation132_spill] sm:$0xff]  ;;  %v14598_v2 = vld [vmem:[%s17897_s3 + $0x70] sm:$0xff] }
 0x3af   : > { %v3784_v33 = vadd.f32 %v3525_v24, %v18054_v11  ;;  %4160 = vmatprep.subr.mxu1 %v4013_v49  ;;  %v2529_v36 = vadd.f32 %v18055_v47, %v14518_v1  ;;  %v3781_v17 = vadd.f32 %v3519_v44, %v18057_v60  ;;  %v18058_v6 = vld [vmem:[#allocation129_spill] sm:$0xff]  ;;  %v3779_v19 = vadd.f32 %v3515_v8, %v3157_v3  ;;  %v14604_v1 = vld [vmem:[%s17897_s3 + $0x88] sm:$0xff]  ;;  %v18059_v44 = vld [vmem:[#allocation127_spill] sm:$0xff] }
 0x3b0   : > { %v3527_v39 = vpop.f32.mrf.mxu0  ;;  %4161 = vmatpush1.msra.mxu1 %v4012_v20  ;;  %v3154_v4 = vadd.f32 %v18058_v6, %v2532_v46  ;;  %v4007_v34 = vmax.f32 %v3935_v0, 0.0  ;;  %v4006_v49 = vmax.f32 %v3934_v38, 0.0  ;;  %v18060_v50 = vld [vmem:[#allocation130_spill] sm:$0xff]  ;;  %v18061_v30 = vld [vmem:[#allocation59_spill] sm:$0xff]  ;;  %v18062_v46 = vld [vmem:[#allocation12_spill] sm:$0xff]  ;;  %v4003_v43 = vmax.f32 %v3931_v55, 0.0 }
 0x3b1   : > { %v3785_v13 = vadd.f32 %v3527_v39, %v3163_v41  ;;  %4162 = vmatprep.subr.mxu1 %v4010_v45  ;;  %4373 = vmatmul.mubr.f32.gmra.mxu0 %v14598_v2  ;;  %v3151_v14 = vadd.f32 %v18059_v44, %v2529_v36  ;;  %v3778_v15 = vadd.f32 %v14523_v12, %v18060_v50  ;;  %v4004_v41 = vmax.f32 %v3932_v35, 0.0  ;;  %v18063_v24 = vld [vmem:[#allocation100_spill] sm:$0xff]  ;;  %v18067_v23 = vld [vmem:[#allocation97_spill] sm:$0xff] }
 0x3b2   : > { %v4000_v20 = vadd.f32 %v18061_v30, %v3784_v33  ;;  %4163 = vmatpush1.msra.mxu1 %v4009_v27  ;;  %9451 = vmatprep.mubr.msk.f32.mxu0 %vm4099_vm7, %v14604_v1  ;;  %v3776_v8 = vadd.f32 %v14509_v9, %v3154_v4  ;;  %v3998_v0 = vadd.f32 %v18062_v46, %v3782_v57  ;;  %v18064_v11 = vld [vmem:[#allocation128_spill] sm:$0xff]  ;;  %v14624_v9 = vld [vmem:[%s17897_s3 + $0x80] sm:$0xff]  ;;  %v18065_v57 = vld [vmem:[#allocation125_spill] sm:$0xff] }
 0x3b3   : > { %v4001_v3 = vadd.f32 %v18061_v30, %v3785_v13  ;;  %4164 = vmatprep.subr.mxu1 %v4007_v34  ;;  %v2523_v38 = vadd.f32 %v18063_v24, %v14504_v63  ;;  %v3775_v12 = vadd.f32 %v14484_v21, %v18064_v11  ;;  %v3997_v33 = vadd.f32 %v18062_v46, %v3781_v17  ;;  %v18066_v47 = vld [vmem:[#allocation56_spill] sm:$0xff]  ;;  %v14633_v21 = vld [vmem:[%s17897_s3 + $0x98] sm:$0xff]  ;;  %v18069_v17 = vld [vmem:[#allocation123_spill] sm:$0xff] }
 0x3b4   : > { %4165 = vmatpush1.msra.mxu1 %v4006_v49  ;;  %v3148_v45 = vadd.f32 %v18065_v57, %v14555_v52  ;;  %v3773_v35 = vadd.f32 %v14471_v62, %v3151_v14  ;;  %v3995_v36 = vadd.f32 %v18066_v47, %v3779_v19  ;;  %v2520_v55 = vadd.f32 %v18067_v23, %v14479_v58  ;;  %v18068_v27 = vld [vmem:[#allocation126_spill] sm:$0xff]  ;;  %v18070_v4 = vld [vmem:[#allocation11_spill] sm:$0xff]  ;;  %v18071_v34 = vld [vmem:[#allocation124_spill] sm:$0xff] }
 0x3b5   : > { %4166 = vmatprep.subr.mxu1 %v4004_v41  ;;  %v4073_v63 = vmax.f32 %v4001_v3, 0.0  ;;  %4378 = vmatmul.mubr.f32.gmra.mxu0 %v14624_v9  ;;  %v3772_v60 = vadd.f32 %v14451_v31, %v18068_v27  ;;  %v3994_v52 = vadd.f32 %v18066_v47, %v3778_v15  ;;  %v4072_v62 = vmax.f32 %v4000_v20, 0.0  ;;  %v14652_v14 = vld [vmem:[%s17897_s3 + $0x90] sm:$0xff]  ;;  %v18073_v15 = vld [vmem:[#allocation54_spill] sm:$0xff]  ;;  %v18077_v57 = vld [vmem:[#allocation52_spill] sm:$0xff] }
 0x3b6   : > { %4167 = vmatpush1.msra.mxu1 %v4003_v43  ;;  %9452 = vmatprep.mubr.msk.f32.mxu0 %vm4099_vm7, %v14633_v21  ;;  %v3145_v39 = vadd.f32 %v18069_v17, %v2523_v38  ;;  %v3770_v6 = vadd.f32 %v14440_v16, %v3148_v45  ;;  %v3992_v19 = vadd.f32 %v18070_v4, %v3776_v8  ;;  %v4070_v13 = vmax.f32 %v3998_v0, 0.0  ;;  %v18072_v49 = vld [vmem:[#allocation121_spill] sm:$0xff]  ;;  %v18074_v8 = vld [vmem:[#allocation122_spill] sm:$0xff]  ;;  %v18076_v43 = vld [vmem:[#allocation119_spill] sm:$0xff] }
 0x3b7   : > { %4184 = vmatprep.subr.mxu1 %v4073_v63  ;;  %v3769_v58 = vadd.f32 %v14418_v22, %v18071_v34  ;;  %v3991_v31 = vadd.f32 %v18070_v4, %v3775_v12  ;;  %v4069_v44 = vmax.f32 %v3997_v33, 0.0  ;;  %v3142_v50 = vadd.f32 %v18072_v49, %v2520_v55  ;;  %v14660_v22 = vld [vmem:[%s17897_s3 + $0xa8] sm:$0xff]  ;;  %v18075_v41 = vld [vmem:[#allocation10_spill] sm:$0xff]  ;;  %v4428_v4 = vld [vmem:[%s17664_s4 + $0xf0] sm:$0xff] }
 0x3b8   : > { %4185 = vmatpush2.msra.mxu1 %v4072_v62  ;;  %v3767_v16 = vadd.f32 %v14401_v10, %v3145_v39  ;;  %v3989_v30 = vadd.f32 %v18073_v15, %v3773_v35  ;;  %v4067_v20 = vmax.f32 %v3995_v36, 0.0  ;;  %v3766_v46 = vadd.f32 %v14379_v37, %v18074_v8  ;;  %v14676_v37 = vld [vmem:[%s17897_s3 + $0xa0] sm:$0xff]  ;;  %v14682_v35 = vld [vmem:[%s17897_s3 + $0xb8] sm:$0xff]  ;;  %v18078_v36 = vld [vmem:[#allocation9_spill] sm:$0xff] }
 0x3b9   : > { %4186 = vmatprep.subr.mxu1 %v4070_v13  ;;  %4383 = vmatmul.mubr.f32.gmra.mxu0 %v14652_v14  ;;  %v3988_v0 = vadd.f32 %v18073_v15, %v3772_v60  ;;  %v4066_v3 = vmax.f32 %v3994_v52, 0.0  ;;  %v3764_v10 = vadd.f32 %v14362_v48, %v3142_v50  ;;  %v3986_v24 = vadd.f32 %v18075_v41, %v3770_v6  ;;  %v14693_v60 = vld [vmem:[%s17897_s3 + $0xb0] sm:$0xff]  ;;  %v4429_v6 = vld [vmem:[%s17664_s4 + $0xf8] sm:$0xff]  ;;  %v4426_v13 = vld [vmem:[%s17664_s4 + $0xe0] sm:$0xff] }
 0x3ba   : > { %4187 = vmatpush2.msra.mxu1 %v4069_v44  ;;  %9453 = vmatprep.mubr.msk.f32.mxu0 %vm4099_vm7, %v14660_v22  ;;  %v4064_v38 = vmax.f32 %v3992_v19, 0.0  ;;  %v3763_v11 = vadd.f32 %v14334_v54, %v18076_v43  ;;  %v3985_v12 = vadd.f32 %v18075_v41, %v3769_v58  ;;  %v4063_v33 = vmax.f32 %v3991_v31, 0.0  ;;  %v4427_v19 = vld [vmem:[%s17664_s4 + $0xe8] sm:$0xff]  ;;  %v4425_v34 = vld [vmem:[%s17664_s4 + $0xd8] sm:$0xff]  ;;  %v4424_v58 = vld [vmem:[%s17664_s4 + $0xd0] sm:$0xff] }
 0x3bb   : > { %4188 = vmatprep.subr.mxu1 %v4067_v20  ;;  %v3983_v45 = vadd.f32 %v18077_v57, %v3767_v16  ;;  %v4061_v48 = vmax.f32 %v3989_v30, 0.0  ;;  %v3982_v54 = vadd.f32 %v18077_v57, %v3766_v46  ;;  %v4060_v47 = vmax.f32 %v3988_v0, 0.0  ;;  %v4421_v31 = vld [vmem:[%s17664_s4 + $0xb8] sm:$0xff]  ;;  %v4420_v44 = vld [vmem:[%s17664_s4 + $0xb0] sm:$0xff]  ;;  %v4446_v57 = vld [vmem:[%s17664_s4 + $0x180] sm:$0xff] }
 0x3bc   : > { %4189 = vmatpush2.msra.mxu1 %v4066_v3  ;;  %v3980_v63 = vadd.f32 %v18078_v36, %v3764_v10  ;;  %v4058_v23 = vmax.f32 %v3986_v24, 0.0  ;;  %v3979_v55 = vadd.f32 %v18078_v36, %v3763_v11  ;;  %v4057_v27 = vmax.f32 %v3985_v12, 0.0  ;;  %v4417_v49 = vld [vmem:[%s17664_s4 + $0x98] sm:$0xff]  ;;  %v4416_v50 = vld [vmem:[%s17664_s4 + $0x90] sm:$0xff] }
 0x3bd   : > { %4190 = vmatprep.subr.mxu1 %v4064_v38  ;;  %4388 = vmatmul.mubr.f32.gmra.mxu0 %v14676_v37  ;;  %v4055_v52 = vmax.f32 %v3983_v45, 0.0  ;;  %v4054_v62 = vmax.f32 %v3982_v54, 0.0  ;;  %v4413_v16 = vld [vmem:[%s17664_s4 + $0x78] sm:$0xff]  ;;  %v4412_v15 = vld [vmem:[%s17664_s4 + $0x70] sm:$0xff]  ;;  %v4442_v54 = vld [vmem:[%s17664_s4 + $0x160] sm:$0xff] }
 0x3be   : > { %4191 = vmatpush2.msra.mxu1 %v4063_v33  ;;  %9454 = vmatprep.mubr.msk.f32.mxu0 %vm4099_vm7, %v14682_v35  ;;  %v4052_v17 = vmax.f32 %v3980_v63, 0.0  ;;  %v4051_v39 = vmax.f32 %v3979_v55, 0.0  ;;  %v4409_v30 = vld [vmem:[%s17664_s4 + $0x58] sm:$0xff]  ;;  %v4408_v20 = vld [vmem:[%s17664_s4 + $0x50] sm:$0xff]  ;;  %v4439_v63 = vld [vmem:[%s17664_s4 + $0x148] sm:$0xff] }
 0x3bf   : > { %4192 = vmatprep.subr.mxu1 %v4061_v48  ;;  %v4405_v8 = vld [vmem:[%s17664_s4 + $0x38] sm:$0xff]  ;;  %v4404_v46 = vld [vmem:[%s17664_s4 + $0x30] sm:$0xff] }
 0x3c0   : > { %4193 = vmatpush2.msra.mxu1 %v4060_v47  ;;  %v4401_v0 = vld [vmem:[%s17664_s4 + $0x18] sm:$0xff]  ;;  %v4400_v3 = vld [vmem:[%s17664_s4 + $0x10] sm:$0xff] }
 0x3c1   : > { %4194 = vmatprep.subr.mxu1 %v4058_v23  ;;  %4393 = vmatmul.mubr.f32.gmra.mxu0 %v14693_v60  ;;  %v4461_v10 = vld [vmem:[%s17664_s4 + $0x1f8] sm:$0xff]  ;;  %v4460_v41 = vld [vmem:[%s17664_s4 + $0x1f0] sm:$0xff]  ;;  %v4438_v23 = vld [vmem:[%s17664_s4 + $0x140] sm:$0xff] }
 0x3c2   : > { %4195 = vmatpush2.msra.mxu1 %v4057_v27  ;;  %4708 = vmatprep.mubr.f32.mxu0 %v17758_v26  ;;  %v4457_v24 = vld [vmem:[%s17664_s4 + $0x1d8] sm:$0xff]  ;;  %v4456_v38 = vld [vmem:[%s17664_s4 + $0x1d0] sm:$0xff] }
 0x3c3   : > { %4196 = vmatprep.subr.mxu1 %v4055_v52  ;;  %v4453_v43 = vld [vmem:[%s17664_s4 + $0x1b8] sm:$0xff]  ;;  %v4452_v11 = vld [vmem:[%s17664_s4 + $0x1b0] sm:$0xff]  ;;  %v4434_v52 = vld [vmem:[%s17664_s4 + $0x120] sm:$0xff] }
 0x3c4   : > { %4197 = vmatpush2.msra.mxu1 %v4054_v62  ;;  %v4449_v12 = vld [vmem:[%s17664_s4 + $0x198] sm:$0xff]  ;;  %v4448_v33 = vld [vmem:[%s17664_s4 + $0x190] sm:$0xff] }
 0x3c5   : > { %4198 = vmatprep.subr.mxu1 %v4052_v17  ;;  %v4445_v45 = vld [vmem:[%s17664_s4 + $0x178] sm:$0xff]  ;;  %v4444_v48 = vld [vmem:[%s17664_s4 + $0x170] sm:$0xff]  ;;  %v4463_v17 = vld [vmem:[%s17664_s4 + $0x208] sm:$0xff] }
 0x3c6   : > { %4199 = vmatpush2.msra.mxu1 %v4051_v39  ;;  %v4441_v47 = vld [vmem:[%s17664_s4 + $0x158] sm:$0xff]  ;;  %v4440_v36 = vld [vmem:[%s17664_s4 + $0x150] sm:$0xff]  ;;  %4674 = vmatprep.subr.mxu0 %v4463_v17 }
 0x3c7   : > { %4201 = vmatmul.mubr.f32.vlgmr.msra.gmra.mxu1 %v14339_v51  ;;  %4507 = vmatprep.subr.mxu1 %v4429_v6  ;;  %v4423_v51 = vld [vmem:[%s17664_s4 + $0xc8] sm:$0xff]  ;;  %v4437_v55 = vld [vmem:[%s17664_s4 + $0x138] sm:$0xff]  ;;  %v4436_v27 = vld [vmem:[%s17664_s4 + $0x130] sm:$0xff] }
 0x3c8   : > { %9432 = vmatprep.mubr.msk.f32.mxu1 %vm4099_vm7, %v14352_v56  ;;  %4508 = vmatpush1.msra.mxu1 %v4428_v4  ;;  %v4422_v56 = vld [vmem:[%s17664_s4 + $0xc0] sm:$0xff]  ;;  %v4433_v62 = vld [vmem:[%s17664_s4 + $0x118] sm:$0xff]  ;;  %v4432_v39 = vld [vmem:[%s17664_s4 + $0x110] sm:$0xff] }
 0x3c9   : > { %4509 = vmatprep.subr.mxu1 %v4427_v19  ;;  %v4462_v6 = vld [vmem:[%s17664_s4 + $0x200] sm:$0xff]  ;;  %v4431_v4 = vld [vmem:[%s17664_s4 + $0x108] sm:$0xff] }
 0x3ca   : > { %4510 = vmatpush1.msra.mxu1 %v4426_v13  ;;  %4675 = vmatpush1.msra.mxu0 %v4462_v6  ;;  %v4430_v19 = vld [vmem:[%s17664_s4 + $0x100] sm:$0xff] }
 0x3cb   : > { %4207 = vmatmul.mubr.f32.gmra.mxu1 %v14384_v25  ;;  %4511 = vmatprep.subr.mxu1 %v4425_v34  ;;  %v4419_v25 = vld [vmem:[%s17664_s4 + $0xa8] sm:$0xff] }
 0x3cc   : > { %9433 = vmatprep.mubr.msk.f32.mxu1 %vm4099_vm7, %v14394_v7  ;;  %4512 = vmatpush1.msra.mxu1 %v4424_v58  ;;  %v4418_v7 = vld [vmem:[%s17664_s4 + $0xa0] sm:$0xff] }
 0x3cd   : > { %4513 = vmatprep.subr.mxu1 %v4423_v51 }
 0x3ce   : > { %4514 = vmatpush1.msra.mxu1 %v4422_v56 }
 0x3cf   : > { %4213 = vmatmul.mubr.f32.gmra.mxu1 %v14423_v18  ;;  %4515 = vmatprep.subr.mxu1 %v4421_v31  ;;  %v4415_v18 = vld [vmem:[%s17664_s4 + $0x88] sm:$0xff] }
 0x3d0   : > { %9434 = vmatprep.mubr.msk.f32.mxu1 %vm4099_vm7, %v14433_v40  ;;  %4516 = vmatpush1.msra.mxu1 %v4420_v44  ;;  %v4414_v40 = vld [vmem:[%s17664_s4 + $0x80] sm:$0xff] }
 0x3d1   : > { %4517 = vmatprep.subr.mxu1 %v4419_v25 }
 0x3d2   : > { %4518 = vmatpush1.msra.mxu1 %v4418_v7 }
 0x3d3   : > { %4219 = vmatmul.mubr.f32.gmra.mxu1 %v14456_v32  ;;  %4519 = vmatprep.subr.mxu1 %v4417_v49  ;;  %v4411_v32 = vld [vmem:[%s17664_s4 + $0x68] sm:$0xff] }
 0x3d4   : > { %9435 = vmatprep.mubr.msk.f32.mxu1 %vm4099_vm7, %v14466_v42  ;;  %4520 = vmatpush1.msra.mxu1 %v4416_v50  ;;  %v4410_v42 = vld [vmem:[%s17664_s4 + $0x60] sm:$0xff] }
 0x3d5   : > { %4521 = vmatprep.subr.mxu1 %v4415_v18 }
 0x3d6   : > { %4522 = vmatpush1.msra.mxu1 %v4414_v40 }
 0x3d7   : > { %4225 = vmatmul.mubr.f32.gmra.mxu1 %v14489_v53  ;;  %4523 = vmatprep.subr.mxu1 %v4413_v16  ;;  %v4407_v53 = vld [vmem:[%s17664_s4 + $0x48] sm:$0xff] }
 0x3d8   : > { %9436 = vmatprep.mubr.msk.f32.mxu1 %vm4099_vm7, %v14500_v5  ;;  %4524 = vmatpush1.msra.mxu1 %v4412_v15  ;;  %v4406_v5 = vld [vmem:[%s17664_s4 + $0x40] sm:$0xff] }
 0x3d9   : > { %4525 = vmatprep.subr.mxu1 %v4411_v32 }
 0x3da   : > { %4526 = vmatpush1.msra.mxu1 %v4410_v42 }
 0x3db   : > { %4231 = vmatmul.mubr.f32.gmra.mxu1 %v14528_v29  ;;  %4527 = vmatprep.subr.mxu1 %v4409_v30  ;;  %v4403_v29 = vld [vmem:[%s17664_s4 + $0x28] sm:$0xff] }
 0x3dc   : > { %9437 = vmatprep.mubr.msk.f32.mxu1 %vm4099_vm7, %v14550_v61  ;;  %4528 = vmatpush1.msra.mxu1 %v4408_v20  ;;  %v4402_v61 = vld [vmem:[%s17664_s4 + $0x20] sm:$0xff] }
 0x3dd   : > { %4529 = vmatprep.subr.mxu1 %v4407_v53 }
 0x3de   : > { %4530 = vmatpush1.msra.mxu1 %v4406_v5 }
 0x3df   : > { %4237 = vmatmul.mubr.f32.gmra.mxu1 %v14571_v28  ;;  %4531 = vmatprep.subr.mxu1 %v4405_v8  ;;  %v4399_v28 = vld [vmem:[%s17664_s4 + $0x8] sm:$0xff] }
 0x3e0   : > { %9438 = vmatprep.mubr.msk.f32.mxu1 %vm4099_vm7, %v14579_v59  ;;  %4532 = vmatpush1.msra.mxu1 %v4404_v46  ;;  %v4398_v59 = vld [vmem:[%s17664_s4] sm:$0xff] }
 0x3e1   : > { %4533 = vmatprep.subr.mxu1 %v4403_v29 }
 0x3e2   : > { %4534 = vmatpush1.msra.mxu1 %v4402_v61 }
 0x3e3   : > { %4243 = vmatmul.mubr.f32.gmra.mxu1 %v14598_v2  ;;  %4535 = vmatprep.subr.mxu1 %v4401_v0  ;;  %v4459_v2 = vld [vmem:[%s17664_s4 + $0x1e8] sm:$0xff] }
 0x3e4   : > { %9439 = vmatprep.mubr.msk.f32.mxu1 %vm4099_vm7, %v14604_v1  ;;  %4536 = vmatpush1.msra.mxu1 %v4400_v3  ;;  %v4458_v1 = vld [vmem:[%s17664_s4 + $0x1e0] sm:$0xff] }
 0x3e5   : > { %4537 = vmatprep.subr.mxu1 %v4399_v28 }
 0x3e6   : > { %4538 = vmatpush1.msra.mxu1 %v4398_v59 }
 0x3e7   : > { %4249 = vmatmul.mubr.f32.gmra.mxu1 %v14624_v9  ;;  %4539 = vmatprep.subr.mxu1 %v4461_v10  ;;  %v4455_v9 = vld [vmem:[%s17664_s4 + $0x1c8] sm:$0xff] }
 0x3e8   : > { %9440 = vmatprep.mubr.msk.f32.mxu1 %vm4099_vm7, %v14633_v21  ;;  %4540 = vmatpush2.msra.mxu1 %v4460_v41  ;;  %v4454_v21 = vld [vmem:[%s17664_s4 + $0x1c0] sm:$0xff] }
 0x3e9   : > { %4541 = vmatprep.subr.mxu1 %v4459_v2 }
 0x3ea   : > { %4542 = vmatpush2.msra.mxu1 %v4458_v1 }
 0x3eb   : > { %4255 = vmatmul.mubr.f32.gmra.mxu1 %v14652_v14  ;;  %4543 = vmatprep.subr.mxu1 %v4457_v24  ;;  %v4451_v14 = vld [vmem:[%s17664_s4 + $0x1a8] sm:$0xff] }
 0x3ec   : > { %9441 = vmatprep.mubr.msk.f32.mxu1 %vm4099_vm7, %v14660_v22  ;;  %4544 = vmatpush2.msra.mxu1 %v4456_v38  ;;  %v4450_v22 = vld [vmem:[%s17664_s4 + $0x1a0] sm:$0xff] }
 0x3ed   : > { %4545 = vmatprep.subr.mxu1 %v4455_v9 }
 0x3ee   : > { %4546 = vmatpush2.msra.mxu1 %v4454_v21 }
 0x3ef   : > { %4261 = vmatmul.mubr.f32.gmra.mxu1 %v14676_v37  ;;  %4547 = vmatprep.subr.mxu1 %v4453_v43  ;;  %v4447_v37 = vld [vmem:[%s17664_s4 + $0x188] sm:$0xff] }
 0x3f0   : > { %9442 = vmatprep.mubr.msk.f32.mxu1 %vm4099_vm7, %v14682_v35  ;;  %4548 = vmatpush2.msra.mxu1 %v4452_v11  ;;  %v4443_v35 = vld [vmem:[%s17664_s4 + $0x168] sm:$0xff] }
 0x3f1   : > { %4549 = vmatprep.subr.mxu1 %v4451_v14 }
 0x3f2   : > { %4550 = vmatpush2.msra.mxu1 %v4450_v22 }
 0x3f3   : > { %4267 = vmatmul.mubr.f32.gmra.mxu1 %v14693_v60  ;;  %4551 = vmatprep.subr.mxu1 %v4449_v12  ;;  %v4435_v60 = vld [vmem:[%s17664_s4 + $0x128] sm:$0xff] }
 0x3f4   : > { %4552 = vmatpush2.msra.mxu1 %v4448_v33 }
 0x3f5   : > { %4553 = vmatprep.subr.mxu1 %v4447_v37 }
 0x3f6   : > { %4554 = vmatpush2.msra.mxu1 %v4446_v57 }
 0x3f7   : > { %4555 = vmatprep.subr.mxu1 %v4445_v45 }
 0x3f8   : > { %4556 = vmatpush2.msra.mxu1 %v4444_v48 }
 0x3f9   : > { %4557 = vmatprep.subr.mxu1 %v4443_v35 }
 0x3fa   : > { %4558 = vmatpush2.msra.mxu1 %v4442_v54 }
 0x3fb   : > { %4559 = vmatprep.subr.mxu1 %v4441_v47 }
 0x3fc   : > { %4560 = vmatpush2.msra.mxu1 %v4440_v36 }
 0x3fd   : > { %4561 = vmatprep.subr.mxu1 %v4439_v63 }
 0x3fe   : > { %4562 = vmatpush2.msra.mxu1 %v4438_v23 }
 0x3ff   : > { %4563 = vmatprep.subr.mxu1 %v4437_v55 }
 0x400   : > { %4564 = vmatpush2.msra.mxu1 %v4436_v27 }
 0x401   : > { %4565 = vmatprep.subr.mxu1 %v4435_v60 }
 0x402   : > { %4566 = vmatpush2.msra.mxu1 %v4434_v52 }
 0x403   : > { %4567 = vmatprep.subr.mxu1 %v4433_v62 }
 0x404   : > { %4568 = vmatpush2.msra.mxu1 %v4432_v39 }
 0x405   : > { %4569 = vmatprep.subr.mxu1 %v4431_v4 }
 0x406   : > { %4570 = vmatpush2.msra.mxu1 %v4430_v19 }
 0x455   : > { %v4339_v13 = vpop.f32.mrf.mxu0 }
 0x456   : > { %9455 = vmatmul.mubr.msk.f32.vlgmr.msra.gmra.mxu0 %vm4470_vm8, %v4339_v13 }
 0x457   : > { %v4341_v34 = vpop.f32.mrf.mxu0  ;;  %4714 = vmatprep.mubr.f32.mxu0 %v17758_v26 }
 0x459   : > { %v4344_v58 = vpop.f32.mrf.mxu0 }
 0x45a   : > { %9456 = vmatmul.mubr.msk.f32.gmra.mxu0 %vm4470_vm8, %v4344_v58 }
 0x45b   : > { %v4346_v51 = vpop.f32.mrf.mxu0  ;;  %4720 = vmatprep.mubr.f32.mxu0 %v17758_v26 }
 0x45d   : > { %v4349_v56 = vpop.f32.mrf.mxu0 }
 0x45e   : > { %9457 = vmatmul.mubr.msk.f32.gmra.mxu0 %vm4470_vm8, %v4349_v56 }
 0x45f   : > { %v4351_v31 = vpop.f32.mrf.mxu0  ;;  %4726 = vmatprep.mubr.f32.mxu0 %v17758_v26 }
 0x461   : > { %v4354_v44 = vpop.f32.mrf.mxu0 }
 0x462   : > { %9458 = vmatmul.mubr.msk.f32.gmra.mxu0 %vm4470_vm8, %v4354_v44 }
 0x463   : > { %v4356_v25 = vpop.f32.mrf.mxu0  ;;  %4732 = vmatprep.mubr.f32.mxu0 %v17758_v26 }
 0x465   : > { %v4359_v7 = vpop.f32.mrf.mxu0 }
 0x466   : > { %9459 = vmatmul.mubr.msk.f32.gmra.mxu0 %vm4470_vm8, %v4359_v7 }
 0x467   : > { %v4361_v49 = vpop.f32.mrf.mxu0  ;;  %4738 = vmatprep.mubr.f32.mxu0 %v17758_v26 }
 0x469   : > { %v4364_v50 = vpop.f32.mrf.mxu0 }
 0x46a   : > { %9460 = vmatmul.mubr.msk.f32.gmra.mxu0 %vm4470_vm8, %v4364_v50 }
 0x46b   : > { %v4366_v18 = vpop.f32.mrf.mxu0  ;;  %4744 = vmatprep.mubr.f32.mxu0 %v17758_v26 }
 0x46d   : > { %v4369_v40 = vpop.f32.mrf.mxu0 }
 0x46e   : > { %9461 = vmatmul.mubr.msk.f32.gmra.mxu0 %vm4470_vm8, %v4369_v40 }
 0x46f   : > { %v4371_v16 = vpop.f32.mrf.mxu0  ;;  %4750 = vmatprep.mubr.f32.mxu0 %v17758_v26 }
 0x471   : > { %v4374_v15 = vpop.f32.mrf.mxu0 }
 0x472   : > { %9462 = vmatmul.mubr.msk.f32.gmra.mxu0 %vm4470_vm8, %v4374_v15 }
 0x473   : > { %v4376_v32 = vpop.f32.mrf.mxu0  ;;  %4756 = vmatprep.mubr.f32.mxu0 %v17758_v26 }
 0x475   : > { %v4379_v42 = vpop.f32.mrf.mxu0 }
 0x476   : > { %9463 = vmatmul.mubr.msk.f32.gmra.mxu0 %vm4470_vm8, %v4379_v42 }
 0x477   : > { %v4381_v30 = vpop.f32.mrf.mxu0  ;;  %4762 = vmatprep.mubr.f32.mxu0 %v17758_v26 }
 0x479   : > { %v4384_v20 = vpop.f32.mrf.mxu0 }
 0x47a   : > { %9464 = vmatmul.mubr.msk.f32.gmra.mxu0 %vm4470_vm8, %v4384_v20 }
 0x47b   : > { %v4386_v53 = vpop.f32.mrf.mxu0  ;;  %4768 = vmatprep.mubr.f32.mxu0 %v17758_v26 }
 0x47d   : > { %v4389_v5 = vpop.f32.mrf.mxu0 }
 0x47e   : > { %9465 = vmatmul.mubr.msk.f32.gmra.mxu0 %vm4470_vm8, %v4389_v5 }
 0x47f   : > { %v4391_v8 = vpop.f32.mrf.mxu0  ;;  %4774 = vmatprep.mubr.f32.mxu0 %v17758_v26 }
 0x481   : > { %v4394_v46 = vpop.f32.mrf.mxu0 }
 0x482   : > { %9466 = vmatmul.mubr.msk.f32.gmra.mxu0 %vm4470_vm8, %v4394_v46 }
 0x483   : > { %v4396_v29 = vpop.f32.mrf.mxu0 }
 0x487   : > { %v4202_v61 = vpop.f32.mrf.mxu1 }
 0x489   : > { %v4204_v0 = vpop.f32.mrf.mxu1 }
 0x48a   : > { %4571 = vmatprep.mubr.f32.mxu1 %v4204_v0 }
 0x48b   : > { %v4208_v3 = vpop.f32.mrf.mxu1  ;;  %4572 = vmatmul.mubr.f32.vlgmr.msra.gmra.mxu1 %v4202_v61 }
 0x48d   : > { %v4210_v28 = vpop.f32.mrf.mxu1 }
 0x48e   : > { %4577 = vmatprep.mubr.f32.mxu1 %v4210_v28 }
 0x48f   : > { %v4214_v59 = vpop.f32.mrf.mxu1  ;;  %4578 = vmatmul.mubr.f32.gmra.mxu1 %v4208_v3 }
 0x491   : > { %v4216_v10 = vpop.f32.mrf.mxu1 }
 0x492   : > { %4583 = vmatprep.mubr.f32.mxu1 %v4216_v10 }
 0x493   : > { %v4220_v41 = vpop.f32.mrf.mxu1  ;;  %4584 = vmatmul.mubr.f32.gmra.mxu1 %v4214_v59 }
 0x495   : > { %v4222_v2 = vpop.f32.mrf.mxu1 }
 0x496   : > { %4589 = vmatprep.mubr.f32.mxu1 %v4222_v2 }
 0x497   : > { %v4226_v1 = vpop.f32.mrf.mxu1  ;;  %4590 = vmatmul.mubr.f32.gmra.mxu1 %v4220_v41 }
 0x499   : > { %v4228_v24 = vpop.f32.mrf.mxu1 }
 0x49a   : > { %4595 = vmatprep.mubr.f32.mxu1 %v4228_v24 }
 0x49b   : > { %v4232_v38 = vpop.f32.mrf.mxu1  ;;  %4596 = vmatmul.mubr.f32.gmra.mxu1 %v4226_v1 }
 0x49d   : > { %v4234_v9 = vpop.f32.mrf.mxu1 }
 0x49e   : > { %4601 = vmatprep.mubr.f32.mxu1 %v4234_v9 }
 0x49f   : > { %v4238_v21 = vpop.f32.mrf.mxu1  ;;  %4602 = vmatmul.mubr.f32.gmra.mxu1 %v4232_v38 }
 0x4a1   : > { %v4240_v43 = vpop.f32.mrf.mxu1 }
 0x4a2   : > { %4607 = vmatprep.mubr.f32.mxu1 %v4240_v43 }
 0x4a3   : > { %v4244_v11 = vpop.f32.mrf.mxu1  ;;  %4608 = vmatmul.mubr.f32.gmra.mxu1 %v4238_v21 }
 0x4a5   : > { %v4246_v14 = vpop.f32.mrf.mxu1 }
 0x4a6   : > { %4613 = vmatprep.mubr.f32.mxu1 %v4246_v14 }
 0x4a7   : > { %v4250_v22 = vpop.f32.mrf.mxu1  ;;  %4614 = vmatmul.mubr.f32.gmra.mxu1 %v4244_v11 }
 0x4a9   : > { %v4252_v12 = vpop.f32.mrf.mxu1 }
 0x4aa   : > { %4619 = vmatprep.mubr.f32.mxu1 %v4252_v12 }
 0x4ab   : > { %v4256_v33 = vpop.f32.mrf.mxu1  ;;  %4620 = vmatmul.mubr.f32.gmra.mxu1 %v4250_v22 }
 0x4ad   : > { %v4258_v37 = vpop.f32.mrf.mxu1 }
 0x4ae   : > { %4625 = vmatprep.mubr.f32.mxu1 %v4258_v37 }
 0x4af   : > { %v4262_v57 = vpop.f32.mrf.mxu1  ;;  %4626 = vmatmul.mubr.f32.gmra.mxu1 %v4256_v33 }
 0x4b1   : > { %v4264_v45 = vpop.f32.mrf.mxu1 }
 0x4b2   : > { %4631 = vmatprep.mubr.f32.mxu1 %v4264_v45 }
 0x4b3   : > { %v4268_v48 = vpop.f32.mrf.mxu1  ;;  %4632 = vmatmul.mubr.f32.gmra.mxu1 %v4262_v57 }
 0x4b5   : > { %v4270_v35 = vpop.f32.mrf.mxu1 }
 0x4b6   : > { %4637 = vmatprep.mubr.f32.mxu1 %v4270_v35 }
 0x4b7   : > { %4638 = vmatmul.mubr.f32.gmra.mxu1 %v4268_v48 }
 0x516   : > { %v4710_v54 = vpop.f32.mrf.mxu0 }
 0x518   : > { %v4712_v47 = vpop.f32.mrf.mxu0 }
 0x51a   : > { %v4716_v36 = vpop.f32.mrf.mxu0 }
 0x51c   : > { %v4718_v63 = vpop.f32.mrf.mxu0 }
 0x51e   : > { %v4722_v23 = vpop.f32.mrf.mxu0 }
 0x520   : > { %v4724_v55 = vpop.f32.mrf.mxu0 }
 0x522   : > { %v4728_v27 = vpop.f32.mrf.mxu0 }
 0x524   : > { %v4730_v60 = vpop.f32.mrf.mxu0 }
 0x526   : > { %v4734_v52 = vpop.f32.mrf.mxu0 }
 0x528   : > { %v4736_v62 = vpop.f32.mrf.mxu0 }
 0x52a   : > { %v4740_v17 = vpop.f32.mrf.mxu0 }
 0x52c   : > { %v4742_v6 = vpop.f32.mrf.mxu0 }
 0x52e   : > { %v4746_v13 = vpop.f32.mrf.mxu0 }
 0x530   : > { %v4748_v31 = vpop.f32.mrf.mxu0 }
 0x532   : > { %v4752_v50 = vpop.f32.mrf.mxu0 }
 0x534   : > { %v4754_v32 = vpop.f32.mrf.mxu0 }
 0x536   : > { %v4758_v5 = vpop.f32.mrf.mxu0 }
 0x538   : > { %v4760_v0 = vpop.f32.mrf.mxu0 }
 0x53a   : > { %v4764_v10 = vpop.f32.mrf.mxu0 }
 0x53c   : > { %v4766_v24 = vpop.f32.mrf.mxu0 }
 0x53e   : > { %v4770_v43 = vpop.f32.mrf.mxu0 }
 0x540   : > { %v4772_v12 = vpop.f32.mrf.mxu0 }
 0x542   : > { %v4776_v45 = vpop.f32.mrf.mxu0 }
 0x54b   : > { %v4573_v39 = vpop.f32.mrf.mxu1 }
 0x54c   : > { %v14952_v4 = vadd.f32 %v4710_v54, %v4573_v39  ;;  %v4782_v39 = vld [vmem:[%s17665_s5 + $0x8] sm:$0xff] }
 0x54d   : > { %v4575_v19 = vpop.f32.mrf.mxu1 }
 0x54e   : > { %v14954_v34 = vadd.f32 %v4712_v47, %v4575_v19  ;;  %4854 = vrot.lane.b32.xlu1 %v14952_v4, %s18079_s1  ;;  %v4784_v19 = vld [vmem:[%s17665_s5 + $0x18] sm:$0xff] }
 0x54f   : > { %v4579_v58 = vpop.f32.mrf.mxu1 }
 0x550   : > { %v14958_v51 = vadd.f32 %v4716_v36, %v4579_v58  ;;  %4856 = vrot.lane.b32.xlu0 %v14954_v34, %s18079_s1  ;;  %v4786_v58 = vld [vmem:[%s17665_s5 + $0x28] sm:$0xff] }
 0x551   : > { %v4581_v56 = vpop.f32.mrf.mxu1 }
 0x552   : > { %v14962_v44 = vadd.f32 %v4718_v63, %v4581_v56  ;;  %4858 = vrot.lane.b32.xlu1 %v14958_v51, %s18079_s1  ;;  %v4787_v56 = vld [vmem:[%s17665_s5 + $0x30] sm:$0xff] }
 0x553   : > { %v4585_v25 = vpop.f32.mrf.mxu1 }
 0x554   : > { %v14966_v7 = vadd.f32 %v4722_v23, %v4585_v25  ;;  %4860 = vrot.lane.b32.xlu0 %v14962_v44, %s18079_s1  ;;  %v4789_v25 = vld [vmem:[%s17665_s5 + $0x40] sm:$0xff] }
 0x555   : > { %v4587_v49 = vpop.f32.mrf.mxu1 }
 0x556   : > { %v14970_v18 = vadd.f32 %v4724_v55, %v4587_v49  ;;  %4862 = vrot.lane.b32.xlu1 %v14966_v7, %s18079_s1  ;;  %v4790_v49 = vld [vmem:[%s17665_s5 + $0x48] sm:$0xff] }
 0x557   : > { %v4591_v40 = vpop.f32.mrf.mxu1 }
 0x558   : > { %v14974_v16 = vadd.f32 %v4728_v27, %v4591_v40  ;;  %4864 = vrot.lane.b32.xlu0 %v14970_v18, %s18079_s1  ;;  %v4778_v27 = vpop.f32.mrf.mxu0  ;;  %v4792_v40 = vld [vmem:[%s17665_s5 + $0x58] sm:$0xff] }
 0x559   : > { %v4593_v15 = vpop.f32.mrf.mxu1 }
 0x55a   : > { %v14978_v42 = vadd.f32 %v4730_v60, %v4593_v15  ;;  %4866 = vrot.lane.b32.xlu1 %v14974_v16, %s18079_s1  ;;  %v4793_v15 = vld [vmem:[%s17665_s5 + $0x60] sm:$0xff] }
 0x55b   : > { %v4597_v30 = vpop.f32.mrf.mxu1 }
 0x55c   : > { %v14982_v20 = vadd.f32 %v4734_v52, %v4597_v30  ;;  %4868 = vrot.lane.b32.xlu0 %v14978_v42, %s18079_s1  ;;  %v4795_v30 = vld [vmem:[%s17665_s5 + $0x70] sm:$0xff] }
 0x55d   : > { %v4599_v53 = vpop.f32.mrf.mxu1 }
 0x55e   : > { %v14986_v8 = vadd.f32 %v4736_v62, %v4599_v53  ;;  %4870 = vrot.lane.b32.xlu1 %v14982_v20, %s18079_s1  ;;  %v9467_v62 = vld [vmem:[%s17665_s5 + $0xc0] sm:$0xff]  ;;  %v4796_v53 = vld [vmem:[%s17665_s5 + $0x78] sm:$0xff] }
 0x55f   : > { %v4603_v46 = vpop.f32.mrf.mxu1  ;;  %10637 = vmatprep.mubr.msk.f32.mxu1 %vm4926_vm9, %v9467_v62 }
 0x560   : > { %v14990_v29 = vadd.f32 %v4740_v17, %v4603_v46  ;;  %4872 = vrot.lane.b32.xlu0 %v14986_v8, %s18079_s1  ;;  %v4781_v17 = vld [vmem:[%s17665_s5] sm:$0xff] }
 0x561   : > { %v4605_v61 = vpop.f32.mrf.mxu1  ;;  %10697 = vmatprep.mubr.msk.f32.mxu0 %vm4926_vm9, %v4781_v17 }
 0x562   : > { %v14994_v3 = vadd.f32 %v4742_v6, %v4605_v61  ;;  %4874 = vrot.lane.b32.xlu1 %v14990_v29, %s18079_s1  ;;  %v4783_v6 = vld [vmem:[%s17665_s5 + $0x10] sm:$0xff]  ;;  %v4798_v61 = vld [vmem:[%s17665_s5 + $0x88] sm:$0xff] }
 0x563   : > { %v4609_v28 = vpop.f32.mrf.mxu1 }
 0x564   : > { %4876 = vrot.lane.b32.xlu0 %v14994_v3, %s18079_s1  ;;  %v15002_v2 = vadd.f32 %v4746_v13, %v4609_v28  ;;  %v4785_v13 = vld [vmem:[%s17665_s5 + $0x20] sm:$0xff]  ;;  %v4799_v28 = vld [vmem:[%s17665_s5 + $0x90] sm:$0xff] }
 0x565   : > { %v4611_v59 = vpop.f32.mrf.mxu1 }
 0x566   : > { %5486 = vrot.lane.b32.xlu1 %v14990_v29, %s17739_s27  ;;  %v15006_v38 = vadd.f32 %v4748_v31, %v4611_v59  ;;  %v4788_v31 = vld [vmem:[%s17665_s5 + $0x38] sm:$0xff] }
 0x567   : > { %v4615_v41 = vpop.f32.mrf.mxu1 }
 0x568   : > { %5488 = vrot.lane.b32.xlu0 %v14994_v3, %s17739_s27  ;;  %v15014_v14 = vadd.f32 %v4752_v50, %v4615_v41  ;;  %v4791_v50 = vld [vmem:[%s17665_s5 + $0x50] sm:$0xff] }
 0x569   : > { %v4617_v1 = vpop.f32.mrf.mxu1 }
 0x56a   : > { %4878 = vrot.lane.b32.xlu1 %v15002_v2, %s18079_s1  ;;  %v15018_v33 = vadd.f32 %v4754_v32, %v4617_v1  ;;  %v4794_v32 = vld [vmem:[%s17665_s5 + $0x68] sm:$0xff]  ;;  %v4801_v1 = vld [vmem:[%s17665_s5 + $0xa0] sm:$0xff] }
 0x56b   : > { %v4621_v9 = vpop.f32.mrf.mxu1 }
 0x56c   : > { %4880 = vrot.lane.b32.xlu0 %v15006_v38, %s18079_s1  ;;  %v15026_v35 = vadd.f32 %v4758_v5, %v4621_v9  ;;  %v4797_v5 = vld [vmem:[%s17665_s5 + $0x80] sm:$0xff]  ;;  %v4802_v9 = vld [vmem:[%s17665_s5 + $0xa8] sm:$0xff] }
 0x56d   : > { %v4623_v21 = vpop.f32.mrf.mxu1 }
 0x56e   : > { %5490 = vrot.lane.b32.xlu1 %v15002_v2, %s17739_s27  ;;  %v15034_v36 = vadd.f32 %v4760_v0, %v4623_v21 }
 0x56f   : > { %v4627_v11 = vpop.f32.mrf.mxu1 }
 0x570   : > { %5492 = vrot.lane.b32.xlu0 %v15006_v38, %s17739_s27  ;;  %v15036_v63 = vadd.f32 %v4764_v10, %v4627_v11  ;;  %v4800_v10 = vld [vmem:[%s17665_s5 + $0x98] sm:$0xff] }
 0x571   : > { %v4629_v22 = vpop.f32.mrf.mxu1 }
 0x572   : > { %4882 = vrot.lane.b32.xlu1 %v15014_v14, %s18079_s1  ;;  %v15054_v23 = vadd.f32 %v4766_v24, %v4629_v22  ;;  %v4804_v22 = vld [vmem:[%s17665_s5 + $0xb8] sm:$0xff] }
 0x573   : > { %v4633_v37 = vpop.f32.mrf.mxu1 }
 0x574   : > { %4884 = vrot.lane.b32.xlu0 %v15018_v33, %s18079_s1  ;;  %v15028_v54 = vadd.f32 %v4770_v43, %v4633_v37  ;;  %v4803_v43 = vld [vmem:[%s17665_s5 + $0xb0] sm:$0xff] }
 0x575   : > { %v4635_v57 = vpop.f32.mrf.mxu1 }
 0x576   : > { %5494 = vrot.lane.b32.xlu1 %v15014_v14, %s17739_s27  ;;  %v4773_v55 = vadd.f32 %v4772_v12, %v4635_v57 }
 0x577   : > { %v4639_v48 = vpop.f32.mrf.mxu1 }
 0x578   : > { %v15030_v47 = vadd.f32 %v4776_v45, %v4639_v48  ;;  %5496 = vrot.lane.b32.xlu0 %v15018_v33, %s17739_s27 }
 0x579   : > { %v4641_v60 = vpop.f32.mrf.mxu1 }
 0x57a   : > { %4886 = vrot.lane.b32.xlu1 %v15026_v35, %s18079_s1  ;;  %10673 = vmatprep.subr.mxu0 %v15030_v47  ;;  %v15086_v52 = vadd.f32 %v4778_v27, %v4641_v60 }
 0x57b   : > { %10674 = vmatpush3.msra.mxu0 %v15030_v47 }
 0x57c   : > { %4888 = vrot.lane.b32.xlu0 %v15034_v36, %s18079_s1  ;;  %10675 = vmatprep.subr.mxu0 %v15028_v54 }
 0x57d   : > { %10676 = vmatpush3.msra.mxu0 %v15028_v54 }
 0x57e   : > { %5498 = vrot.lane.b32.xlu1 %v15026_v35, %s17739_s27  ;;  %10677 = vmatprep.subr.mxu0 %v15036_v63 }
 0x57f   : > { %10678 = vmatpush3.msra.mxu0 %v15036_v63 }
 0x580   : > { %5500 = vrot.lane.b32.xlu0 %v15034_v36, %s17739_s27  ;;  %10679 = vmatprep.subr.mxu0 %v15026_v35 }
 0x581   : > { %10680 = vmatpush3.msra.mxu0 %v15026_v35 }
 0x582   : > { %4890 = vrot.lane.b32.xlu1 %v15036_v63, %s18079_s1  ;;  %10681 = vmatprep.subr.mxu0 %v15014_v14 }
 0x583   : > { %10682 = vmatpush3.msra.mxu0 %v15014_v14 }
 0x584   : > { %4892 = vrot.lane.b32.xlu0 %v15054_v23, %s18079_s1  ;;  %10683 = vmatprep.subr.mxu0 %v15002_v2 }
 0x585   : > { %10684 = vmatpush3.msra.mxu0 %v15002_v2 }
 0x586   : > { %5502 = vrot.lane.b32.xlu1 %v15036_v63, %s17739_s27  ;;  %10685 = vmatprep.subr.mxu0 %v14990_v29 }
 0x587   : > { %10686 = vmatpush3.msra.mxu0 %v14990_v29 }
 0x588   : > { %5504 = vrot.lane.b32.xlu0 %v15054_v23, %s17739_s27  ;;  %10687 = vmatprep.subr.mxu0 %v14982_v20 }
 0x589   : > { %10688 = vmatpush3.msra.mxu0 %v14982_v20 }
 0x58a   : > { %4894 = vrot.lane.b32.xlu1 %v15028_v54, %s18079_s1  ;;  %10689 = vmatprep.subr.mxu0 %v14974_v16 }
 0x58b   : > { %10690 = vmatpush3.msra.mxu0 %v14974_v16 }
 0x58c   : > { %4896 = vrot.lane.b32.xlu0 %v4773_v55, %s18079_s1  ;;  %10691 = vmatprep.subr.mxu0 %v14966_v7 }
 0x58d   : > { %10692 = vmatpush3.msra.mxu0 %v14966_v7 }
 0x58e   : > { %5506 = vrot.lane.b32.xlu1 %v15028_v54, %s17739_s27  ;;  %10693 = vmatprep.subr.mxu0 %v14958_v51 }
 0x58f   : > { %10694 = vmatpush3.msra.mxu0 %v14958_v51 }
 0x590   : > { %5508 = vrot.lane.b32.xlu0 %v4773_v55, %s17739_s27  ;;  %10695 = vmatprep.subr.mxu0 %v14952_v4 }
 0x591   : > { %10696 = vmatpush3.msra.mxu0 %v14952_v4 }
 0x592   : > { %4898 = vrot.lane.b32.xlu1 %v15030_v47, %s18079_s1  ;;  %10698 = vmatmul.mubr.msk.f32.vlgmr.msra.gmra.mxu0 %vm4926_vm9, %v4782_v39 }
 0x593   : > { %10700 = vmatprep.mubr.msk.f32.mxu0 %vm4926_vm9, %v4783_v6 }
 0x594   : > { %4900 = vrot.lane.b32.xlu0 %v15086_v52, %s18079_s1  ;;  %s11534_s1 = smov 96  }
 0x596   : > { %5482 = vrot.lane.b32.xlu1 %v14982_v20, %s17739_s27  ;;  %10701 = vmatmul.mubr.msk.f32.gmra.mxu0 %vm4926_vm9, %v4784_v19 }
 0x597   : > { %10703 = vmatprep.mubr.msk.f32.mxu0 %vm4926_vm9, %v4785_v13 }
 0x598   : > { %5484 = vrot.lane.b32.xlu0 %v14986_v8, %s17739_s27 }
 0x59a   : > { %5510 = vrot.lane.b32.xlu1 %v15030_v47, %s17739_s27  ;;  %10704 = vmatmul.mubr.msk.f32.gmra.mxu0 %vm4926_vm9, %v4786_v58 }
 0x59b   : > { %10706 = vmatprep.mubr.msk.f32.mxu0 %vm4926_vm9, %v4787_v56  ;;  %v6590_v56 = vld [vmem:[%s17666_s6 + $0x78] sm:$0xff] }
 0x59c   : > { %5480 = vrot.lane.b32.xlu0 %v14978_v42, %s17739_s27 }
 0x59e   : > { %5478 = vrot.lane.b32.xlu1 %v14974_v16, %s17739_s27  ;;  %10707 = vmatmul.mubr.msk.f32.gmra.mxu0 %vm4926_vm9, %v4788_v31 }
 0x59f   : > { %10709 = vmatprep.mubr.msk.f32.mxu0 %vm4926_vm9, %v4789_v25 }
 0x5a0   : > { %5476 = vrot.lane.b32.xlu0 %v14970_v18, %s17739_s27 }
 0x5a2   : > { %5474 = vrot.lane.b32.xlu1 %v14966_v7, %s17739_s27  ;;  %10710 = vmatmul.mubr.msk.f32.gmra.mxu0 %vm4926_vm9, %v4790_v49 }
 0x5a3   : > { %10712 = vmatprep.mubr.msk.f32.mxu0 %vm4926_vm9, %v4791_v50  ;;  %v6588_v50 = vld [vmem:[%s17666_s6 + $0x68] sm:$0xff] }
 0x5a4   : > { %5472 = vrot.lane.b32.xlu0 %v14962_v44, %s17739_s27 }
 0x5a6   : > { %5470 = vrot.lane.b32.xlu1 %v14958_v51, %s17739_s27  ;;  %10713 = vmatmul.mubr.msk.f32.gmra.mxu0 %vm4926_vm9, %v4792_v40 }
 0x5a7   : > { %10715 = vmatprep.mubr.msk.f32.mxu0 %vm4926_vm9, %v4793_v15  ;;  %v6587_v15 = vld [vmem:[%s17666_s6 + $0x60] sm:$0xff] }
 0x5a8   : > { %5468 = vrot.lane.b32.xlu0 %v14954_v34, %s17739_s27 }
 0x5aa   : > { %5466 = vrot.lane.b32.xlu1 %v14952_v4, %s17739_s27  ;;  %10716 = vmatmul.mubr.msk.f32.gmra.mxu0 %vm4926_vm9, %v4794_v32 }
 0x5ab   : > { %10718 = vmatprep.mubr.msk.f32.mxu0 %vm4926_vm9, %v4795_v30 }
 0x5ac   : > { %5886 = vrot.lane.b32.xlu0 %v4773_v55, %s18080_s23 }
 0x5ae   : > { %5888 = vrot.lane.b32.xlu1 %v15030_v47, %s18080_s23  ;;  %10719 = vmatmul.mubr.msk.f32.gmra.mxu0 %vm4926_vm9, %v4796_v53  ;;  %v6586_v53 = vld [vmem:[%s17666_s6 + $0x58] sm:$0xff] }
 0x5af   : > { %10721 = vmatprep.mubr.msk.f32.mxu0 %vm4926_vm9, %v4797_v5 }
 0x5b0   : > { %5882 = vrot.lane.b32.xlu0 %v15054_v23, %s18080_s23 }
 0x5b2   : > { %5884 = vrot.lane.b32.xlu1 %v15028_v54, %s18080_s23  ;;  %10722 = vmatmul.mubr.msk.f32.gmra.mxu0 %vm4926_vm9, %v4798_v61 }
 0x5b3   : > { %10724 = vmatprep.mubr.msk.f32.mxu0 %vm4926_vm9, %v4799_v28  ;;  %v6585_v28 = vld [vmem:[%s17666_s6 + $0x50] sm:$0xff] }
 0x5b4   : > { %6264 = vrot.lane.b32.xlu0 %v4773_v55, %s18081_s30 }
 0x5b6   : > { %6266 = vrot.lane.b32.xlu1 %v15030_v47, %s18081_s30  ;;  %10725 = vmatmul.mubr.msk.f32.gmra.mxu0 %vm4926_vm9, %v4800_v10 }
 0x5b7   : > { %10727 = vmatprep.mubr.msk.f32.mxu0 %vm4926_vm9, %v4801_v1 }
 0x5b8   : > { %5878 = vrot.lane.b32.xlu0 %v15034_v36, %s18080_s23 }
 0x5ba   : > { %5880 = vrot.lane.b32.xlu1 %v15036_v63, %s18080_s23  ;;  %10728 = vmatmul.mubr.msk.f32.gmra.mxu0 %vm4926_vm9, %v4802_v9  ;;  %v6584_v9 = vld [vmem:[%s17666_s6 + $0x48] sm:$0xff] }
 0x5bb   : > { %10730 = vmatprep.mubr.msk.f32.mxu0 %vm4926_vm9, %v4803_v43 }
 0x5bc   : > { %6260 = vrot.lane.b32.xlu0 %v15054_v23, %s18081_s30 }
 0x5be   : > { %6262 = vrot.lane.b32.xlu1 %v15028_v54, %s18081_s30  ;;  %10731 = vmatmul.mubr.msk.f32.gmra.mxu0 %vm4926_vm9, %v4804_v22 }
 0x5c0   : > { %v15203_v46 = vpop.permute.xlu1 %4854  ;;  %5874 = vrot.lane.b32.xlu0 %v15018_v33, %s18080_s23 }
 0x5c2   : > { %v15211_v0 = vpop.permute.xlu0 %4856  ;;  %5876 = vrot.lane.b32.xlu1 %v15026_v35, %s18080_s23 }
 0x5c4   : > { %v15219_v59 = vpop.permute.xlu1 %4858  ;;  %5512 = vrot.lane.b32.xlu0 %v15086_v52, %s17739_s27  ;;  %s11531_s27 = smov 120  }
 0x5c6   : > { %v15227_v41 = vpop.permute.xlu0 %4860  ;;  %6258 = vrot.lane.b32.xlu1 %v15036_v63, %s18081_s30 }
 0x5c8   : > { %v15235_v24 = vpop.permute.xlu1 %4862  ;;  %6256 = vrot.lane.b32.xlu0 %v15034_v36, %s18081_s30 }
 0x5ca   : > { %v15243_v21 = vpop.permute.xlu0 %4864  ;;  %5872 = vrot.lane.b32.xlu1 %v15014_v14, %s18080_s23 }
 0x5cb   : > { %v4904_v22 = vsel %vm952_vm3, %v15235_v24, %v15243_v21  ;;  %v4902_v24 = vsel %vm952_vm3, %v15203_v46, %v15211_v0  ;;  %v6581_v21 = vld [vmem:[%s17666_s6 + $0x30] sm:$0xff]  ;;  %v6580_v46 = vld [vmem:[%s17666_s6 + $0x28] sm:$0xff] }
 0x5cc   : > { %v15251_v11 = vpop.permute.xlu1 %4866  ;;  %5870 = vrot.lane.b32.xlu0 %v15006_v38, %s18080_s23 }
 0x5ce   : > { %v15259_v12 = vpop.permute.xlu0 %4868  ;;  %6254 = vrot.lane.b32.xlu1 %v15026_v35, %s18081_s30 }
 0x5cf   : > { %v4905_v1 = vsel %vm952_vm3, %v15251_v11, %v15259_v12  ;;  %v4903_v12 = vsel %vm952_vm3, %v15219_v59, %v15227_v41  ;;  %v9468_v59 = vld [vmem:[%s17665_s5 + $0xc8] sm:$0xff] }
 0x5d0   : > { %v15264_v37 = vpop.permute.xlu1 %4870  ;;  %6252 = vrot.lane.b32.xlu0 %v15018_v33, %s18081_s30 }
 0x5d2   : > { %v15268_v57 = vpop.permute.xlu0 %4872  ;;  %5868 = vrot.lane.b32.xlu1 %v15002_v2, %s18080_s23 }
 0x5d3   : > { %v4906_v61 = vsel %vm952_vm3, %v15264_v37, %v15268_v57  ;;  %v6583_v37 = vld [vmem:[%s17666_s6 + $0x40] sm:$0xff]  ;;  %v6582_v57 = vld [vmem:[%s17666_s6 + $0x38] sm:$0xff] }
 0x5d4   : > { %v15272_v45 = vpop.permute.xlu1 %4874  ;;  %5866 = vrot.lane.b32.xlu0 %v14994_v3, %s18080_s23 }
 0x5d6   : > { %v15276_v48 = vpop.permute.xlu0 %4876  ;;  %6250 = vrot.lane.b32.xlu1 %v15014_v14, %s18081_s30 }
 0x5d7   : > { %v4907_v30 = vsel %vm952_vm3, %v15272_v45, %v15276_v48  ;;  %v9469_v48 = vld [vmem:[%s17665_s5 + $0xd0] sm:$0xff] }
 0x5d8   : > { %v15280_v35 = vpop.permute.xlu1 %5486  ;;  %6248 = vrot.lane.b32.xlu0 %v15006_v38, %s18081_s30 }
 0x5da   : > { %v15284_v33 = vpop.permute.xlu0 %5488  ;;  %5864 = vrot.lane.b32.xlu1 %v14990_v29, %s18080_s23 }
 0x5dc   : > { %v15288_v54 = vpop.permute.xlu1 %4878  ;;  %5862 = vrot.lane.b32.xlu0 %v14986_v8, %s18080_s23 }
 0x5de   : > { %v15292_v47 = vpop.permute.xlu0 %4880  ;;  %6246 = vrot.lane.b32.xlu1 %v15002_v2, %s18081_s30 }
 0x5df   : > { %v4908_v40 = vsel %vm952_vm3, %v15288_v54, %v15292_v47  ;;  %v6579_v54 = vld [vmem:[%s17666_s6 + $0x20] sm:$0xff]  ;;  %v9470_v47 = vld [vmem:[%s17665_s5 + $0xd8] sm:$0xff] }
 0x5e0   : > { %v15296_v14 = vpop.permute.xlu1 %5490  ;;  %6244 = vrot.lane.b32.xlu0 %v14994_v3, %s18081_s30 }
 0x5e2   : > { %v15300_v38 = vpop.permute.xlu0 %5492  ;;  %5860 = vrot.lane.b32.xlu1 %v14982_v20, %s18080_s23 }
 0x5e4   : > { %v4883_v36 = vpop.permute.xlu1 %4882  ;;  %5858 = vrot.lane.b32.xlu0 %v14978_v42, %s18080_s23 }
 0x5e6   : > { %v4885_v63 = vpop.permute.xlu0 %4884  ;;  %6242 = vrot.lane.b32.xlu1 %v14990_v29, %s18081_s30 }
 0x5e7   : > { %v4909_v49 = vsel %vm952_vm3, %v4883_v36, %v4885_v63  ;;  %v9471_v63 = vld [vmem:[%s17665_s5 + $0xe0] sm:$0xff] }
 0x5e8   : > { %v15308_v23 = vpop.permute.xlu1 %5494  ;;  %6240 = vrot.lane.b32.xlu0 %v14986_v8, %s18081_s30 }
 0x5ea   : > { %v15312_v2 = vpop.permute.xlu0 %5496  ;;  %5856 = vrot.lane.b32.xlu1 %v14974_v16, %s18080_s23 }
 0x5ec   : > { %v4887_v3 = vpop.permute.xlu1 %4886  ;;  %5854 = vrot.lane.b32.xlu0 %v14970_v18, %s18080_s23 }
 0x5ee   : > { %v4889_v55 = vpop.permute.xlu0 %4888  ;;  %6238 = vrot.lane.b32.xlu1 %v14982_v20, %s18081_s30 }
 0x5f0   : > { %v15320_v27 = vpop.permute.xlu1 %5498  ;;  %5890 = vrot.lane.b32.xlu0 %v15086_v52, %s18080_s23 }
 0x5f2   : > { %v15324_v29 = vpop.permute.xlu0 %5500  ;;  %5852 = vrot.lane.b32.xlu1 %v14966_v7, %s18080_s23 }
 0x5f4   : > { %v4891_v8 = vpop.permute.xlu1 %4890  ;;  %6268 = vrot.lane.b32.xlu0 %v15086_v52, %s18081_s30 }
 0x5f6   : > { %v4893_v60 = vpop.permute.xlu0 %4892  ;;  %6234 = vrot.lane.b32.xlu1 %v14974_v16, %s18081_s30  ;;  %v9587_v16 = vld [vmem:[%s17665_s5 + $0x240] sm:$0xff] }
 0x5f7   : > { %10817 = vmatprep.mubr.msk.f32.mxu0 %vm4926_vm9, %v9587_v16  ;;  %v6576_v16 = vld [vmem:[%s17666_s6 + $0x8] sm:$0xff] }
 0x5f8   : > { %v15332_v62 = vpop.permute.xlu1 %5502  ;;  %6236 = vrot.lane.b32.xlu0 %v14978_v42, %s18081_s30 }
 0x5fa   : > { %v15336_v20 = vpop.permute.xlu0 %5504  ;;  %5848 = vrot.lane.b32.xlu1 %v14958_v51, %s18080_s23 }
 0x5fc   : > { %v4895_v17 = vpop.permute.xlu1 %4894  ;;  %5850 = vrot.lane.b32.xlu0 %v14962_v44, %s18080_s23 }
 0x5fe   : > { %v4897_v39 = vpop.permute.xlu0 %4896  ;;  %6230 = vrot.lane.b32.xlu1 %v14966_v7, %s18081_s30 }
 0x600   : > { %v15347_v52 = vpop.permute.xlu1 %5506  ;;  %6232 = vrot.lane.b32.xlu0 %v14970_v18, %s18081_s30  ;;  %v4912_v18 = vsel %vm952_vm3, %v4895_v17, %v4897_v39  ;;  %v9473_v39 = vld [vmem:[%s17665_s5 + $0xf0] sm:$0xff] }
 0x602   : > { %v15352_v42 = vpop.permute.xlu0 %5508  ;;  %5844 = vrot.lane.b32.xlu1 %v14952_v4, %s18080_s23 }
 0x604   : > { %v4899_v6 = vpop.permute.xlu1 %4898  ;;  %5846 = vrot.lane.b32.xlu0 %v14954_v34, %s18080_s23 }
 0x606   : > { %6226 = vrot.lane.b32.xlu1 %v14958_v51, %s18081_s30  ;;  %v4901_v7 = vpop.permute.xlu0 %4900  ;;  %v4911_v51 = vsel %vm952_vm3, %v4891_v8, %v4893_v60  ;;  %v6577_v8 = vld [vmem:[%s17666_s6 + $0x10] sm:$0xff]  ;;  %v9472_v60 = vld [vmem:[%s17665_s5 + $0xe8] sm:$0xff] }
 0x607   : > { %v4913_v19 = vsel %vm952_vm3, %v4899_v6, %v4901_v7  ;;  %v6575_v7 = vld [vmem:[%s17666_s6] sm:$0xff] }
 0x608   : > { %v15361_v13 = vpop.permute.xlu1 %5482  ;;  %6228 = vrot.lane.b32.xlu0 %v14962_v44, %s18081_s30  ;;  %10613 = vmatprep.subr.mxu1 %v4913_v19  ;;  %v4910_v44 = vsel %vm952_vm3, %v4887_v3, %v4889_v55  ;;  %v6578_v3 = vld [vmem:[%s17666_s6 + $0x18] sm:$0xff] }
 0x609   : > { %10614 = vmatpush3.msra.mxu1 %v4913_v19  ;;  %v9474_v19 = vld [vmem:[%s17665_s5 + $0xf8] sm:$0xff] }
 0x60a   : > { %6222 = vrot.lane.b32.xlu1 %v14952_v4, %s18081_s30  ;;  %10615 = vmatprep.subr.mxu1 %v4912_v18  ;;  %v15368_v58 = vpop.permute.xlu0 %5484  ;;  %v6589_v4 = vld [vmem:[%s17666_s6 + $0x70] sm:$0xff] }
 0x60b   : > { %10616 = vmatpush3.msra.mxu1 %v4912_v18 }
 0x60c   : > { %v15374_v31 = vpop.permute.xlu1 %5510  ;;  %6224 = vrot.lane.b32.xlu0 %v14954_v34, %s18081_s30  ;;  %10617 = vmatprep.subr.mxu1 %v4911_v51 }
 0x60d   : > { %10618 = vmatpush3.msra.mxu1 %v4911_v51  ;;  %v9475_v51 = vld [vmem:[%s17665_s5 + $0x100] sm:$0xff] }
 0x60e   : > { %6676 = vperm.xlu1 %11455, %v6590_v56   ;;  %10619 = vmatprep.subr.mxu1 %v4910_v44  ;;  %v15382_v25 = vpop.permute.xlu0 %5480  ;;  %v6598_v56 = vld [vmem:[%s17666_s6 + $0xb8] sm:$0xff] }
 0x60f   : > { %10620 = vmatpush3.msra.mxu1 %v4910_v44 }
 0x610   : > { %v15388_v34 = vpop.permute.xlu1 %5478  ;;  %6671 = vperm.xlu0 %11454, %v6589_v4   ;;  %10621 = vmatprep.subr.mxu1 %v4909_v49  ;;  %v6597_v4 = vld [vmem:[%s17666_s6 + $0xb0] sm:$0xff] }
 0x611   : > { %10622 = vmatpush3.msra.mxu1 %v4909_v49  ;;  %v9476_v49 = vld [vmem:[%s17665_s5 + $0x108] sm:$0xff] }
 0x612   : > { %6666 = vperm.xlu1 %11455, %v6588_v50   ;;  %10623 = vmatprep.subr.mxu1 %v4908_v40  ;;  %v15396_v32 = vpop.permute.xlu0 %5476 }
 0x613   : > { %10624 = vmatpush3.msra.mxu1 %v4908_v40  ;;  %v9477_v40 = vld [vmem:[%s17665_s5 + $0x110] sm:$0xff] }
 0x614   : > { %v15404_v5 = vpop.permute.xlu1 %5474  ;;  %6661 = vperm.xlu0 %11454, %v6587_v15   ;;  %10625 = vmatprep.subr.mxu1 %v4907_v30  ;;  %v6596_v15 = vld [vmem:[%s17666_s6 + $0xa8] sm:$0xff] }
 0x615   : > { %10626 = vmatpush3.msra.mxu1 %v4907_v30 }
 0x616   : > { %6656 = vperm.xlu1 %11455, %v6586_v53   ;;  %10627 = vmatprep.subr.mxu1 %v4906_v61  ;;  %v15412_v10 = vpop.permute.xlu0 %5472  ;;  %v6595_v53 = vld [vmem:[%s17666_s6 + $0xa0] sm:$0xff] }
 0x617   : > { %10628 = vmatpush3.msra.mxu1 %v4906_v61  ;;  %v9478_v61 = vld [vmem:[%s17665_s5 + $0x118] sm:$0xff] }
 0x618   : > { %v15420_v43 = vpop.permute.xlu1 %5470  ;;  %6651 = vperm.xlu0 %11454, %v6585_v28   ;;  %10629 = vmatprep.subr.mxu1 %v4905_v1 }
 0x619   : > { %10630 = vmatpush3.msra.mxu1 %v4905_v1  ;;  %v9479_v1 = vld [vmem:[%s17665_s5 + $0x120] sm:$0xff] }
 0x61a   : > { %6646 = vperm.xlu1 %11455, %v6584_v9   ;;  %10631 = vmatprep.subr.mxu1 %v4904_v22  ;;  %v15428_v11 = vpop.permute.xlu0 %5468  ;;  %v6594_v9 = vld [vmem:[%s17666_s6 + $0x98] sm:$0xff] }
 0x61b   : > { %10632 = vmatpush3.msra.mxu1 %v4904_v22 }
 0x61c   : > { %v15436_v45 = vpop.permute.xlu1 %5466  ;;  %6641 = vperm.xlu0 %11454, %v6583_v37   ;;  %10633 = vmatprep.subr.mxu1 %v4903_v12  ;;  %v6593_v37 = vld [vmem:[%s17666_s6 + $0x90] sm:$0xff] }
 0x61d   : > { %10634 = vmatpush3.msra.mxu1 %v4903_v12  ;;  %v9480_v12 = vld [vmem:[%s17665_s5 + $0x128] sm:$0xff] }
 0x61e   : > { %6636 = vperm.xlu1 %11455, %v6582_v57   ;;  %10635 = vmatprep.subr.mxu1 %v4902_v24  ;;  %v15447_v41 = vpop.permute.xlu0 %5886 }
 0x61f   : > { %10636 = vmatpush3.msra.mxu1 %v4902_v24  ;;  %v9481_v24 = vld [vmem:[%s17665_s5 + $0x130] sm:$0xff] }
 0x620   : > { %v15455_v0 = vpop.permute.xlu1 %5888  ;;  %6631 = vperm.xlu0 %11454, %v6581_v21   ;;  %10638 = vmatmul.mubr.msk.f32.vlgmr.msra.gmra.mxu1 %vm4926_vm9, %v9468_v59  ;;  %v6592_v59 = vld [vmem:[%s17666_s6 + $0x88] sm:$0xff] }
 0x621   : > { %10640 = vmatprep.mubr.msk.f32.mxu1 %vm4926_vm9, %v9469_v48 }
 0x622   : > { %6626 = vperm.xlu1 %11455, %v6580_v46   ;;  %v15465_v36 = vpop.permute.xlu0 %5882  ;;  %v6591_v46 = vld [vmem:[%s17666_s6 + $0x80] sm:$0xff] }
 0x624   : > { %v15473_v55 = vpop.permute.xlu1 %5884  ;;  %6621 = vperm.xlu0 %11454, %v6579_v54   ;;  %10641 = vmatmul.mubr.msk.f32.gmra.mxu1 %vm4926_vm9, %v9470_v47  ;;  %v9482_v47 = vld [vmem:[%s17665_s5 + $0x138] sm:$0xff] }
 0x625   : > { %10643 = vmatprep.mubr.msk.f32.mxu1 %vm4926_vm9, %v9471_v63  ;;  %v9483_v63 = vld [vmem:[%s17665_s5 + $0x140] sm:$0xff] }
 0x626   : > { %6616 = vperm.xlu1 %11455, %v6578_v3   ;;  %v15483_v17 = vpop.permute.xlu0 %6264 }
 0x628   : > { %v15491_v6 = vpop.permute.xlu1 %6266  ;;  %6611 = vperm.xlu0 %11454, %v6577_v8   ;;  %10644 = vmatmul.mubr.msk.f32.gmra.mxu1 %vm4926_vm9, %v9472_v60  ;;  %v5523_v8 = vsel %vm1976_vm4, %v15332_v62, %v15336_v20  ;;  %v9484_v60 = vld [vmem:[%s17665_s5 + $0x148] sm:$0xff]  ;;  %v9485_v62 = vld [vmem:[%s17665_s5 + $0x150] sm:$0xff] }
 0x629   : > { %10646 = vmatprep.mubr.msk.f32.mxu1 %vm4926_vm9, %v9473_v39 }
 0x62a   : > { %6606 = vperm.xlu1 %11455, %v6576_v16   ;;  %v15501_v18 = vpop.permute.xlu0 %5878  ;;  %v9486_v16 = vld [vmem:[%s17665_s5 + $0x158] sm:$0xff] }
 0x62c   : > { %v15509_v44 = vpop.permute.xlu1 %5880  ;;  %6601 = vperm.xlu0 %11454, %v6575_v7   ;;  %10647 = vmatmul.mubr.msk.f32.gmra.mxu1 %vm4926_vm9, %v9474_v19  ;;  %v9488_v19 = vld [vmem:[%s17665_s5 + $0x168] sm:$0xff] }
 0x62d   : > { %10649 = vmatprep.mubr.msk.f32.mxu1 %vm4926_vm9, %v9475_v51 }
 0x62e   : > { %6716 = vperm.xlu1 %11455, %v6598_v56   ;;  %v15519_v50 = vpop.permute.xlu0 %6260  ;;  %v9490_v56 = vld [vmem:[%s17665_s5 + $0x178] sm:$0xff] }
 0x630   : > { %v15527_v30 = vpop.permute.xlu1 %6262  ;;  %6711 = vperm.xlu0 %11454, %v6597_v4   ;;  %10650 = vmatmul.mubr.msk.f32.gmra.mxu1 %vm4926_vm9, %v9476_v49  ;;  %v9540_v49 = vld [vmem:[%s17665_s5 + $0x188] sm:$0xff] }
 0x631   : > { %10652 = vmatprep.mubr.msk.f32.mxu1 %vm4926_vm9, %v9477_v40 }
 0x632   : > { %6706 = vperm.xlu1 %11455, %v6596_v15   ;;  %v15537_v28 = vpop.permute.xlu0 %5874 }
 0x634   : > { %v15545_v22 = vpop.permute.xlu1 %5876  ;;  %6701 = vperm.xlu0 %11454, %v6595_v53   ;;  %10653 = vmatmul.mubr.msk.f32.gmra.mxu1 %vm4926_vm9, %v9478_v61  ;;  %v9544_v61 = vld [vmem:[%s17665_s5 + $0x1a8] sm:$0xff] }
 0x635   : > { %10655 = vmatprep.mubr.msk.f32.mxu1 %vm4926_vm9, %v9479_v1  ;;  %v9545_v1 = vld [vmem:[%s17665_s5 + $0x1b0] sm:$0xff] }
 0x636   : > { %6696 = vperm.xlu1 %11455, %v6594_v9   ;;  %v5513_v57 = vpop.permute.xlu0 %5512 }
 0x637   : > { %v5525_v21 = vsel %vm1976_vm4, %v15374_v31, %v5513_v57  ;;  %v5524_v31 = vsel %vm1976_vm4, %v15347_v52, %v15352_v42  ;;  %v5522_v52 = vsel %vm1976_vm4, %v15320_v27, %v15324_v29  ;;  %v5521_v27 = vsel %vm1976_vm4, %v15308_v23, %v15312_v2  ;;  %v9487_v23 = vld [vmem:[%s17665_s5 + $0x160] sm:$0xff] }
 0x638   : > { %v15563_v48 = vpop.permute.xlu1 %6258  ;;  %6691 = vperm.xlu0 %11454, %v6593_v37   ;;  %10656 = vmatmul.mubr.msk.f32.gmra.mxu1 %vm4926_vm9, %v9480_v12  ;;  %v5520_v29 = vsel %vm1976_vm4, %v15296_v14, %v15300_v38  ;;  %v5519_v14 = vsel %vm1976_vm4, %v15280_v35, %v15284_v33  ;;  %v5518_v38 = vsel %vm1976_vm4, %v15361_v13, %v15368_v58  ;;  %v9489_v35 = vld [vmem:[%s17665_s5 + $0x170] sm:$0xff]  ;;  %v9546_v12 = vld [vmem:[%s17665_s5 + $0x1b8] sm:$0xff]  ;;  %v9547_v57 = vld [vmem:[%s17665_s5 + $0x1c0] sm:$0xff] }
 0x639   : > { %10733 = vmatprep.subr.mxu1 %v5525_v21  ;;  %10658 = vmatprep.mubr.msk.f32.mxu1 %vm4926_vm9, %v9481_v24  ;;  %v5517_v13 = vsel %vm1976_vm4, %v15388_v34, %v15382_v25  ;;  %v5516_v58 = vsel %vm1976_vm4, %v15404_v5, %v15396_v32  ;;  %v9539_v25 = vld [vmem:[%s17665_s5 + $0x180] sm:$0xff]  ;;  %v5515_v32 = vsel %vm1976_vm4, %v15420_v43, %v15412_v10  ;;  %v9541_v10 = vld [vmem:[%s17665_s5 + $0x190] sm:$0xff] }
 0x63a   : > { %10734 = vmatpush3.msra.mxu1 %v5525_v21  ;;  %6686 = vperm.xlu1 %11455, %v6592_v59   ;;  %v15573_v54 = vpop.permute.xlu0 %6256  ;;  %v5514_v5 = vsel %vm1976_vm4, %v15436_v45, %v15428_v11  ;;  %v9542_v11 = vld [vmem:[%s17665_s5 + $0x198] sm:$0xff]  ;;  %v9543_v45 = vld [vmem:[%s17665_s5 + $0x1a0] sm:$0xff]  ;;  %v9548_v59 = vld [vmem:[%s17665_s5 + $0x1c8] sm:$0xff] }
 0x63b   : > { %10735 = vmatprep.subr.mxu1 %v5524_v31 }
 0x63c   : > { %10736 = vmatpush3.msra.mxu1 %v5524_v31  ;;  %v15581_v3 = vpop.permute.xlu1 %5872  ;;  %6681 = vperm.xlu0 %11454, %v6591_v46   ;;  %v9549_v46 = vld [vmem:[%s17665_s5 + $0x1d0] sm:$0xff] }
 0x63d   : > { %10659 = vmatmul.mubr.msk.f32.gmra.mxu1 %vm4926_vm9, %v9482_v47  ;;  %10737 = vmatprep.subr.mxu1 %v5523_v8 }
 0x63e   : > { %10738 = vmatpush3.msra.mxu1 %v5523_v8  ;;  %v15590_v42 = vpop.permute.xlu0 %5870  ;;  %10661 = vmatprep.mubr.msk.f32.mxu1 %vm4926_vm9, %v9483_v63  ;;  %v9550_v63 = vld [vmem:[%s17665_s5 + $0x1d8] sm:$0xff] }
 0x63f   : > { %10739 = vmatprep.subr.mxu1 %v5522_v52 }
 0x640   : > { %10740 = vmatpush3.msra.mxu1 %v5522_v52  ;;  %v15599_v20 = vpop.permute.xlu1 %6254  ;;  %v9551_v52 = vld [vmem:[%s17665_s5 + $0x1e0] sm:$0xff] }
 0x641   : > { %10662 = vmatmul.mubr.msk.f32.gmra.mxu1 %vm4926_vm9, %v9484_v60  ;;  %10741 = vmatprep.subr.mxu1 %v5521_v27 }
 0x642   : > { %10742 = vmatpush3.msra.mxu1 %v5521_v27  ;;  %v15608_v39 = vpop.permute.xlu0 %6252  ;;  %10664 = vmatprep.mubr.msk.f32.mxu1 %vm4926_vm9, %v9485_v62  ;;  %v5902_v62 = vsel %vm2598_vm5, %v15473_v55, %v15447_v41  ;;  %v9553_v41 = vld [vmem:[%s17665_s5 + $0x1f0] sm:$0xff]  ;;  %v5900_v55 = vsel %vm2598_vm5, %v15545_v22, %v15501_v18  ;;  %v5899_v18 = vsel %vm2598_vm5, %v15581_v3, %v15537_v28 }
 0x643   : > { %10743 = vmatprep.subr.mxu1 %v5520_v29  ;;  %v6278_v28 = vsel %vm3220_vm6, %v15599_v20, %v15573_v54  ;;  %v9557_v20 = vld [vmem:[%s17665_s5 + $0x210] sm:$0xff] }
 0x644   : > { %10744 = vmatpush3.msra.mxu1 %v5520_v29  ;;  %v15617_v2 = vpop.permute.xlu1 %5868  ;;  %v5901_v29 = vsel %vm2598_vm5, %v15509_v44, %v15465_v36  ;;  %v6280_v36 = vsel %vm3220_vm6, %v15527_v30, %v15483_v17  ;;  %v9554_v44 = vld [vmem:[%s17665_s5 + $0x1f8] sm:$0xff]  ;;  %v6279_v17 = vsel %vm3220_vm6, %v15563_v48, %v15519_v50  ;;  %v9555_v30 = vld [vmem:[%s17665_s5 + $0x200] sm:$0xff]  ;;  %v9556_v50 = vld [vmem:[%s17665_s5 + $0x208] sm:$0xff] }
 0x645   : > { %10665 = vmatmul.mubr.msk.f32.gmra.mxu1 %vm4926_vm9, %v9486_v16  ;;  %10745 = vmatprep.subr.mxu1 %v5519_v14  ;;  %v5898_v22 = vsel %vm2598_vm5, %v15617_v2, %v15590_v42 }
 0x646   : > { %10746 = vmatpush3.msra.mxu1 %v5519_v14  ;;  %v15626_v7 = vpop.permute.xlu0 %5866  ;;  %10667 = vmatprep.mubr.msk.f32.mxu1 %vm4926_vm9, %v9487_v23 }
 0x647   : > { %10747 = vmatprep.subr.mxu1 %v5518_v38 }
 0x648   : > { %10748 = vmatpush3.msra.mxu1 %v5518_v38  ;;  %v15635_v33 = vpop.permute.xlu1 %6250 }
 0x649   : > { %10668 = vmatmul.mubr.msk.f32.gmra.mxu1 %vm4926_vm9, %v9488_v19  ;;  %10749 = vmatprep.subr.mxu1 %v5517_v13  ;;  %v6277_v54 = vsel %vm3220_vm6, %v15635_v33, %v15608_v39  ;;  %v9558_v39 = vld [vmem:[%s17665_s5 + $0x218] sm:$0xff] }
 0x64a   : > { %10750 = vmatpush3.msra.mxu1 %v5517_v13  ;;  %v15644_v51 = vpop.permute.xlu0 %6248  ;;  %10670 = vmatprep.mubr.msk.f32.mxu1 %vm4926_vm9, %v9489_v35 }
 0x64b   : > { %10751 = vmatprep.subr.mxu1 %v5516_v58 }
 0x64c   : > { %10752 = vmatpush3.msra.mxu1 %v5516_v58  ;;  %v15653_v34 = vpop.permute.xlu1 %5864  ;;  %v9559_v58 = vld [vmem:[%s17665_s5 + $0x220] sm:$0xff] }
 0x64d   : > { %10671 = vmatmul.mubr.msk.f32.gmra.mxu1 %vm4926_vm9, %v9490_v56  ;;  %10753 = vmatprep.subr.mxu1 %v5515_v32  ;;  %v5897_v3 = vsel %vm2598_vm5, %v15653_v34, %v15626_v7 }
 0x64e   : > { %10754 = vmatpush3.msra.mxu1 %v5515_v32  ;;  %v15662_v4 = vpop.permute.xlu0 %5862  ;;  %10757 = vmatprep.mubr.msk.f32.mxu1 %vm4926_vm9, %v9539_v25  ;;  %v9560_v25 = vld [vmem:[%s17665_s5 + $0x228] sm:$0xff] }
 0x64f   : > { %10755 = vmatprep.subr.mxu1 %v5514_v5 }
 0x650   : > { %10756 = vmatpush3.msra.mxu1 %v5514_v5  ;;  %v15671_v43 = vpop.permute.xlu1 %6246 }
 0x651   : > { %10758 = vmatmul.mubr.msk.f32.vlgmr.msra.gmra.mxu1 %vm4926_vm9, %v9540_v49  ;;  %v6276_v7 = vsel %vm3220_vm6, %v15671_v43, %v15644_v51  ;;  %v9561_v49 = vld [vmem:[%s17665_s5 + $0x230] sm:$0xff] }
 0x652   : > { %v15674_v40 = vpop.permute.xlu0 %6244  ;;  %10760 = vmatprep.mubr.msk.f32.mxu1 %vm4926_vm9, %v9541_v10 }
 0x654   : > { %v15683_v15 = vpop.permute.xlu1 %5860 }
 0x655   : > { %10761 = vmatmul.mubr.msk.f32.gmra.mxu1 %vm4926_vm9, %v9542_v11  ;;  %v5896_v2 = vsel %vm2598_vm5, %v15683_v15, %v15662_v4  ;;  %v9588_v11 = vld [vmem:[%s17665_s5 + $0x248] sm:$0xff] }
 0x656   : > { %v15686_v53 = vpop.permute.xlu0 %5858  ;;  %10763 = vmatprep.mubr.msk.f32.mxu1 %vm4926_vm9, %v9543_v45 }
 0x658   : > { %v15695_v9 = vpop.permute.xlu1 %6242 }
 0x659   : > { %10764 = vmatmul.mubr.msk.f32.gmra.mxu1 %vm4926_vm9, %v9544_v61  ;;  %v6275_v13 = vsel %vm3220_vm6, %v15695_v9, %v15674_v40  ;;  %v9562_v40 = vld [vmem:[%s17665_s5 + $0x238] sm:$0xff] }
 0x65a   : > { %v15698_v37 = vpop.permute.xlu0 %6240  ;;  %10766 = vmatprep.mubr.msk.f32.mxu1 %vm4926_vm9, %v9545_v1  ;;  %v9635_v1 = vld [vmem:[%s17665_s5 + $0x300] sm:$0xff] }
 0x65c   : > { %v15707_v24 = vpop.permute.xlu1 %5856 }
 0x65d   : > { %10767 = vmatmul.mubr.msk.f32.gmra.mxu1 %vm4926_vm9, %v9546_v12  ;;  %v5895_v35 = vsel %vm2598_vm5, %v15707_v24, %v15686_v53  ;;  %v9589_v53 = vld [vmem:[%s17665_s5 + $0x250] sm:$0xff]  ;;  %v9636_v12 = vld [vmem:[%s17665_s5 + $0x308] sm:$0xff] }
 0x65e   : > { %v15710_v21 = vpop.permute.xlu0 %5854  ;;  %10769 = vmatprep.mubr.msk.f32.mxu1 %vm4926_vm9, %v9547_v57  ;;  %v9591_v57 = vld [vmem:[%s17665_s5 + $0x260] sm:$0xff]  ;;  %v9637_v24 = vld [vmem:[%s17665_s5 + $0x310] sm:$0xff] }
 0x660   : > { %v15719_v31 = vpop.permute.xlu1 %6238 }
 0x661   : > { %10770 = vmatmul.mubr.msk.f32.gmra.mxu1 %vm4926_vm9, %v9548_v59  ;;  %v6274_v56 = vsel %vm3220_vm6, %v15719_v31, %v15698_v37  ;;  %v9590_v37 = vld [vmem:[%s17665_s5 + $0x258] sm:$0xff]  ;;  %v9639_v31 = vld [vmem:[%s17665_s5 + $0x320] sm:$0xff] }
 0x662   : > { %v5891_v47 = vpop.permute.xlu0 %5890  ;;  %10772 = vmatprep.mubr.msk.f32.mxu1 %vm4926_vm9, %v9549_v46  ;;  %v9638_v59 = vld [vmem:[%s17665_s5 + $0x318] sm:$0xff]  ;;  %v9593_v46 = vld [vmem:[%s17665_s5 + $0x270] sm:$0xff] }
 0x663   : > { %v5903_v8 = vsel %vm2598_vm5, %v15455_v0, %v5891_v47  ;;  %v9552_v0 = vld [vmem:[%s17665_s5 + $0x1e8] sm:$0xff]  ;;  %v9594_v47 = vld [vmem:[%s17665_s5 + $0x278] sm:$0xff] }
 0x664   : > { %v15731_v60 = vpop.permute.xlu1 %5852  ;;  %10793 = vmatprep.subr.mxu0 %v5903_v8 }
 0x665   : > { %10773 = vmatmul.mubr.msk.f32.gmra.mxu1 %vm4926_vm9, %v9550_v63  ;;  %10794 = vmatpush3.msra.mxu0 %v5903_v8  ;;  %v5894_v51 = vsel %vm2598_vm5, %v15731_v60, %v15710_v21  ;;  %v9592_v21 = vld [vmem:[%s17665_s5 + $0x268] sm:$0xff]  ;;  %v9595_v8 = vld [vmem:[%s17665_s5 + $0x280] sm:$0xff] }
 0x666   : > { %10795 = vmatprep.subr.mxu0 %v5902_v62  ;;  %v6269_v27 = vpop.permute.xlu0 %6268  ;;  %10775 = vmatprep.mubr.msk.f32.mxu1 %vm4926_vm9, %v9551_v52  ;;  %v9640_v63 = vld [vmem:[%s17665_s5 + $0x328] sm:$0xff]  ;;  %v9641_v52 = vld [vmem:[%s17665_s5 + $0x330] sm:$0xff] }
 0x667   : > { %10796 = vmatpush3.msra.mxu0 %v5902_v62  ;;  %v6281_v16 = vsel %vm3220_vm6, %v15491_v6, %v6269_v27  ;;  %v9596_v60 = vld [vmem:[%s17665_s5 + $0x288] sm:$0xff]  ;;  %v9642_v62 = vld [vmem:[%s17665_s5 + $0x338] sm:$0xff]  ;;  %v9597_v27 = vld [vmem:[%s17665_s5 + $0x290] sm:$0xff] }
 0x668   : > { %v15746_v23 = vpop.permute.xlu1 %6234  ;;  %10797 = vmatprep.subr.mxu0 %v5901_v29  ;;  %10853 = vmatprep.subr.mxu1 %v6281_v16 }
 0x669   : > { %10776 = vmatmul.mubr.msk.f32.gmra.mxu1 %vm4926_vm9, %v9552_v0  ;;  %10798 = vmatpush3.msra.mxu0 %v5901_v29  ;;  %v9643_v0 = vld [vmem:[%s17665_s5 + $0x340] sm:$0xff]  ;;  %v9598_v29 = vld [vmem:[%s17665_s5 + $0x298] sm:$0xff] }
 0x66a   : > { %10854 = vmatpush3.msra.mxu1 %v6281_v16  ;;  %10799 = vmatprep.subr.mxu0 %v5900_v55  ;;  %v15758_v6 = vpop.permute.xlu0 %6236  ;;  %v9644_v16 = vld [vmem:[%s17665_s5 + $0x348] sm:$0xff] }
 0x66b   : > { %10855 = vmatprep.subr.mxu1 %v6280_v36  ;;  %10778 = vmatprep.mubr.msk.f32.mxu1 %vm4926_vm9, %v9553_v41  ;;  %v6273_v4 = vsel %vm3220_vm6, %v15746_v23, %v15758_v6  ;;  %v9599_v23 = vld [vmem:[%s17665_s5 + $0x2a0] sm:$0xff]  ;;  %v9645_v41 = vld [vmem:[%s17665_s5 + $0x350] sm:$0xff] }
 0x66c   : > { %10800 = vmatpush3.msra.mxu0 %v5900_v55  ;;  %10856 = vmatpush3.msra.mxu1 %v6280_v36  ;;  %v5849_v14 = vpop.permute.xlu1 %5848  ;;  %v9600_v55 = vld [vmem:[%s17665_s5 + $0x2a8] sm:$0xff]  ;;  %v9646_v36 = vld [vmem:[%s17665_s5 + $0x358] sm:$0xff]  ;;  %v9601_v6 = vld [vmem:[%s17665_s5 + $0x2b0] sm:$0xff] }
 0x66d   : > { %10779 = vmatmul.mubr.msk.f32.gmra.mxu1 %vm4926_vm9, %v9554_v44  ;;  %10801 = vmatprep.subr.mxu0 %v5899_v18  ;;  %v9647_v44 = vld [vmem:[%s17665_s5 + $0x360] sm:$0xff] }
 0x66e   : > { %10857 = vmatprep.subr.mxu1 %v6279_v17  ;;  %10802 = vmatpush3.msra.mxu0 %v5899_v18  ;;  %v5851_v38 = vpop.permute.xlu0 %5850  ;;  %v9648_v18 = vld [vmem:[%s17665_s5 + $0x368] sm:$0xff] }
 0x66f   : > { %10858 = vmatpush3.msra.mxu1 %v6279_v17  ;;  %10803 = vmatprep.subr.mxu0 %v5898_v22  ;;  %v5893_v5 = vsel %vm2598_vm5, %v5849_v14, %v5851_v38  ;;  %v9602_v14 = vld [vmem:[%s17665_s5 + $0x2b8] sm:$0xff]  ;;  %v9603_v17 = vld [vmem:[%s17665_s5 + $0x2c0] sm:$0xff] }
 0x670   : > { %10859 = vmatprep.subr.mxu1 %v6278_v28  ;;  %10781 = vmatprep.mubr.msk.f32.mxu1 %vm4926_vm9, %v9555_v30  ;;  %v6231_v48 = vpop.permute.xlu1 %6230  ;;  %v9649_v30 = vld [vmem:[%s17665_s5 + $0x370] sm:$0xff]  ;;  %v9650_v38 = vld [vmem:[%s17665_s5 + $0x378] sm:$0xff] }
 0x671   : > { %10804 = vmatpush3.msra.mxu0 %v5898_v22  ;;  %10860 = vmatpush3.msra.mxu1 %v6278_v28  ;;  %v9604_v22 = vld [vmem:[%s17665_s5 + $0x2c8] sm:$0xff]  ;;  %v9605_v28 = vld [vmem:[%s17665_s5 + $0x2d0] sm:$0xff] }
 0x672   : > { %10782 = vmatmul.mubr.msk.f32.gmra.mxu1 %vm4926_vm9, %v9556_v50  ;;  %10805 = vmatprep.subr.mxu0 %v5897_v3  ;;  %v6233_v42 = vpop.permute.xlu0 %6232  ;;  %v9651_v50 = vld [vmem:[%s17665_s5 + $0x380] sm:$0xff] }
 0x673   : > { %10861 = vmatprep.subr.mxu1 %v6277_v54  ;;  %10806 = vmatpush3.msra.mxu0 %v5897_v3  ;;  %v6272_v43 = vsel %vm3220_vm6, %v6231_v48, %v6233_v42  ;;  %v9606_v48 = vld [vmem:[%s17665_s5 + $0x2d8] sm:$0xff]  ;;  %v9652_v3 = vld [vmem:[%s17665_s5 + $0x388] sm:$0xff]  ;;  %v9653_v42 = vld [vmem:[%s17665_s5 + $0x390] sm:$0xff] }
 0x674   : > { %10862 = vmatpush3.msra.mxu1 %v6277_v54  ;;  %10807 = vmatprep.subr.mxu0 %v5896_v2  ;;  %v5845_v19 = vpop.permute.xlu1 %5844  ;;  %v9607_v54 = vld [vmem:[%s17665_s5 + $0x2e0] sm:$0xff] }
 0x675   : > { %10863 = vmatprep.subr.mxu1 %v6276_v7  ;;  %10784 = vmatprep.mubr.msk.f32.mxu1 %vm4926_vm9, %v9557_v20  ;;  %v9608_v20 = vld [vmem:[%s17665_s5 + $0x2e8] sm:$0xff] }
 0x676   : > { %10808 = vmatpush3.msra.mxu0 %v5896_v2  ;;  %10864 = vmatpush3.msra.mxu1 %v6276_v7  ;;  %v5847_v33 = vpop.permute.xlu0 %5846  ;;  %v9654_v2 = vld [vmem:[%s17665_s5 + $0x398] sm:$0xff]  ;;  %v9609_v7 = vld [vmem:[%s17665_s5 + $0x2f0] sm:$0xff] }
 0x677   : > { %10785 = vmatmul.mubr.msk.f32.gmra.mxu1 %vm4926_vm9, %v9558_v39  ;;  %10809 = vmatprep.subr.mxu0 %v5895_v35  ;;  %v5892_v10 = vsel %vm2598_vm5, %v5845_v19, %v5847_v33  ;;  %v9655_v19 = vld [vmem:[%s17665_s5 + $0x3a0] sm:$0xff]  ;;  %v9610_v39 = vld [vmem:[%s17665_s5 + $0x2f8] sm:$0xff]  ;;  %v9657_v33 = vld [vmem:[%s17665_s5 + $0x3b0] sm:$0xff] }
 0x678   : > { %10865 = vmatprep.subr.mxu1 %v6275_v13  ;;  %10810 = vmatpush3.msra.mxu0 %v5895_v35  ;;  %v6227_v34 = vpop.permute.xlu1 %6226  ;;  %v9656_v35 = vld [vmem:[%s17665_s5 + $0x3a8] sm:$0xff] }
 0x679   : > { %10866 = vmatpush3.msra.mxu1 %v6275_v13  ;;  %10811 = vmatprep.subr.mxu0 %v5894_v51  ;;  %v9658_v13 = vld [vmem:[%s17665_s5 + $0x3b8] sm:$0xff] }
 0x67a   : > { %10867 = vmatprep.subr.mxu1 %v6274_v56  ;;  %10787 = vmatprep.mubr.msk.f32.mxu1 %vm4926_vm9, %v9559_v58  ;;  %v6229_v32 = vpop.permute.xlu0 %6228 }
 0x67b   : > { %10812 = vmatpush3.msra.mxu0 %v5894_v51  ;;  %10868 = vmatpush3.msra.mxu1 %v6274_v56  ;;  %v6271_v15 = vsel %vm3220_vm6, %v6227_v34, %v6229_v32  ;;  %v10699_v56 = vpop.f32.mrf.mxu0 }
 0x67c   : > { %10788 = vmatmul.mubr.msk.f32.gmra.mxu1 %vm4926_vm9, %v9560_v25  ;;  %10813 = vmatprep.subr.mxu0 %v5893_v5  ;;  %v6223_v61 = vpop.permute.xlu1 %6222 }
 0x67d   : > { %10869 = vmatprep.subr.mxu1 %v6273_v4  ;;  %10814 = vmatpush3.msra.mxu0 %v5893_v5  ;;  %v16034_v32 = vpop.f32.mrf.mxu0 }
 0x67e   : > { %10870 = vmatpush3.msra.mxu1 %v6273_v4  ;;  %10815 = vmatprep.subr.mxu0 %v5892_v10  ;;  %v6225_v45 = vpop.permute.xlu0 %6224  ;;  %18083 = vst [vmem:[#allocation8_spill] sm:$0xff] %v16034_v32 }
 0x67f   : > { %10871 = vmatprep.subr.mxu1 %v6272_v43  ;;  %10790 = vmatprep.mubr.msk.f32.mxu1 %vm4926_vm9, %v9561_v49  ;;  %v6270_v9 = vsel %vm3220_vm6, %v6223_v61, %v6225_v45  ;;  %v10702_v49 = vpop.f32.mrf.mxu0 }
 0x680   : > { %10816 = vmatpush3.msra.mxu0 %v5892_v10  ;;  %10872 = vmatpush3.msra.mxu1 %v6272_v43 }
 0x681   : > { %10791 = vmatmul.mubr.msk.f32.gmra.mxu1 %vm4926_vm9, %v9562_v40  ;;  %10818 = vmatmul.mubr.msk.f32.vlgmr.msra.gmra.mxu0 %vm4926_vm9, %v9588_v11  ;;  %v16040_v40 = vpop.f32.mrf.mxu0 }
 0x682   : > { %10873 = vmatprep.subr.mxu1 %v6271_v15  ;;  %10820 = vmatprep.mubr.msk.f32.mxu0 %vm4926_vm9, %v9589_v53  ;;  %18084 = vst [vmem:[#allocation48_spill] sm:$0xff] %v16040_v40 }
 0x683   : > { %10874 = vmatpush3.msra.mxu1 %v6271_v15  ;;  %10877 = vmatprep.mubr.msk.f32.mxu1 %vm4926_vm9, %v9635_v1  ;;  %v10705_v15 = vpop.f32.mrf.mxu0 }
 0x684   : > { %10875 = vmatprep.subr.mxu1 %v6270_v9  ;;  %6847 = vmatprep.subr.mxu0 %v17758_v26 }
 0x685   : > { %10821 = vmatmul.mubr.msk.f32.gmra.mxu0 %vm4926_vm9, %v9590_v37  ;;  %10876 = vmatpush3.msra.mxu1 %v6270_v9  ;;  %v16048_v1 = vpop.f32.mrf.mxu0 }
 0x686   : > { %10878 = vmatmul.mubr.msk.f32.vlgmr.msra.gmra.mxu1 %vm4926_vm9, %v9636_v12  ;;  %10823 = vmatprep.mubr.msk.f32.mxu0 %vm4926_vm9, %v9591_v57 }
 0x687   : > { %10880 = vmatprep.mubr.msk.f32.mxu1 %vm4926_vm9, %v9637_v24  ;;  %v10708_v12 = vpop.f32.mrf.mxu0 }
 0x689   : > { %10824 = vmatmul.mubr.msk.f32.gmra.mxu0 %vm4926_vm9, %v9592_v21  ;;  %v16058_v21 = vpop.f32.mrf.mxu0 }
 0x68a   : > { %10881 = vmatmul.mubr.msk.f32.gmra.mxu1 %vm4926_vm9, %v9638_v59  ;;  %10826 = vmatprep.mubr.msk.f32.mxu0 %vm4926_vm9, %v9593_v46 }
 0x68b   : > { %10883 = vmatprep.mubr.msk.f32.mxu1 %vm4926_vm9, %v9639_v31  ;;  %v10711_v31 = vpop.f32.mrf.mxu0 }
 0x68d   : > { %10827 = vmatmul.mubr.msk.f32.gmra.mxu0 %vm4926_vm9, %v9594_v47 }
 0x68e   : > { %10884 = vmatmul.mubr.msk.f32.gmra.mxu1 %vm4926_vm9, %v9640_v63  ;;  %10829 = vmatprep.mubr.msk.f32.mxu0 %vm4926_vm9, %v9595_v8  ;;  %v16064_v8 = vpop.f32.mrf.mxu0 }
 0x68f   : > { %10886 = vmatprep.mubr.msk.f32.mxu1 %vm4926_vm9, %v9641_v52 }
 0x691   : > { %10830 = vmatmul.mubr.msk.f32.gmra.mxu0 %vm4926_vm9, %v9596_v60 }
 0x692   : > { %10887 = vmatmul.mubr.msk.f32.gmra.mxu1 %vm4926_vm9, %v9642_v62  ;;  %10832 = vmatprep.mubr.msk.f32.mxu0 %vm4926_vm9, %v9597_v27  ;;  %v16068_v62 = vpop.f32.mrf.mxu0 }
 0x693   : > { %10889 = vmatprep.mubr.msk.f32.mxu1 %vm4926_vm9, %v9643_v0 }
 0x694   : > { %v16072_v0 = vpop.f32.mrf.mxu0 }
 0x695   : > { %10833 = vmatmul.mubr.msk.f32.gmra.mxu0 %vm4926_vm9, %v9598_v29 }
 0x696   : > { %10890 = vmatmul.mubr.msk.f32.gmra.mxu1 %vm4926_vm9, %v9644_v16  ;;  %10835 = vmatprep.mubr.msk.f32.mxu0 %vm4926_vm9, %v9599_v23 }
 0x697   : > { %10892 = vmatprep.mubr.msk.f32.mxu1 %vm4926_vm9, %v9645_v41 }
 0x699   : > { %10836 = vmatmul.mubr.msk.f32.gmra.mxu0 %vm4926_vm9, %v9600_v55  ;;  %v16078_v55 = vpop.f32.mrf.mxu0 }
 0x69a   : > { %10893 = vmatmul.mubr.msk.f32.gmra.mxu1 %vm4926_vm9, %v9646_v36  ;;  %10838 = vmatprep.mubr.msk.f32.mxu0 %vm4926_vm9, %v9601_v6 }
 0x69b   : > { %10895 = vmatprep.mubr.msk.f32.mxu1 %vm4926_vm9, %v9647_v44 }
 0x69d   : > { %10839 = vmatmul.mubr.msk.f32.gmra.mxu0 %vm4926_vm9, %v9602_v14 }
 0x69e   : > { %10896 = vmatmul.mubr.msk.f32.gmra.mxu1 %vm4926_vm9, %v9648_v18  ;;  %10841 = vmatprep.mubr.msk.f32.mxu0 %vm4926_vm9, %v9603_v17  ;;  %v16084_v18 = vpop.f32.mrf.mxu0 }
 0x69f   : > { %10898 = vmatprep.mubr.msk.f32.mxu1 %vm4926_vm9, %v9649_v30  ;;  %v6768_v30 = vld [vmem:[%s17667_s7 + $0x8] sm:$0xff] }
 0x6a1   : > { %10842 = vmatmul.mubr.msk.f32.gmra.mxu0 %vm4926_vm9, %v9604_v22 }
 0x6a2   : > { %10899 = vmatmul.mubr.msk.f32.gmra.mxu1 %vm4926_vm9, %v9650_v38  ;;  %10844 = vmatprep.mubr.msk.f32.mxu0 %vm4926_vm9, %v9605_v28 }
 0x6a3   : > { %10901 = vmatprep.mubr.msk.f32.mxu1 %vm4926_vm9, %v9651_v50  ;;  %v16094_v50 = vpop.f32.mrf.mxu0 }
 0x6a5   : > { %10845 = vmatmul.mubr.msk.f32.gmra.mxu0 %vm4926_vm9, %v9606_v48 }
 0x6a6   : > { %10902 = vmatmul.mubr.msk.f32.gmra.mxu1 %vm4926_vm9, %v9652_v3  ;;  %10847 = vmatprep.mubr.msk.f32.mxu0 %vm4926_vm9, %v9607_v54 }
 0x6a7   : > { %10904 = vmatprep.mubr.msk.f32.mxu1 %vm4926_vm9, %v9653_v42 }
 0x6a9   : > { %10848 = vmatmul.mubr.msk.f32.gmra.mxu0 %vm4926_vm9, %v9608_v20  ;;  %v16100_v20 = vpop.f32.mrf.mxu0 }
 0x6aa   : > { %10905 = vmatmul.mubr.msk.f32.gmra.mxu1 %vm4926_vm9, %v9654_v2  ;;  %10850 = vmatprep.mubr.msk.f32.mxu0 %vm4926_vm9, %v9609_v7 }
 0x6ab   : > { %10907 = vmatprep.mubr.msk.f32.mxu1 %vm4926_vm9, %v9655_v19 }
 0x6ad   : > { %10851 = vmatmul.mubr.msk.f32.gmra.mxu0 %vm4926_vm9, %v9610_v39 }
 0x6ae   : > { %10908 = vmatmul.mubr.msk.f32.gmra.mxu1 %vm4926_vm9, %v9656_v35  ;;  %9683 = vmatprep.mubr.msk.f32.mxu0 %vm4099_vm7, %v6768_v30  ;;  %v10723_v35 = vpop.f32.mrf.mxu0 }
 0x6af   : > { %10910 = vmatprep.mubr.msk.f32.mxu1 %vm4926_vm9, %v9657_v33 }
 0x6b2   : > { %10911 = vmatmul.mubr.msk.f32.gmra.mxu1 %vm4926_vm9, %v9658_v13 }
 0x6e0   : > { %v10639_v58 = vpop.f32.mrf.mxu1 }
 0x6e1   : > { %v5328_v16 = vadd.f32 %v10699_v56, %v10639_v58  ;;  %v16110_v58 = vpop.f32.mrf.mxu0 }
 0x6e2   : > { %v16030_v51 = vpop.f32.mrf.mxu1  ;;  %18094 = vst [vmem:[#allocation139_spill] sm:$0xff] %v16110_v58 }
 0x6e3   : > { %18082 = vst [vmem:[#allocation50_spill] sm:$0xff] %v16030_v51 }
 0x6e4   : > { %v10642_v25 = vpop.f32.mrf.mxu1 }
 0x6e5   : > { %v5338_v6 = vadd.f32 %v10702_v49, %v10642_v25 }
 0x6e6   : > { %v16032_v34 = vpop.f32.mrf.mxu1 }
 0x6e8   : > { %v10645_v5 = vpop.f32.mrf.mxu1 }
 0x6e9   : > { %v5348_v22 = vadd.f32 %v10705_v15, %v10645_v5  ;;  %v10726_v5 = vpop.f32.mrf.mxu0 }
 0x6ea   : > { %v16036_v4 = vpop.f32.mrf.mxu1 }
 0x6ec   : > { %v10648_v10 = vpop.f32.mrf.mxu1 }
 0x6ed   : > { %v5358_v3 = vadd.f32 %v10708_v12, %v10648_v10 }
 0x6ee   : > { %v16038_v43 = vpop.f32.mrf.mxu1 }
 0x6f0   : > { %v10651_v11 = vpop.f32.mrf.mxu1 }
 0x6f1   : > { %v5368_v7 = vadd.f32 %v10711_v31, %v10651_v11  ;;  %v16120_v11 = vpop.f32.mrf.mxu0 }
 0x6f2   : > { %v16042_v45 = vpop.f32.mrf.mxu1  ;;  %18095 = vst [vmem:[#allocation24_spill] sm:$0xff] %v16120_v11 }
 0x6f4   : > { %v16044_v53 = vpop.f32.mrf.mxu1 }
 0x6f6   : > { %v16046_v61 = vpop.f32.mrf.mxu1 }
 0x6f8   : > { %v16050_v9 = vpop.f32.mrf.mxu1 }
 0x6fa   : > { %v16052_v37 = vpop.f32.mrf.mxu1 }
 0x6fd   : > { %v16054_v57 = vpop.f32.mrf.mxu1 }
 0x6ff   : > { %v16056_v24 = vpop.f32.mrf.mxu1 }
 0x701   : > { %v10663_v59 = vpop.f32.mrf.mxu1 }
 0x702   : > { %v5408_v12 = vadd.f32 %v10723_v35, %v10663_v59 }
 0x703   : > { %v16060_v46 = vpop.f32.mrf.mxu1 }
 0x704   : > { %18085 = vst [vmem:[#allocation141_spill] sm:$0xff] %v16060_v46 }
 0x705   : > { %v10666_v47 = vpop.f32.mrf.mxu1 }
 0x707   : > { %v16062_v63 = vpop.f32.mrf.mxu1 }
 0x708   : > { %18086 = vst [vmem:[#allocation66_spill] sm:$0xff] %v16062_v63 }
 0x709   : > { %v10669_v52 = vpop.f32.mrf.mxu1 }
 0x70b   : > { %v16066_v60 = vpop.f32.mrf.mxu1 }
 0x70c   : > { %18087 = vst [vmem:[#allocation143_spill] sm:$0xff] %v16066_v60 }
 0x70d   : > { %v16070_v27 = vpop.f32.mrf.mxu1 }
 0x70e   : > { %18088 = vst [vmem:[#allocation25_spill] sm:$0xff] %v16070_v27  ;;  %v7004_v27 = vld [vmem:[%s17668_s8 + $0x60] sm:$0xff] }
 0x70f   : > { %v16074_v29 = vpop.f32.mrf.mxu1 }
 0x710   : > { %18089 = vst [vmem:[#allocation69_spill] sm:$0xff] %v16074_v29 }
 0x711   : > { %v10759_v23 = vpop.f32.mrf.mxu1 }
 0x712   : > { %v16076_v41 = vadd.f32 %v10759_v23, %v5328_v16  ;;  %v10729_v16 = vpop.f32.mrf.mxu0 }
 0x713   : > { %v16080_v36 = vpop.f32.mrf.mxu1 }
 0x714   : > { %18090 = vst [vmem:[#allocation120_spill] sm:$0xff] %v16076_v41  ;;  %18091 = vst [vmem:[#allocation118_spill] sm:$0xff] %v16080_v36  ;;  %v16128_v30 = vpop.f32.mrf.mxu0 }
 0x715   : > { %v10762_v44 = vpop.f32.mrf.mxu1  ;;  %18098 = vst [vmem:[#allocation68_spill] sm:$0xff] %v16128_v30 }
 0x716   : > { %v16082_v14 = vadd.f32 %v10762_v44, %v5338_v6  ;;  %v5418_v44 = vadd.f32 %v10726_v5, %v10666_v47 }
 0x717   : > { %v16086_v17 = vpop.f32.mrf.mxu1 }
 0x718   : > { %18092 = vst [vmem:[#allocation137_spill] sm:$0xff] %v16082_v14  ;;  %18093 = vst [vmem:[#allocation76_spill] sm:$0xff] %v16086_v17 }
 0x719   : > { %v10765_v38 = vpop.f32.mrf.mxu1 }
 0x71a   : > { %v16092_v28 = vadd.f32 %v10765_v38, %v5348_v22 }
 0x71b   : > { %v16096_v48 = vpop.f32.mrf.mxu1 }
 0x71d   : > { %v10768_v54 = vpop.f32.mrf.mxu1 }
 0x71e   : > { %v16098_v42 = vadd.f32 %v10768_v54, %v5358_v3  ;;  %v5428_v54 = vadd.f32 %v10729_v16, %v10669_v52 }
 0x71f   : > { %v16102_v2 = vpop.f32.mrf.mxu1 }
 0x721   : > { %v10771_v19 = vpop.f32.mrf.mxu1 }
 0x722   : > { %v16104_v39 = vadd.f32 %v10771_v19, %v5368_v7  ;;  %v16134_v7 = vpop.f32.mrf.mxu0 }
 0x723   : > { %v16106_v33 = vpop.f32.mrf.mxu1  ;;  %18101 = vst [vmem:[#allocation22_spill] sm:$0xff] %v16134_v7 }
 0x724   : > { %v16140_v35 = vpop.f32.mrf.mxu0 }
 0x725   : > { %v16108_v13 = vpop.f32.mrf.mxu1  ;;  %18104 = vst [vmem:[#allocation67_spill] sm:$0xff] %v16140_v35 }
 0x727   : > { %v16112_v56 = vpop.f32.mrf.mxu1 }
 0x729   : > { %v16114_v25 = vpop.f32.mrf.mxu1 }
 0x72b   : > { %v16116_v49 = vpop.f32.mrf.mxu1 }
 0x72d   : > { %v16118_v10 = vpop.f32.mrf.mxu1 }
 0x72f   : > { %v16122_v15 = vpop.f32.mrf.mxu1 }
 0x732   : > { %v10783_v31 = vpop.f32.mrf.mxu1 }
 0x733   : > { %v16124_v23 = vadd.f32 %v10783_v31, %v5408_v12 }
 0x734   : > { %v16126_v6 = vpop.f32.mrf.mxu1 }
 0x735   : > { %18096 = vst [vmem:[#allocation146_spill] sm:$0xff] %v16124_v23  ;;  %18097 = vst [vmem:[#allocation23_spill] sm:$0xff] %v16126_v6  ;;  %v16162_v23 = vpop.permute.xlu1 %6676 }
 0x737   : > { %v10786_v22 = vpop.f32.mrf.mxu1 }
 0x738   : > { %v16130_v38 = vadd.f32 %v10786_v22, %v5418_v44 }
 0x739   : > { %v16132_v3 = vpop.f32.mrf.mxu1 }
 0x73a   : > { %18099 = vst [vmem:[#allocation147_spill] sm:$0xff] %v16130_v38  ;;  %18100 = vst [vmem:[#allocation74_spill] sm:$0xff] %v16132_v3  ;;  %v16170_v3 = vpop.permute.xlu0 %6671 }
 0x73c   : > { %v10789_v19 = vpop.f32.mrf.mxu1 }
 0x73d   : > { %v16136_v58 = vadd.f32 %v10789_v19, %v5428_v54 }
 0x73e   : > { %v16138_v59 = vpop.f32.mrf.mxu1 }
 0x73f   : > { %18102 = vst [vmem:[#allocation144_spill] sm:$0xff] %v16136_v58  ;;  %18103 = vst [vmem:[#allocation21_spill] sm:$0xff] %v16138_v59  ;;  %v16178_v59 = vpop.permute.xlu1 %6666 }
 0x741   : > { %v16142_v12 = vpop.f32.mrf.mxu1  ;;  %v16144_v47 = vpop.f32.mrf.mxu0 }
 0x742   : > { %18105 = vst [vmem:[#allocation145_spill] sm:$0xff] %v16142_v12  ;;  %18106 = vst [vmem:[#allocation72_spill] sm:$0xff] %v16144_v47  ;;  %v7006_v12 = vld [vmem:[%s17668_s8 + $0x70] sm:$0xff] }
 0x743   : > { %v16146_v5 = vpop.f32.mrf.mxu0  ;;  %v16148_v31 = vpop.f32.mrf.mxu1 }
 0x744   : > { %18107 = vst [vmem:[#allocation18_spill] sm:$0xff] %v16146_v5  ;;  %18108 = vst [vmem:[#allocation140_spill] sm:$0xff] %v16148_v31  ;;  %v16186_v31 = vpop.permute.xlu0 %6661  ;;  %v7007_v5 = vld [vmem:[%s17668_s8 + $0x78] sm:$0xff]  ;;  %v16201_v47 = vpop.permute.xlu1 %6656 }
 0x745   : > { %v16150_v44 = vpop.f32.mrf.mxu0  ;;  %10913 = vmatprep.subr.mxu1 %v7007_v5 }
 0x746   : > { %18109 = vst [vmem:[#allocation19_spill] sm:$0xff] %v16150_v44  ;;  %v16152_v52 = vpop.f32.mrf.mxu1  ;;  %10914 = vmatpush3.msra.mxu1 %v7007_v5  ;;  %v5388_v44 = vadd.f32 %v16078_v55, %v16050_v9 }
 0x747   : > { %18110 = vst [vmem:[#allocation65_spill] sm:$0xff] %v16152_v52  ;;  %v16154_v16 = vpop.f32.mrf.mxu0  ;;  %10915 = vmatprep.subr.mxu1 %v7006_v12 }
 0x748   : > { %18111 = vst [vmem:[#allocation142_spill] sm:$0xff] %v16154_v16  ;;  %v16156_v22 = vpop.f32.mrf.mxu1  ;;  %10916 = vmatpush3.msra.mxu1 %v7006_v12  ;;  %v7003_v16 = vld [vmem:[%s17668_s8 + $0x58] sm:$0xff]  ;;  %v7002_v12 = vld [vmem:[%s17668_s8 + $0x50] sm:$0xff]  ;;  %v5808_v40 = vadd.f32 %v16114_v25, %v5388_v44  ;;  %v5373_v44 = vadd.f32 %v16072_v0, %v16046_v61 }
 0x749   : > { %18112 = vst [vmem:[#allocation16_spill] sm:$0xff] %v16156_v22  ;;  %v16158_v54 = vpop.f32.mrf.mxu0 }
 0x74a   : > { %v16160_v19 = vpop.f32.mrf.mxu1 }
 0x74b   : > { %18113 = vst [vmem:[#allocation138_spill] sm:$0xff] %v16160_v19  ;;  %v16164_v6 = vpop.f32.mrf.mxu0  ;;  %v16210_v19 = vpop.permute.xlu0 %6651 }
 0x74c   : > { %18114 = vst [vmem:[#allocation136_spill] sm:$0xff] %v16164_v6  ;;  %v16166_v46 = vpop.f32.mrf.mxu1  ;;  %v5393_v6 = vadd.f32 %v16100_v20, %v16056_v24 }
 0x74d   : > { %18115 = vst [vmem:[#allocation45_spill] sm:$0xff] %v16166_v46  ;;  %v16168_v38 = vpop.f32.mrf.mxu0  ;;  %v7005_v46 = vld [vmem:[%s17668_s8 + $0x68] sm:$0xff] }
 0x74e   : > { %v16172_v11 = vpop.f32.mrf.mxu1  ;;  %10917 = vmatprep.subr.mxu1 %v7005_v46  ;;  %v5809_v24 = vadd.f32 %v16122_v15, %v5393_v6 }
 0x74f   : > { %18116 = vst [vmem:[#allocation91_spill] sm:$0xff] %v16172_v11  ;;  %v16174_v63 = vpop.f32.mrf.mxu0  ;;  %10918 = vmatpush3.msra.mxu1 %v7005_v46  ;;  %v5398_v46 = vadd.f32 %v16094_v50, %v16054_v57  ;;  %v5383_v11 = vadd.f32 %v16084_v18, %v16052_v37  ;;  %v16233_v57 = vpop.permute.xlu0 %6641  ;;  %v5378_v50 = vadd.f32 %v16068_v62, %v16044_v53  ;;  %v7000_v37 = vld [vmem:[%s17668_s8 + $0x40] sm:$0xff] }
 0x750   : > { %v16176_v58 = vpop.f32.mrf.mxu1  ;;  %10919 = vmatprep.subr.mxu1 %v7004_v27 }
 0x751   : > { %18117 = vst [vmem:[#allocation43_spill] sm:$0xff] %v16176_v58  ;;  %v16180_v30 = vpop.f32.mrf.mxu0  ;;  %10920 = vmatpush3.msra.mxu1 %v7004_v27  ;;  %v16218_v58 = vpop.permute.xlu1 %6646  ;;  %v7001_v27 = vld [vmem:[%s17668_s8 + $0x48] sm:$0xff]  ;;  %v5810_v9 = vadd.f32 %v16118_v10, %v5398_v46  ;;  %v5807_v18 = vadd.f32 %v16116_v49, %v5383_v11  ;;  %v5806_v53 = vadd.f32 %v16108_v13, %v5378_v50 }
 0x752   : > { %v16182_v60 = vpop.f32.mrf.mxu1  ;;  %10921 = vmatprep.subr.mxu1 %v7003_v16 }
 0x753   : > { %v16184_v22 = vpop.f32.mrf.mxu0  ;;  %10922 = vmatpush3.msra.mxu1 %v7003_v16 }
 0x754   : > { %v16188_v52 = vpop.f32.mrf.mxu1  ;;  %10923 = vmatprep.subr.mxu1 %v7002_v12 }
 0x755   : > { %v10834_v35 = vpop.f32.mrf.mxu0  ;;  %10924 = vmatpush3.msra.mxu1 %v7002_v12  ;;  %v6999_v12 = vld [vmem:[%s17668_s8 + $0x38] sm:$0xff]  ;;  %v16250_v46 = vpop.permute.xlu1 %6636 }
 0x756   : > { %v16196_v29 = vpop.f32.mrf.mxu1  ;;  %10925 = vmatprep.subr.mxu1 %v7001_v27  ;;  %v6184_v0 = vadd.f32 %v10834_v35, %v5806_v53 }
 0x757   : > { %v16203_v41 = vpop.f32.mrf.mxu0  ;;  %10926 = vmatpush3.msra.mxu1 %v7001_v27 }
 0x758   : > { %v16205_v7 = vpop.f32.mrf.mxu1  ;;  %10927 = vmatprep.subr.mxu1 %v7000_v37 }
 0x759   : > { %v10837_v36 = vpop.f32.mrf.mxu0  ;;  %10928 = vmatpush3.msra.mxu1 %v7000_v37 }
 0x75a   : > { %v10894_v5 = vpop.f32.mrf.mxu1  ;;  %v6186_v20 = vadd.f32 %v10837_v36, %v5808_v40  ;;  %10929 = vmatprep.subr.mxu1 %v6999_v12 }
 0x75b   : > { %v6114_v32 = vpop.f32.mrf.mxu0  ;;  %10930 = vmatpush3.msra.mxu1 %v6999_v12 }
 0x75c   : > { %v6482_v51 = vpop.f32.mrf.mxu1  ;;  %v6185_v49 = vadd.f32 %v6114_v32, %v5807_v18  ;;  %v5363_v32 = vadd.f32 %v16064_v8, %v16042_v45  ;;  %v6182_v45 = vadd.f32 %v16180_v30, %v16104_v39 }
 0x75d   : > { %v10840_v14 = vpop.f32.mrf.mxu0 }
 0x75e   : > { %v10897_v17 = vpop.f32.mrf.mxu1  ;;  %v6188_v25 = vadd.f32 %v10840_v14, %v5810_v9  ;;  %v5805_v14 = vadd.f32 %v16112_v56, %v5373_v44  ;;  %v16256_v9 = vpop.permute.xlu0 %6631  ;;  %v6562_v56 = vadd.f32 %v10894_v5, %v6184_v0  ;;  %v18122_v0 = vld [vmem:[#allocation137_spill] sm:$0xff] }
 0x75f   : > { %v6124_v55 = vpop.f32.mrf.mxu0  ;;  %v6564_v40 = vadd.f32 %v10897_v17, %v6186_v20  ;;  %v6627_v5 = vpop.permute.xlu1 %6626 }
 0x760   : > { %v6492_v16 = vpop.f32.mrf.mxu1  ;;  %v6187_v11 = vadd.f32 %v6124_v55, %v5809_v24  ;;  %v6183_v17 = vadd.f32 %v16203_v41, %v5805_v14 }
 0x761   : > { %v16242_v10 = vpop.f32.mrf.mxu0  ;;  %v6563_v13 = vadd.f32 %v6492_v16, %v6185_v49  ;;  %v6732_v50 = vadd.f32 %v16178_v59, %v6564_v40  ;;  %v5353_v59 = vadd.f32 %v16058_v21, %v16038_v43  ;;  %v6180_v43 = vadd.f32 %v16168_v38, %v16098_v42 }
 0x762   : > { %v10900_v62 = vpop.f32.mrf.mxu1  ;;  %v6561_v8 = vadd.f32 %v6482_v51, %v6183_v17  ;;  %v6622_v51 = vpop.permute.xlu0 %6621 }
 0x763   : > { %v6566_v36 = vadd.f32 %v10900_v62, %v6188_v25  ;;  %v16253_v15 = vpop.f32.mrf.mxu0  ;;  %v6731_v41 = vadd.f32 %v16186_v31, %v6563_v13  ;;  %v6730_v25 = vadd.f32 %v16201_v47, %v6562_v56  ;;  %v6756_v39 = vmax.f32 %v6732_v50, 0.0  ;;  %v6617_v38 = vpop.permute.xlu1 %6616  ;;  %v18125_v50 = vld [vmem:[#allocation50_spill] sm:$0xff] }
 0x764   : > { %v6502_v61 = vpop.f32.mrf.mxu1  ;;  %v5801_v30 = vadd.f32 %v16102_v2, %v5353_v59  ;;  %v6558_v53 = vadd.f32 %v16182_v60, %v6180_v43 }
 0x765   : > { %v6734_v6 = vadd.f32 %v16162_v23, %v6566_v36  ;;  %v6565_v27 = vadd.f32 %v6502_v61, %v6187_v11  ;;  %v5803_v23 = vadd.f32 %v16106_v33, %v5363_v32  ;;  %v16266_v16 = vpop.f32.mrf.mxu0  ;;  %v6755_v44 = vmax.f32 %v6731_v41, 0.0  ;;  %v18120_v36 = vld [vmem:[#allocation91_spill] sm:$0xff] }
 0x766   : > { %v16261_v55 = vpop.f32.mrf.mxu1  ;;  %v6179_v2 = vadd.f32 %v16174_v63, %v5801_v30  ;;  %v6754_v42 = vmax.f32 %v6730_v25, 0.0  ;;  %v6612_v60 = vpop.permute.xlu0 %6611  ;;  %v18130_v25 = vld [vmem:[#allocation25_spill] sm:$0xff] }
 0x767   : > { %v6758_v37 = vmax.f32 %v6734_v6, 0.0  ;;  %v6733_v35 = vadd.f32 %v16170_v3, %v6565_v27  ;;  %v6181_v33 = vadd.f32 %v16184_v22, %v5803_v23  ;;  %v6560_v3 = vadd.f32 %v16196_v29, %v6182_v45  ;;  %v16282_v31 = vpop.f32.mrf.mxu0  ;;  %v18124_v6 = vld [vmem:[#allocation43_spill] sm:$0xff]  ;;  %v6607_v56 = vpop.permute.xlu1 %6606  ;;  %v18127_v23 = vld [vmem:[#allocation142_spill] sm:$0xff] }
 0x768   : > { %v16268_v18 = vpop.f32.mrf.mxu1  ;;  %v6729_v22 = vadd.f32 %v16210_v19, %v6561_v8  ;;  %v5343_v29 = vadd.f32 %v16048_v1, %v16036_v4  ;;  %v6178_v4 = vadd.f32 %v16158_v54, %v16092_v28  ;;  %v6557_v1 = vadd.f32 %v16188_v52, %v6179_v2  ;;  %v18121_v52 = vld [vmem:[#allocation76_spill] sm:$0xff]  ;;  %v18128_v8 = vld [vmem:[#allocation138_spill] sm:$0xff] }
 0x769   : > { %v6757_v24 = vmax.f32 %v6733_v35, 0.0  ;;  %6848 = vmatpush1.msra.mxu0 %v6758_v37  ;;  %v6559_v21 = vadd.f32 %v16205_v7, %v6181_v33  ;;  %v6728_v62 = vadd.f32 %v16218_v58, %v6560_v3  ;;  %v16298_v19 = vpop.f32.mrf.mxu0  ;;  %v18118_v58 = vld [vmem:[#allocation48_spill] sm:$0xff]  ;;  %v6726_v28 = vadd.f32 %v16250_v46, %v6558_v53  ;;  %v18129_v3 = vld [vmem:[#allocation118_spill] sm:$0xff] }
 0x76a   : > { %v16275_v20 = vpop.f32.mrf.mxu1  ;;  %6849 = vmatprep.subr.mxu0 %v17758_v26  ;;  %v5799_v7 = vadd.f32 %v16096_v48, %v5343_v29  ;;  %v6753_v12 = vmax.f32 %v6729_v22, 0.0  ;;  %v5333_v49 = vadd.f32 %v18118_v58, %v16032_v34  ;;  %v18119_v48 = vld [vmem:[#allocation136_spill] sm:$0xff]  ;;  %v6556_v14 = vadd.f32 %v18120_v36, %v6178_v4  ;;  %v18123_v34 = vld [vmem:[#allocation19_spill] sm:$0xff]  ;;  %v6602_v33 = vpop.permute.xlu0 %6601  ;;  %v18134_v29 = vld [vmem:[#allocation45_spill] sm:$0xff] }
 0x76b   : > { %6850 = vmatpush1.msra.mxu0 %v6757_v24  ;;  %v6727_v63 = vadd.f32 %v16233_v57, %v6559_v21  ;;  %v6752_v54 = vmax.f32 %v6728_v62, 0.0  ;;  %v16314_v61 = vpop.f32.mrf.mxu0  ;;  %v6176_v13 = vadd.f32 %v18123_v34, %v18122_v0  ;;  %v6725_v32 = vadd.f32 %v16256_v9, %v6557_v1  ;;  %v18126_v46 = vld [vmem:[#allocation8_spill] sm:$0xff]  ;;  %v18137_v4 = vld [vmem:[#allocation145_spill] sm:$0xff] }
 0x76c   : > { %6851 = vmatprep.subr.mxu0 %v17758_v26  ;;  %v16291_v47 = vpop.f32.mrf.mxu1  ;;  %v6177_v40 = vadd.f32 %v18119_v48, %v5799_v7  ;;  %v5797_v57 = vadd.f32 %v18121_v52, %v5333_v49  ;;  %v5323_v37 = vadd.f32 %v18126_v46, %v18125_v50  ;;  %v6724_v24 = vadd.f32 %v6627_v5, %v6556_v14  ;;  %v18132_v21 = vld [vmem:[#allocation120_spill] sm:$0xff]  ;;  %v18135_v5 = vld [vmem:[#allocation69_spill] sm:$0xff]  ;;  %v6717_v14 = vpop.permute.xlu1 %6716 }
 0x76d   : > { %6852 = vmatpush1.msra.mxu0 %v6756_v39  ;;  %v6751_v17 = vmax.f32 %v6727_v63, 0.0  ;;  %v6554_v41 = vadd.f32 %v18128_v8, %v6176_v13  ;;  %v6750_v59 = vmax.f32 %v6726_v28, 0.0  ;;  %v18131_v39 = vld [vmem:[#allocation22_spill] sm:$0xff]  ;;  %v10852_v43 = vpop.f32.mrf.mxu0  ;;  %v18133_v22 = vld [vmem:[#allocation72_spill] sm:$0xff]  ;;  %v6749_v62 = vmax.f32 %v6725_v32, 0.0  ;;  %v18139_v49 = vld [vmem:[#allocation65_spill] sm:$0xff] }
 0x76e   : > { %6853 = vmatprep.subr.mxu0 %v17758_v26  ;;  %v16307_v11 = vpop.f32.mrf.mxu1  ;;  %v6555_v27 = vadd.f32 %v18124_v6, %v6177_v40  ;;  %v6175_v45 = vadd.f32 %v18127_v23, %v5797_v57  ;;  %v5795_v9 = vadd.f32 %v18129_v3, %v5323_v37  ;;  %v5438_v30 = vadd.f32 %v18131_v39, %v18130_v25  ;;  %v18140_v28 = vld [vmem:[#allocation140_spill] sm:$0xff]  ;;  %v6712_v6 = vpop.permute.xlu0 %6711  ;;  %v18146_v25 = vld [vmem:[#allocation66_spill] sm:$0xff] }
 0x76f   : > { %6854 = vmatpush1.msra.mxu0 %v6755_v44  ;;  %v6174_v44 = vadd.f32 %v18133_v22, %v18132_v21  ;;  %v6722_v40 = vadd.f32 %v6617_v38, %v6554_v41  ;;  %v6748_v36 = vmax.f32 %v6724_v24, 0.0  ;;  %v18141_v52 = vld [vmem:[#allocation16_spill] sm:$0xff] }
 0x770   : > { %6855 = vmatprep.subr.mxu0 %v17758_v26  ;;  %v16323_v35 = vpop.f32.mrf.mxu1  ;;  %v6553_v2 = vadd.f32 %v18134_v29, %v6175_v45  ;;  %v6723_v53 = vadd.f32 %v6622_v51, %v6555_v27  ;;  %v5818_v1 = vadd.f32 %v18137_v4, %v5438_v30  ;;  %v18142_v27 = vld [vmem:[#allocation143_spill] sm:$0xff]  ;;  %v18143_v32 = vld [vmem:[#allocation68_spill] sm:$0xff]  ;;  %v18144_v45 = vld [vmem:[#allocation21_spill] sm:$0xff] }
 0x771   : > { %6856 = vmatpush1.msra.mxu0 %v6754_v42  ;;  %v18136_v42 = vld [vmem:[#allocation67_spill] sm:$0xff]  ;;  %v6552_v48 = vadd.f32 %v18139_v49, %v6174_v44  ;;  %v6746_v46 = vmax.f32 %v6722_v40, 0.0  ;;  %v18145_v24 = vld [vmem:[#allocation144_spill] sm:$0xff]  ;;  %v18148_v44 = vld [vmem:[#allocation74_spill] sm:$0xff] }
 0x772   : > { %6857 = vmatprep.subr.mxu0 %v17758_v26  ;;  %v5433_v7 = vadd.f32 %v18136_v42, %v18135_v5  ;;  %v10912_v63 = vpop.f32.mrf.mxu1  ;;  %v6721_v0 = vadd.f32 %v6612_v60, %v6553_v2  ;;  %v6747_v34 = vmax.f32 %v6723_v53, 0.0  ;;  %v6196_v13 = vadd.f32 %v10852_v43, %v5818_v1  ;;  %v18147_v39 = vld [vmem:[#allocation24_spill] sm:$0xff]  ;;  %v18149_v2 = vld [vmem:[#allocation147_spill] sm:$0xff]  ;;  %v18150_v42 = vld [vmem:[#allocation141_spill] sm:$0xff] }
 0x773   : > { %6858 = vmatpush1.msra.mxu0 %v6753_v12  ;;  %v18138_v12 = vld [vmem:[#allocation18_spill] sm:$0xff]  ;;  %v6720_v38 = vadd.f32 %v6607_v56, %v6552_v48  ;;  %v5413_v30 = vadd.f32 %v18147_v39, %v18146_v25  ;;  %v6192_v53 = vadd.f32 %v16266_v16, %v18149_v2  ;;  %v6785_v39 = vld [vmem:[%s17667_s7 + $0x90] sm:$0xff]  ;;  %v6795_v2 = vld [vmem:[%s17667_s7 + $0xe0] sm:$0xff] }
 0x774   : > { %6859 = vmatprep.subr.mxu0 %v17758_v26  ;;  %v6173_v58 = vadd.f32 %v18138_v12, %v5795_v9  ;;  %v5817_v51 = vadd.f32 %v18140_v28, %v5433_v7  ;;  %v6542_v50 = vpop.f32.mrf.mxu1  ;;  %v6574_v23 = vadd.f32 %v10912_v63, %v6196_v13  ;;  %v6745_v41 = vmax.f32 %v6721_v0, 0.0  ;;  %v6707_v9 = vpop.permute.xlu1 %6706  ;;  %v18151_v7 = vld [vmem:[#allocation139_spill] sm:$0xff]  ;;  %v18153_v16 = vld [vmem:[#allocation146_spill] sm:$0xff] }
 0x775   : > { %6860 = vmatpush1.msra.mxu0 %v6752_v54  ;;  %v6164_v54 = vpop.f32.mrf.mxu0  ;;  %v6744_v56 = vmax.f32 %v6720_v38, 0.0  ;;  %v5813_v29 = vadd.f32 %v18148_v44, %v5413_v30  ;;  %v6570_v4 = vadd.f32 %v16275_v20, %v6192_v53  ;;  %v6774_v38 = vld [vmem:[%s17667_s7 + $0x38] sm:$0xff]  ;;  %v6788_v30 = vld [vmem:[%s17667_s7 + $0xa8] sm:$0xff] }
 0x776   : > { %6861 = vmatprep.subr.mxu0 %v17758_v26  ;;  %v6551_v57 = vadd.f32 %v18141_v52, %v6173_v58  ;;  %v6195_v37 = vadd.f32 %v6164_v54, %v5817_v51  ;;  %v6742_v22 = vadd.f32 %v6717_v14, %v6574_v23  ;;  %v18152_v58 = vld [vmem:[#allocation23_spill] sm:$0xff]  ;;  %v6786_v25 = vld [vmem:[%s17667_s7 + $0x98] sm:$0xff] }
 0x777   : > { %6862 = vmatpush1.msra.mxu0 %v6751_v17  ;;  %v5423_v17 = vadd.f32 %v18143_v32, %v18142_v27  ;;  %v6770_v27 = vld [vmem:[%s17667_s7 + $0x18] sm:$0xff]  ;;  %v6769_v32 = vld [vmem:[%s17667_s7 + $0x10] sm:$0xff]  ;;  %v6775_v23 = vld [vmem:[%s17667_s7 + $0x40] sm:$0xff] }
 0x778   : > { %6863 = vmatprep.subr.mxu0 %v17758_v26  ;;  %v6719_v60 = vadd.f32 %v6602_v33, %v6551_v57  ;;  %v6573_v3 = vadd.f32 %v6542_v50, %v6195_v37  ;;  %v6702_v33 = vpop.permute.xlu0 %6701  ;;  %v6766_v63 = vmax.f32 %v6742_v22, 0.0  ;;  %v6697_v12 = vpop.permute.xlu1 %6696  ;;  %v6771_v50 = vld [vmem:[%s17667_s7 + $0x20] sm:$0xff]  ;;  %v6776_v37 = vld [vmem:[%s17667_s7 + $0x48] sm:$0xff]  ;;  %v6794_v44 = vld [vmem:[%s17667_s7 + $0xd8] sm:$0xff] }
 0x779   : > { %6864 = vmatpush1.msra.mxu0 %v6750_v59  ;;  %v5815_v8 = vadd.f32 %v18144_v45, %v5423_v17  ;;  %v6194_v59 = vadd.f32 %v16298_v19, %v18145_v24  ;;  %v6738_v28 = vadd.f32 %v6697_v12, %v6570_v4  ;;  %v6772_v17 = vld [vmem:[%s17667_s7 + $0x28] sm:$0xff]  ;;  %v6778_v45 = vld [vmem:[%s17667_s7 + $0x58] sm:$0xff] }
 0x77a   : > { %6865 = vmatprep.subr.mxu0 %v17758_v26  ;;  %v6743_v19 = vmax.f32 %v6719_v60, 0.0  ;;  %v6741_v5 = vadd.f32 %v6712_v6, %v6573_v3  ;;  %v6767_v6 = vld [vmem:[%s17667_s7] sm:$0xff]  ;;  %v6780_v60 = vld [vmem:[%s17667_s7 + $0x68] sm:$0xff]  ;;  %v6782_v24 = vld [vmem:[%s17667_s7 + $0x78] sm:$0xff] }
 0x77b   : > { %6866 = vmatpush1.msra.mxu0 %v6749_v62  ;;  %v6193_v43 = vadd.f32 %v16314_v61, %v5815_v8  ;;  %v6572_v21 = vadd.f32 %v16307_v11, %v6194_v59  ;;  %v5403_v61 = vadd.f32 %v18151_v7, %v18150_v42  ;;  %v6191_v11 = vadd.f32 %v16282_v31, %v5813_v29  ;;  %v6777_v8 = vld [vmem:[%s17667_s7 + $0x50] sm:$0xff]  ;;  %v6784_v3 = vld [vmem:[%s17667_s7 + $0x88] sm:$0xff]  ;;  %v6798_v53 = vld [vmem:[%s17667_s7 + $0xf8] sm:$0xff] }
 0x77c   : > { %6867 = vmatprep.subr.mxu0 %v17758_v26  ;;  %v6692_v14 = vpop.permute.xlu0 %6691  ;;  %v6762_v0 = vmax.f32 %v6738_v28, 0.0  ;;  %v6781_v59 = vld [vmem:[%s17667_s7 + $0x70] sm:$0xff]  ;;  %v6792_v22 = vld [vmem:[%s17667_s7 + $0xc8] sm:$0xff]  ;;  %v6996_v7 = vld [vmem:[%s17668_s8 + $0x20] sm:$0xff] }
 0x77d   : > { %6868 = vmatpush1.msra.mxu0 %v6748_v36  ;;  %v6571_v62 = vadd.f32 %v16323_v35, %v6193_v43  ;;  %v6740_v1 = vadd.f32 %v6707_v9, %v6572_v21  ;;  %v5811_v49 = vadd.f32 %v18152_v58, %v5403_v61  ;;  %v6190_v35 = vadd.f32 %v16242_v10, %v18153_v16  ;;  %v6783_v9 = vld [vmem:[%s17667_s7 + $0x80] sm:$0xff]  ;;  %v6790_v43 = vld [vmem:[%s17667_s7 + $0xb8] sm:$0xff]  ;;  %v6789_v21 = vld [vmem:[%s17667_s7 + $0xb0] sm:$0xff] }
 0x77e   : > { %6869 = vmatprep.subr.mxu0 %v17758_v26  ;;  %v6569_v48 = vadd.f32 %v16291_v47, %v6191_v11  ;;  %v6765_v36 = vmax.f32 %v6741_v5, 0.0  ;;  %v6687_v47 = vpop.permute.xlu1 %6686  ;;  %v6793_v29 = vld [vmem:[%s17667_s7 + $0xd0] sm:$0xff]  ;;  %v6997_v42 = vld [vmem:[%s17668_s8 + $0x28] sm:$0xff]  ;;  %v6995_v61 = vld [vmem:[%s17668_s8 + $0x18] sm:$0xff] }
 0x77f   : > { %6870 = vmatpush1.msra.mxu0 %v6747_v34  ;;  %v6739_v40 = vadd.f32 %v6702_v33, %v6571_v62  ;;  %v6189_v20 = vadd.f32 %v16253_v15, %v5811_v49  ;;  %v6568_v31 = vadd.f32 %v16261_v55, %v6190_v35  ;;  %v6764_v51 = vmax.f32 %v6740_v1, 0.0  ;;  %v6791_v33 = vld [vmem:[%s17667_s7 + $0xc0] sm:$0xff]  ;;  %v6998_v62 = vld [vmem:[%s17668_s8 + $0x30] sm:$0xff]  ;;  %v6993_v4 = vld [vmem:[%s17668_s8 + $0x8] sm:$0xff] }
 0x780   : > { %6871 = vmatprep.subr.mxu0 %v17758_v26  ;;  %v6737_v10 = vadd.f32 %v6692_v14, %v6569_v48  ;;  %v6682_v34 = vpop.permute.xlu0 %6681  ;;  %v6797_v5 = vld [vmem:[%s17667_s7 + $0xf0] sm:$0xff]  ;;  %10931 = vmatprep.subr.mxu1 %v6998_v62  ;;  %v6992_v1 = vld [vmem:[%s17668_s8] sm:$0xff] }
 0x781   : > { %6872 = vmatpush1.msra.mxu0 %v6746_v46  ;;  %v6567_v54 = vadd.f32 %v16268_v18, %v6189_v20  ;;  %v6763_v52 = vmax.f32 %v6739_v40, 0.0  ;;  %v6736_v57 = vadd.f32 %v6687_v47, %v6568_v31  ;;  %v6773_v46 = vld [vmem:[%s17667_s7 + $0x30] sm:$0xff]  ;;  %10932 = vmatpush3.msra.mxu1 %v6998_v62 }
 0x782   : > { %6873 = vmatprep.subr.mxu0 %v17758_v26  ;;  %v6761_v55 = vmax.f32 %v6737_v10, 0.0  ;;  %10933 = vmatprep.subr.mxu1 %v6997_v42  ;;  %v6994_v11 = vld [vmem:[%s17668_s8 + $0x10] sm:$0xff] }
 0x783   : > { %6874 = vmatpush1.msra.mxu0 %v6745_v41  ;;  %v6735_v15 = vadd.f32 %v6682_v34, %v6567_v54  ;;  %v6760_v13 = vmax.f32 %v6736_v57, 0.0  ;;  %v6779_v41 = vld [vmem:[%s17667_s7 + $0x60] sm:$0xff]  ;;  %10934 = vmatpush3.msra.mxu1 %v6997_v42  ;;  %v7159_v62 = vld [vmem:[%s17669_s9 + $0x30] sm:$0xff] }
 0x784   : > { %6875 = vmatprep.subr.mxu0 %v17758_v26  ;;  %10935 = vmatprep.subr.mxu1 %v6996_v7  ;;  %v7161_v42 = vld [vmem:[%s17669_s9 + $0x40] sm:$0xff] }
 0x785   : > { %6876 = vmatpush1.msra.mxu0 %v6744_v56  ;;  %v6759_v18 = vmax.f32 %v6735_v15, 0.0  ;;  %v6787_v56 = vld [vmem:[%s17667_s7 + $0xa0] sm:$0xff]  ;;  %10936 = vmatpush3.msra.mxu1 %v6996_v7  ;;  %v7162_v7 = vld [vmem:[%s17669_s9 + $0x48] sm:$0xff] }
 0x786   : > { %6877 = vmatprep.subr.mxu0 %v17758_v26  ;;  %10937 = vmatprep.subr.mxu1 %v6995_v61 }
 0x787   : > { %6878 = vmatpush1.msra.mxu0 %v6743_v19  ;;  %v6796_v19 = vld [vmem:[%s17667_s7 + $0xe8] sm:$0xff]  ;;  %10938 = vmatpush3.msra.mxu1 %v6995_v61  ;;  %v7163_v61 = vld [vmem:[%s17669_s9 + $0x50] sm:$0xff] }
 0x788   : > { %6895 = vmatprep.subr.mxu0 %v17758_v26  ;;  %10939 = vmatprep.subr.mxu1 %v6994_v11 }
 0x789   : > { %6896 = vmatpush2.msra.mxu0 %v6766_v63  ;;  %10940 = vmatpush3.msra.mxu1 %v6994_v11  ;;  %v7164_v11 = vld [vmem:[%s17669_s9 + $0x58] sm:$0xff] }
 0x78a   : > { %6897 = vmatprep.subr.mxu0 %v17758_v26  ;;  %10941 = vmatprep.subr.mxu1 %v6993_v4 }
 0x78b   : > { %6898 = vmatpush2.msra.mxu0 %v6765_v36  ;;  %10942 = vmatpush3.msra.mxu1 %v6993_v4  ;;  %v7165_v4 = vld [vmem:[%s17669_s9 + $0x60] sm:$0xff] }
 0x78c   : > { %6899 = vmatprep.subr.mxu0 %v17758_v26  ;;  %10943 = vmatprep.subr.mxu1 %v6992_v1 }
 0x78d   : > { %6900 = vmatpush2.msra.mxu0 %v6764_v51  ;;  %10944 = vmatpush3.msra.mxu1 %v6992_v1  ;;  %v7166_v1 = vld [vmem:[%s17669_s9 + $0x68] sm:$0xff] }
 0x78e   : > { %6901 = vmatprep.subr.mxu0 %v17758_v26 }
 0x78f   : > { %6902 = vmatpush2.msra.mxu0 %v6763_v52 }
 0x790   : > { %6903 = vmatprep.subr.mxu0 %v17758_v26 }
 0x791   : > { %6904 = vmatpush2.msra.mxu0 %v6762_v0 }
 0x792   : > { %6905 = vmatprep.subr.mxu0 %v17758_v26 }
 0x793   : > { %6906 = vmatpush2.msra.mxu0 %v6761_v55 }
 0x794   : > { %6907 = vmatprep.subr.mxu0 %v17758_v26 }
 0x795   : > { %6908 = vmatpush2.msra.mxu0 %v6760_v13 }
 0x796   : > { %6909 = vmatprep.subr.mxu0 %v17758_v26 }
 0x797   : > { %6910 = vmatpush2.msra.mxu0 %v6759_v18 }
 0x798   : > { %6912 = vmatmul.mubr.f32.vlgmr.msra.gmra.mxu0 %v6767_v6 }
 0x799   : > { %9684 = vmatprep.mubr.msk.f32.mxu0 %vm4099_vm7, %v6770_v27 }
 0x79c   : > { %6917 = vmatmul.mubr.f32.gmra.mxu0 %v6769_v32 }
 0x79d   : > { %9685 = vmatprep.mubr.msk.f32.mxu0 %vm4099_vm7, %v6772_v17 }
 0x7a0   : > { %6922 = vmatmul.mubr.f32.gmra.mxu0 %v6771_v50 }
 0x7a1   : > { %9686 = vmatprep.mubr.msk.f32.mxu0 %vm4099_vm7, %v6774_v38 }
 0x7a4   : > { %6927 = vmatmul.mubr.f32.gmra.mxu0 %v6773_v46 }
 0x7a5   : > { %9687 = vmatprep.mubr.msk.f32.mxu0 %vm4099_vm7, %v6776_v37 }
 0x7a8   : > { %6932 = vmatmul.mubr.f32.gmra.mxu0 %v6775_v23 }
 0x7a9   : > { %9688 = vmatprep.mubr.msk.f32.mxu0 %vm4099_vm7, %v6778_v45 }
 0x7ac   : > { %6937 = vmatmul.mubr.f32.gmra.mxu0 %v6777_v8 }
 0x7ad   : > { %9689 = vmatprep.mubr.msk.f32.mxu0 %vm4099_vm7, %v6780_v60 }
 0x7b0   : > { %6942 = vmatmul.mubr.f32.gmra.mxu0 %v6779_v41 }
 0x7b1   : > { %9690 = vmatprep.mubr.msk.f32.mxu0 %vm4099_vm7, %v6782_v24 }
 0x7b4   : > { %6947 = vmatmul.mubr.f32.gmra.mxu0 %v6781_v59 }
 0x7b5   : > { %9691 = vmatprep.mubr.msk.f32.mxu0 %vm4099_vm7, %v6784_v3 }
 0x7b8   : > { %6952 = vmatmul.mubr.f32.gmra.mxu0 %v6783_v9 }
 0x7b9   : > { %9692 = vmatprep.mubr.msk.f32.mxu0 %vm4099_vm7, %v6786_v25 }
 0x7bc   : > { %6957 = vmatmul.mubr.f32.gmra.mxu0 %v6785_v39 }
 0x7bd   : > { %9693 = vmatprep.mubr.msk.f32.mxu0 %vm4099_vm7, %v6788_v30 }
 0x7c0   : > { %6962 = vmatmul.mubr.f32.gmra.mxu0 %v6787_v56 }
 0x7c1   : > { %9694 = vmatprep.mubr.msk.f32.mxu0 %vm4099_vm7, %v6790_v43 }
 0x7c4   : > { %6967 = vmatmul.mubr.f32.gmra.mxu0 %v6789_v21 }
 0x7c5   : > { %9695 = vmatprep.mubr.msk.f32.mxu0 %vm4099_vm7, %v6792_v22  ;;  %v7153_v22 = vld [vmem:[%s17669_s9] sm:$0xff] }
 0x7c8   : > { %6972 = vmatmul.mubr.f32.gmra.mxu0 %v6791_v33  ;;  %v7154_v33 = vld [vmem:[%s17669_s9 + $0x8] sm:$0xff] }
 0x7c9   : > { %9696 = vmatprep.mubr.msk.f32.mxu0 %vm4099_vm7, %v6794_v44  ;;  %v9699_v44 = vld [vmem:[%s17669_s9 + $0x80] sm:$0xff] }
 0x7cc   : > { %6977 = vmatmul.mubr.f32.gmra.mxu0 %v6793_v29  ;;  %v7155_v29 = vld [vmem:[%s17669_s9 + $0x10] sm:$0xff] }
 0x7cd   : > { %9697 = vmatprep.mubr.msk.f32.mxu0 %vm4099_vm7, %v6796_v19  ;;  %v7156_v19 = vld [vmem:[%s17669_s9 + $0x18] sm:$0xff] }
 0x7d0   : > { %6982 = vmatmul.mubr.f32.gmra.mxu0 %v6795_v2  ;;  %v7157_v2 = vld [vmem:[%s17669_s9 + $0x20] sm:$0xff] }
 0x7d1   : > { %9698 = vmatprep.mubr.msk.f32.mxu0 %vm4099_vm7, %v6798_v53  ;;  %v7158_v53 = vld [vmem:[%s17669_s9 + $0x28] sm:$0xff] }
 0x7d4   : > { %6987 = vmatmul.mubr.f32.gmra.mxu0 %v6797_v5  ;;  %v7160_v5 = vld [vmem:[%s17669_s9 + $0x38] sm:$0xff] }
 0x7d5   : > { %11057 = vmatprep.mubr.f32.mxu0 %v7153_v22 }
 0x858   : > { %v6913_v63 = vpop.f32.mrf.mxu0 }
 0x859   : > { %10945 = vmatprep.mubr.f32.mxu1 %v6913_v63 }
 0x85a   : > { %v6915_v12 = vpop.f32.mrf.mxu0 }
 0x85c   : > { %v6918_v58 = vpop.f32.mrf.mxu0 }
 0x85d   : > { %10946 = vmatmul.mubr.f32.vlgmr.msra.gmra.mxu1 %v6918_v58  ;;  %v7167_v58 = vld [vmem:[%s17669_s9 + $0x70] sm:$0xff] }
 0x85e   : > { %v6920_v49 = vpop.f32.mrf.mxu0 }
 0x85f   : > { %v7168_v49 = vld [vmem:[%s17669_s9 + $0x78] sm:$0xff] }
 0x860   : > { %v6923_v16 = vpop.f32.mrf.mxu0 }
 0x861   : > { %10948 = vmatprep.mubr.f32.mxu1 %v6923_v16 }
 0x862   : > { %v6925_v35 = vpop.f32.mrf.mxu0 }
 0x864   : > { %v6928_v48 = vpop.f32.mrf.mxu0 }
 0x865   : > { %10949 = vmatmul.mubr.f32.gmra.mxu1 %v6928_v48 }
 0x866   : > { %v6930_v40 = vpop.f32.mrf.mxu0 }
 0x868   : > { %v6933_v36 = vpop.f32.mrf.mxu0 }
 0x869   : > { %10951 = vmatprep.mubr.f32.mxu1 %v6933_v36  ;;  %v9731_v36 = vld [vmem:[%s17669_s9 + $0x180] sm:$0xff] }
 0x86a   : > { %v6935_v14 = vpop.f32.mrf.mxu0 }
 0x86c   : > { %v6938_v20 = vpop.f32.mrf.mxu0 }
 0x86d   : > { %10952 = vmatmul.mubr.f32.gmra.mxu1 %v6938_v20 }
 0x86e   : > { %v6940_v31 = vpop.f32.mrf.mxu0 }
 0x870   : > { %v6943_v28 = vpop.f32.mrf.mxu0 }
 0x871   : > { %10954 = vmatprep.mubr.f32.mxu1 %v6943_v28 }
 0x872   : > { %v6945_v51 = vpop.f32.mrf.mxu0 }
 0x874   : > { %v6948_v54 = vpop.f32.mrf.mxu0 }
 0x875   : > { %10955 = vmatmul.mubr.f32.gmra.mxu1 %v6948_v54 }
 0x876   : > { %v6950_v10 = vpop.f32.mrf.mxu0 }
 0x878   : > { %v6953_v52 = vpop.f32.mrf.mxu0 }
 0x879   : > { %10957 = vmatprep.mubr.f32.mxu1 %v6953_v52 }
 0x87a   : > { %v6955_v47 = vpop.f32.mrf.mxu0 }
 0x87c   : > { %v6958_v57 = vpop.f32.mrf.mxu0 }
 0x87d   : > { %10958 = vmatmul.mubr.f32.gmra.mxu1 %v6958_v57 }
 0x87e   : > { %v6960_v0 = vpop.f32.mrf.mxu0 }
 0x880   : > { %v6963_v34 = vpop.f32.mrf.mxu0 }
 0x881   : > { %10960 = vmatprep.mubr.f32.mxu1 %v6963_v34 }
 0x882   : > { %v6965_v15 = vpop.f32.mrf.mxu0 }
 0x884   : > { %v6968_v55 = vpop.f32.mrf.mxu0 }
 0x885   : > { %10961 = vmatmul.mubr.f32.gmra.mxu1 %v6968_v55 }
 0x886   : > { %v6970_v13 = vpop.f32.mrf.mxu0 }
 0x888   : > { %v6973_v18 = vpop.f32.mrf.mxu0 }
 0x889   : > { %10963 = vmatprep.mubr.f32.mxu1 %v6973_v18 }
 0x88a   : > { %v6975_v6 = vpop.f32.mrf.mxu0 }
 0x88b   : > { %v8458_v6 = vld [vmem:[%s17670_s10 + $0x70] sm:$0xff] }
 0x88c   : > { %v6978_v27 = vpop.f32.mrf.mxu0 }
 0x88d   : > { %10964 = vmatmul.mubr.f32.gmra.mxu1 %v6978_v27 }
 0x88e   : > { %v6980_v32 = vpop.f32.mrf.mxu0 }
 0x890   : > { %v6983_v17 = vpop.f32.mrf.mxu0 }
 0x891   : > { %10966 = vmatprep.mubr.f32.mxu1 %v6983_v17  ;;  %v8459_v17 = vld [vmem:[%s17670_s10 + $0x78] sm:$0xff] }
 0x892   : > { %v6985_v50 = vpop.f32.mrf.mxu0 }
 0x893   : > { %v8456_v50 = vld [vmem:[%s17670_s10 + $0x60] sm:$0xff] }
 0x894   : > { %v6988_v38 = vpop.f32.mrf.mxu0 }
 0x895   : > { %10967 = vmatmul.mubr.f32.gmra.mxu1 %v6988_v38 }
 0x896   : > { %v6990_v46 = vpop.f32.mrf.mxu0  ;;  %11001 = vmatprep.mubr.f32.mxu1 %v9699_v44 }
 0x897   : > { %v8457_v46 = vld [vmem:[%s17670_s10 + $0x68] sm:$0xff] }
 0x91d   : > { %v16510_v37 = vpop.f32.mrf.mxu1 }
 0x91e   : > { %7204 = vrot.lane.b32.xlu1 %v16510_v37, %s11531_s27 }
 0x91f   : > { %v16514_v23 = vpop.f32.mrf.mxu1 }
 0x920   : > { %7202 = vrot.lane.b32.xlu0 %v16514_v23, %s11531_s27 }
 0x925   : > { %v16518_v45 = vpop.f32.mrf.mxu1 }
 0x926   : > { %7208 = vrot.lane.b32.xlu1 %v16518_v45, %s11531_s27 }
 0x927   : > { %v16522_v8 = vpop.f32.mrf.mxu1 }
 0x928   : > { %7206 = vrot.lane.b32.xlu0 %v16522_v8, %s11531_s27 }
 0x92d   : > { %v16526_v60 = vpop.f32.mrf.mxu1 }
 0x92e   : > { %7212 = vrot.lane.b32.xlu1 %v16526_v60, %s11531_s27 }
 0x92f   : > { %v16530_v41 = vpop.f32.mrf.mxu1 }
 0x930   : > { %7210 = vrot.lane.b32.xlu0 %v16530_v41, %s11531_s27 }
 0x935   : > { %v16534_v24 = vpop.f32.mrf.mxu1 }
 0x936   : > { %7571 = vrot.lane.b32.xlu0 %v16534_v24, %s11532_s0  ;;  %7216 = vrot.lane.b32.xlu1 %v16534_v24, %s11531_s27 }
 0x937   : > { %v16540_v59 = vpop.f32.mrf.mxu1 }
 0x93a   : > { %7797 = vrot.lane.b32.xlu1 %v16534_v24, %s11533_s26  ;;  %7214 = vrot.lane.b32.xlu0 %v16540_v59, %s11531_s27 }
 0x93d   : > { %v16546_v3 = vpop.f32.mrf.mxu1 }
 0x93e   : > { %7569 = vrot.lane.b32.xlu0 %v16540_v59, %s11532_s0  ;;  %7220 = vrot.lane.b32.xlu1 %v16546_v3, %s11531_s27 }
 0x93f   : > { %v16556_v9 = vpop.f32.mrf.mxu1 }
 0x942   : > { %7575 = vrot.lane.b32.xlu0 %v16546_v3, %s11532_s0  ;;  %7801 = vrot.lane.b32.xlu1 %v16546_v3, %s11533_s26 }
 0x945   : > { %v16562_v25 = vpop.f32.mrf.mxu1 }
 0x946   : > { %7799 = vrot.lane.b32.xlu1 %v16556_v9, %s11533_s26  ;;  %7218 = vrot.lane.b32.xlu0 %v16556_v9, %s11531_s27 }
 0x947   : > { %v16568_v39 = vpop.f32.mrf.mxu1 }
 0x94a   : > { %7573 = vrot.lane.b32.xlu0 %v16556_v9, %s11532_s0  ;;  %7224 = vrot.lane.b32.xlu1 %v16562_v25, %s11531_s27 }
 0x94d   : > { %v16570_v30 = vpop.f32.mrf.mxu1 }
 0x94e   : > { %7579 = vrot.lane.b32.xlu0 %v16562_v25, %s11532_s0  ;;  %7805 = vrot.lane.b32.xlu1 %v16562_v25, %s11533_s26 }
 0x94f   : > { %v16576_v56 = vpop.f32.mrf.mxu1 }
 0x952   : > { %7803 = vrot.lane.b32.xlu1 %v16568_v39, %s11533_s26  ;;  %7222 = vrot.lane.b32.xlu0 %v16568_v39, %s11531_s27 }
 0x955   : > { %v16582_v43 = vpop.f32.mrf.mxu1 }
 0x956   : > { %7577 = vrot.lane.b32.xlu0 %v16568_v39, %s11532_s0  ;;  %7228 = vrot.lane.b32.xlu1 %v16570_v30, %s11531_s27 }
 0x957   : > { %11025 = vmatprep.subr.mxu0 %v16582_v43  ;;  %v16589_v21 = vpop.f32.mrf.mxu1 }
 0x958   : > { %11026 = vmatpush3.msra.mxu0 %v16582_v43 }
 0x959   : > { %11027 = vmatprep.subr.mxu0 %v16589_v21 }
 0x95a   : > { %11028 = vmatpush3.msra.mxu0 %v16589_v21  ;;  %7583 = vrot.lane.b32.xlu0 %v16570_v30, %s11532_s0 }
 0x95b   : > { %7809 = vrot.lane.b32.xlu1 %v16570_v30, %s11533_s26  ;;  %11029 = vmatprep.subr.mxu0 %v16570_v30 }
 0x95c   : > { %11030 = vmatpush3.msra.mxu0 %v16570_v30 }
 0x95d   : > { %11031 = vmatprep.subr.mxu0 %v16576_v56 }
 0x95e   : > { %11032 = vmatpush3.msra.mxu0 %v16576_v56  ;;  %7226 = vrot.lane.b32.xlu0 %v16576_v56, %s11531_s27 }
 0x95f   : > { %7807 = vrot.lane.b32.xlu1 %v16576_v56, %s11533_s26  ;;  %11033 = vmatprep.subr.mxu0 %v16562_v25 }
 0x960   : > { %11034 = vmatpush3.msra.mxu0 %v16562_v25 }
 0x961   : > { %11035 = vmatprep.subr.mxu0 %v16568_v39 }
 0x962   : > { %11036 = vmatpush3.msra.mxu0 %v16568_v39  ;;  %7581 = vrot.lane.b32.xlu0 %v16576_v56, %s11532_s0 }
 0x963   : > { %7232 = vrot.lane.b32.xlu1 %v16582_v43, %s11531_s27  ;;  %11037 = vmatprep.subr.mxu0 %v16546_v3 }
 0x964   : > { %11038 = vmatpush3.msra.mxu0 %v16546_v3 }
 0x965   : > { %11039 = vmatprep.subr.mxu0 %v16556_v9 }
 0x966   : > { %11040 = vmatpush3.msra.mxu0 %v16556_v9  ;;  %7230 = vrot.lane.b32.xlu0 %v16589_v21, %s11531_s27  ;;  %s488_s27 = sand.u32 1, %s11508_s19  }
 0x967   : > { %7587 = vrot.lane.b32.xlu1 %v16582_v43, %s11532_s0  ;;  %11041 = vmatprep.subr.mxu0 %v16534_v24  ;;  %s9048_s16 = sshll.u32 %s488_s27, 3  ;;  %s8972_s2 = scalar_lea.sflag [#allocation4], %s488_s27 }
 0x968   : > { %11042 = vmatpush3.msra.mxu0 %v16534_v24  ;;  %s490_s20 = scalar_lea.vmem [#allocation3], %s9048_s16 }
 0x969   : > { %11043 = vmatprep.subr.mxu0 %v16540_v59  ;;  %s8985_s25 = sshll.u32 %s490_s20, 4  ;;  %s8986_s25 = int_to_ptr.vmem [resolvable:$true] %s8985_s25 }
 0x96a   : > { %11044 = vmatpush3.msra.mxu0 %v16540_v59  ;;  %7567 = vrot.lane.b32.xlu0 %v16526_v60, %s11532_s0  ;;  %s11456_s3 = scalar_lea.vmem %s8986_s25, 128 }
 0x96b   : > { %7813 = vrot.lane.b32.xlu1 %v16582_v43, %s11533_s26  ;;  %11045 = vmatprep.subr.mxu0 %v16526_v60  ;;  %p11457_p11 = scmp.ne.s32.totalorder %s8986_s25, %s11456_s3 }
 0x96c   : > { %11046 = vmatpush3.msra.mxu0 %v16526_v60 }
 0x96d   : > { %11047 = vmatprep.subr.mxu0 %v16530_v41  ;;  %p11458_p12 = pnand %p11457_p11, %p11656_p5 }
 0x96e   : > { %11048 = vmatpush3.msra.mxu0 %v16530_v41  ;;  %7565 = vrot.lane.b32.xlu0 %v16530_v41, %s11532_s0 }
 0x96f   : > { %7795 = vrot.lane.b32.xlu1 %v16540_v59, %s11533_s26  ;;  %11049 = vmatprep.subr.mxu0 %v16518_v45  ;;  %p11459_p13 = pneg %p11458_p12 }
 0x970   : > { %11050 = vmatpush3.msra.mxu0 %v16518_v45 }
 0x971   : > { %11051 = vmatprep.subr.mxu0 %v16522_v8 }
 0x972   : > { %11052 = vmatpush3.msra.mxu0 %v16522_v8  ;;  %7563 = vrot.lane.b32.xlu0 %v16518_v45, %s11532_s0 }
 0x973   : > { %7793 = vrot.lane.b32.xlu1 %v16526_v60, %s11533_s26  ;;  %11053 = vmatprep.subr.mxu0 %v16510_v37 }
 0x974   : > { %11054 = vmatpush3.msra.mxu0 %v16510_v37 }
 0x975   : > { %11055 = vmatprep.subr.mxu0 %v16514_v23 }
 0x976   : > { %11056 = vmatpush3.msra.mxu0 %v16514_v23  ;;  %7561 = vrot.lane.b32.xlu0 %v16522_v8, %s11532_s0 }
 0x977   : > { %7791 = vrot.lane.b32.xlu1 %v16530_v41, %s11533_s26  ;;  %11058 = vmatmul.mubr.f32.vlgmr.msra.gmra.mxu0 %v7154_v33  ;;  %v8446_v33 = vld [vmem:[%s17670_s10 + $0x10] sm:$0xff] }
 0x978   : > { %11060 = vmatprep.mubr.f32.mxu0 %v7155_v29  ;;  %v8447_v29 = vld [vmem:[%s17670_s10 + $0x18] sm:$0xff] }
 0x97a   : > { %7559 = vrot.lane.b32.xlu0 %v16510_v37, %s11532_s0 }
 0x97b   : > { %7789 = vrot.lane.b32.xlu1 %v16518_v45, %s11533_s26  ;;  %11061 = vmatmul.mubr.f32.gmra.mxu0 %v7156_v19 }
 0x97c   : > { %11063 = vmatprep.mubr.f32.mxu0 %v7157_v2  ;;  %v8444_v2 = vld [vmem:[%s17670_s10] sm:$0xff] }
 0x97e   : > { %7557 = vrot.lane.b32.xlu0 %v16514_v23, %s11532_s0 }
 0x97f   : > { %7787 = vrot.lane.b32.xlu1 %v16522_v8, %s11533_s26  ;;  %11064 = vmatmul.mubr.f32.gmra.mxu0 %v7158_v53 }
 0x980   : > { %11066 = vmatprep.mubr.f32.mxu0 %v7159_v62  ;;  %v8445_v62 = vld [vmem:[%s17670_s10 + $0x8] sm:$0xff] }
 0x982   : > { %7783 = vrot.lane.b32.xlu0 %v16514_v23, %s11533_s26 }
 0x983   : > { %7785 = vrot.lane.b32.xlu1 %v16510_v37, %s11533_s26  ;;  %11067 = vmatmul.mubr.f32.gmra.mxu0 %v7160_v5 }
 0x984   : > { %11069 = vmatprep.mubr.f32.mxu0 %v7161_v42  ;;  %v8589_v42 = vld [vmem:[%s17672_s12 + $0x8] sm:$0xff] }
 0x986   : > { %7585 = vrot.lane.b32.xlu0 %v16589_v21, %s11532_s0  ;;  %s11537_s0 = smov [#allocation3]  }
 0x987   : > { %8039 = vrot.lane.b32.xlu1 %v16582_v43, %s11534_s1  ;;  %11070 = vmatmul.mubr.f32.gmra.mxu0 %v7162_v7 }
 0x988   : > { %11072 = vmatprep.mubr.f32.mxu0 %v7163_v61  ;;  %v8588_v61 = vld [vmem:[%s17672_s12] sm:$0xff] }
 0x98a   : > { %8035 = vrot.lane.b32.xlu0 %v16570_v30, %s11534_s1 }
 0x98b   : > { %7811 = vrot.lane.b32.xlu1 %v16589_v21, %s11533_s26  ;;  %11073 = vmatmul.mubr.f32.gmra.mxu0 %v7164_v11 }
 0x98c   : > { %11075 = vmatprep.mubr.f32.mxu0 %v7165_v4  ;;  %v8591_v4 = vld [vmem:[%s17672_s12 + $0x18] sm:$0xff] }
 0x98e   : > { %8033 = vrot.lane.b32.xlu0 %v16576_v56, %s11534_s1 }
 0x98f   : > { %8265 = vrot.lane.b32.xlu1 %v16582_v43, %s11535_s17  ;;  %11076 = vmatmul.mubr.f32.gmra.mxu0 %v7166_v1 }
 0x990   : > { %v16735_v63 = vpop.permute.xlu1 %7204  ;;  %11078 = vmatprep.mubr.f32.mxu0 %v7167_v58  ;;  %v8590_v58 = vld [vmem:[%s17672_s12 + $0x10] sm:$0xff] }
 0x992   : > { %8031 = vrot.lane.b32.xlu0 %v16562_v25, %s11534_s1  ;;  %v16737_v12 = vpop.permute.xlu0 %7202 }
 0x993   : > { %8261 = vrot.lane.b32.xlu1 %v16570_v30, %s11535_s17  ;;  %11079 = vmatmul.mubr.f32.gmra.mxu0 %v7168_v49 }
 0x994   : > { %11169 = vmatprep.mubr.f32.mxu0 %v9731_v36 }
 0x996   : > { %8029 = vrot.lane.b32.xlu0 %v16568_v39, %s11534_s1 }
 0x997   : > { %8259 = vrot.lane.b32.xlu1 %v16576_v56, %s11535_s17  ;;  %v8448_v56 = vld [vmem:[%s17670_s10 + $0x20] sm:$0xff] }
 0x998   : > { %v16749_v16 = vpop.permute.xlu1 %7208 }
 0x99a   : > { %8027 = vrot.lane.b32.xlu0 %v16546_v3, %s11534_s1  ;;  %v16751_v35 = vpop.permute.xlu0 %7206 }
 0x99b   : > { %8257 = vrot.lane.b32.xlu1 %v16562_v25, %s11535_s17 }
 0x99e   : > { %8025 = vrot.lane.b32.xlu0 %v16556_v9, %s11534_s1 }
 0x99f   : > { %8255 = vrot.lane.b32.xlu1 %v16568_v39, %s11535_s17  ;;  %v8451_v39 = vld [vmem:[%s17670_s10 + $0x38] sm:$0xff] }
 0x9a0   : > { %v16757_v48 = vpop.permute.xlu1 %7212 }
 0x9a2   : > { %8023 = vrot.lane.b32.xlu0 %v16534_v24, %s11534_s1  ;;  %v16759_v40 = vpop.permute.xlu0 %7210 }
 0x9a3   : > { %8253 = vrot.lane.b32.xlu1 %v16546_v3, %s11535_s17 }
 0x9a6   : > { %8037 = vrot.lane.b32.xlu0 %v16589_v21, %s11534_s1 }
 0x9a7   : > { %8251 = vrot.lane.b32.xlu1 %v16556_v9, %s11535_s17  ;;  %v8450_v9 = vld [vmem:[%s17670_s10 + $0x30] sm:$0xff] }
 0x9a8   : > { %v16768_v14 = vpop.permute.xlu0 %7571  ;;  %v16770_v20 = vpop.permute.xlu1 %7216 }
 0x9aa   : > { %8021 = vrot.lane.b32.xlu0 %v16540_v59, %s11534_s1 }
 0x9ab   : > { %8263 = vrot.lane.b32.xlu1 %v16589_v21, %s11535_s17  ;;  %v8449_v21 = vld [vmem:[%s17670_s10 + $0x28] sm:$0xff] }
 0x9ac   : > { %v16776_v31 = vpop.permute.xlu1 %7797  ;;  %v16778_v28 = vpop.permute.xlu0 %7214 }
 0x9ae   : > { %8019 = vrot.lane.b32.xlu0 %v16526_v60, %s11534_s1 }
 0x9af   : > { %8249 = vrot.lane.b32.xlu1 %v16534_v24, %s11535_s17 }
 0x9b0   : > { %v16784_v51 = vpop.permute.xlu0 %7569  ;;  %v16786_v54 = vpop.permute.xlu1 %7220 }
 0x9b2   : > { %8017 = vrot.lane.b32.xlu0 %v16530_v41, %s11534_s1 }
 0x9b3   : > { %8247 = vrot.lane.b32.xlu1 %v16540_v59, %s11535_s17  ;;  %v8453_v59 = vld [vmem:[%s17670_s10 + $0x48] sm:$0xff] }
 0x9b4   : > { %v16792_v10 = vpop.permute.xlu0 %7575  ;;  %v16794_v52 = vpop.permute.xlu1 %7801 }
 0x9b6   : > { %8015 = vrot.lane.b32.xlu0 %v16518_v45, %s11534_s1 }
 0x9b7   : > { %8245 = vrot.lane.b32.xlu1 %v16526_v60, %s11535_s17 }
 0x9b8   : > { %v16800_v47 = vpop.permute.xlu1 %7799  ;;  %v16802_v57 = vpop.permute.xlu0 %7218 }
 0x9ba   : > { %8013 = vrot.lane.b32.xlu0 %v16522_v8, %s11534_s1 }
 0x9bb   : > { %8243 = vrot.lane.b32.xlu1 %v16530_v41, %s11535_s17  ;;  %v8452_v41 = vld [vmem:[%s17670_s10 + $0x40] sm:$0xff] }
 0x9bc   : > { %v16808_v0 = vpop.permute.xlu0 %7573  ;;  %v7225_v34 = vpop.permute.xlu1 %7224 }
 0x9be   : > { %8011 = vrot.lane.b32.xlu0 %v16510_v37, %s11534_s1 }
 0x9bf   : > { %8241 = vrot.lane.b32.xlu1 %v16518_v45, %s11535_s17 }
 0x9c0   : > { %v16814_v15 = vpop.permute.xlu0 %7579  ;;  %v16816_v55 = vpop.permute.xlu1 %7805 }
 0x9c2   : > { %8009 = vrot.lane.b32.xlu0 %v16514_v23, %s11534_s1  ;;  %s9781_s1 = sshll.u32 %s11639_s22, 7  ;;  %s11460_s22 = sshll.u32 %s11537_s0, 4  ;;  %s11461_s22 = int_to_ptr.vmem [resolvable:$false] %s11460_s22 }
 0x9c3   : > { %8239 = vrot.lane.b32.xlu1 %v16522_v8, %s11535_s17  ;;  %v8455_v8 = vld [vmem:[%s17670_s10 + $0x58] sm:$0xff]  ;;  %s17625_s23 = scalar_lea.hbm %s17675_s15, %s9781_s1  ;;  %s11462_s16 = scalar_lea.vmem %s11461_s22, 256 }
 0x9c4   : > { %v16822_v13 = vpop.permute.xlu1 %7803  ;;  %v7223_v18 = vpop.permute.xlu0 %7222  ;;  %p11463_p0 = scmp.lt.s32.totalorder %s8986_s25, %s11461_s22  ;;  %p11464_p1 = scmp.lt.s32.totalorder %s11462_s16, %s11456_s3 }
 0x9c6   : > { %8235 = vrot.lane.b32.xlu0 %v16514_v23, %s11535_s17  ;;  %v8454_v23 = vld [vmem:[%s17670_s10 + $0x50] sm:$0xff]  ;;  %p11465_p2 = por %p11464_p1, %p11463_p0 }
 0x9c7   : > { %8237 = vrot.lane.b32.xlu1 %v16510_v37, %s11535_s17 }
 0x9c8   : > { %v16831_v27 = vpop.permute.xlu0 %7577  ;;  %v7229_v32 = vpop.permute.xlu1 %7228  ;;  %p11466_p3 = pnand %p11465_p2, %p11459_p13 }
 0x9ca   : > { %8532 = vperm.xlu0 %11454, %v8458_v6   ;;  %v8596_v6 = vld [vmem:[%s17672_s12 + $0x40] sm:$0xff] }
 0x9cb   : > { %8537 = vperm.xlu1 %11455, %v8459_v17   ;;  %v9703_v17 = vld [vmem:[%s17669_s9 + $0xa0] sm:$0xff] }
 0x9cc   : > { %v16839_v38 = vpop.permute.xlu0 %7583 }
 0x9cd   : > { %v16844_v37 = vpop.permute.xlu1 %7809 }
 0x9ce   : > { %8522 = vperm.xlu0 %11454, %v8456_v50  }
 0x9cf   : > { %8527 = vperm.xlu1 %11455, %v8457_v46   ;;  %v8598_v46 = vld [vmem:[%s17672_s12 + $0x50] sm:$0xff] }
 0x9d0   : > { %v7227_v45 = vpop.permute.xlu0 %7226 }
 0x9d1   : > { %v16852_v60 = vpop.permute.xlu1 %7807 }
 0x9d2   : > { %8512 = vperm.xlu0 %11454, %v8454_v23   ;;  %v8599_v23 = vld [vmem:[%s17672_s12 + $0x58] sm:$0xff] }
 0x9d3   : > { %8517 = vperm.xlu1 %11455, %v8455_v8   ;;  %v9704_v8 = vld [vmem:[%s17669_s9 + $0xa8] sm:$0xff] }
 0x9d4   : > { %v16857_v24 = vpop.permute.xlu0 %7581 }
 0x9d5   : > { %v7233_v3 = vpop.permute.xlu1 %7232 }
 0x9d6   : > { %8502 = vperm.xlu0 %11454, %v8452_v41   ;;  %10969 = vmatprep.subr.mxu1 %v7233_v3 }
 0x9d7   : > { %8507 = vperm.xlu1 %11455, %v8453_v59   ;;  %10970 = vmatpush3.msra.mxu1 %v7233_v3  ;;  %v9705_v3 = vld [vmem:[%s17669_s9 + $0xb0] sm:$0xff] }
 0x9d8   : > { %v7231_v25 = vpop.permute.xlu0 %7230 }
 0x9d9   : > { %v16868_v30 = vpop.permute.xlu1 %7587  ;;  %10971 = vmatprep.subr.mxu1 %v7231_v25 }
 0x9da   : > { %8492 = vperm.xlu0 %11454, %v8450_v9   ;;  %10972 = vmatpush3.msra.mxu1 %v7231_v25  ;;  %v9706_v9 = vld [vmem:[%s17669_s9 + $0xb8] sm:$0xff] }
 0x9db   : > { %8497 = vperm.xlu1 %11455, %v8451_v39   ;;  %10973 = vmatprep.subr.mxu1 %v7229_v32  ;;  %v8603_v39 = vld [vmem:[%s17672_s12 + $0x78] sm:$0xff] }
 0x9dc   : > { %10974 = vmatpush3.msra.mxu1 %v7229_v32  ;;  %v16873_v43 = vpop.permute.xlu0 %7567 }
 0x9dd   : > { %v7814_v22 = vpop.permute.xlu1 %7813  ;;  %10975 = vmatprep.subr.mxu1 %v7227_v45 }
 0x9de   : > { %8482 = vperm.xlu0 %11454, %v8448_v56   ;;  %10976 = vmatpush3.msra.mxu1 %v7227_v45 }
 0x9df   : > { %8487 = vperm.xlu1 %11455, %v8449_v21   ;;  %10977 = vmatprep.subr.mxu1 %v7225_v34 }
 0x9e0   : > { %10978 = vmatpush3.msra.mxu1 %v7225_v34  ;;  %v16881_v44 = vpop.permute.xlu0 %7565  ;;  %11137 = vmatprep.subr.mxu0 %v7814_v22  ;;  %v9701_v34 = vld [vmem:[%s17669_s9 + $0x90] sm:$0xff] }
 0x9e1   : > { %v16886_v19 = vpop.permute.xlu1 %7795  ;;  %10979 = vmatprep.subr.mxu1 %v7223_v18  ;;  %11138 = vmatpush3.msra.mxu0 %v7814_v22 }
 0x9e2   : > { %8472 = vperm.xlu0 %11454, %v8446_v33   ;;  %10980 = vmatpush3.msra.mxu1 %v7223_v18  ;;  %v9715_v33 = vld [vmem:[%s17669_s9 + $0x100] sm:$0xff] }
 0x9e3   : > { %8477 = vperm.xlu1 %11455, %v8447_v29   ;;  %10981 = vmatprep.subr.mxu1 %v16786_v54 }
 0x9e4   : > { %10982 = vmatpush3.msra.mxu1 %v16786_v54  ;;  %v16893_v53 = vpop.permute.xlu0 %7563  ;;  %v8594_v54 = vld [vmem:[%s17672_s12 + $0x30] sm:$0xff] }
 0x9e5   : > { %v16898_v5 = vpop.permute.xlu1 %7793  ;;  %10983 = vmatprep.subr.mxu1 %v16802_v57 }
 0x9e6   : > { %8462 = vperm.xlu0 %11454, %v8444_v2   ;;  %10984 = vmatpush3.msra.mxu1 %v16802_v57  ;;  %v9700_v57 = vld [vmem:[%s17669_s9 + $0x88] sm:$0xff]  ;;  %v9717_v2 = vld [vmem:[%s17669_s9 + $0x110] sm:$0xff] }
 0x9e7   : > { %8467 = vperm.xlu1 %11455, %v8445_v62   ;;  %10985 = vmatprep.subr.mxu1 %v16770_v20  ;;  %v9732_v62 = vld [vmem:[%s17669_s9 + $0x188] sm:$0xff] }
 0x9e8   : > { %10986 = vmatpush3.msra.mxu1 %v16770_v20  ;;  %v16907_v7 = vpop.permute.xlu0 %7561  ;;  %v8592_v20 = vld [vmem:[%s17672_s12 + $0x20] sm:$0xff] }
 0x9e9   : > { %v16912_v11 = vpop.permute.xlu1 %7791  ;;  %10987 = vmatprep.subr.mxu1 %v16778_v28 }
 0x9ea   : > { %8611 = vperm.xlu0 %11454, %v8589_v42   ;;  %10988 = vmatpush3.msra.mxu1 %v16778_v28 }
 0x9eb   : > { %8606 = vperm.xlu1 %11455, %v8588_v61   ;;  %10989 = vmatprep.subr.mxu1 %v16757_v48  ;;  %v9733_v61 = vld [vmem:[%s17669_s9 + $0x190] sm:$0xff] }
 0x9ec   : > { %10990 = vmatpush3.msra.mxu1 %v16757_v48  ;;  %v16921_v1 = vpop.permute.xlu0 %7559  ;;  %v8593_v48 = vld [vmem:[%s17672_s12 + $0x28] sm:$0xff] }
 0x9ed   : > { %v16926_v49 = vpop.permute.xlu1 %7789  ;;  %10991 = vmatprep.subr.mxu1 %v16759_v40 }
 0x9ee   : > { %8621 = vperm.xlu0 %11454, %v8591_v4   ;;  %10992 = vmatpush3.msra.mxu1 %v16759_v40  ;;  %v9734_v4 = vld [vmem:[%s17669_s9 + $0x198] sm:$0xff] }
 0x9ef   : > { %8616 = vperm.xlu1 %11455, %v8590_v58   ;;  %10993 = vmatprep.subr.mxu1 %v16749_v16 }
 0x9f0   : > { %10994 = vmatpush3.msra.mxu1 %v16749_v16  ;;  %v16935_v36 = vpop.permute.xlu0 %7557  ;;  %v8595_v16 = vld [vmem:[%s17672_s12 + $0x38] sm:$0xff] }
 0x9f1   : > { %v16940_v28 = vpop.permute.xlu1 %7787  ;;  %10995 = vmatprep.subr.mxu1 %v16751_v35 }
 0x9f2   : > { %8631 = vperm.xlu0 %11454, %v8593_v48   ;;  %10996 = vmatpush3.msra.mxu1 %v16751_v35  ;;  %v9735_v48 = vld [vmem:[%s17669_s9 + $0x1a0] sm:$0xff] }
 0x9f3   : > { %8626 = vperm.xlu1 %11455, %v8592_v20   ;;  %10997 = vmatprep.subr.mxu1 %v16735_v63  ;;  %v9736_v20 = vld [vmem:[%s17669_s9 + $0x1a8] sm:$0xff] }
 0x9f4   : > { %10998 = vmatpush3.msra.mxu1 %v16735_v63  ;;  %v16949_v40 = vpop.permute.xlu0 %7783  ;;  %v8597_v63 = vld [vmem:[%s17672_s12 + $0x48] sm:$0xff] }
 0x9f5   : > { %v16957_v35 = vpop.permute.xlu1 %7785  ;;  %10999 = vmatprep.subr.mxu1 %v16737_v12 }
 0x9f6   : > { %8641 = vperm.xlu0 %11454, %v8595_v16   ;;  %11000 = vmatpush3.msra.mxu1 %v16737_v12  ;;  %v9702_v12 = vld [vmem:[%s17669_s9 + $0x98] sm:$0xff] }
 0x9f7   : > { %8636 = vperm.xlu1 %11455, %v8594_v54   ;;  %11002 = vmatmul.mubr.f32.vlgmr.msra.gmra.mxu1 %v9700_v57  ;;  %v9737_v54 = vld [vmem:[%s17669_s9 + $0x1b0] sm:$0xff]  ;;  %v9724_v57 = vld [vmem:[%s17669_s9 + $0x148] sm:$0xff] }
 0x9f8   : > { %11081 = vmatprep.subr.mxu1 %v16868_v30  ;;  %v7586_v18 = vpop.permute.xlu0 %7585  ;;  %11004 = vmatprep.mubr.f32.mxu1 %v9701_v34 }
 0x9f9   : > { %v16971_v32 = vpop.permute.xlu1 %8039  ;;  %11082 = vmatpush3.msra.mxu1 %v16868_v30 }
 0x9fa   : > { %11083 = vmatprep.subr.mxu1 %v7586_v18  ;;  %8651 = vperm.xlu0 %11454, %v8597_v63  }
 0x9fb   : > { %8646 = vperm.xlu1 %11455, %v8596_v6   ;;  %11084 = vmatpush3.msra.mxu1 %v7586_v18  ;;  %v9725_v18 = vld [vmem:[%s17669_s9 + $0x150] sm:$0xff]  ;;  %v9739_v6 = vld [vmem:[%s17669_s9 + $0x1c0] sm:$0xff] }
 0x9fc   : > { %11005 = vmatmul.mubr.f32.gmra.mxu1 %v9702_v12  ;;  %11085 = vmatprep.subr.mxu1 %v16839_v38  ;;  %v16981_v50 = vpop.permute.xlu0 %8035  ;;  %v9740_v12 = vld [vmem:[%s17669_s9 + $0x1c8] sm:$0xff] }
 0x9fd   : > { %v7812_v45 = vpop.permute.xlu1 %7811  ;;  %11086 = vmatpush3.msra.mxu1 %v16839_v38  ;;  %11007 = vmatprep.mubr.f32.mxu1 %v9703_v17  ;;  %v8600_v38 = vld [vmem:[%s17672_s12 + $0x60] sm:$0xff] }
 0x9fe   : > { %11087 = vmatprep.subr.mxu1 %v16857_v24  ;;  %11139 = vmatprep.subr.mxu0 %v7812_v45 }
 0x9ff   : > { %8656 = vperm.xlu1 %11455, %v8598_v46   ;;  %8661 = vperm.xlu0 %11454, %v8599_v23   ;;  %v9727_v46 = vld [vmem:[%s17669_s9 + $0x160] sm:$0xff]  ;;  %v9741_v23 = vld [vmem:[%s17669_s9 + $0x1d0] sm:$0xff] }
 0xa00   : > { %11088 = vmatpush3.msra.mxu1 %v16857_v24  ;;  %11140 = vmatpush3.msra.mxu0 %v7812_v45  ;;  %v16995_v41 = vpop.permute.xlu0 %8033  ;;  %v8601_v24 = vld [vmem:[%s17672_s12 + $0x68] sm:$0xff] }
 0xa01   : > { %11008 = vmatmul.mubr.f32.gmra.mxu1 %v9704_v8  ;;  %11089 = vmatprep.subr.mxu1 %v16814_v15  ;;  %v16998_v59 = vpop.permute.xlu1 %8265  ;;  %v9728_v45 = vld [vmem:[%s17669_s9 + $0x168] sm:$0xff]  ;;  %v9742_v8 = vld [vmem:[%s17669_s9 + $0x1d8] sm:$0xff] }
 0xa02   : > { %11141 = vmatprep.subr.mxu0 %v16844_v37  ;;  %11090 = vmatpush3.msra.mxu1 %v16814_v15 }
 0xa03   : > { %11142 = vmatpush3.msra.mxu0 %v16844_v37  ;;  %11091 = vmatprep.subr.mxu1 %v16831_v27  ;;  %v8602_v37 = vld [vmem:[%s17672_s12 + $0x70] sm:$0xff] }
 0xa04   : > { %11143 = vmatprep.subr.mxu0 %v16852_v60  ;;  %8666 = vperm.xlu1 %11455, %v8600_v38   ;;  %v17017_v15 = vpop.permute.xlu0 %8031  ;;  %v9729_v38 = vld [vmem:[%s17669_s9 + $0x170] sm:$0xff] }
 0xa05   : > { %8671 = vperm.xlu0 %11454, %v8601_v24   ;;  %11010 = vmatprep.mubr.f32.mxu1 %v9705_v3  ;;  %v17019_v25 = vpop.permute.xlu1 %8261  ;;  %v9743_v24 = vld [vmem:[%s17669_s9 + $0x1e0] sm:$0xff]  ;;  %v9730_v3 = vld [vmem:[%s17669_s9 + $0x178] sm:$0xff] }
 0xa06   : > { %11092 = vmatpush3.msra.mxu1 %v16831_v27  ;;  %11144 = vmatpush3.msra.mxu0 %v16852_v60  ;;  %v9707_v27 = vld [vmem:[%s17669_s9 + $0xc0] sm:$0xff] }
 0xa07   : > { %11011 = vmatmul.mubr.f32.gmra.mxu1 %v9706_v9  ;;  %11093 = vmatprep.subr.mxu1 %v16792_v10  ;;  %v9744_v9 = vld [vmem:[%s17669_s9 + $0x1e8] sm:$0xff] }
 0xa08   : > { %11145 = vmatprep.subr.mxu0 %v16816_v55  ;;  %11094 = vmatpush3.msra.mxu1 %v16792_v10  ;;  %v17035_v60 = vpop.permute.xlu0 %8029  ;;  %v9708_v10 = vld [vmem:[%s17669_s9 + $0xc8] sm:$0xff] }
 0xa09   : > { %11146 = vmatpush3.msra.mxu0 %v16816_v55  ;;  %11095 = vmatprep.subr.mxu1 %v16808_v0  ;;  %v17039_v30 = vpop.permute.xlu1 %8259  ;;  %v9709_v55 = vld [vmem:[%s17669_s9 + $0xd0] sm:$0xff] }
 0xa0a   : > { %11147 = vmatprep.subr.mxu0 %v16822_v13  ;;  %8676 = vperm.xlu1 %11455, %v8602_v37   ;;  %v9745_v37 = vld [vmem:[%s17669_s9 + $0x1f0] sm:$0xff] }
 0xa0b   : > { %8681 = vperm.xlu0 %11454, %v8603_v39   ;;  %11013 = vmatprep.mubr.f32.mxu1 %v9707_v27  ;;  %v9747_v39 = vld [vmem:[%s17669_s9 + $0x200] sm:$0xff]  ;;  %v9746_v27 = vld [vmem:[%s17669_s9 + $0x1f8] sm:$0xff] }
 0xa0c   : > { %11096 = vmatpush3.msra.mxu1 %v16808_v0  ;;  %11148 = vmatpush3.msra.mxu0 %v16822_v13  ;;  %v17055_v21 = vpop.permute.xlu0 %8027  ;;  %v9710_v0 = vld [vmem:[%s17669_s9 + $0xd8] sm:$0xff] }
 0xa0d   : > { %11014 = vmatmul.mubr.f32.gmra.mxu1 %v9708_v10  ;;  %11097 = vmatprep.subr.mxu1 %v16768_v14  ;;  %v17051_v56 = vpop.permute.xlu1 %8257  ;;  %v9749_v10 = vld [vmem:[%s17669_s9 + $0x210] sm:$0xff] }
 0xa0e   : > { %11149 = vmatprep.subr.mxu0 %v16794_v52  ;;  %11098 = vmatpush3.msra.mxu1 %v16768_v14  ;;  %v9711_v14 = vld [vmem:[%s17669_s9 + $0xe0] sm:$0xff] }
 0xa0f   : > { %11150 = vmatpush3.msra.mxu0 %v16794_v52  ;;  %11099 = vmatprep.subr.mxu1 %v16784_v51 }
 0xa10   : > { %11151 = vmatprep.subr.mxu0 %v16800_v47  ;;  %11016 = vmatprep.mubr.f32.mxu1 %v9709_v55  ;;  %v9763_v55 = vld [vmem:[%s17669_s9 + $0x280] sm:$0xff] }
 0xa11   : > { %11100 = vmatpush3.msra.mxu1 %v16784_v51  ;;  %11152 = vmatpush3.msra.mxu0 %v16800_v47  ;;  %v17069_v52 = vpop.permute.xlu1 %8255  ;;  %v9712_v51 = vld [vmem:[%s17669_s9 + $0xe8] sm:$0xff]  ;;  %v17078_v47 = vpop.permute.xlu0 %8025 }
 0xa12   : > { %11017 = vmatmul.mubr.f32.gmra.mxu1 %v9710_v0  ;;  %11101 = vmatprep.subr.mxu1 %v16873_v43  ;;  %v9764_v0 = vld [vmem:[%s17669_s9 + $0x288] sm:$0xff] }
 0xa13   : > { %11153 = vmatprep.subr.mxu0 %v16776_v31  ;;  %11102 = vmatpush3.msra.mxu1 %v16873_v43  ;;  %v9714_v43 = vld [vmem:[%s17669_s9 + $0xf8] sm:$0xff] }
 0xa14   : > { %11154 = vmatpush3.msra.mxu0 %v16776_v31  ;;  %11103 = vmatprep.subr.mxu1 %v16881_v44  ;;  %v9713_v31 = vld [vmem:[%s17669_s9 + $0xf0] sm:$0xff] }
 0xa15   : > { %11155 = vmatprep.subr.mxu0 %v16886_v19  ;;  %11019 = vmatprep.mubr.f32.mxu1 %v9711_v14  ;;  %v17089_v13 = vpop.permute.xlu1 %8253  ;;  %v17097_v22 = vpop.permute.xlu0 %8023  ;;  %v9751_v14 = vld [vmem:[%s17669_s9 + $0x220] sm:$0xff] }
 0xa16   : > { %11104 = vmatpush3.msra.mxu1 %v16881_v44  ;;  %11156 = vmatpush3.msra.mxu0 %v16886_v19  ;;  %v9716_v44 = vld [vmem:[%s17669_s9 + $0x108] sm:$0xff] }
 0xa17   : > { %11020 = vmatmul.mubr.f32.gmra.mxu1 %v9712_v51  ;;  %11105 = vmatprep.subr.mxu1 %v16893_v53  ;;  %v9752_v51 = vld [vmem:[%s17669_s9 + $0x228] sm:$0xff] }
 0xa18   : > { %11157 = vmatprep.subr.mxu0 %v16898_v5  ;;  %11106 = vmatpush3.msra.mxu1 %v16893_v53  ;;  %v9718_v53 = vld [vmem:[%s17669_s9 + $0x118] sm:$0xff] }
 0xa19   : > { %11158 = vmatpush3.msra.mxu0 %v16898_v5  ;;  %11107 = vmatprep.subr.mxu1 %v16907_v7  ;;  %v17112_v29 = vpop.permute.xlu1 %8251  ;;  %v8038_v19 = vpop.permute.xlu0 %8037 }
 0xa1a   : > { %11159 = vmatprep.subr.mxu0 %v16912_v11  ;;  %11022 = vmatprep.mubr.f32.mxu1 %v9713_v31  ;;  %v9753_v31 = vld [vmem:[%s17669_s9 + $0x230] sm:$0xff] }
 0xa1b   : > { %11108 = vmatpush3.msra.mxu1 %v16907_v7  ;;  %11160 = vmatpush3.msra.mxu0 %v16912_v11  ;;  %v9719_v7 = vld [vmem:[%s17669_s9 + $0x120] sm:$0xff]  ;;  %v9720_v11 = vld [vmem:[%s17669_s9 + $0x128] sm:$0xff] }
 0xa1c   : > { %11023 = vmatmul.mubr.f32.gmra.mxu1 %v9714_v43  ;;  %11109 = vmatprep.subr.mxu1 %v16921_v1  ;;  %v9754_v43 = vld [vmem:[%s17669_s9 + $0x238] sm:$0xff] }
 0xa1d   : > { %11161 = vmatprep.subr.mxu0 %v16926_v49  ;;  %11110 = vmatpush3.msra.mxu1 %v16921_v1  ;;  %v8264_v5 = vpop.permute.xlu1 %8263  ;;  %v17132_v42 = vpop.permute.xlu0 %8021 }
 0xa1e   : > { %11162 = vmatpush3.msra.mxu0 %v16926_v49  ;;  %11111 = vmatprep.subr.mxu1 %v16935_v36  ;;  %v9721_v49 = vld [vmem:[%s17669_s9 + $0x130] sm:$0xff] }
 0xa1f   : > { %11163 = vmatprep.subr.mxu0 %v16940_v28  ;;  %11112 = vmatpush3.msra.mxu1 %v16935_v36  ;;  %v9722_v36 = vld [vmem:[%s17669_s9 + $0x138] sm:$0xff] }
 0xa20   : > { %11113 = vmatprep.mubr.f32.mxu1 %v9715_v33  ;;  %11164 = vmatpush3.msra.mxu0 %v16940_v28  ;;  %v9755_v33 = vld [vmem:[%s17669_s9 + $0x240] sm:$0xff] }
 0xa21   : > { %11114 = vmatmul.mubr.f32.vlgmr.msra.gmra.mxu1 %v9716_v44  ;;  %11165 = vmatprep.subr.mxu0 %v16957_v35  ;;  %v17151_v1 = vpop.permute.xlu1 %8249  ;;  %v8020_v58 = vpop.permute.xlu0 %8019  ;;  %v9769_v44 = vld [vmem:[%s17669_s9 + $0x2b0] sm:$0xff] }
 0xa22   : > { %11193 = vmatprep.subr.mxu1 %v16971_v32  ;;  %11166 = vmatpush3.msra.mxu0 %v16957_v35  ;;  %v9738_v35 = vld [vmem:[%s17669_s9 + $0x1b8] sm:$0xff] }
 0xa23   : > { %11194 = vmatpush3.msra.mxu1 %v16971_v32  ;;  %11167 = vmatprep.subr.mxu0 %v16949_v40  ;;  %v9726_v32 = vld [vmem:[%s17669_s9 + $0x158] sm:$0xff] }
 0xa24   : > { %11195 = vmatprep.subr.mxu1 %v8038_v19  ;;  %11116 = vmatprep.mubr.f32.mxu1 %v9717_v2  ;;  %v9757_v2 = vld [vmem:[%s17669_s9 + $0x250] sm:$0xff] }
 0xa25   : > { %11168 = vmatpush3.msra.mxu0 %v16949_v40  ;;  %11196 = vmatpush3.msra.mxu1 %v8038_v19  ;;  %v8248_v28 = vpop.permute.xlu1 %8247  ;;  %v8018_v16 = vpop.permute.xlu0 %8017  ;;  %v9723_v40 = vld [vmem:[%s17669_s9 + $0x140] sm:$0xff]  ;;  %v9770_v19 = vld [vmem:[%s17669_s9 + $0x2b8] sm:$0xff] }
 0xa26   : > { %11117 = vmatmul.mubr.f32.gmra.mxu1 %v9718_v53  ;;  %11170 = vmatmul.mubr.f32.vlgmr.msra.gmra.mxu0 %v9732_v62  ;;  %v9771_v53 = vld [vmem:[%s17669_s9 + $0x2c0] sm:$0xff]  ;;  %v9758_v62 = vld [vmem:[%s17669_s9 + $0x258] sm:$0xff] }
 0xa27   : > { %11197 = vmatprep.subr.mxu1 %v16981_v50  ;;  %11249 = vmatprep.subr.mxu0 %v16998_v59 }
 0xa28   : > { %11198 = vmatpush3.msra.mxu1 %v16981_v50  ;;  %11250 = vmatpush3.msra.mxu0 %v16998_v59 }
 0xa29   : > { %11199 = vmatprep.subr.mxu1 %v16995_v41  ;;  %11251 = vmatprep.subr.mxu0 %v8264_v5  ;;  %v8246_v34 = vpop.permute.xlu1 %8245  ;;  %v8016_v63 = vpop.permute.xlu0 %8015 }
 0xa2a   : > { %11119 = vmatprep.mubr.f32.mxu1 %v9719_v7  ;;  %11172 = vmatprep.mubr.f32.mxu0 %v9733_v61  ;;  %v9773_v7 = vld [vmem:[%s17669_s9 + $0x2d0] sm:$0xff]  ;;  %v9760_v61 = vld [vmem:[%s17669_s9 + $0x268] sm:$0xff] }
 0xa2b   : > { %11200 = vmatpush3.msra.mxu1 %v16995_v41  ;;  %11252 = vmatpush3.msra.mxu0 %v8264_v5  ;;  %v9772_v5 = vld [vmem:[%s17669_s9 + $0x2c8] sm:$0xff] }
 0xa2c   : > { %11120 = vmatmul.mubr.f32.gmra.mxu1 %v9720_v11  ;;  %11173 = vmatmul.mubr.f32.gmra.mxu0 %v9734_v4  ;;  %v9774_v11 = vld [vmem:[%s17669_s9 + $0x2d8] sm:$0xff]  ;;  %v9761_v4 = vld [vmem:[%s17669_s9 + $0x270] sm:$0xff] }
 0xa2d   : > { %11201 = vmatprep.subr.mxu1 %v17017_v15  ;;  %11253 = vmatprep.subr.mxu0 %v17019_v25  ;;  %v8244_v17 = vpop.permute.xlu1 %8243  ;;  %v8014_v50 = vpop.permute.xlu0 %8013 }
 0xa2e   : > { %11202 = vmatpush3.msra.mxu1 %v17017_v15  ;;  %11254 = vmatpush3.msra.mxu0 %v17019_v25 }
 0xa2f   : > { %11203 = vmatprep.subr.mxu1 %v17035_v60  ;;  %11255 = vmatprep.subr.mxu0 %v17039_v30 }
 0xa30   : > { %11122 = vmatprep.mubr.f32.mxu1 %v9721_v49  ;;  %11175 = vmatprep.mubr.f32.mxu0 %v9735_v48  ;;  %v9776_v49 = vld [vmem:[%s17669_s9 + $0x2e8] sm:$0xff]  ;;  %v9777_v48 = vld [vmem:[%s17669_s9 + $0x2f0] sm:$0xff] }
 0xa31   : > { %11204 = vmatpush3.msra.mxu1 %v17035_v60  ;;  %11256 = vmatpush3.msra.mxu0 %v17039_v30  ;;  %v8242_v41 = vpop.permute.xlu1 %8241  ;;  %v8012_v59 = vpop.permute.xlu0 %8011  ;;  %v9748_v60 = vld [vmem:[%s17669_s9 + $0x208] sm:$0xff] }
 0xa32   : > { %11123 = vmatmul.mubr.f32.gmra.mxu1 %v9722_v36  ;;  %11176 = vmatmul.mubr.f32.gmra.mxu0 %v9736_v20  ;;  %v9778_v36 = vld [vmem:[%s17669_s9 + $0x2f8] sm:$0xff] }
 0xa33   : > { %11205 = vmatprep.subr.mxu1 %v17055_v21  ;;  %11257 = vmatprep.subr.mxu0 %v17051_v56 }
 0xa34   : > { %11206 = vmatpush3.msra.mxu1 %v17055_v21  ;;  %11258 = vmatpush3.msra.mxu0 %v17051_v56  ;;  %v9750_v56 = vld [vmem:[%s17669_s9 + $0x218] sm:$0xff] }
 0xa35   : > { %11207 = vmatprep.subr.mxu1 %v17078_v47  ;;  %11259 = vmatprep.subr.mxu0 %v17069_v52  ;;  %v8240_v15 = vpop.permute.xlu1 %8239  ;;  %v8010_v25 = vpop.permute.xlu0 %8009 }
 0xa36   : > { %11125 = vmatprep.mubr.f32.mxu1 %v9723_v40  ;;  %11178 = vmatprep.mubr.f32.mxu0 %v9737_v54 }
 0xa37   : > { %11208 = vmatpush3.msra.mxu1 %v17078_v47  ;;  %11260 = vmatpush3.msra.mxu0 %v17069_v52  ;;  %v9765_v52 = vld [vmem:[%s17669_s9 + $0x290] sm:$0xff]  ;;  %v9766_v47 = vld [vmem:[%s17669_s9 + $0x298] sm:$0xff]  ;;  %v11059_v20 = vpop.f32.mrf.mxu0 }
 0xa38   : > { %11126 = vmatmul.mubr.f32.gmra.mxu1 %v9724_v57  ;;  %11179 = vmatmul.mubr.f32.gmra.mxu0 %v9738_v35 }
 0xa39   : > { %11209 = vmatprep.subr.mxu1 %v17097_v22  ;;  %11261 = vmatprep.subr.mxu0 %v17089_v13  ;;  %v8238_v30 = vpop.permute.xlu1 %8237  ;;  %v8236_v21 = vpop.permute.xlu0 %8235 }
 0xa3a   : > { %11210 = vmatpush3.msra.mxu1 %v17097_v22  ;;  %11262 = vmatpush3.msra.mxu0 %v17089_v13  ;;  %v9767_v13 = vld [vmem:[%s17669_s9 + $0x2a0] sm:$0xff]  ;;  %v9768_v22 = vld [vmem:[%s17669_s9 + $0x2a8] sm:$0xff] }
 0xa3b   : > { %11211 = vmatprep.subr.mxu1 %v17132_v42  ;;  %11263 = vmatprep.subr.mxu0 %v17112_v29 }
 0xa3c   : > { %11128 = vmatprep.mubr.f32.mxu1 %v9725_v18  ;;  %11181 = vmatprep.mubr.f32.mxu0 %v9739_v6 }
 0xa3d   : > { %11212 = vmatpush3.msra.mxu1 %v17132_v42  ;;  %11264 = vmatpush3.msra.mxu0 %v17112_v29  ;;  %v9756_v29 = vld [vmem:[%s17669_s9 + $0x248] sm:$0xff]  ;;  %v9759_v42 = vld [vmem:[%s17669_s9 + $0x260] sm:$0xff] }
 0xa3e   : > { %11129 = vmatmul.mubr.f32.gmra.mxu1 %v9726_v32  ;;  %11182 = vmatmul.mubr.f32.gmra.mxu0 %v9740_v12 }
 0xa3f   : > { %11213 = vmatprep.subr.mxu1 %v8020_v58  ;;  %11265 = vmatprep.subr.mxu0 %v17151_v1 }
 0xa40   : > { %11214 = vmatpush3.msra.mxu1 %v8020_v58  ;;  %11266 = vmatpush3.msra.mxu0 %v17151_v1  ;;  %v9775_v1 = vld [vmem:[%s17669_s9 + $0x2e0] sm:$0xff]  ;;  %v9762_v58 = vld [vmem:[%s17669_s9 + $0x278] sm:$0xff] }
 0xa41   : > { %11215 = vmatprep.subr.mxu1 %v8018_v16  ;;  %11267 = vmatprep.subr.mxu0 %v8248_v28 }
 0xa42   : > { %11131 = vmatprep.mubr.f32.mxu1 %v9727_v46  ;;  %11184 = vmatprep.mubr.f32.mxu0 %v9741_v23 }
 0xa43   : > { %11216 = vmatpush3.msra.mxu1 %v8018_v16  ;;  %11268 = vmatpush3.msra.mxu0 %v8248_v28  ;;  %v7461_v28 = vpop.f32.mrf.mxu0 }
 0xa44   : > { %11132 = vmatmul.mubr.f32.gmra.mxu1 %v9728_v45  ;;  %11185 = vmatmul.mubr.f32.gmra.mxu0 %v9742_v8 }
 0xa45   : > { %11217 = vmatprep.subr.mxu1 %v8016_v63  ;;  %11269 = vmatprep.subr.mxu0 %v8246_v34  ;;  %v11062_v16 = vpop.f32.mrf.mxu0 }
 0xa46   : > { %11218 = vmatpush3.msra.mxu1 %v8016_v63  ;;  %11270 = vmatpush3.msra.mxu0 %v8246_v34 }
 0xa47   : > { %11219 = vmatprep.subr.mxu1 %v8014_v50  ;;  %11271 = vmatprep.subr.mxu0 %v8244_v17  ;;  %v7471_v40 = vpop.f32.mrf.mxu0 }
 0xa48   : > { %11134 = vmatprep.mubr.f32.mxu1 %v9729_v38  ;;  %11187 = vmatprep.mubr.f32.mxu0 %v9743_v24 }
 0xa49   : > { %11220 = vmatpush3.msra.mxu1 %v8014_v50  ;;  %11272 = vmatpush3.msra.mxu0 %v8244_v17  ;;  %v11065_v54 = vpop.f32.mrf.mxu0 }
 0xa4a   : > { %11135 = vmatmul.mubr.f32.gmra.mxu1 %v9730_v3  ;;  %11188 = vmatmul.mubr.f32.gmra.mxu0 %v9744_v9 }
 0xa4b   : > { %11221 = vmatprep.subr.mxu1 %v8012_v59  ;;  %11273 = vmatprep.subr.mxu0 %v8242_v41  ;;  %v7481_v35 = vpop.f32.mrf.mxu0 }
 0xa4c   : > { %11222 = vmatpush3.msra.mxu1 %v8012_v59  ;;  %11274 = vmatpush3.msra.mxu0 %v8242_v41 }
 0xa4d   : > { %11223 = vmatprep.subr.mxu1 %v8010_v25  ;;  %11275 = vmatprep.subr.mxu0 %v8240_v15  ;;  %v17343_v63 = vpop.f32.mrf.mxu0 }
 0xa4e   : > { %11190 = vmatprep.mubr.f32.mxu0 %v9745_v37  ;;  %11224 = vmatpush3.msra.mxu1 %v8010_v25  ;;  %v8572_v37 = vld [vmem:[%s17671_s11] sm:$0xff] }
 0xa4f   : > { %11225 = vmatprep.mubr.f32.mxu1 %v9747_v39  ;;  %11276 = vmatpush3.msra.mxu0 %v8240_v15  ;;  %v17345_v32 = vpop.f32.mrf.mxu0 }
 0xa50   : > { %11191 = vmatmul.mubr.f32.gmra.mxu0 %v9746_v27  ;;  %11226 = vmatmul.mubr.f32.vlgmr.msra.gmra.mxu1 %v9748_v60 }
 0xa51   : > { %11277 = vmatprep.subr.mxu0 %v8238_v30  ;;  %11228 = vmatprep.mubr.f32.mxu1 %v9749_v10  ;;  %v17347_v50 = vpop.f32.mrf.mxu0 }
 0xa52   : > { %11278 = vmatpush3.msra.mxu0 %v8238_v30  ;;  %11281 = vmatprep.mubr.f32.mxu0 %v9763_v55 }
 0xa53   : > { %11279 = vmatprep.subr.mxu0 %v8236_v21  ;;  %v17351_v23 = vpop.f32.mrf.mxu0 }
 0xa54   : > { %11229 = vmatmul.mubr.f32.gmra.mxu1 %v9750_v56  ;;  %11280 = vmatpush3.msra.mxu0 %v8236_v21 }
 0xa55   : > { %11282 = vmatmul.mubr.f32.vlgmr.msra.gmra.mxu0 %v9764_v0  ;;  %11231 = vmatprep.mubr.f32.mxu1 %v9751_v14  ;;  %v17355_v8 = vpop.f32.mrf.mxu0 }
 0xa56   : > { %11284 = vmatprep.mubr.f32.mxu0 %v9765_v52  ;;  %11361 = vmatprep.subr.mxu0 %v17758_v26 }
 0xa57   : > { %v17361_v38 = vpop.f32.mrf.mxu0 }
 0xa58   : > { %11232 = vmatmul.mubr.f32.gmra.mxu1 %v9752_v51 }
 0xa59   : > { %11285 = vmatmul.mubr.f32.gmra.mxu0 %v9766_v47  ;;  %11234 = vmatprep.mubr.f32.mxu1 %v9753_v31  ;;  %v11077_v3 = vpop.f32.mrf.mxu0 }
 0xa5a   : > { %11287 = vmatprep.mubr.f32.mxu0 %v9767_v13 }
 0xa5b   : > { %v7521_v25 = vpop.f32.mrf.mxu0 }
 0xa5c   : > { %11235 = vmatmul.mubr.f32.gmra.mxu1 %v9754_v43 }
 0xa5d   : > { %11288 = vmatmul.mubr.f32.gmra.mxu0 %v9768_v22  ;;  %11237 = vmatprep.mubr.f32.mxu1 %v9755_v33  ;;  %v17378_v56 = vpop.f32.mrf.mxu0 }
 0xa5e   : > { %11290 = vmatprep.mubr.f32.mxu0 %v9769_v44 }
 0xa5f   : > { %v17380_v51 = vpop.f32.mrf.mxu0 }
 0xa60   : > { %11238 = vmatmul.mubr.f32.gmra.mxu1 %v9756_v29 }
 0xa61   : > { %11291 = vmatmul.mubr.f32.gmra.mxu0 %v9770_v19  ;;  %11240 = vmatprep.mubr.f32.mxu1 %v9757_v2 }
 0xa62   : > { %11293 = vmatprep.mubr.f32.mxu0 %v9771_v53 }
 0xa64   : > { %11241 = vmatmul.mubr.f32.gmra.mxu1 %v9758_v62 }
 0xa65   : > { %11294 = vmatmul.mubr.f32.gmra.mxu0 %v9772_v5  ;;  %11243 = vmatprep.mubr.f32.mxu1 %v9759_v42 }
 0xa66   : > { %11296 = vmatprep.mubr.f32.mxu0 %v9773_v7 }
 0xa68   : > { %11244 = vmatmul.mubr.f32.gmra.mxu1 %v9760_v61 }
 0xa69   : > { %11297 = vmatmul.mubr.f32.gmra.mxu0 %v9774_v11  ;;  %11246 = vmatprep.mubr.f32.mxu1 %v9761_v4 }
 0xa6a   : > { %11299 = vmatprep.mubr.f32.mxu0 %v9775_v1 }
 0xa6c   : > { %11247 = vmatmul.mubr.f32.gmra.mxu1 %v9762_v58 }
 0xa6d   : > { %11300 = vmatmul.mubr.f32.gmra.mxu0 %v9776_v49  ;;  %11337 = vmatprep.mubr.f32.mxu1 %v8572_v37 }
 0xa6e   : > { %11302 = vmatprep.mubr.f32.mxu0 %v9777_v48 }
 0xa71   : > { %11303 = vmatmul.mubr.f32.gmra.mxu0 %v9778_v36 }
 0xab7   : > { %v11003_v57 = vpop.f32.mrf.mxu1 }
 0xab8   : > { %v7467_v55 = vadd.f32 %v11059_v20, %v11003_v57 }
 0xab9   : > { %v7316_v34 = vpop.f32.mrf.mxu1 }
 0xaba   : > { %v7462_v0 = vadd.f32 %v7461_v28, %v7316_v34 }
 0xabc   : > { %v11006_v18 = vpop.f32.mrf.mxu1 }
 0xabd   : > { %v7477_v31 = vadd.f32 %v11062_v16, %v11006_v18 }
 0xabe   : > { %v7326_v6 = vpop.f32.mrf.mxu1 }
 0xabf   : > { %v7472_v22 = vadd.f32 %v7471_v40, %v7326_v6 }
 0xac1   : > { %v11009_v12 = vpop.f32.mrf.mxu1 }
 0xac2   : > { %v7487_v62 = vadd.f32 %v11065_v54, %v11009_v12 }
 0xac3   : > { %v7336_v17 = vpop.f32.mrf.mxu1 }
 0xac4   : > { %v7482_v7 = vadd.f32 %v7481_v35, %v7336_v17 }
 0xac7   : > { %v17349_v46 = vpop.f32.mrf.mxu1 }
 0xac9   : > { %v17353_v45 = vpop.f32.mrf.mxu1 }
 0xacd   : > { %v17357_v41 = vpop.f32.mrf.mxu1 }
 0xacf   : > { %v17359_v59 = vpop.f32.mrf.mxu1 }
 0xad2   : > { %v17363_v24 = vpop.f32.mrf.mxu1 }
 0xad4   : > { %v17365_v9 = vpop.f32.mrf.mxu1 }
 0xad7   : > { %v11021_v15 = vpop.f32.mrf.mxu1 }
 0xad8   : > { %v17370_v39 = vadd.f32 %v11077_v3, %v11021_v15 }
 0xad9   : > { %v7376_v27 = vpop.f32.mrf.mxu1 }
 0xada   : > { %v17372_v60 = vadd.f32 %v7521_v25, %v7376_v27 }
 0xadc   : > { %v17374_v30 = vpop.f32.mrf.mxu1 }
 0xade   : > { %v17376_v10 = vpop.f32.mrf.mxu1 }
 0xae1   : > { %v11115_v21 = vpop.f32.mrf.mxu1 }
 0xae2   : > { %v7751_v14 = vadd.f32 %v11115_v21, %v7467_v55 }
 0xae3   : > { %v7671_v52 = vpop.f32.mrf.mxu1 }
 0xae4   : > { %v7750_v47 = vadd.f32 %v7671_v52, %v7462_v0 }
 0xae6   : > { %v11118_v13 = vpop.f32.mrf.mxu1  ;;  %v11171_v43 = vpop.f32.mrf.mxu0 }
 0xae7   : > { %v7753_v33 = vadd.f32 %v11118_v13, %v7477_v31  ;;  %v17382_v44 = vadd.f32 %v11171_v43, %v7751_v14 }
 0xae8   : > { %v7681_v29 = vpop.f32.mrf.mxu1  ;;  %v7897_v19 = vpop.f32.mrf.mxu0 }
 0xae9   : > { %18154 = vst [vmem:[#allocation88_spill] sm:$0xff] %v17382_v44  ;;  %v7752_v2 = vadd.f32 %v7681_v29, %v7472_v22  ;;  %v17384_v53 = vadd.f32 %v7897_v19, %v7750_v47 }
 0xaeb   : > { %18155 = vst [vmem:[#allocation47_spill] sm:$0xff] %v17384_v53 }
 0xaec   : > { %v11121_v5 = vpop.f32.mrf.mxu1  ;;  %v11174_v42 = vpop.f32.mrf.mxu0 }
 0xaed   : > { %v7755_v61 = vadd.f32 %v11121_v5, %v7487_v62  ;;  %v17386_v11 = vadd.f32 %v11174_v42, %v7753_v33 }
 0xaee   : > { %v7691_v4 = vpop.f32.mrf.mxu1  ;;  %v7907_v1 = vpop.f32.mrf.mxu0 }
 0xaef   : > { %18156 = vst [vmem:[#allocation94_spill] sm:$0xff] %v17386_v11  ;;  %v7754_v58 = vadd.f32 %v7691_v4, %v7482_v7  ;;  %v17388_v49 = vadd.f32 %v7907_v1, %v7752_v2 }
 0xaf1   : > { %18157 = vst [vmem:[#allocation114_spill] sm:$0xff] %v17388_v49 }
 0xaf2   : > { %v17390_v48 = vpop.f32.mrf.mxu1  ;;  %v11177_v36 = vpop.f32.mrf.mxu0 }
 0xaf3   : > { %v17392_v20 = vadd.f32 %v11177_v36, %v7755_v61 }
 0xaf4   : > { %v17394_v28 = vpop.f32.mrf.mxu1  ;;  %v7917_v16 = vpop.f32.mrf.mxu0 }
 0xaf5   : > { %18158 = vst [vmem:[#allocation41_spill] sm:$0xff] %v17392_v20  ;;  %v17396_v40 = vadd.f32 %v7917_v16, %v7754_v58  ;;  %v8538_v58 = vpop.permute.xlu1 %8537 }
 0xaf7   : > { %18159 = vst [vmem:[#allocation85_spill] sm:$0xff] %v17396_v40  ;;  %v7517_v40 = vadd.f32 %v17355_v8, %v17363_v24  ;;  %v7507_v8 = vadd.f32 %v17347_v50, %v17357_v41 }
 0xaf8   : > { %v17398_v54 = vpop.f32.mrf.mxu1  ;;  %v17400_v57 = vpop.f32.mrf.mxu0 }
 0xafa   : > { %v17402_v35 = vpop.f32.mrf.mxu1  ;;  %v17404_v34 = vpop.f32.mrf.mxu0 }
 0xafe   : > { %v11130_v18 = vpop.f32.mrf.mxu1  ;;  %v17406_v6 = vpop.f32.mrf.mxu0 }
 0xb00   : > { %v17408_v12 = vpop.f32.mrf.mxu1  ;;  %v17410_v17 = vpop.f32.mrf.mxu0 }
 0xb04   : > { %v11133_v3 = vpop.f32.mrf.mxu1  ;;  %v11186_v15 = vpop.f32.mrf.mxu0 }
 0xb05   : > { %v7763_v11 = vadd.f32 %v11133_v3, %v17370_v39 }
 0xb06   : > { %v7731_v25 = vpop.f32.mrf.mxu1  ;;  %v17412_v37 = vpop.f32.mrf.mxu0 }
 0xb07   : > { %v7762_v20 = vadd.f32 %v7731_v25, %v17372_v60 }
 0xb0a   : > { %v11136_v27 = vpop.f32.mrf.mxu1  ;;  %v11189_v55 = vpop.f32.mrf.mxu0 }
 0xb0c   : > { %v7741_v21 = vpop.f32.mrf.mxu1  ;;  %v7957_v0 = vpop.f32.mrf.mxu0 }
 0xb10   : > { %v11192_v14 = vpop.f32.mrf.mxu0  ;;  %v17414_v52 = vpop.f32.mrf.mxu1 }
 0xb11   : > { %18160 = vst [vmem:[#allocation112_spill] sm:$0xff] %v17414_v52 }
 0xb12   : > { %v17416_v47 = vpop.f32.mrf.mxu1  ;;  %v7967_v31 = vpop.f32.mrf.mxu0 }
 0xb13   : > { %18161 = vst [vmem:[#allocation117_spill] sm:$0xff] %v17416_v47 }
 0xb14   : > { %v17418_v13 = vpop.f32.mrf.mxu1 }
 0xb15   : > { %18162 = vst [vmem:[#allocation115_spill] sm:$0xff] %v17418_v13  ;;  %v17420_v43 = vpop.f32.mrf.mxu0  ;;  %v7532_v13 = vadd.f32 %v17380_v51, %v17376_v10  ;;  %v7988_v51 = vadd.f32 %v7957_v0, %v7762_v20 }
 0xb16   : > { %18163 = vst [vmem:[#allocation61_spill] sm:$0xff] %v17420_v43  ;;  %v17422_v22 = vpop.f32.mrf.mxu1 }
 0xb17   : > { %18164 = vst [vmem:[#allocation39_spill] sm:$0xff] %v17422_v22  ;;  %v17424_v33 = vpop.f32.mrf.mxu0 }
 0xb18   : > { %18165 = vst [vmem:[#allocation83_spill] sm:$0xff] %v17424_v33  ;;  %v17426_v29 = vpop.f32.mrf.mxu1  ;;  %v8533_v33 = vpop.permute.xlu0 %8532 }
 0xb19   : > { %18166 = vst [vmem:[#allocation110_spill] sm:$0xff] %v17426_v29  ;;  %v17428_v19 = vpop.f32.mrf.mxu0 }
 0xb1a   : > { %18167 = vst [vmem:[#allocation37_spill] sm:$0xff] %v17428_v19  ;;  %v17430_v2 = vpop.f32.mrf.mxu1  ;;  %v7537_v19 = vadd.f32 %v17378_v56, %v17374_v30  ;;  %v7512_v56 = vadd.f32 %v17361_v38, %v17365_v9  ;;  %v7502_v38 = vadd.f32 %v17351_v23, %v17359_v59  ;;  %v7759_v9 = vadd.f32 %v17398_v54, %v7507_v8 }
 0xb1b   : > { %18168 = vst [vmem:[#allocation81_spill] sm:$0xff] %v17430_v2  ;;  %v17432_v62 = vpop.f32.mrf.mxu0 }
 0xb1c   : > { %18169 = vst [vmem:[#allocation58_spill] sm:$0xff] %v17432_v62  ;;  %v17434_v5 = vpop.f32.mrf.mxu1  ;;  %v8528_v62 = vpop.permute.xlu1 %8527  ;;  %v7760_v24 = vadd.f32 %v17408_v12, %v7512_v56  ;;  %v7758_v12 = vadd.f32 %v17402_v35, %v7502_v38 }
 0xb1d   : > { %18170 = vst [vmem:[#allocation107_spill] sm:$0xff] %v17434_v5  ;;  %v17436_v42 = vpop.f32.mrf.mxu0  ;;  %v8523_v49 = vpop.permute.xlu0 %8522 }
 0xb1e   : > { %18171 = vst [vmem:[#allocation35_spill] sm:$0xff] %v17436_v42  ;;  %v17438_v7 = vpop.f32.mrf.mxu1  ;;  %v7765_v42 = vadd.f32 %v11136_v27, %v7537_v19  ;;  %v7986_v20 = vadd.f32 %v17412_v37, %v7760_v24 }
 0xb1f   : > { %18172 = vst [vmem:[#allocation79_spill] sm:$0xff] %v17438_v7  ;;  %v17440_v61 = vpop.f32.mrf.mxu0  ;;  %v7764_v7 = vadd.f32 %v7741_v21, %v7532_v13 }
 0xb20   : > { %18173 = vst [vmem:[#allocation108_spill] sm:$0xff] %v17440_v61  ;;  %v17442_v4 = vpop.f32.mrf.mxu1  ;;  %v8518_v29 = vpop.permute.xlu1 %8517  ;;  %v7991_v30 = vadd.f32 %v11192_v14, %v7765_v42 }
 0xb21   : > { %v17444_v1 = vpop.f32.mrf.mxu0  ;;  %v7990_v39 = vadd.f32 %v7967_v31, %v7764_v7  ;;  %v8513_v19 = vpop.permute.xlu0 %8512 }
 0xb22   : > { %18174 = vst [vmem:[#allocation104_spill] sm:$0xff] %v17444_v1  ;;  %v17446_v36 = vpop.f32.mrf.mxu1  ;;  %v7989_v1 = vadd.f32 %v11189_v55, %v7763_v11 }
 0xb23   : > { %v17448_v16 = vpop.f32.mrf.mxu0 }
 0xb24   : > { %18175 = vst [vmem:[#allocation33_spill] sm:$0xff] %v17448_v16  ;;  %v11242_v26 = vpop.f32.mrf.mxu1  ;;  %v8508_v41 = vpop.permute.xlu1 %8507 }
 0xb25   : > { %v17450_v43 = vpop.f32.mrf.mxu0  ;;  %v18186_v24 = vld [vmem:[#allocation35_spill] sm:$0xff] }
 0xb26   : > { %v8173_v47 = vpop.f32.mrf.mxu1 }
 0xb27   : > { %v17452_v53 = vpop.f32.mrf.mxu0  ;;  %v8212_v31 = vadd.f32 %v8173_v47, %v7986_v20 }
 0xb28   : > { %18176 = vst [vmem:[#allocation77_spill] sm:$0xff] %v17452_v53  ;;  %v11245_v52 = vpop.f32.mrf.mxu1  ;;  %v7761_v53 = vadd.f32 %v11130_v18, %v7517_v40 }
 0xb29   : > { %v11298_v44 = vpop.f32.mrf.mxu0  ;;  %v8215_v3 = vadd.f32 %v11245_v52, %v7989_v1 }
 0xb2a   : > { %v8183_v22 = vpop.f32.mrf.mxu1  ;;  %v7987_v60 = vadd.f32 %v11186_v15, %v7761_v53  ;;  %v7497_v53 = vadd.f32 %v17343_v63, %v17349_v46  ;;  %v7985_v15 = vadd.f32 %v17406_v6, %v7759_v9  ;;  %v18189_v9 = vld [vmem:[#allocation108_spill] sm:$0xff] }
 0xb2b   : > { %v8399_v61 = vpop.f32.mrf.mxu0  ;;  %v8214_v25 = vadd.f32 %v8183_v22, %v7988_v51  ;;  %v8503_v22 = vpop.permute.xlu0 %8502  ;;  %v18183_v56 = vld [vmem:[#allocation33_spill] sm:$0xff] }
 0xb2c   : > { %v11248_v2 = vpop.f32.mrf.mxu1  ;;  %v8213_v18 = vadd.f32 %v11242_v26, %v7987_v60  ;;  %v7492_v26 = vadd.f32 %v17345_v32, %v17353_v45  ;;  %v7757_v37 = vadd.f32 %v17390_v48, %v7497_v53  ;;  %v8438_v63 = vadd.f32 %v8399_v61, %v8212_v31  ;;  %v8498_v48 = vpop.permute.xlu1 %8497 }
 0xb2d   : > { %v11301_v16 = vpop.f32.mrf.mxu0  ;;  %v8217_v27 = vadd.f32 %v11248_v2, %v7991_v30  ;;  %v7984_v2 = vadd.f32 %v17410_v17, %v7758_v12 }
 0xb2e   : > { %v8193_v5 = vpop.f32.mrf.mxu1  ;;  %v8441_v21 = vadd.f32 %v11301_v16, %v8215_v3  ;;  %v8439_v13 = vadd.f32 %v11298_v44, %v8213_v18  ;;  %v7756_v6 = vadd.f32 %v17394_v28, %v7492_v26  ;;  %v7983_v44 = vadd.f32 %v17400_v57, %v7757_v37  ;;  %v18181_v16 = vld [vmem:[#allocation41_spill] sm:$0xff] }
 0xb2f   : > { %v8409_v10 = vpop.f32.mrf.mxu0  ;;  %v8216_v55 = vadd.f32 %v8193_v5, %v7990_v39  ;;  %v8211_v5 = vadd.f32 %v17442_v4, %v7985_v15  ;;  %v8210_v47 = vadd.f32 %v17446_v36, %v7984_v2  ;;  %v18178_v42 = vld [vmem:[#allocation77_spill] sm:$0xff]  ;;  %v8550_v61 = vadd.f32 %v8513_v19, %v8438_v63  ;;  %v8493_v57 = vpop.permute.xlu0 %8492  ;;  %v18179_v4 = vld [vmem:[#allocation79_spill] sm:$0xff] }
 0xb30   : > { %v8440_v0 = vadd.f32 %v8409_v10, %v8214_v25  ;;  %v8553_v23 = vadd.f32 %v8528_v62, %v8441_v21  ;;  %v8551_v32 = vadd.f32 %v8518_v29, %v8439_v13  ;;  %v7982_v17 = vadd.f32 %v17404_v34, %v7756_v6  ;;  %v18177_v62 = vld [vmem:[#allocation107_spill] sm:$0xff]  ;;  %v18182_v34 = vld [vmem:[#allocation110_spill] sm:$0xff]  ;;  %v8488_v3 = vpop.permute.xlu1 %8487  ;;  %v18185_v19 = vld [vmem:[#allocation81_spill] sm:$0xff] }
 0xb31   : > { %v11304_v11 = vpop.f32.mrf.mxu0  ;;  %v8436_v7 = vadd.f32 %v18178_v42, %v8210_v47  ;;  %v8207_v30 = vadd.f32 %v18182_v34, %v18181_v16  ;;  %v8566_v39 = vmax.f32 %v8550_v61, 0.0  ;;  %v18187_v21 = vld [vmem:[#allocation94_spill] sm:$0xff]  ;;  %v18193_v13 = vld [vmem:[#allocation88_spill] sm:$0xff]  ;;  %v18197_v63 = vld [vmem:[#allocation117_spill] sm:$0xff] }
 0xb32   : > { %v8443_v14 = vadd.f32 %v11304_v11, %v8217_v27  ;;  %v8552_v46 = vadd.f32 %v8523_v49, %v8440_v0  ;;  %v8569_v45 = vmax.f32 %v8553_v23, 0.0  ;;  %v8209_v49 = vadd.f32 %v18177_v62, %v7983_v44  ;;  %v18184_v27 = vld [vmem:[#allocation85_spill] sm:$0xff]  ;;  %v18190_v0 = vld [vmem:[#allocation114_spill] sm:$0xff]  ;;  %v18194_v23 = vld [vmem:[#allocation112_spill] sm:$0xff] }
 0xb33   : > { %v8419_v40 = vpop.f32.mrf.mxu0  ;;  %v8208_v1 = vadd.f32 %v18179_v4, %v7982_v17  ;;  %v8567_v36 = vmax.f32 %v8551_v32, 0.0  ;;  %v8548_v51 = vadd.f32 %v8503_v22, %v8436_v7  ;;  %v8206_v8 = vadd.f32 %v18185_v19, %v18184_v27  ;;  %v8573_v4 = vld [vmem:[%s17671_s11 + $0x8] sm:$0xff]  ;;  %v8579_v16 = vld [vmem:[%s17671_s11 + $0x38] sm:$0xff]  ;;  %v8580_v34 = vld [vmem:[%s17671_s11 + $0x40] sm:$0xff] }
 0xb34   : > { %v8555_v52 = vadd.f32 %v8538_v58, %v8443_v14  ;;  %v8442_v50 = vadd.f32 %v8419_v40, %v8216_v55  ;;  %v8568_v28 = vmax.f32 %v8552_v46, 0.0  ;;  %v18180_v58 = vld [vmem:[#allocation104_spill] sm:$0xff]  ;;  %v8433_v60 = vadd.f32 %v18186_v24, %v8207_v30  ;;  %v8483_v55 = vpop.permute.xlu0 %8482  ;;  %v18188_v14 = vld [vmem:[#allocation115_spill] sm:$0xff]  ;;  %v8478_v31 = vpop.permute.xlu1 %8477  ;;  %v8587_v27 = vld [vmem:[%s17671_s11 + $0x78] sm:$0xff] }
 0xb35   : > { %v8434_v10 = vadd.f32 %v18183_v56, %v8208_v1  ;;  %v8205_v38 = vadd.f32 %v18188_v14, %v18187_v21  ;;  %v8432_v20 = vadd.f32 %v18189_v9, %v8206_v8  ;;  %v8564_v18 = vmax.f32 %v8548_v51, 0.0  ;;  %v8574_v1 = vld [vmem:[%s17671_s11 + $0x10] sm:$0xff]  ;;  %v8581_v30 = vld [vmem:[%s17671_s11 + $0x48] sm:$0xff]  ;;  %v8584_v51 = vld [vmem:[%s17671_s11 + $0x60] sm:$0xff] }
 0xb36   : > { %v8571_v59 = vmax.f32 %v8555_v52, 0.0  ;;  %v8554_v54 = vadd.f32 %v8533_v33, %v8442_v50  ;;  %v8437_v33 = vadd.f32 %v17450_v43, %v8211_v5  ;;  %v8435_v43 = vadd.f32 %v18180_v58, %v8209_v49  ;;  %v18191_v52 = vld [vmem:[#allocation39_spill] sm:$0xff]  ;;  %v8575_v58 = vld [vmem:[%s17671_s11 + $0x18] sm:$0xff]  ;;  %v8582_v56 = vld [vmem:[%s17671_s11 + $0x50] sm:$0xff] }
 0xb37   : > { %v8546_v40 = vadd.f32 %v8493_v57, %v8434_v10  ;;  %v8204_v50 = vadd.f32 %v18191_v52, %v18190_v0  ;;  %v8545_v12 = vadd.f32 %v8488_v3, %v8433_v60  ;;  %v8544_v26 = vadd.f32 %v8483_v55, %v8432_v20  ;;  %v18196_v5 = vld [vmem:[#allocation47_spill] sm:$0xff]  ;;  %v8583_v10 = vld [vmem:[%s17671_s11 + $0x58] sm:$0xff]  ;;  %v8586_v3 = vld [vmem:[%s17671_s11 + $0x70] sm:$0xff] }
 0xb38   : > { %v8570_v35 = vmax.f32 %v8554_v54, 0.0  ;;  %11305 = vmatprep.subr.mxu1 %v8571_v59  ;;  %v8549_v29 = vadd.f32 %v8508_v41, %v8437_v33  ;;  %v8547_v11 = vadd.f32 %v8498_v48, %v8435_v43  ;;  %v18192_v41 = vld [vmem:[#allocation37_spill] sm:$0xff]  ;;  %v18195_v54 = vld [vmem:[#allocation58_spill] sm:$0xff]  ;;  %v8473_v2 = vpop.permute.xlu0 %8472  ;;  %v8202_v46 = vadd.f32 %v18197_v63, %v18196_v5  ;;  %v18199_v33 = vld [vmem:[#allocation83_spill] sm:$0xff]  ;;  %v8468_v17 = vpop.permute.xlu1 %8467 }
 0xb39   : > { %11306 = vmatpush3.msra.mxu1 %v8571_v59  ;;  %v8431_v53 = vadd.f32 %v18192_v41, %v8205_v38  ;;  %v8203_v59 = vadd.f32 %v18194_v23, %v18193_v13  ;;  %v8430_v22 = vadd.f32 %v18195_v54, %v8204_v50  ;;  %v8562_v37 = vmax.f32 %v8546_v40, 0.0  ;;  %v8576_v43 = vld [vmem:[%s17671_s11 + $0x20] sm:$0xff]  ;;  %v8860_v19 = vld [vmem:[%s17673_s13 + $0x78] sm:$0xff]  ;;  %v8859_v8 = vld [vmem:[%s17673_s13 + $0x70] sm:$0xff] }
 0xb3a   : > { %11307 = vmatprep.subr.mxu1 %v8570_v35  ;;  %v8565_v25 = vmax.f32 %v8549_v29, 0.0  ;;  %v8563_v15 = vmax.f32 %v8547_v11, 0.0  ;;  %v8561_v47 = vmax.f32 %v8545_v12, 0.0  ;;  %v8428_v32 = vadd.f32 %v18199_v33, %v8202_v46  ;;  %v8577_v29 = vld [vmem:[%s17671_s11 + $0x28] sm:$0xff]  ;;  %11362 = vmatpush3.msra.mxu0 %v8860_v19  ;;  %v8857_v11 = vld [vmem:[%s17673_s13 + $0x60] sm:$0xff]  ;;  %v8855_v55 = vld [vmem:[%s17673_s13 + $0x50] sm:$0xff] }
 0xb3b   : > { %11308 = vmatpush3.msra.mxu1 %v8570_v35  ;;  %v18198_v35 = vld [vmem:[#allocation61_spill] sm:$0xff]  ;;  %v8543_v44 = vadd.f32 %v8478_v31, %v8431_v53  ;;  %v8560_v48 = vmax.f32 %v8544_v26, 0.0  ;;  %v18200_v24 = vmov 0.0   ;;  %v8858_v60 = vld [vmem:[%s17673_s13 + $0x68] sm:$0xff]  ;;  %v8853_v14 = vld [vmem:[%s17673_s13 + $0x40] sm:$0xff] }
 0xb3c   : > { %11309 = vmatprep.subr.mxu1 %v8569_v45  ;;  %v8429_v6 = vadd.f32 %v18198_v35, %v8203_v59  ;;  %v8463_v42 = vpop.permute.xlu0 %8462  ;;  %11393 = vmatprep.mubr.msk.f32.mxu0 %vm11536_vm10, %v18200_v24  ;;  %v8854_v21 = vld [vmem:[%s17673_s13 + $0x48] sm:$0xff]  ;;  %v8852_v38 = vld [vmem:[%s17673_s13 + $0x38] sm:$0xff]  ;;  %v8851_v9 = vld [vmem:[%s17673_s13 + $0x30] sm:$0xff]  ;;  %v8607_v53 = vpop.permute.xlu1 %8606 }
 0xb3d   : > { %11310 = vmatpush3.msra.mxu1 %v8569_v45  ;;  %v8542_v45 = vadd.f32 %v8473_v2, %v8430_v22  ;;  %v8559_v49 = vmax.f32 %v8543_v44, 0.0  ;;  %v8540_v7 = vadd.f32 %v8463_v42, %v8428_v32  ;;  %11363 = vmatprep.subr.mxu0 %v18200_v24  ;;  %v8850_v20 = vld [vmem:[%s17673_s13 + $0x28] sm:$0xff]  ;;  %v8849_v40 = vld [vmem:[%s17673_s13 + $0x20] sm:$0xff]  ;;  %v8847_v0 = vld [vmem:[%s17673_s13 + $0x10] sm:$0xff] }
 0xb3e   : > { %11311 = vmatprep.subr.mxu1 %v8568_v28  ;;  %v8541_v62 = vadd.f32 %v8468_v17, %v8429_v6  ;;  %11364 = vmatpush3.msra.mxu0 %v8859_v8  ;;  %v8846_v52 = vld [vmem:[%s17673_s13 + $0x8] sm:$0xff]  ;;  %v8845_v50 = vld [vmem:[%s17673_s13] sm:$0xff] }
 0xb3f   : > { %11312 = vmatpush3.msra.mxu1 %v8568_v28  ;;  %v8558_v61 = vmax.f32 %v8542_v45, 0.0  ;;  %v8556_v57 = vmax.f32 %v8540_v7, 0.0  ;;  %11365 = vmatprep.subr.mxu0 %v18200_v24 }
 0xb40   : > { %11313 = vmatprep.subr.mxu1 %v8567_v36  ;;  %v8557_v28 = vmax.f32 %v8541_v62, 0.0  ;;  %11366 = vmatpush3.msra.mxu0 %v8858_v60  ;;  %v8612_v31 = vpop.permute.xlu0 %8611  ;;  %v8617_v22 = vpop.permute.xlu1 %8616 }
 0xb41   : > { %11314 = vmatpush3.msra.mxu1 %v8567_v36  ;;  %v8578_v36 = vld [vmem:[%s17671_s11 + $0x30] sm:$0xff]  ;;  %11367 = vmatprep.subr.mxu0 %v18200_v24 }
 0xb42   : > { %11315 = vmatprep.subr.mxu1 %v8566_v39  ;;  %11368 = vmatpush3.msra.mxu0 %v8857_v11 }
 0xb43   : > { %11316 = vmatpush3.msra.mxu1 %v8566_v39  ;;  %v8585_v39 = vld [vmem:[%s17671_s11 + $0x68] sm:$0xff]  ;;  %11369 = vmatprep.subr.mxu0 %v18200_v24 }
 0xb44   : > { %11317 = vmatprep.subr.mxu1 %v8565_v25  ;;  %v8622_v5 = vpop.permute.xlu0 %8621  ;;  %v8627_v6 = vpop.permute.xlu1 %8626 }
 0xb45   : > { %11318 = vmatpush3.msra.mxu1 %v8565_v25  ;;  %v8856_v25 = vld [vmem:[%s17673_s13 + $0x58] sm:$0xff] }
 0xb46   : > { %11319 = vmatprep.subr.mxu1 %v8564_v18  ;;  %11370 = vmatpush3.msra.mxu0 %v8856_v25 }
 0xb47   : > { %11320 = vmatpush3.msra.mxu1 %v8564_v18  ;;  %11371 = vmatprep.subr.mxu0 %v18200_v24  ;;  %v8848_v18 = vld [vmem:[%s17673_s13 + $0x18] sm:$0xff] }
 0xb48   : > { %11321 = vmatprep.subr.mxu1 %v8563_v15  ;;  %11372 = vmatpush3.msra.mxu0 %v8855_v55  ;;  %v8632_v32 = vpop.permute.xlu0 %8631  ;;  %v8637_v62 = vpop.permute.xlu1 %8636 }
 0xb49   : > { %11322 = vmatpush3.msra.mxu1 %v8563_v15  ;;  %11373 = vmatprep.subr.mxu0 %v18200_v24 }
 0xb4a   : > { %11323 = vmatprep.subr.mxu1 %v8562_v37  ;;  %11374 = vmatpush3.msra.mxu0 %v8854_v21 }
 0xb4b   : > { %11324 = vmatpush3.msra.mxu1 %v8562_v37  ;;  %11375 = vmatprep.subr.mxu0 %v18200_v24 }
 0xb4c   : > { %11325 = vmatprep.subr.mxu1 %v8561_v47  ;;  %11376 = vmatpush3.msra.mxu0 %v8853_v14 }
 0xb4d   : > { %11326 = vmatpush3.msra.mxu1 %v8561_v47  ;;  %11377 = vmatprep.subr.mxu0 %v18200_v24 }
 0xb4e   : > { %11327 = vmatprep.subr.mxu1 %v8560_v48  ;;  %11378 = vmatpush3.msra.mxu0 %v8852_v38 }
 0xb4f   : > { %11328 = vmatpush3.msra.mxu1 %v8560_v48  ;;  %11379 = vmatprep.subr.mxu0 %v18200_v24 }
 0xb50   : > { %11329 = vmatprep.subr.mxu1 %v8559_v49  ;;  %11380 = vmatpush3.msra.mxu0 %v8851_v9 }
 0xb51   : > { %11330 = vmatpush3.msra.mxu1 %v8559_v49  ;;  %11381 = vmatprep.subr.mxu0 %v18200_v24 }
 0xb52   : > { %11331 = vmatprep.subr.mxu1 %v8558_v61  ;;  %11382 = vmatpush3.msra.mxu0 %v8850_v20 }
 0xb53   : > { %11332 = vmatpush3.msra.mxu1 %v8558_v61  ;;  %11383 = vmatprep.subr.mxu0 %v18200_v24  ;;  %v8642_v61 = vpop.permute.xlu0 %8641 }
 0xb54   : > { %11333 = vmatprep.subr.mxu1 %v8557_v28  ;;  %11384 = vmatpush3.msra.mxu0 %v8849_v40 }
 0xb55   : > { %11334 = vmatpush3.msra.mxu1 %v8557_v28  ;;  %11385 = vmatprep.subr.mxu0 %v18200_v24 }
 0xb56   : > { %11335 = vmatprep.subr.mxu1 %v8556_v57  ;;  %11386 = vmatpush3.msra.mxu0 %v8848_v18 }
 0xb57   : > { %11336 = vmatpush3.msra.mxu1 %v8556_v57  ;;  %11387 = vmatprep.subr.mxu0 %v18200_v24 }
 0xb58   : > { %11338 = vmatmul.mubr.f32.vlgmr.msra.gmra.mxu1 %v8573_v4  ;;  %11388 = vmatpush3.msra.mxu0 %v8847_v0 }
 0xb59   : > { %11340 = vmatprep.mubr.f32.mxu1 %v8574_v1  ;;  %11389 = vmatprep.subr.mxu0 %v18200_v24  ;;  %v8647_v1 = vpop.permute.xlu1 %8646 }
 0xb5a   : > { %11390 = vmatpush3.msra.mxu0 %v8846_v52 }
 0xb5b   : > { %11391 = vmatprep.subr.mxu0 %v18200_v24 }
 0xb5c   : > { %11341 = vmatmul.mubr.f32.gmra.mxu1 %v8575_v58  ;;  %11392 = vmatpush3.msra.mxu0 %v8845_v50 }
 0xb5d   : > { %11343 = vmatprep.mubr.f32.mxu1 %v8576_v43 }
 0xb60   : > { %11344 = vmatmul.mubr.f32.gmra.mxu1 %v8577_v29 }
 0xb61   : > { %11346 = vmatprep.mubr.f32.mxu1 %v8578_v36  ;;  %v8652_v36 = vpop.permute.xlu0 %8651 }
 0xb64   : > { %11347 = vmatmul.mubr.f32.gmra.mxu1 %v8579_v16 }
 0xb65   : > { %11349 = vmatprep.mubr.f32.mxu1 %v8580_v34 }
 0xb68   : > { %11350 = vmatmul.mubr.f32.gmra.mxu1 %v8581_v30 }
 0xb69   : > { %11352 = vmatprep.mubr.f32.mxu1 %v8582_v56  ;;  %v8657_v56 = vpop.permute.xlu1 %8656 }
 0xb6c   : > { %11353 = vmatmul.mubr.f32.gmra.mxu1 %v8583_v10 }
 0xb6d   : > { %11355 = vmatprep.mubr.f32.mxu1 %v8584_v51  ;;  %v8667_v24 = vpop.permute.xlu1 %8666 }
 0xb70   : > { %11356 = vmatmul.mubr.f32.gmra.mxu1 %v8585_v39 }
 0xb71   : > { %11358 = vmatprep.mubr.f32.mxu1 %v8586_v3  ;;  %v8662_v3 = vpop.permute.xlu0 %8661  ;;  %v8677_v9 = vpop.permute.xlu1 %8676 }
 0xb74   : > { %11359 = vmatmul.mubr.f32.gmra.mxu1 %v8587_v27 }
 0xb75   : > { %v8672_v55 = vpop.permute.xlu0 %8671 }
 0xb79   : > { %v8682_v18 = vpop.permute.xlu0 %8681 }
 0xc18   : > { %v11339_v41 = vpop.f32.mrf.mxu1 }
 0xc19   : > { %v8756_v23 = vadd.f32 %v11339_v41, %v8612_v31 }
 0xc1a   : > { %v8750_v12 = vpop.f32.mrf.mxu1 }
 0xc1b   : > { %v8751_v15 = vadd.f32 %v8750_v12, %v8607_v53  ;;  %v8830_v26 = vmax.f32 %v8756_v23, 0.0  ;;  %v9779_v53 = vld [vmem:[%s17674_s14] ss:$0 sm:$0xff] }
 0xc1c   : > { %v11342_v13 = vpop.f32.mrf.mxu1 }
 0xc1d   : > { %v8829_v59 = vmax.f32 %v8751_v15, 0.0  ;;  %v8766_v63 = vadd.f32 %v11342_v13, %v8622_v5 }
 0xc1e   : > { %v8760_v54 = vpop.f32.mrf.mxu1 }
 0xc1f   : > { %8868 = vxpose.xlu1.b32.start [1/16] (narrow) %v8829_v59, 8  ;;  %v8761_v37 = vadd.f32 %v8760_v54, %v8617_v22  ;;  %v8832_v44 = vmax.f32 %v8766_v63, 0.0 }
 0xc20   : > { %v11345_v2 = vpop.f32.mrf.mxu1 }
 0xc21   : > { %v8831_v46 = vmax.f32 %v8761_v37, 0.0  ;;  %v8776_v45 = vadd.f32 %v11345_v2, %v8632_v32 }
 0xc22   : > { %v8770_v35 = vpop.f32.mrf.mxu1 }
 0xc23   : > { %8869 = vxpose.xlu1.b32.cont [2/16] (narrow) %v8830_v26, 8  ;;  %v8771_v47 = vadd.f32 %v8770_v35, %v8627_v6  ;;  %v8834_v49 = vmax.f32 %v8776_v45, 0.0 }
 0xc24   : > { %v11348_v33 = vpop.f32.mrf.mxu1 }
 0xc25   : > { %v8833_v48 = vmax.f32 %v8771_v47, 0.0  ;;  %v8786_v28 = vadd.f32 %v11348_v33, %v8642_v61 }
 0xc26   : > { %v8780_v17 = vpop.f32.mrf.mxu1 }
 0xc27   : > { %8870 = vxpose.xlu1.b32.cont [3/16] (narrow) %v8831_v46, 8  ;;  %v8781_v42 = vadd.f32 %v8780_v17, %v8637_v62  ;;  %v8836_v58 = vmax.f32 %v8786_v28, 0.0 }
 0xc28   : > { %v11351_v7 = vpop.f32.mrf.mxu1 }
 0xc29   : > { %v8835_v57 = vmax.f32 %v8781_v42, 0.0  ;;  %v8796_v16 = vadd.f32 %v11351_v7, %v8652_v36 }
 0xc2a   : > { %v8790_v4 = vpop.f32.mrf.mxu1 }
 0xc2b   : > { %8871 = vxpose.xlu1.b32.cont [4/16] (narrow) %v8832_v44, 8  ;;  %v8791_v43 = vadd.f32 %v8790_v4, %v8647_v1  ;;  %v8838_v10 = vmax.f32 %v8796_v16, 0.0 }
 0xc2c   : > { %v11354_v29 = vpop.f32.mrf.mxu1 }
 0xc2d   : > { %v8837_v34 = vmax.f32 %v8791_v43, 0.0  ;;  %v8806_v27 = vadd.f32 %v11354_v29, %v8662_v3 }
 0xc2e   : > { %v8800_v30 = vpop.f32.mrf.mxu1 }
 0xc2f   : > { %8872 = vxpose.xlu1.b32.cont [5/16] (narrow) %v8833_v48, 8  ;;  %v8801_v51 = vadd.f32 %v8800_v30, %v8657_v56  ;;  %v8840_v60 = vmax.f32 %v8806_v27, 0.0 }
 0xc30   : > { %v11357_v39 = vpop.f32.mrf.mxu1 }
 0xc31   : > { %v8839_v19 = vmax.f32 %v8801_v51, 0.0  ;;  %v8816_v21 = vadd.f32 %v11357_v39, %v8672_v55 }
 0xc32   : > { %v8810_v8 = vpop.f32.mrf.mxu1 }
 0xc33   : > { %8873 = vxpose.xlu1.b32.cont [6/16] (narrow) %v8834_v49, 8  ;;  %v8811_v11 = vadd.f32 %v8810_v8, %v8667_v24  ;;  %v8842_v20 = vmax.f32 %v8816_v21, 0.0 }
 0xc34   : > { %v11360_v25 = vpop.f32.mrf.mxu1 }
 0xc35   : > { %v8841_v14 = vmax.f32 %v8811_v11, 0.0  ;;  %v8826_v0 = vadd.f32 %v11360_v25, %v8682_v18 }
 0xc36   : > { %v8820_v38 = vpop.f32.mrf.mxu1 }
 0xc37   : > { %8874 = vxpose.xlu1.b32.cont [7/16] (narrow) %v8835_v57, 8  ;;  %v8821_v40 = vadd.f32 %v8820_v38, %v8677_v9  ;;  %v8844_v50 = vmax.f32 %v8826_v0, 0.0 }
 0xc39   : > { %v8843_v52 = vmax.f32 %v8821_v40, 0.0 }
 0xc3b   : > { %8875 = vxpose.xlu1.b32.cont [8/16] (narrow) %v8836_v58, 8 }
 0xc3f   : > { %8876 = vxpose.xlu1.b32.cont [9/16] (narrow) %v8837_v34, 8 }
 0xc43   : > { %8877 = vxpose.xlu1.b32.cont [10/16] (narrow) %v8838_v10, 8 }
 0xc47   : > { %8878 = vxpose.xlu1.b32.cont [11/16] (narrow) %v8839_v19, 8 }
 0xc4b   : > { %8879 = vxpose.xlu1.b32.cont [12/16] (narrow) %v8840_v60, 8 }
 0xc4f   : > { %8880 = vxpose.xlu1.b32.cont [13/16] (narrow) %v8841_v14, 8 }
 0xc53   : > { %8881 = vxpose.xlu1.b32.cont [14/16] (narrow) %v8842_v20, 8 }
 0xc57   : > { %8882 = vxpose.xlu1.b32.cont [15/16] (narrow) %v8843_v52, 8 }
 0xc5b   : > { %8883 = vxpose.xlu1.b32.end [16/16] (narrow) %v8844_v50, 8 }
 0xc9b   : > { %v8884_v41 = vpop.trf.xlu1 }
 0xc9c   : > { %11394 = vmatmul.mubr.f32.vlgmr.msra.gmra.mxu0 %v8884_v41 }
 0xd5c   : > { %v8966_v12 = vpop.f32.mrf.mxu0 }
 0xd5d   : > { %v8967_v15 = vadd.f32 %v9779_v53, %v8966_v12 }
 0xd5e   : > { %v11395_v31 = vpop.f32.mrf.mxu0 }
 0xd5f   : > { %8970 = vst [vmem:[%s490_s20] sm:$0xff] %v8967_v15 }
 0xd60   : > { %11469 = shalt.err (!%p11466_p3)
}
 0xd61   : > { %s11470_s30 = scalar_lea.hbm %s17625_s23, 128  ;;  %s11474_s20 = scalar_lea.hbm %s17675_s15, 256 }
 0xd62   : > { %p11471_p4 = scmp.ne.s32.totalorder %s17625_s23, %s11470_s30  ;;  %p11475_p9 = scmp.lt.s32.totalorder %s17625_s23, %s17675_s15 }
 0xd63   : > { %p11476_p10 = scmp.lt.s32.totalorder %s11474_s20, %s11470_s30 }
 0xd64   : > { %p11472_p7 = pnand %p11471_p4, %p11656_p5 }
 0xd65   : > { %p11477_p11 = por %p11476_p10, %p11475_p9 }
 0xd66   : > { %p11473_p8 = pneg %p11472_p7 }
 0xd68   : > { %p11478_p12 = pnand %p11477_p11, %p11473_p8 }
 0xd6a   : > { %11481 = shalt.err (!%p11478_p12)
}
 0xd6b   : > { %11396 = dma.vmem_to_hbm [thread:$0]  (%p11656_p5), %s8986_s25, 128, %s17625_s23, %s8972_s2  }
 0xd6c PF: > { %p11402_p13 = scmp.ge.s32.totalorder %s11516_s21, 2  ;;  %s8997_s3 = sand.u32 1, %s11504_s18  }
 0xd6d   : > { %s8998_s0 = scalar_lea.sflag [#allocation4], %s8997_s3 }
 0xd6e   : > { %p11399_p0 = pnand %p11402_p13, %p11660_p6 }
 0xd70   : > { %p11400_p1 = pneg %p11399_p0 }
 0xd72   : > { %11499 = dma.done.wait (%p11400_p1), %s8998_s0, 128  }
 0xd73   : > { %11501 = vsyncadd (%p11400_p1), %s8998_s0, 4294967168  ;;  %s18201_s22 = sld [smem:[#allocation6_spill]]  ;;  %p25_p2 = scmp.ge.s32.totalorder %s11643_s24, 4  }
 0xd74   : > { %s18202_s20 = sld [smem:[#allocation7_spill]]  ;;  %s18203_s18 = smov %s11508_s19 }
 0xd75   : > { %s18205_s21 = smov %s11643_s24  ;;  %27 = sbr.rel (!%p25_p2) target bundleno = 8 (0x8), region = 135 }
 0xd79   : > { %s18204_s19 = smov %s18201_s22 }
 0xd7a   :  { %9003 = vsyncpa [#allocation4], 1 }
 0xd7b   :  { %9005 = vsyncpa [#allocation4 + $0x1], 1 }

</bundles_post_ra>
